<compile_context>
chip_gen: v7x
topology: tpu7x:2x2x1
jax: 0.10.0
libtpu: 0.0.40
codegen_flags: <defaults>
</compile_context>

<pallas_src>
import functools

import jax
import jax.numpy as jnp
from jax.experimental import pallas as pl
from jax.experimental.pallas import tpu as pltpu

IN_DIM = 8
H1, H2, H3, OUT = 64, 256, 256, 10
TM = 784               # rows (time steps) per grid step; 784 = whole time axis


def ff_mnist_kernel(x_ref, w1_ref, b1_ref, w2_ref, b2_ref, w3_ref, b3_ref, o_ref):
    """One (TM, IN_DIM) row tile of one batch element -> partial spike-sum.

    x_ref : (1, TM, IN_DIM) f32   sliding-window rows for batch b, time block t
    w2/w3 are bf16, w1/b* are f32.
    o_ref : (1, 1, 1, H3) f32     sum over this block's rows of the layer-3 spikes.
    """
    x = x_ref[0]                                   # (TM, IN_DIM) f32
    tm = x.shape[0]

    # Layer 1 on the VPU: K=8 would waste the MXU (and an f32 matmul lowers to
    # multi-pass bf16 there); 8 broadcast MACs keep exact f32 at the threshold.
    w1 = w1_ref[...]                               # (IN_DIM, H1) f32
    h1 = jnp.zeros((tm, H1), jnp.float32) + b1_ref[...]
    for k in range(IN_DIM):                        # static, fully unrolled
        h1 = h1 + x[:, k:k + 1] * w1[k:k + 1, :]
    # TODO(synk): `spiking_neuron()` is an injected, unspecified constructor in the
    # PyTorch module; modeled as a stateless Heaviside threshold at 1.0 (no membrane
    # state carried across time steps).
    s1 = (h1 >= 1.0).astype(jnp.bfloat16)          # exact {0,1}

    h2 = jnp.dot(s1, w2_ref[...], preferred_element_type=jnp.float32) + b2_ref[...]
    s2 = (h2 >= 1.0).astype(jnp.bfloat16)

    h3 = jnp.dot(s2, w3_ref[...], preferred_element_type=jnp.float32) + b3_ref[...]
    s3 = (h3 >= 1.0).astype(jnp.float32)           # (TM, H3)

    # Sum the layer-3 spikes over this block's time steps; layer 4 (w4/b4) is
    # applied once in the wrapper thanks to linearity.
    o_ref[...] = jnp.sum(s3, axis=0, keepdims=True)[None, None]   # (1,1,1,H3)


@functools.partial(jax.jit, static_argnames=("in_dim", "tm"))
def ff_mnist_forward(x, params, in_dim=IN_DIM, tm=TM):
    """JAX/Pallas equivalent of ffMnist.forward.

    x: (B, T, F) with F == 1 and T == 784 (the PyTorch module hard-codes the
       784 - in_dim tail slice, so other T would be silently wrong).
    tm: rows per grid step.  Default 784 (one block).  On v7x with tiny batch,
        tm=112 gives 7 parallel time blocks per batch element.
    """
    assert x.ndim == 3, "dimension of x is not correct!"
    B, T, F = x.shape
    assert F == 1, "only F == 1 is supported (matches MNIST usage of the module)"
    assert T == 784, "module hard-codes the tail window at 784 - in_dim : 784"
    assert T % tm == 0 and tm % 8 == 0, "tm must be a multiple of 8 dividing T"

    # Build the T sliding windows (batch-major) exactly as the PyTorch loop does.
    t_idx = jnp.arange(T)
    starts = jnp.where(t_idx < T - in_dim, t_idx, T - in_dim)        # 784-in_dim tail
    gather_idx = starts[:, None] + jnp.arange(in_dim)[None, :]       # (T, in_dim)
    win = jnp.take(x[:, :, 0], gather_idx, axis=1)                   # (B, T, in_dim)
    # TODO(synk): windows are materialized in HBM (8x expansion of x); on v5e at
    # large B build them in-kernel from a raw-x slice to cut input bandwidth.

    (w1, b1), (w2, b2), (w3, b3), (w4, b4) = params
    w2b = w2.astype(jnp.bfloat16)
    w3b = w3.astype(jnp.bfloat16)

    nt = T // tm
    grid = (B, nt)
    const = lambda b, t: (0, 0)   # weights/biases resident in VMEM across the grid

    flops = 2 * B * T * (in_dim * H1 + H1 * H2 + H2 * H3)
    bytes_accessed = (
        win.size * 4
        + w1.size * 4 + w2b.size * 2 + w3b.size * 2
        + (b1.size + b2.size + b3.size) * 4
        + B * nt * H3 * 4
    )

    spike_sums = pl.pallas_call(
        ff_mnist_kernel,
        out_shape=jax.ShapeDtypeStruct((B, nt, 1, H3), jnp.float32),
        grid_spec=pltpu.PrefetchScalarGridSpec(
            num_scalar_prefetch=0,
            grid=grid,
            in_specs=[
                pl.BlockSpec((1, tm, in_dim), lambda b, t: (b, t, 0)),
                pl.BlockSpec((in_dim, H1), const),
                pl.BlockSpec((1, H1), const),
                pl.BlockSpec((H1, H2), const),
                pl.BlockSpec((1, H2), const),
                pl.BlockSpec((H2, H3), const),
                pl.BlockSpec((1, H3), const),
            ],
            out_specs=pl.BlockSpec((1, 1, 1, H3), lambda b, t: (b, t, 0, 0)),
        ),
        compiler_params=pltpu.CompilerParams(
            dimension_semantics=("parallel", "parallel"),
        ),
        cost_estimate=pl.CostEstimate(
            flops=flops, transcendentals=0, bytes_accessed=bytes_accessed),
    )(win, w1, b1, w2b, b2, w3b, b3)

    # Layer 4 applied exactly once (linearity): sum_t (s3 @ w4 + b4)
    #   = (sum_t s3) @ w4 + T * b4.   Kept in full f32.
    s3_total = jnp.sum(spike_sums, axis=(1, 2))                      # (B, H3)
    return s3_total @ w4 + jnp.float32(T) * b4                       # (B, OUT)


def _reference(x, params, in_dim=IN_DIM):
    """Pure-JAX reference with the same numerics (bf16-rounded weights for L2-L3)."""
    B, T, _ = x.shape
    t_idx = jnp.arange(T)
    starts = jnp.where(t_idx < T - in_dim, t_idx, T - in_dim)
    gather_idx = starts[:, None] + jnp.arange(in_dim)[None, :]
    rows = jnp.take(x[:, :, 0], gather_idx, axis=1).reshape(B * T, in_dim)
    (w1, b1), (w2, b2), (w3, b3), (w4, b4) = params
    spike = lambda v: (v >= 1.0).astype(jnp.float32)
    h = spike(rows @ w1 + b1)
    h = spike(h @ w2.astype(jnp.bfloat16).astype(jnp.float32) + b2)
    h = spike(h @ w3.astype(jnp.bfloat16).astype(jnp.float32) + b3)
    h = h @ w4 + b4
    return h.reshape(B, T, OUT).sum(axis=1)


def _linear_params(key, fan_in, fan_out):
    """Deterministic PyTorch-default-style init: U(-1/sqrt(fan_in), 1/sqrt(fan_in))."""
    kw, kb = jax.random.split(key)
    bound = 1.0 / float(fan_in) ** 0.5
    w = jax.random.uniform(kw, (fan_in, fan_out), jnp.float32, -bound, bound)
    b = jax.random.uniform(kb, (1, fan_out), jnp.float32, -bound, bound)
    return w, b


if __name__ == "__main__":
    key = jax.random.PRNGKey(0)
    kx, k1, k2, k3, k4 = jax.random.split(key, 5)

    B, T, F = 2, 784, 1          # T must be 784 (module hard-codes the tail slice)
    x = jax.random.uniform(kx, (B, T, F), jnp.float32)

    params = (
        _linear_params(k1, IN_DIM, H1),
        _linear_params(k2, H1, H2),
        _linear_params(k3, H2, H3),
        _linear_params(k4, H3, OUT),
    )

    out = ff_mnist_forward(x, params)
    out = jax.block_until_ready(out)

    assert out.shape == (B, OUT) and out.dtype == jnp.float32
    assert bool(jnp.all(jnp.isfinite(out)))

    # Loose comparison vs a pure-JAX reference (a borderline spike could flip under
    # summation-order differences between the in-kernel dots and XLA dots).
    ref = jax.block_until_ready(_reference(x, params))
    assert bool(jnp.allclose(out, ref, rtol=5e-2, atol=5e-1)), (
        "kernel/reference mismatch: max abs diff = "
        + str(float(jnp.max(jnp.abs(out - ref)))))

    print("KERNEL_OK")
</pallas_src>

<mosaic_0001>
module attributes {stable_mosaic.version = 11 : i64} {
  func.func @ff_mnist_kernel(%arg0: i32, %arg1: i32, %arg2: memref<1x784x8xf32, #tpu.memory_space<vmem>>, %arg3: memref<8x64xf32, #tpu.memory_space<vmem>>, %arg4: memref<1x64xf32, #tpu.memory_space<vmem>>, %arg5: memref<64x256xbf16, #tpu.memory_space<vmem>>, %arg6: memref<1x256xf32, #tpu.memory_space<vmem>>, %arg7: memref<256x256xbf16, #tpu.memory_space<vmem>>, %arg8: memref<1x256xf32, #tpu.memory_space<vmem>>, %arg9: memref<1x1x1x256xf32, #tpu.memory_space<vmem>>) attributes {dimension_semantics = [#tpu.dimension_semantics<parallel>, #tpu.dimension_semantics<parallel>], iteration_bounds = array<i64: 2, 1>, scalar_prefetch = 0 : i64, scratch_operands = 0 : i64, tpu.core_type = #tpu.core_type<tc>, window_params = [{transform_indices = @transform_0, window_bounds = array<i64: 1, 784, 8>}, {pipeline_mode = #tpu.pipeline_mode<synchronous>, transform_indices = @transform_1, window_bounds = array<i64: 8, 64>}, {pipeline_mode = #tpu.pipeline_mode<synchronous>, transform_indices = @transform_2, window_bounds = array<i64: 1, 64>}, {pipeline_mode = #tpu.pipeline_mode<synchronous>, transform_indices = @transform_3, window_bounds = array<i64: 64, 256>}, {pipeline_mode = #tpu.pipeline_mode<synchronous>, transform_indices = @transform_4, window_bounds = array<i64: 1, 256>}, {pipeline_mode = #tpu.pipeline_mode<synchronous>, transform_indices = @transform_5, window_bounds = array<i64: 256, 256>}, {pipeline_mode = #tpu.pipeline_mode<synchronous>, transform_indices = @transform_6, window_bounds = array<i64: 1, 256>}, {transform_indices = @transform_7, window_bounds = array<i64: 1, 1, 1, 256>}]} {
    %c0 = arith.constant 0 : index
    %c0_0 = arith.constant 0 : index
    %c0_1 = arith.constant 0 : index
    %0 = vector.load %arg2[%c0, %c0_0, %c0_1] : memref<1x784x8xf32, #tpu.memory_space<vmem>>, vector<1x784x8xf32>
    %1 = vector.shape_cast %0 : vector<1x784x8xf32> to vector<784x8xf32>
    %c0_2 = arith.constant 0 : index
    %c0_3 = arith.constant 0 : index
    %2 = vector.load %arg3[%c0_2, %c0_3] : memref<8x64xf32, #tpu.memory_space<vmem>>, vector<8x64xf32>
    %cst = arith.constant 0.000000e+00 : f32
    %3 = vector.broadcast %cst : f32 to vector<784x64xf32>
    %c0_4 = arith.constant 0 : index
    %c0_5 = arith.constant 0 : index
    %4 = vector.load %arg4[%c0_4, %c0_5] : memref<1x64xf32, #tpu.memory_space<vmem>>, vector<1x64xf32>
    %5 = vector.broadcast %4 : vector<1x64xf32> to vector<784x64xf32>
    %6 = arith.addf %3, %5 : vector<784x64xf32>
    %7 = vector.extract_strided_slice %1 {offsets = [0, 0], sizes = [784, 1], strides = [1, 1]} : vector<784x8xf32> to vector<784x1xf32>
    %8 = vector.extract_strided_slice %2 {offsets = [0, 0], sizes = [1, 64], strides = [1, 1]} : vector<8x64xf32> to vector<1x64xf32>
    %9 = vector.broadcast %7 : vector<784x1xf32> to vector<784x64xf32>
    %10 = vector.broadcast %8 : vector<1x64xf32> to vector<784x64xf32>
    %11 = arith.mulf %9, %10 : vector<784x64xf32>
    %12 = arith.addf %6, %11 : vector<784x64xf32>
    %13 = vector.extract_strided_slice %1 {offsets = [0, 1], sizes = [784, 1], strides = [1, 1]} : vector<784x8xf32> to vector<784x1xf32>
    %14 = vector.extract_strided_slice %2 {offsets = [1, 0], sizes = [1, 64], strides = [1, 1]} : vector<8x64xf32> to vector<1x64xf32>
    %15 = vector.broadcast %13 : vector<784x1xf32> to vector<784x64xf32>
    %16 = vector.broadcast %14 : vector<1x64xf32> to vector<784x64xf32>
    %17 = arith.mulf %15, %16 : vector<784x64xf32>
    %18 = arith.addf %12, %17 : vector<784x64xf32>
    %19 = vector.extract_strided_slice %1 {offsets = [0, 2], sizes = [784, 1], strides = [1, 1]} : vector<784x8xf32> to vector<784x1xf32>
    %20 = vector.extract_strided_slice %2 {offsets = [2, 0], sizes = [1, 64], strides = [1, 1]} : vector<8x64xf32> to vector<1x64xf32>
    %21 = vector.broadcast %19 : vector<784x1xf32> to vector<784x64xf32>
    %22 = vector.broadcast %20 : vector<1x64xf32> to vector<784x64xf32>
    %23 = arith.mulf %21, %22 : vector<784x64xf32>
    %24 = arith.addf %18, %23 : vector<784x64xf32>
    %25 = vector.extract_strided_slice %1 {offsets = [0, 3], sizes = [784, 1], strides = [1, 1]} : vector<784x8xf32> to vector<784x1xf32>
    %26 = vector.extract_strided_slice %2 {offsets = [3, 0], sizes = [1, 64], strides = [1, 1]} : vector<8x64xf32> to vector<1x64xf32>
    %27 = vector.broadcast %25 : vector<784x1xf32> to vector<784x64xf32>
    %28 = vector.broadcast %26 : vector<1x64xf32> to vector<784x64xf32>
    %29 = arith.mulf %27, %28 : vector<784x64xf32>
    %30 = arith.addf %24, %29 : vector<784x64xf32>
    %31 = vector.extract_strided_slice %1 {offsets = [0, 4], sizes = [784, 1], strides = [1, 1]} : vector<784x8xf32> to vector<784x1xf32>
    %32 = vector.extract_strided_slice %2 {offsets = [4, 0], sizes = [1, 64], strides = [1, 1]} : vector<8x64xf32> to vector<1x64xf32>
    %33 = vector.broadcast %31 : vector<784x1xf32> to vector<784x64xf32>
    %34 = vector.broadcast %32 : vector<1x64xf32> to vector<784x64xf32>
    %35 = arith.mulf %33, %34 : vector<784x64xf32>
    %36 = arith.addf %30, %35 : vector<784x64xf32>
    %37 = vector.extract_strided_slice %1 {offsets = [0, 5], sizes = [784, 1], strides = [1, 1]} : vector<784x8xf32> to vector<784x1xf32>
    %38 = vector.extract_strided_slice %2 {offsets = [5, 0], sizes = [1, 64], strides = [1, 1]} : vector<8x64xf32> to vector<1x64xf32>
    %39 = vector.broadcast %37 : vector<784x1xf32> to vector<784x64xf32>
    %40 = vector.broadcast %38 : vector<1x64xf32> to vector<784x64xf32>
    %41 = arith.mulf %39, %40 : vector<784x64xf32>
    %42 = arith.addf %36, %41 : vector<784x64xf32>
    %43 = vector.extract_strided_slice %1 {offsets = [0, 6], sizes = [784, 1], strides = [1, 1]} : vector<784x8xf32> to vector<784x1xf32>
    %44 = vector.extract_strided_slice %2 {offsets = [6, 0], sizes = [1, 64], strides = [1, 1]} : vector<8x64xf32> to vector<1x64xf32>
    %45 = vector.broadcast %43 : vector<784x1xf32> to vector<784x64xf32>
    %46 = vector.broadcast %44 : vector<1x64xf32> to vector<784x64xf32>
    %47 = arith.mulf %45, %46 : vector<784x64xf32>
    %48 = arith.addf %42, %47 : vector<784x64xf32>
    %49 = vector.extract_strided_slice %1 {offsets = [0, 7], sizes = [784, 1], strides = [1, 1]} : vector<784x8xf32> to vector<784x1xf32>
    %50 = vector.extract_strided_slice %2 {offsets = [7, 0], sizes = [1, 64], strides = [1, 1]} : vector<8x64xf32> to vector<1x64xf32>
    %51 = vector.broadcast %49 : vector<784x1xf32> to vector<784x64xf32>
    %52 = vector.broadcast %50 : vector<1x64xf32> to vector<784x64xf32>
    %53 = arith.mulf %51, %52 : vector<784x64xf32>
    %54 = arith.addf %48, %53 : vector<784x64xf32>
    %cst_6 = arith.constant 1.000000e+00 : f32
    %55 = vector.broadcast %cst_6 : f32 to vector<784x64xf32>
    %56 = arith.cmpf oge, %54, %55 : vector<784x64xf32>
    %57 = arith.extui %56 : vector<784x64xi1> to vector<784x64xi32>
    %58 = arith.sitofp %57 : vector<784x64xi32> to vector<784x64xf32>
    %59 = arith.truncf %58 : vector<784x64xf32> to vector<784x64xbf16>
    %c0_7 = arith.constant 0 : index
    %c0_8 = arith.constant 0 : index
    %60 = vector.load %arg5[%c0_7, %c0_8] : memref<64x256xbf16, #tpu.memory_space<vmem>>, vector<64x256xbf16>
    %cst_9 = arith.constant dense<0.000000e+00> : vector<784x256xf32>
    %61 = tpu.matmul %59, %60, %cst_9 {dimension_numbers = #tpu.dot_dimension_numbers<[1], [0], [0], [1], [0, 0, 1, 1], [], []>} : vector<784x64xbf16>, vector<64x256xbf16>, vector<784x256xf32> -> vector<784x256xf32>
    %c0_10 = arith.constant 0 : index
    %c0_11 = arith.constant 0 : index
    %62 = vector.load %arg6[%c0_10, %c0_11] : memref<1x256xf32, #tpu.memory_space<vmem>>, vector<1x256xf32>
    %63 = vector.broadcast %62 : vector<1x256xf32> to vector<784x256xf32>
    %64 = arith.addf %61, %63 : vector<784x256xf32>
    %cst_12 = arith.constant 1.000000e+00 : f32
    %65 = vector.broadcast %cst_12 : f32 to vector<784x256xf32>
    %66 = arith.cmpf oge, %64, %65 : vector<784x256xf32>
    %67 = arith.extui %66 : vector<784x256xi1> to vector<784x256xi32>
    %68 = arith.sitofp %67 : vector<784x256xi32> to vector<784x256xf32>
    %69 = arith.truncf %68 : vector<784x256xf32> to vector<784x256xbf16>
    %c0_13 = arith.constant 0 : index
    %c0_14 = arith.constant 0 : index
    %70 = vector.load %arg7[%c0_13, %c0_14] : memref<256x256xbf16, #tpu.memory_space<vmem>>, vector<256x256xbf16>
    %cst_15 = arith.constant dense<0.000000e+00> : vector<784x256xf32>
    %71 = tpu.matmul %69, %70, %cst_15 {dimension_numbers = #tpu.dot_dimension_numbers<[1], [0], [0], [1], [0, 0, 1, 1], [], []>} : vector<784x256xbf16>, vector<256x256xbf16>, vector<784x256xf32> -> vector<784x256xf32>
    %c0_16 = arith.constant 0 : index
    %c0_17 = arith.constant 0 : index
    %72 = vector.load %arg8[%c0_16, %c0_17] : memref<1x256xf32, #tpu.memory_space<vmem>>, vector<1x256xf32>
    %73 = vector.broadcast %72 : vector<1x256xf32> to vector<784x256xf32>
    %74 = arith.addf %71, %73 : vector<784x256xf32>
    %cst_18 = arith.constant 1.000000e+00 : f32
    %75 = vector.broadcast %cst_18 : f32 to vector<784x256xf32>
    %76 = arith.cmpf oge, %74, %75 : vector<784x256xf32>
    %77 = arith.extui %76 : vector<784x256xi1> to vector<784x256xi32>
    %78 = arith.sitofp %77 : vector<784x256xi32> to vector<784x256xf32>
    %cst_19 = arith.constant dense<0.000000e+00> : vector<256xf32>
    %79 = vector.multi_reduction <add>, %78, %cst_19 [0] : vector<784x256xf32> to vector<256xf32>
    %80 = vector.shape_cast %79 : vector<256xf32> to vector<1x256xf32>
    %81 = vector.shape_cast %80 : vector<1x256xf32> to vector<1x1x1x256xf32>
    %c0_20 = arith.constant 0 : index
    %c0_21 = arith.constant 0 : index
    %c0_22 = arith.constant 0 : index
    %c0_23 = arith.constant 0 : index
    %82 = vector.load %arg9[%c0_20, %c0_21, %c0_22, %c0_23] : memref<1x1x1x256xf32, #tpu.memory_space<vmem>>, vector<1x1x1x256xf32>
    tpu.vector_store %arg9[%c0_20, %c0_21, %c0_22, %c0_23], %81 {strides = array<i32>} : memref<1x1x1x256xf32, #tpu.memory_space<vmem>>, vector<1x1x1x256xf32>,
    return
  }
  func.func @transform_0(%arg0: i32, %arg1: i32) -> (i32, i32, i32) {
    %c0_i32 = arith.constant 0 : i32
    %c0_i32_0 = arith.constant 0 : i32
    return %arg0, %arg1, %c0_i32 : i32, i32, i32
  }
  func.func @transform_1(%arg0: i32, %arg1: i32) -> (i32, i32) {
    %c0_i32 = arith.constant 0 : i32
    %c0_i32_0 = arith.constant 0 : i32
    %c0_i32_1 = arith.constant 0 : i32
    return %c0_i32, %c0_i32_0 : i32, i32
  }
  func.func @transform_2(%arg0: i32, %arg1: i32) -> (i32, i32) {
    %c0_i32 = arith.constant 0 : i32
    %c0_i32_0 = arith.constant 0 : i32
    %c0_i32_1 = arith.constant 0 : i32
    return %c0_i32, %c0_i32_0 : i32, i32
  }
  func.func @transform_3(%arg0: i32, %arg1: i32) -> (i32, i32) {
    %c0_i32 = arith.constant 0 : i32
    %c0_i32_0 = arith.constant 0 : i32
    %c0_i32_1 = arith.constant 0 : i32
    return %c0_i32, %c0_i32_0 : i32, i32
  }
  func.func @transform_4(%arg0: i32, %arg1: i32) -> (i32, i32) {
    %c0_i32 = arith.constant 0 : i32
    %c0_i32_0 = arith.constant 0 : i32
    %c0_i32_1 = arith.constant 0 : i32
    return %c0_i32, %c0_i32_0 : i32, i32
  }
  func.func @transform_5(%arg0: i32, %arg1: i32) -> (i32, i32) {
    %c0_i32 = arith.constant 0 : i32
    %c0_i32_0 = arith.constant 0 : i32
    %c0_i32_1 = arith.constant 0 : i32
    return %c0_i32, %c0_i32_0 : i32, i32
  }
  func.func @transform_6(%arg0: i32, %arg1: i32) -> (i32, i32) {
    %c0_i32 = arith.constant 0 : i32
    %c0_i32_0 = arith.constant 0 : i32
    %c0_i32_1 = arith.constant 0 : i32
    return %c0_i32, %c0_i32_0 : i32, i32
  }
  func.func @transform_7(%arg0: i32, %arg1: i32) -> (i32, i32, i32, i32) {
    %c0_i32 = arith.constant 0 : i32
    %c0_i32_0 = arith.constant 0 : i32
    %c0_i32_1 = arith.constant 0 : i32
    return %arg0, %arg1, %c0_i32, %c0_i32_0 : i32, i32, i32, i32
  }
}

</mosaic_0001>

<bundles_post_ra>
// kernel: ff_mnist_forward.1
= control target key start
LH: loop header
LB: loop body
LE: loop exit
PB: predicated region body
PF: predicated region fallthrough
CT: control target
= control target key end

     0   :  { %s10031_s24 = smov 0   ;;  %s10033_s25 = smov 0   ;;  %s16037_s0 = inlined_call_operand.vmem [shape: f32[2,784,8], index: 0, kind: input, shape index: {}]   ;;  %s16038_s1 = inlined_call_operand.vmem [shape: f32[8,64], index: 1, kind: input, shape index: {}]   ;;  %s16039_s2 = inlined_call_operand.vmem [shape: f32[1,64], index: 2, kind: input, shape index: {}]   ;;  %s16040_s3 = inlined_call_operand.vmem [shape: bf16[64,256], index: 3, kind: input, shape index: {}]   ;;  %s16041_s4 = inlined_call_operand.vmem [shape: f32[1,256], index: 4, kind: input, shape index: {}]   ;;  %s16042_s5 = inlined_call_operand.vmem [shape: bf16[256,256], index: 5, kind: input, shape index: {}]   ;;  %s16043_s6 = inlined_call_operand.vmem [shape: f32[1,256], index: 6, kind: input, shape index: {}]   ;;  %s16044_s7 = inlined_call_operand.vmem [shape: f32[2,1,1,256], index: 7, kind: output, shape index: {}]  }
   0x1   :  { %s10035_s26 = smov 0  }
   0x2 LB: > { %s29_s27 = sadd.s32 1, %s9974_s25  ;;  %p8648_p0 = scmp.ge.s32.totalorder %s9978_s26, 1  ;;  %s9978_s26 = sphi %s10035_s26, %s17_s26   ;;  %s9974_s25 = sphi %s10033_s25, %s17748_s25   ;;  %s9970_s24 = sphi %s10031_s24, %s17747_s24  }
   0x3   : > { %p31_p1 = scmp.ge.s32.totalorder %s29_s27, 2  ;;  %p258_p2 = scmp.lt.s32.totalorder %s9978_s26, 3 }
   0x5   : > { %s17750_s27 = smov (%p31_p1, %s29_s27), 0  ;;  %p259_p3 = pnand %p8648_p0, %p258_p2 }
   0x7   : > { %262 = sbr.rel (%p259_p3) target bundleno = 2440 (0x988), region = 48 }
   0xe   : > { %p298_p4 = scmp.lt.s32.totalorder %s9970_s24, 1  ;;  %v16045_v0 = vmov 0   ;;  %vm5660_vm2 = vcmask 523264  }
   0xf   : > { %9498 = vset.pattern.permute.xlu1 %v16045_v0  ;;  %9497 = vset.pattern.permute.xlu0 %v16045_v0 }
  0x10   : > { %s17752_s24 = smov (!%p298_p4, %s9970_s24), 1  ;;  %5840 = vmatprep.mubr.bf16.mxu0 %v16045_v0 }
  0x11   : > { %s9461_s28 = smul.u32 784, %s17752_s24  ;;  %s8650_s16 = sshll.u32 %s17752_s24, 1 }
  0x12   : > { %s314_s19 = scalar_lea.vmem %s16044_s7, %s8650_s16 }
  0x13   : > { %s10058_s8 = scalar_lea.vmem %s16037_s0, %s9461_s28 }
  0x14   : > { %v10061_v1 = vld [vmem:[%s10058_s8 + $0x10] sm:$0xff]  ;;  %v10064_v2 = vld [vmem:[%s10058_s8] sm:$0xff]  ;;  %v10069_v3 = vld [vmem:[%s10058_s8 + $0x18] sm:$0xff] }
  0x15   : > { %435 = vperm.xlu1 %9498, %v10061_v1   ;;  %425 = vperm.xlu0 %9497, %v10064_v2   ;;  %v10072_v4 = vld [vmem:[%s10058_s8 + $0x8] sm:$0xff]  ;;  %v10080_v6 = vld [vmem:[%s10058_s8 + $0x20] sm:$0xff]  ;;  %v10085_v7 = vld [vmem:[%s10058_s8 + $0x38] sm:$0xff] }
  0x16   : > { %v10077_v5 = vld [vmem:[%s10058_s8 + $0x28] sm:$0xff]  ;;  %v10088_v8 = vld [vmem:[%s10058_s8 + $0x30] sm:$0xff]  ;;  %v10096_v10 = vld [vmem:[%s10058_s8 + $0x40] sm:$0xff] }
  0x17   : > { %v10093_v9 = vld [vmem:[%s10058_s8 + $0x48] sm:$0xff]  ;;  %v10101_v11 = vld [vmem:[%s10058_s8 + $0x58] sm:$0xff]  ;;  %v10104_v12 = vld [vmem:[%s10058_s8 + $0x50] sm:$0xff] }
  0x18   : > { %v10109_v13 = vld [vmem:[%s10058_s8 + $0x68] sm:$0xff]  ;;  %v10112_v14 = vld [vmem:[%s10058_s8 + $0x60] sm:$0xff]  ;;  %v10117_v15 = vld [vmem:[%s10058_s8 + $0x78] sm:$0xff] }
  0x19   : > { %440 = vperm.xlu1 %9498, %v10069_v3   ;;  %430 = vperm.xlu0 %9497, %v10072_v4   ;;  %v10120_v16 = vld [vmem:[%s10058_s8 + $0x70] sm:$0xff]  ;;  %v10123_v17 = vld [vmem:[%s10058_s8 + $0x88] sm:$0xff]  ;;  %v10126_v18 = vld [vmem:[%s10058_s8 + $0x80] sm:$0xff] }
  0x1a   : > { %v10133_v19 = vld [vmem:[%s10058_s8 + $0x98] sm:$0xff]  ;;  %v10136_v20 = vld [vmem:[%s10058_s8 + $0x90] sm:$0xff]  ;;  %v10141_v21 = vld [vmem:[%s10058_s8 + $0xa8] sm:$0xff] }
  0x1b   : > { %v10144_v22 = vld [vmem:[%s10058_s8 + $0xa0] sm:$0xff]  ;;  %v10149_v23 = vld [vmem:[%s10058_s8 + $0xb8] sm:$0xff]  ;;  %v10152_v24 = vld [vmem:[%s10058_s8 + $0xb0] sm:$0xff] }
  0x1c   : > { %v10157_v25 = vld [vmem:[%s10058_s8 + $0xc8] sm:$0xff]  ;;  %v10160_v26 = vld [vmem:[%s10058_s8 + $0xc0] sm:$0xff]  ;;  %v10165_v27 = vld [vmem:[%s10058_s8 + $0xd8] sm:$0xff] }
  0x1d   : > { %450 = vperm.xlu1 %9498, %v10077_v5   ;;  %445 = vperm.xlu0 %9497, %v10080_v6   ;;  %v10168_v28 = vld [vmem:[%s10058_s8 + $0xd0] sm:$0xff]  ;;  %v10173_v29 = vld [vmem:[%s10058_s8 + $0xe8] sm:$0xff]  ;;  %v10176_v30 = vld [vmem:[%s10058_s8 + $0xe0] sm:$0xff] }
  0x1e   : > { %v10181_v31 = vld [vmem:[%s10058_s8 + $0xf8] sm:$0xff]  ;;  %v10184_v32 = vld [vmem:[%s10058_s8 + $0xf0] sm:$0xff]  ;;  %v10189_v33 = vld [vmem:[%s10058_s8 + $0x108] sm:$0xff] }
  0x1f   : > { %v10192_v34 = vld [vmem:[%s10058_s8 + $0x100] sm:$0xff]  ;;  %v10197_v35 = vld [vmem:[%s10058_s8 + $0x118] sm:$0xff]  ;;  %v10200_v36 = vld [vmem:[%s10058_s8 + $0x110] sm:$0xff] }
  0x20   : > { %v10205_v37 = vld [vmem:[%s10058_s8 + $0x128] sm:$0xff]  ;;  %v10208_v38 = vld [vmem:[%s10058_s8 + $0x120] sm:$0xff]  ;;  %v10213_v39 = vld [vmem:[%s10058_s8 + $0x138] sm:$0xff] }
  0x21   : > { %460 = vperm.xlu1 %9498, %v10085_v7   ;;  %455 = vperm.xlu0 %9497, %v10088_v8   ;;  %v10216_v40 = vld [vmem:[%s10058_s8 + $0x130] sm:$0xff]  ;;  %v10221_v41 = vld [vmem:[%s10058_s8 + $0x148] sm:$0xff]  ;;  %v10224_v42 = vld [vmem:[%s10058_s8 + $0x140] sm:$0xff] }
  0x22   : > { %v10229_v43 = vld [vmem:[%s10058_s8 + $0x158] sm:$0xff]  ;;  %v10232_v44 = vld [vmem:[%s10058_s8 + $0x150] sm:$0xff]  ;;  %v10237_v45 = vld [vmem:[%s10058_s8 + $0x168] sm:$0xff] }
  0x23   : > { %v10240_v46 = vld [vmem:[%s10058_s8 + $0x160] sm:$0xff]  ;;  %v10245_v47 = vld [vmem:[%s10058_s8 + $0x178] sm:$0xff]  ;;  %v10248_v48 = vld [vmem:[%s10058_s8 + $0x170] sm:$0xff] }
  0x24   : > { %v10253_v49 = vld [vmem:[%s10058_s8 + $0x188] sm:$0xff]  ;;  %v10256_v50 = vld [vmem:[%s10058_s8 + $0x180] sm:$0xff]  ;;  %v10261_v51 = vld [vmem:[%s10058_s8 + $0x198] sm:$0xff] }
  0x25   : > { %470 = vperm.xlu1 %9498, %v10093_v9   ;;  %465 = vperm.xlu0 %9497, %v10096_v10   ;;  %16204 = vst [vmem:[#allocation2_spill] sm:$0xff] %v10253_v49  ;;  %16205 = vst [vmem:[#allocation3_spill] sm:$0xff] %v10261_v51  ;;  %v10264_v52 = vld [vmem:[%s10058_s8 + $0x190] sm:$0xff]  ;;  %v10269_v53 = vld [vmem:[%s10058_s8 + $0x1a8] sm:$0xff] }
  0x26   : > { %16206 = vst [vmem:[#allocation4_spill] sm:$0xff] %v10269_v53  ;;  %v10272_v54 = vld [vmem:[%s10058_s8 + $0x1a0] sm:$0xff]  ;;  %v10277_v55 = vld [vmem:[%s10058_s8 + $0x1b8] sm:$0xff]  ;;  %v10280_v56 = vld [vmem:[%s10058_s8 + $0x1b0] sm:$0xff] }
  0x27   : > { %16207 = vst [vmem:[#allocation5_spill] sm:$0xff] %v10272_v54  ;;  %16208 = vst [vmem:[#allocation6_spill] sm:$0xff] %v10277_v55  ;;  %v10285_v57 = vld [vmem:[%s10058_s8 + $0x1c8] sm:$0xff]  ;;  %v10288_v58 = vld [vmem:[%s10058_s8 + $0x1c0] sm:$0xff] }
  0x28   : > { %16209 = vst [vmem:[#allocation7_spill] sm:$0xff] %v10280_v56  ;;  %16210 = vst [vmem:[#allocation8_spill] sm:$0xff] %v10285_v57  ;;  %v10293_v59 = vld [vmem:[%s10058_s8 + $0x1d8] sm:$0xff]  ;;  %v10296_v60 = vld [vmem:[%s10058_s8 + $0x1d0] sm:$0xff] }
  0x29   : > { %480 = vperm.xlu1 %9498, %v10101_v11   ;;  %475 = vperm.xlu0 %9497, %v10104_v12   ;;  %16211 = vst [vmem:[#allocation9_spill] sm:$0xff] %v10288_v58  ;;  %16212 = vst [vmem:[#allocation10_spill] sm:$0xff] %v10293_v59  ;;  %v10301_v61 = vld [vmem:[%s10058_s8 + $0x1e8] sm:$0xff]  ;;  %v10304_v62 = vld [vmem:[%s10058_s8 + $0x1e0] sm:$0xff] }
  0x2a   : > { %16213 = vst [vmem:[#allocation11_spill] sm:$0xff] %v10296_v60  ;;  %16214 = vst [vmem:[#allocation12_spill] sm:$0xff] %v10301_v61  ;;  %v10309_v63 = vld [vmem:[%s10058_s8 + $0x1f8] sm:$0xff]  ;;  %v10312_v0 = vld [vmem:[%s10058_s8 + $0x1f0] sm:$0xff] }
  0x2b   : > { %16215 = vst [vmem:[#allocation13_spill] sm:$0xff] %v10304_v62  ;;  %16216 = vst [vmem:[#allocation14_spill] sm:$0xff] %v10309_v63 }
  0x2c   : > { %16217 = vst [vmem:[#allocation15_spill] sm:$0xff] %v10312_v0 }
  0x2d   : > { %490 = vperm.xlu1 %9498, %v10109_v13   ;;  %485 = vperm.xlu0 %9497, %v10112_v14  }
  0x31   : > { %500 = vperm.xlu1 %9498, %v10117_v15   ;;  %495 = vperm.xlu0 %9497, %v10120_v16  }
  0x35   : > { %510 = vperm.xlu1 %9498, %v10123_v17   ;;  %505 = vperm.xlu0 %9497, %v10126_v18  }
  0x39   : > { %520 = vperm.xlu1 %9498, %v10133_v19   ;;  %515 = vperm.xlu0 %9497, %v10136_v20  }
  0x3d   : > { %530 = vperm.xlu1 %9498, %v10141_v21   ;;  %525 = vperm.xlu0 %9497, %v10144_v22  }
  0x41   : > { %540 = vperm.xlu1 %9498, %v10149_v23   ;;  %535 = vperm.xlu0 %9497, %v10152_v24  }
  0x45   : > { %550 = vperm.xlu1 %9498, %v10157_v25   ;;  %545 = vperm.xlu0 %9497, %v10160_v26  }
  0x49   : > { %560 = vperm.xlu1 %9498, %v10165_v27   ;;  %555 = vperm.xlu0 %9497, %v10168_v28  }
  0x4d   : > { %570 = vperm.xlu1 %9498, %v10173_v29   ;;  %565 = vperm.xlu0 %9497, %v10176_v30  }
  0x51   : > { %580 = vperm.xlu1 %9498, %v10181_v31   ;;  %575 = vperm.xlu0 %9497, %v10184_v32  }
  0x55   : > { %590 = vperm.xlu1 %9498, %v10189_v33   ;;  %585 = vperm.xlu0 %9497, %v10192_v34  }
  0x59   : > { %600 = vperm.xlu1 %9498, %v10197_v35   ;;  %595 = vperm.xlu0 %9497, %v10200_v36  }
  0x5d   : > { %610 = vperm.xlu1 %9498, %v10205_v37   ;;  %605 = vperm.xlu0 %9497, %v10208_v38  }
  0x61   : > { %620 = vperm.xlu1 %9498, %v10213_v39   ;;  %615 = vperm.xlu0 %9497, %v10216_v40  }
  0x65   : > { %630 = vperm.xlu1 %9498, %v10221_v41   ;;  %625 = vperm.xlu0 %9497, %v10224_v42  }
  0x69   : > { %640 = vperm.xlu1 %9498, %v10229_v43   ;;  %635 = vperm.xlu0 %9497, %v10232_v44  }
  0x6d   : > { %650 = vperm.xlu1 %9498, %v10237_v45   ;;  %645 = vperm.xlu0 %9497, %v10240_v46  }
  0x71   : > { %660 = vperm.xlu1 %9498, %v10245_v47   ;;  %655 = vperm.xlu0 %9497, %v10248_v48  }
  0x75   : > { %670 = vperm.xlu1 %9498, %v10253_v49   ;;  %665 = vperm.xlu0 %9497, %v10256_v50  }
  0x79   : > { %680 = vperm.xlu1 %9498, %v10261_v51   ;;  %675 = vperm.xlu0 %9497, %v10264_v52  }
  0x7d   : > { %690 = vperm.xlu1 %9498, %v10269_v53   ;;  %685 = vperm.xlu0 %9497, %v10272_v54  }
  0x81   : > { %700 = vperm.xlu1 %9498, %v10277_v55   ;;  %695 = vperm.xlu0 %9497, %v10280_v56  }
  0x85   : > { %710 = vperm.xlu1 %9498, %v10285_v57   ;;  %705 = vperm.xlu0 %9497, %v10288_v58   ;;  %v10332_v58 = vld [vmem:[%s10058_s8 + $0x210] sm:$0xff] }
  0x86   : > { %16223 = vst [vmem:[#allocation21_spill] sm:$0xff] %v10332_v58 }
  0x89   : > { %720 = vperm.xlu1 %9498, %v10293_v59   ;;  %715 = vperm.xlu0 %9497, %v10296_v60   ;;  %v10317_v59 = vld [vmem:[%s10058_s8 + $0x208] sm:$0xff]  ;;  %v10320_v60 = vld [vmem:[%s10058_s8 + $0x200] sm:$0xff] }
  0x8a   : > { %16218 = vst [vmem:[#allocation16_spill] sm:$0xff] %v10317_v59  ;;  %16219 = vst [vmem:[#allocation17_spill] sm:$0xff] %v10320_v60 }
  0x8d   : > { %730 = vperm.xlu1 %9498, %v10301_v61   ;;  %725 = vperm.xlu0 %9497, %v10304_v62   ;;  %v10329_v62 = vld [vmem:[%s10058_s8 + $0x218] sm:$0xff] }
  0x8e   : > { %16222 = vst [vmem:[#allocation20_spill] sm:$0xff] %v10329_v62 }
  0x91   : > { %740 = vperm.xlu1 %9498, %v10309_v63   ;;  %735 = vperm.xlu0 %9497, %v10312_v0  }
  0x94   : > { %v10322_v57 = vpop.permute.xlu1 %435  ;;  %v10324_v61 = vpop.permute.xlu0 %425 }
  0x95   : > { %16220 = vst [vmem:[#allocation18_spill] sm:$0xff] %v10322_v57  ;;  %16221 = vst [vmem:[#allocation19_spill] sm:$0xff] %v10324_v61  ;;  %750 = vperm.xlu1 %9498, %v10317_v59   ;;  %745 = vperm.xlu0 %9497, %v10320_v60   ;;  %v10341_v57 = vld [vmem:[%s10058_s8 + $0x228] sm:$0xff]  ;;  %v10344_v61 = vld [vmem:[%s10058_s8 + $0x220] sm:$0xff] }
  0x96   : > { %16226 = vst [vmem:[#allocation24_spill] sm:$0xff] %v10341_v57  ;;  %16227 = vst [vmem:[#allocation25_spill] sm:$0xff] %v10344_v61 }
  0x98   : > { %v10334_v63 = vpop.permute.xlu1 %440  ;;  %v10336_v0 = vpop.permute.xlu0 %430 }
  0x99   : > { %16224 = vst [vmem:[#allocation22_spill] sm:$0xff] %v10334_v63  ;;  %16225 = vst [vmem:[#allocation23_spill] sm:$0xff] %v10336_v0  ;;  %760 = vperm.xlu1 %9498, %v10329_v62   ;;  %755 = vperm.xlu0 %9497, %v10332_v58   ;;  %v10353_v63 = vld [vmem:[%s10058_s8 + $0x238] sm:$0xff]  ;;  %v10356_v0 = vld [vmem:[%s10058_s8 + $0x230] sm:$0xff] }
  0x9a   : > { %16230 = vst [vmem:[#allocation28_spill] sm:$0xff] %v10353_v63  ;;  %16231 = vst [vmem:[#allocation29_spill] sm:$0xff] %v10356_v0 }
  0x9c   : > { %v10346_v59 = vpop.permute.xlu1 %450  ;;  %v10348_v60 = vpop.permute.xlu0 %445 }
  0x9d   : > { %16228 = vst [vmem:[#allocation26_spill] sm:$0xff] %v10346_v59  ;;  %16229 = vst [vmem:[#allocation27_spill] sm:$0xff] %v10348_v60  ;;  %770 = vperm.xlu1 %9498, %v10341_v57   ;;  %765 = vperm.xlu0 %9497, %v10344_v61   ;;  %v10365_v60 = vld [vmem:[%s10058_s8 + $0x248] sm:$0xff]  ;;  %v10368_v59 = vld [vmem:[%s10058_s8 + $0x240] sm:$0xff] }
  0x9e   : > { %16234 = vst [vmem:[#allocation32_spill] sm:$0xff] %v10365_v60  ;;  %16235 = vst [vmem:[#allocation33_spill] sm:$0xff] %v10368_v59 }
  0xa0   : > { %v10358_v62 = vpop.permute.xlu1 %460  ;;  %v10360_v58 = vpop.permute.xlu0 %455 }
  0xa1   : > { %16232 = vst [vmem:[#allocation30_spill] sm:$0xff] %v10358_v62  ;;  %16233 = vst [vmem:[#allocation31_spill] sm:$0xff] %v10360_v58  ;;  %780 = vperm.xlu1 %9498, %v10353_v63   ;;  %775 = vperm.xlu0 %9497, %v10356_v0   ;;  %v10377_v62 = vld [vmem:[%s10058_s8 + $0x258] sm:$0xff]  ;;  %v10380_v58 = vld [vmem:[%s10058_s8 + $0x250] sm:$0xff] }
  0xa2   : > { %16238 = vst [vmem:[#allocation36_spill] sm:$0xff] %v10377_v62  ;;  %16239 = vst [vmem:[#allocation37_spill] sm:$0xff] %v10380_v58 }
  0xa4   : > { %v10370_v57 = vpop.permute.xlu1 %470  ;;  %v10372_v61 = vpop.permute.xlu0 %465 }
  0xa5   : > { %16236 = vst [vmem:[#allocation34_spill] sm:$0xff] %v10370_v57  ;;  %16237 = vst [vmem:[#allocation35_spill] sm:$0xff] %v10372_v61  ;;  %790 = vperm.xlu1 %9498, %v10365_v60   ;;  %785 = vperm.xlu0 %9497, %v10368_v59   ;;  %v10389_v61 = vld [vmem:[%s10058_s8 + $0x268] sm:$0xff]  ;;  %v10392_v57 = vld [vmem:[%s10058_s8 + $0x260] sm:$0xff] }
  0xa6   : > { %16242 = vst [vmem:[#allocation40_spill] sm:$0xff] %v10389_v61  ;;  %16243 = vst [vmem:[#allocation41_spill] sm:$0xff] %v10392_v57 }
  0xa8   : > { %v10382_v63 = vpop.permute.xlu1 %480  ;;  %v10384_v0 = vpop.permute.xlu0 %475 }
  0xa9   : > { %16240 = vst [vmem:[#allocation38_spill] sm:$0xff] %v10382_v63  ;;  %16241 = vst [vmem:[#allocation39_spill] sm:$0xff] %v10384_v0  ;;  %800 = vperm.xlu1 %9498, %v10377_v62   ;;  %795 = vperm.xlu0 %9497, %v10380_v58   ;;  %v10401_v63 = vld [vmem:[%s10058_s8 + $0x278] sm:$0xff]  ;;  %v10404_v0 = vld [vmem:[%s10058_s8 + $0x270] sm:$0xff] }
  0xaa   : > { %16246 = vst [vmem:[#allocation44_spill] sm:$0xff] %v10401_v63  ;;  %16247 = vst [vmem:[#allocation45_spill] sm:$0xff] %v10404_v0 }
  0xac   : > { %v10394_v60 = vpop.permute.xlu1 %490  ;;  %v10396_v59 = vpop.permute.xlu0 %485 }
  0xad   : > { %16244 = vst [vmem:[#allocation42_spill] sm:$0xff] %v10394_v60  ;;  %16245 = vst [vmem:[#allocation43_spill] sm:$0xff] %v10396_v59  ;;  %810 = vperm.xlu1 %9498, %v10389_v61   ;;  %805 = vperm.xlu0 %9497, %v10392_v57   ;;  %v10413_v59 = vld [vmem:[%s10058_s8 + $0x288] sm:$0xff]  ;;  %v10416_v60 = vld [vmem:[%s10058_s8 + $0x280] sm:$0xff] }
  0xae   : > { %16250 = vst [vmem:[#allocation48_spill] sm:$0xff] %v10413_v59  ;;  %16251 = vst [vmem:[#allocation49_spill] sm:$0xff] %v10416_v60 }
  0xb0   : > { %v10406_v62 = vpop.permute.xlu1 %500  ;;  %v10408_v58 = vpop.permute.xlu0 %495 }
  0xb1   : > { %16248 = vst [vmem:[#allocation46_spill] sm:$0xff] %v10406_v62  ;;  %16249 = vst [vmem:[#allocation47_spill] sm:$0xff] %v10408_v58  ;;  %820 = vperm.xlu1 %9498, %v10401_v63   ;;  %815 = vperm.xlu0 %9497, %v10404_v0   ;;  %v10425_v62 = vld [vmem:[%s10058_s8 + $0x298] sm:$0xff]  ;;  %v10428_v58 = vld [vmem:[%s10058_s8 + $0x290] sm:$0xff] }
  0xb2   : > { %16254 = vst [vmem:[#allocation52_spill] sm:$0xff] %v10425_v62  ;;  %16255 = vst [vmem:[#allocation53_spill] sm:$0xff] %v10428_v58 }
  0xb4   : > { %v10418_v61 = vpop.permute.xlu1 %510  ;;  %v10420_v57 = vpop.permute.xlu0 %505 }
  0xb5   : > { %16252 = vst [vmem:[#allocation50_spill] sm:$0xff] %v10418_v61  ;;  %16253 = vst [vmem:[#allocation51_spill] sm:$0xff] %v10420_v57  ;;  %830 = vperm.xlu1 %9498, %v10413_v59   ;;  %825 = vperm.xlu0 %9497, %v10416_v60   ;;  %v10437_v57 = vld [vmem:[%s10058_s8 + $0x2a8] sm:$0xff]  ;;  %v10440_v61 = vld [vmem:[%s10058_s8 + $0x2a0] sm:$0xff] }
  0xb6   : > { %16258 = vst [vmem:[#allocation56_spill] sm:$0xff] %v10437_v57  ;;  %16259 = vst [vmem:[#allocation57_spill] sm:$0xff] %v10440_v61 }
  0xb8   : > { %v10430_v63 = vpop.permute.xlu1 %520  ;;  %v10432_v0 = vpop.permute.xlu0 %515 }
  0xb9   : > { %16256 = vst [vmem:[#allocation54_spill] sm:$0xff] %v10430_v63  ;;  %16257 = vst [vmem:[#allocation55_spill] sm:$0xff] %v10432_v0  ;;  %840 = vperm.xlu1 %9498, %v10425_v62   ;;  %835 = vperm.xlu0 %9497, %v10428_v58   ;;  %v10449_v63 = vld [vmem:[%s10058_s8 + $0x2b8] sm:$0xff]  ;;  %v10452_v0 = vld [vmem:[%s10058_s8 + $0x2b0] sm:$0xff] }
  0xba   : > { %16262 = vst [vmem:[#allocation60_spill] sm:$0xff] %v10449_v63  ;;  %16263 = vst [vmem:[#allocation61_spill] sm:$0xff] %v10452_v0 }
  0xbc   : > { %v10442_v59 = vpop.permute.xlu1 %530  ;;  %v10444_v60 = vpop.permute.xlu0 %525 }
  0xbd   : > { %16260 = vst [vmem:[#allocation58_spill] sm:$0xff] %v10442_v59  ;;  %16261 = vst [vmem:[#allocation59_spill] sm:$0xff] %v10444_v60  ;;  %850 = vperm.xlu1 %9498, %v10437_v57   ;;  %845 = vperm.xlu0 %9497, %v10440_v61   ;;  %v10461_v60 = vld [vmem:[%s10058_s8 + $0x2c8] sm:$0xff]  ;;  %v10464_v59 = vld [vmem:[%s10058_s8 + $0x2c0] sm:$0xff] }
  0xbe   : > { %16266 = vst [vmem:[#allocation64_spill] sm:$0xff] %v10461_v60  ;;  %16267 = vst [vmem:[#allocation65_spill] sm:$0xff] %v10464_v59 }
  0xc0   : > { %v10454_v62 = vpop.permute.xlu1 %540  ;;  %v10456_v58 = vpop.permute.xlu0 %535 }
  0xc1   : > { %16264 = vst [vmem:[#allocation62_spill] sm:$0xff] %v10454_v62  ;;  %16265 = vst [vmem:[#allocation63_spill] sm:$0xff] %v10456_v58  ;;  %860 = vperm.xlu1 %9498, %v10449_v63   ;;  %855 = vperm.xlu0 %9497, %v10452_v0   ;;  %v10473_v62 = vld [vmem:[%s10058_s8 + $0x2d8] sm:$0xff]  ;;  %v10476_v58 = vld [vmem:[%s10058_s8 + $0x2d0] sm:$0xff] }
  0xc2   : > { %16270 = vst [vmem:[#allocation68_spill] sm:$0xff] %v10473_v62  ;;  %16271 = vst [vmem:[#allocation69_spill] sm:$0xff] %v10476_v58 }
  0xc4   : > { %v10466_v57 = vpop.permute.xlu1 %550  ;;  %v10468_v61 = vpop.permute.xlu0 %545 }
  0xc5   : > { %16268 = vst [vmem:[#allocation66_spill] sm:$0xff] %v10466_v57  ;;  %16269 = vst [vmem:[#allocation67_spill] sm:$0xff] %v10468_v61  ;;  %870 = vperm.xlu1 %9498, %v10461_v60   ;;  %865 = vperm.xlu0 %9497, %v10464_v59   ;;  %v10485_v61 = vld [vmem:[%s10058_s8 + $0x2e8] sm:$0xff]  ;;  %v10488_v57 = vld [vmem:[%s10058_s8 + $0x2e0] sm:$0xff] }
  0xc6   : > { %16274 = vst [vmem:[#allocation72_spill] sm:$0xff] %v10485_v61  ;;  %16275 = vst [vmem:[#allocation73_spill] sm:$0xff] %v10488_v57 }
  0xc8   : > { %v10478_v63 = vpop.permute.xlu1 %560  ;;  %v10480_v0 = vpop.permute.xlu0 %555 }
  0xc9   : > { %16272 = vst [vmem:[#allocation70_spill] sm:$0xff] %v10478_v63  ;;  %16273 = vst [vmem:[#allocation71_spill] sm:$0xff] %v10480_v0  ;;  %880 = vperm.xlu1 %9498, %v10473_v62   ;;  %875 = vperm.xlu0 %9497, %v10476_v58   ;;  %v10497_v63 = vld [vmem:[%s10058_s8 + $0x2f8] sm:$0xff]  ;;  %v10500_v0 = vld [vmem:[%s10058_s8 + $0x2f0] sm:$0xff] }
  0xca   : > { %16278 = vst [vmem:[#allocation76_spill] sm:$0xff] %v10497_v63  ;;  %v10509_v58 = vld [vmem:[%s10058_s8 + $0x308] sm:$0xff] }
  0xcc   : > { %v10490_v60 = vpop.permute.xlu1 %570  ;;  %v10492_v59 = vpop.permute.xlu0 %565 }
  0xcd   : > { %16276 = vst [vmem:[#allocation74_spill] sm:$0xff] %v10490_v60  ;;  %16277 = vst [vmem:[#allocation75_spill] sm:$0xff] %v10492_v59  ;;  %890 = vperm.xlu1 %9498, %v10485_v61   ;;  %885 = vperm.xlu0 %9497, %v10488_v57   ;;  %v10512_v60 = vld [vmem:[%s10058_s8 + $0x300] sm:$0xff] }
  0xd0   : > { %v10502_v55 = vpop.permute.xlu1 %580  ;;  %v10504_v62 = vpop.permute.xlu0 %575 }
  0xd1   : > { %16279 = vst [vmem:[#allocation77_spill] sm:$0xff] %v10502_v55  ;;  %16280 = vst [vmem:[#allocation78_spill] sm:$0xff] %v10504_v62  ;;  %900 = vperm.xlu1 %9498, %v10497_v63   ;;  %895 = vperm.xlu0 %9497, %v10500_v0   ;;  %v9981_v62 = vmov 1  }
  0xd4   : > { %v10514_v59 = vpop.permute.xlu1 %590  ;;  %v10516_v61 = vpop.permute.xlu0 %585 }
  0xd5   : > { %16281 = vst [vmem:[#allocation79_spill] sm:$0xff] %v10514_v59  ;;  %16282 = vst [vmem:[#allocation80_spill] sm:$0xff] %v10516_v61  ;;  %910 = vperm.xlu1 %9498, %v10509_v58   ;;  %905 = vperm.xlu0 %9497, %v10512_v60  }
  0xd8   : > { %v10520_v57 = vpop.permute.xlu1 %600  ;;  %v10522_v55 = vpop.permute.xlu0 %595 }
  0xd9   : > { %16283 = vst [vmem:[#allocation81_spill] sm:$0xff] %v10520_v57  ;;  %16284 = vst [vmem:[#allocation82_spill] sm:$0xff] %v10522_v55  ;;  %9500 = vset.pattern.permute.xlu1 %v9981_v62  ;;  %9499 = vset.pattern.permute.xlu0 %v9981_v62 }
  0xda   : > { %1118 = vperm.xlu1 %9500, %v10072_v4   ;;  %1114 = vperm.xlu0 %9499, %v10064_v2  }
  0xdc   : > { %v10526_v63 = vpop.permute.xlu1 %610  ;;  %v10528_v59 = vpop.permute.xlu0 %605 }
  0xdd   : > { %16285 = vst [vmem:[#allocation83_spill] sm:$0xff] %v10526_v63  ;;  %16286 = vst [vmem:[#allocation84_spill] sm:$0xff] %v10528_v59 }
  0xde   : > { %1122 = vperm.xlu1 %9500, %v10061_v1   ;;  %1126 = vperm.xlu0 %9499, %v10069_v3  }
  0xe0   : > { %v10532_v61 = vpop.permute.xlu1 %620  ;;  %v10534_v57 = vpop.permute.xlu0 %615 }
  0xe1   : > { %16287 = vst [vmem:[#allocation85_spill] sm:$0xff] %v10532_v61  ;;  %16288 = vst [vmem:[#allocation86_spill] sm:$0xff] %v10534_v57 }
  0xe2   : > { %1130 = vperm.xlu1 %9500, %v10080_v6   ;;  %1134 = vperm.xlu0 %9499, %v10077_v5  }
  0xe4   : > { %v10538_v62 = vpop.permute.xlu1 %630  ;;  %v10540_v55 = vpop.permute.xlu0 %625 }
  0xe5   : > { %16289 = vst [vmem:[#allocation87_spill] sm:$0xff] %v10538_v62  ;;  %16290 = vst [vmem:[#allocation88_spill] sm:$0xff] %v10540_v55 }
  0xe6   : > { %1138 = vperm.xlu1 %9500, %v10088_v8   ;;  %1142 = vperm.xlu0 %9499, %v10085_v7  }
  0xe8   : > { %v10544_v59 = vpop.permute.xlu1 %640  ;;  %v10546_v63 = vpop.permute.xlu0 %635 }
  0xe9   : > { %16291 = vst [vmem:[#allocation89_spill] sm:$0xff] %v10544_v59  ;;  %16292 = vst [vmem:[#allocation90_spill] sm:$0xff] %v10546_v63 }
  0xea   : > { %1146 = vperm.xlu1 %9500, %v10096_v10   ;;  %1150 = vperm.xlu0 %9499, %v10093_v9  }
  0xec   : > { %v10550_v61 = vpop.permute.xlu1 %650  ;;  %v10552_v57 = vpop.permute.xlu0 %645 }
  0xed   : > { %16293 = vst [vmem:[#allocation91_spill] sm:$0xff] %v10550_v61  ;;  %16294 = vst [vmem:[#allocation92_spill] sm:$0xff] %v10552_v57 }
  0xee   : > { %1154 = vperm.xlu1 %9500, %v10104_v12   ;;  %1158 = vperm.xlu0 %9499, %v10101_v11  }
  0xf0   : > { %v10556_v55 = vpop.permute.xlu1 %660  ;;  %v10558_v62 = vpop.permute.xlu0 %655 }
  0xf1   : > { %16295 = vst [vmem:[#allocation93_spill] sm:$0xff] %v10556_v55  ;;  %16296 = vst [vmem:[#allocation94_spill] sm:$0xff] %v10558_v62 }
  0xf2   : > { %1162 = vperm.xlu1 %9500, %v10112_v14   ;;  %1166 = vperm.xlu0 %9499, %v10109_v13  }
  0xf4   : > { %v10562_v63 = vpop.permute.xlu1 %670  ;;  %v10564_v59 = vpop.permute.xlu0 %665 }
  0xf5   : > { %16297 = vst [vmem:[#allocation95_spill] sm:$0xff] %v10562_v63  ;;  %16298 = vst [vmem:[#allocation96_spill] sm:$0xff] %v10564_v59 }
  0xf6   : > { %1170 = vperm.xlu1 %9500, %v10120_v16   ;;  %1174 = vperm.xlu0 %9499, %v10117_v15  }
  0xf8   : > { %v10568_v57 = vpop.permute.xlu1 %680  ;;  %v10570_v61 = vpop.permute.xlu0 %675 }
  0xf9   : > { %16299 = vst [vmem:[#allocation97_spill] sm:$0xff] %v10568_v57  ;;  %16300 = vst [vmem:[#allocation98_spill] sm:$0xff] %v10570_v61 }
  0xfa   : > { %1178 = vperm.xlu1 %9500, %v10126_v18   ;;  %1182 = vperm.xlu0 %9499, %v10123_v17  }
  0xfc   : > { %v10574_v62 = vpop.permute.xlu1 %690  ;;  %v10576_v55 = vpop.permute.xlu0 %685 }
  0xfd   : > { %16301 = vst [vmem:[#allocation99_spill] sm:$0xff] %v10574_v62  ;;  %16302 = vst [vmem:[#allocation100_spill] sm:$0xff] %v10576_v55 }
  0xfe   : > { %1186 = vperm.xlu1 %9500, %v10136_v20   ;;  %1190 = vperm.xlu0 %9499, %v10133_v19  }
 0x100   : > { %v10580_v59 = vpop.permute.xlu1 %700  ;;  %v10582_v63 = vpop.permute.xlu0 %695 }
 0x101   : > { %16303 = vst [vmem:[#allocation101_spill] sm:$0xff] %v10580_v59  ;;  %16304 = vst [vmem:[#allocation102_spill] sm:$0xff] %v10582_v63 }
 0x102   : > { %1194 = vperm.xlu1 %9500, %v10144_v22   ;;  %1198 = vperm.xlu0 %9499, %v10141_v21  }
 0x104   : > { %v10586_v61 = vpop.permute.xlu1 %710  ;;  %v10588_v57 = vpop.permute.xlu0 %705 }
 0x105   : > { %16305 = vst [vmem:[#allocation103_spill] sm:$0xff] %v10586_v61  ;;  %16306 = vst [vmem:[#allocation104_spill] sm:$0xff] %v10588_v57 }
 0x106   : > { %1202 = vperm.xlu1 %9500, %v10152_v24   ;;  %1206 = vperm.xlu0 %9499, %v10149_v23  }
 0x108   : > { %v10592_v55 = vpop.permute.xlu1 %720  ;;  %v10594_v62 = vpop.permute.xlu0 %715 }
 0x109   : > { %16307 = vst [vmem:[#allocation105_spill] sm:$0xff] %v10592_v55  ;;  %16308 = vst [vmem:[#allocation106_spill] sm:$0xff] %v10594_v62 }
 0x10a   : > { %1210 = vperm.xlu1 %9500, %v10160_v26   ;;  %1214 = vperm.xlu0 %9499, %v10157_v25  }
 0x10c   : > { %v10598_v63 = vpop.permute.xlu1 %730  ;;  %v10600_v59 = vpop.permute.xlu0 %725 }
 0x10d   : > { %16309 = vst [vmem:[#allocation107_spill] sm:$0xff] %v10598_v63  ;;  %16310 = vst [vmem:[#allocation108_spill] sm:$0xff] %v10600_v59 }
 0x10e   : > { %1218 = vperm.xlu1 %9500, %v10168_v28   ;;  %1222 = vperm.xlu0 %9499, %v10165_v27  }
 0x110   : > { %v10604_v57 = vpop.permute.xlu1 %740  ;;  %v10606_v61 = vpop.permute.xlu0 %735 }
 0x111   : > { %16311 = vst [vmem:[#allocation109_spill] sm:$0xff] %v10604_v57  ;;  %16312 = vst [vmem:[#allocation110_spill] sm:$0xff] %v10606_v61 }
 0x112   : > { %1226 = vperm.xlu1 %9500, %v10176_v30   ;;  %1230 = vperm.xlu0 %9499, %v10173_v29  }
 0x114   : > { %v10610_v62 = vpop.permute.xlu1 %750  ;;  %v10612_v55 = vpop.permute.xlu0 %745 }
 0x115   : > { %16313 = vst [vmem:[#allocation111_spill] sm:$0xff] %v10610_v62  ;;  %16314 = vst [vmem:[#allocation112_spill] sm:$0xff] %v10612_v55 }
 0x116   : > { %1234 = vperm.xlu1 %9500, %v10184_v32   ;;  %1238 = vperm.xlu0 %9499, %v10181_v31  }
 0x118   : > { %v10616_v59 = vpop.permute.xlu1 %760  ;;  %v10618_v63 = vpop.permute.xlu0 %755 }
 0x119   : > { %16315 = vst [vmem:[#allocation113_spill] sm:$0xff] %v10616_v59  ;;  %16316 = vst [vmem:[#allocation114_spill] sm:$0xff] %v10618_v63 }
 0x11a   : > { %1242 = vperm.xlu1 %9500, %v10192_v34   ;;  %1246 = vperm.xlu0 %9499, %v10189_v33  }
 0x11c   : > { %v10622_v61 = vpop.permute.xlu1 %770  ;;  %v10624_v57 = vpop.permute.xlu0 %765 }
 0x11d   : > { %16317 = vst [vmem:[#allocation115_spill] sm:$0xff] %v10622_v61  ;;  %16318 = vst [vmem:[#allocation116_spill] sm:$0xff] %v10624_v57 }
 0x11e   : > { %1250 = vperm.xlu1 %9500, %v10200_v36   ;;  %1254 = vperm.xlu0 %9499, %v10197_v35  }
 0x120   : > { %v10628_v62 = vpop.permute.xlu1 %780  ;;  %v10630_v55 = vpop.permute.xlu0 %775 }
 0x121   : > { %16319 = vst [vmem:[#allocation117_spill] sm:$0xff] %v10628_v62  ;;  %16320 = vst [vmem:[#allocation118_spill] sm:$0xff] %v10630_v55 }
 0x122   : > { %1258 = vperm.xlu1 %9500, %v10208_v38   ;;  %1262 = vperm.xlu0 %9499, %v10205_v37  }
 0x124   : > { %v10634_v59 = vpop.permute.xlu1 %790  ;;  %v10636_v63 = vpop.permute.xlu0 %785 }
 0x125   : > { %16321 = vst [vmem:[#allocation119_spill] sm:$0xff] %v10634_v59  ;;  %16322 = vst [vmem:[#allocation120_spill] sm:$0xff] %v10636_v63 }
 0x126   : > { %1266 = vperm.xlu1 %9500, %v10216_v40   ;;  %1270 = vperm.xlu0 %9499, %v10213_v39  }
 0x128   : > { %v10640_v61 = vpop.permute.xlu1 %800  ;;  %v10642_v57 = vpop.permute.xlu0 %795 }
 0x129   : > { %16323 = vst [vmem:[#allocation121_spill] sm:$0xff] %v10640_v61  ;;  %16324 = vst [vmem:[#allocation122_spill] sm:$0xff] %v10642_v57 }
 0x12a   : > { %1274 = vperm.xlu1 %9500, %v10224_v42   ;;  %1278 = vperm.xlu0 %9499, %v10221_v41  }
 0x12c   : > { %v10646_v62 = vpop.permute.xlu1 %810  ;;  %v10648_v55 = vpop.permute.xlu0 %805 }
 0x12d   : > { %16325 = vst [vmem:[#allocation123_spill] sm:$0xff] %v10646_v62  ;;  %16326 = vst [vmem:[#allocation124_spill] sm:$0xff] %v10648_v55 }
 0x12e   : > { %1282 = vperm.xlu1 %9500, %v10232_v44   ;;  %1286 = vperm.xlu0 %9499, %v10229_v43  }
 0x130   : > { %v10652_v59 = vpop.permute.xlu1 %820  ;;  %v10654_v63 = vpop.permute.xlu0 %815 }
 0x131   : > { %16327 = vst [vmem:[#allocation125_spill] sm:$0xff] %v10652_v59  ;;  %16328 = vst [vmem:[#allocation126_spill] sm:$0xff] %v10654_v63 }
 0x132   : > { %1290 = vperm.xlu1 %9500, %v10240_v46   ;;  %1294 = vperm.xlu0 %9499, %v10237_v45  }
 0x134   : > { %v10658_v61 = vpop.permute.xlu1 %830  ;;  %v10660_v57 = vpop.permute.xlu0 %825 }
 0x135   : > { %16329 = vst [vmem:[#allocation127_spill] sm:$0xff] %v10658_v61  ;;  %16330 = vst [vmem:[#allocation128_spill] sm:$0xff] %v10660_v57 }
 0x136   : > { %1298 = vperm.xlu1 %9500, %v10248_v48   ;;  %1302 = vperm.xlu0 %9499, %v10245_v47  }
 0x138   : > { %v10664_v62 = vpop.permute.xlu1 %840  ;;  %v10666_v55 = vpop.permute.xlu0 %835 }
 0x139   : > { %16331 = vst [vmem:[#allocation129_spill] sm:$0xff] %v10664_v62  ;;  %16332 = vst [vmem:[#allocation130_spill] sm:$0xff] %v10666_v55 }
 0x13a   : > { %1306 = vperm.xlu1 %9500, %v10256_v50   ;;  %1310 = vperm.xlu0 %9499, %v10253_v49  }
 0x13c   : > { %v10670_v59 = vpop.permute.xlu1 %850  ;;  %v10672_v63 = vpop.permute.xlu0 %845 }
 0x13d   : > { %16333 = vst [vmem:[#allocation131_spill] sm:$0xff] %v10670_v59  ;;  %16334 = vst [vmem:[#allocation132_spill] sm:$0xff] %v10672_v63  ;;  %v16339_v59 = vld [vmem:[#allocation6_spill] sm:$0xff] }
 0x13e   : > { %1314 = vperm.xlu1 %9500, %v10264_v52   ;;  %1318 = vperm.xlu0 %9499, %v10261_v51   ;;  %v16342_v51 = vld [vmem:[#allocation9_spill] sm:$0xff] }
 0x140   : > { %v10676_v61 = vpop.permute.xlu1 %860  ;;  %v10678_v57 = vpop.permute.xlu0 %855 }
 0x141   : > { %16335 = vst [vmem:[#allocation133_spill] sm:$0xff] %v10676_v61  ;;  %16336 = vst [vmem:[#allocation134_spill] sm:$0xff] %v10678_v57  ;;  %v16343_v61 = vld [vmem:[#allocation8_spill] sm:$0xff] }
 0x142   : > { %1322 = vperm.xlu1 %9500, %v10272_v54   ;;  %1326 = vperm.xlu0 %9499, %v10269_v53   ;;  %v16346_v53 = vld [vmem:[#allocation11_spill] sm:$0xff] }
 0x144   : > { %v10682_v62 = vpop.permute.xlu1 %870  ;;  %v10684_v55 = vpop.permute.xlu0 %865 }
 0x145   : > { %16337 = vst [vmem:[#allocation135_spill] sm:$0xff] %v10682_v62  ;;  %16338 = vst [vmem:[#allocation136_spill] sm:$0xff] %v10684_v55  ;;  %v16347_v62 = vld [vmem:[#allocation10_spill] sm:$0xff] }
 0x146   : > { %1330 = vperm.xlu1 %9500, %v10280_v56   ;;  %1334 = vperm.xlu0 %9499, %v16339_v59   ;;  %v16350_v59 = vld [vmem:[#allocation13_spill] sm:$0xff] }
 0x148   : > { %v10688_v63 = vpop.permute.xlu1 %880  ;;  %v10690_v49 = vpop.permute.xlu0 %875 }
 0x149   : > { %16340 = vst [vmem:[#allocation137_spill] sm:$0xff] %v10688_v63  ;;  %16341 = vst [vmem:[#allocation138_spill] sm:$0xff] %v10690_v49  ;;  %v16351_v63 = vld [vmem:[#allocation12_spill] sm:$0xff] }
 0x14a   : > { %1338 = vperm.xlu1 %9500, %v16342_v51   ;;  %1342 = vperm.xlu0 %9499, %v16343_v61   ;;  %v16354_v61 = vld [vmem:[#allocation15_spill] sm:$0xff] }
 0x14c   : > { %v10694_v57 = vpop.permute.xlu1 %890  ;;  %v10696_v54 = vpop.permute.xlu0 %885 }
 0x14d   : > { %16344 = vst [vmem:[#allocation139_spill] sm:$0xff] %v10694_v57  ;;  %16345 = vst [vmem:[#allocation140_spill] sm:$0xff] %v10696_v54  ;;  %v16355_v57 = vld [vmem:[#allocation14_spill] sm:$0xff] }
 0x14e   : > { %1346 = vperm.xlu1 %9500, %v16346_v53   ;;  %1350 = vperm.xlu0 %9499, %v16347_v62   ;;  %v16358_v62 = vld [vmem:[#allocation17_spill] sm:$0xff] }
 0x150   : > { %v10700_v55 = vpop.permute.xlu1 %900  ;;  %v10702_v56 = vpop.permute.xlu0 %895 }
 0x151   : > { %16348 = vst [vmem:[#allocation141_spill] sm:$0xff] %v10700_v55  ;;  %16349 = vst [vmem:[#allocation142_spill] sm:$0xff] %v10702_v56  ;;  %v16359_v55 = vld [vmem:[#allocation16_spill] sm:$0xff] }
 0x152   : > { %1354 = vperm.xlu1 %9500, %v16350_v59   ;;  %1358 = vperm.xlu0 %9499, %v16351_v63   ;;  %v16362_v63 = vld [vmem:[#allocation21_spill] sm:$0xff] }
 0x154   : > { %v10706_v49 = vpop.permute.xlu1 %910  ;;  %v10708_v51 = vpop.permute.xlu0 %905 }
 0x155   : > { %16352 = vst [vmem:[#allocation143_spill] sm:$0xff] %v10706_v49  ;;  %16353 = vst [vmem:[#allocation144_spill] sm:$0xff] %v10708_v51  ;;  %v16363_v49 = vld [vmem:[#allocation20_spill] sm:$0xff] }
 0x156   : > { %1362 = vperm.xlu1 %9500, %v16354_v61   ;;  %1366 = vperm.xlu0 %9499, %v16355_v57   ;;  %v16366_v57 = vld [vmem:[#allocation25_spill] sm:$0xff] }
 0x159   : > { %v10712_v54 = vpop.permute.xlu1 %1118  ;;  %v10714_v53 = vpop.permute.xlu0 %1114 }
 0x15a   : > { %16356 = vst [vmem:[#allocation145_spill] sm:$0xff] %v10712_v54  ;;  %16357 = vst [vmem:[#allocation146_spill] sm:$0xff] %v10714_v53  ;;  %1370 = vperm.xlu1 %9500, %v16358_v62   ;;  %1374 = vperm.xlu0 %9499, %v16359_v55   ;;  %v16367_v54 = vld [vmem:[#allocation24_spill] sm:$0xff]  ;;  %v16370_v55 = vld [vmem:[#allocation29_spill] sm:$0xff] }
 0x15d   : > { %v10718_v56 = vpop.permute.xlu1 %1122  ;;  %v10720_v59 = vpop.permute.xlu0 %1126 }
 0x15e   : > { %16360 = vst [vmem:[#allocation147_spill] sm:$0xff] %v10718_v56  ;;  %16361 = vst [vmem:[#allocation148_spill] sm:$0xff] %v10720_v59  ;;  %1378 = vperm.xlu1 %9500, %v16362_v63   ;;  %1382 = vperm.xlu0 %9499, %v16363_v49   ;;  %v16371_v56 = vld [vmem:[#allocation28_spill] sm:$0xff]  ;;  %v16374_v49 = vld [vmem:[#allocation33_spill] sm:$0xff] }
 0x161   : > { %v10724_v51 = vpop.permute.xlu1 %1130  ;;  %v10726_v61 = vpop.permute.xlu0 %1134 }
 0x162   : > { %16364 = vst [vmem:[#allocation149_spill] sm:$0xff] %v10724_v51  ;;  %16365 = vst [vmem:[#allocation150_spill] sm:$0xff] %v10726_v61  ;;  %1386 = vperm.xlu1 %9500, %v16366_v57   ;;  %1390 = vperm.xlu0 %9499, %v16367_v54   ;;  %v16375_v51 = vld [vmem:[#allocation32_spill] sm:$0xff]  ;;  %v16378_v54 = vld [vmem:[#allocation37_spill] sm:$0xff] }
 0x165   : > { %v10730_v53 = vpop.permute.xlu1 %1138  ;;  %v10732_v62 = vpop.permute.xlu0 %1142 }
 0x166   : > { %16368 = vst [vmem:[#allocation151_spill] sm:$0xff] %v10730_v53  ;;  %16369 = vst [vmem:[#allocation152_spill] sm:$0xff] %v10732_v62  ;;  %1394 = vperm.xlu1 %9500, %v16370_v55   ;;  %1398 = vperm.xlu0 %9499, %v16371_v56   ;;  %v16379_v53 = vld [vmem:[#allocation36_spill] sm:$0xff]  ;;  %v16382_v56 = vld [vmem:[#allocation41_spill] sm:$0xff] }
 0x169   : > { %v10736_v59 = vpop.permute.xlu1 %1146  ;;  %v10738_v63 = vpop.permute.xlu0 %1150 }
 0x16a   : > { %16372 = vst [vmem:[#allocation153_spill] sm:$0xff] %v10736_v59  ;;  %16373 = vst [vmem:[#allocation154_spill] sm:$0xff] %v10738_v63  ;;  %1402 = vperm.xlu1 %9500, %v16374_v49   ;;  %1406 = vperm.xlu0 %9499, %v16375_v51   ;;  %v16383_v59 = vld [vmem:[#allocation40_spill] sm:$0xff]  ;;  %v16386_v51 = vld [vmem:[#allocation45_spill] sm:$0xff] }
 0x16d   : > { %v10742_v61 = vpop.permute.xlu1 %1154  ;;  %v10744_v57 = vpop.permute.xlu0 %1158 }
 0x16e   : > { %16376 = vst [vmem:[#allocation155_spill] sm:$0xff] %v10742_v61  ;;  %16377 = vst [vmem:[#allocation156_spill] sm:$0xff] %v10744_v57  ;;  %1410 = vperm.xlu1 %9500, %v16378_v54   ;;  %1414 = vperm.xlu0 %9499, %v16379_v53   ;;  %v16387_v61 = vld [vmem:[#allocation44_spill] sm:$0xff]  ;;  %v16390_v53 = vld [vmem:[#allocation49_spill] sm:$0xff] }
 0x171   : > { %v10748_v62 = vpop.permute.xlu1 %1162  ;;  %v10750_v55 = vpop.permute.xlu0 %1166 }
 0x172   : > { %16380 = vst [vmem:[#allocation157_spill] sm:$0xff] %v10748_v62  ;;  %16381 = vst [vmem:[#allocation158_spill] sm:$0xff] %v10750_v55  ;;  %1418 = vperm.xlu1 %9500, %v16382_v56   ;;  %1422 = vperm.xlu0 %9499, %v16383_v59   ;;  %v16391_v62 = vld [vmem:[#allocation48_spill] sm:$0xff]  ;;  %v16394_v59 = vld [vmem:[#allocation53_spill] sm:$0xff] }
 0x175   : > { %v10754_v63 = vpop.permute.xlu1 %1170  ;;  %v10756_v49 = vpop.permute.xlu0 %1174 }
 0x176   : > { %16384 = vst [vmem:[#allocation159_spill] sm:$0xff] %v10754_v63  ;;  %16385 = vst [vmem:[#allocation160_spill] sm:$0xff] %v10756_v49  ;;  %1426 = vperm.xlu1 %9500, %v16386_v51   ;;  %1430 = vperm.xlu0 %9499, %v16387_v61   ;;  %v16395_v63 = vld [vmem:[#allocation52_spill] sm:$0xff]  ;;  %v16398_v61 = vld [vmem:[#allocation57_spill] sm:$0xff] }
 0x179   : > { %v10760_v57 = vpop.permute.xlu1 %1178  ;;  %v10762_v54 = vpop.permute.xlu0 %1182 }
 0x17a   : > { %16388 = vst [vmem:[#allocation161_spill] sm:$0xff] %v10760_v57  ;;  %16389 = vst [vmem:[#allocation162_spill] sm:$0xff] %v10762_v54  ;;  %1434 = vperm.xlu1 %9500, %v16390_v53   ;;  %1438 = vperm.xlu0 %9499, %v16391_v62   ;;  %v16399_v57 = vld [vmem:[#allocation56_spill] sm:$0xff]  ;;  %v16402_v62 = vld [vmem:[#allocation61_spill] sm:$0xff] }
 0x17d   : > { %v10766_v55 = vpop.permute.xlu1 %1186  ;;  %v10768_v56 = vpop.permute.xlu0 %1190 }
 0x17e   : > { %16392 = vst [vmem:[#allocation163_spill] sm:$0xff] %v10766_v55  ;;  %16393 = vst [vmem:[#allocation164_spill] sm:$0xff] %v10768_v56  ;;  %1442 = vperm.xlu1 %9500, %v16394_v59   ;;  %1446 = vperm.xlu0 %9499, %v16395_v63   ;;  %v16403_v55 = vld [vmem:[#allocation60_spill] sm:$0xff]  ;;  %v16406_v63 = vld [vmem:[#allocation65_spill] sm:$0xff] }
 0x181   : > { %v10772_v49 = vpop.permute.xlu1 %1194  ;;  %v10774_v51 = vpop.permute.xlu0 %1198 }
 0x182   : > { %16396 = vst [vmem:[#allocation165_spill] sm:$0xff] %v10772_v49  ;;  %16397 = vst [vmem:[#allocation166_spill] sm:$0xff] %v10774_v51  ;;  %1450 = vperm.xlu1 %9500, %v16398_v61   ;;  %1454 = vperm.xlu0 %9499, %v16399_v57   ;;  %v16407_v49 = vld [vmem:[#allocation64_spill] sm:$0xff]  ;;  %v16410_v57 = vld [vmem:[#allocation69_spill] sm:$0xff] }
 0x185   : > { %v10778_v54 = vpop.permute.xlu1 %1202  ;;  %v10780_v53 = vpop.permute.xlu0 %1206 }
 0x186   : > { %16400 = vst [vmem:[#allocation167_spill] sm:$0xff] %v10778_v54  ;;  %16401 = vst [vmem:[#allocation168_spill] sm:$0xff] %v10780_v53  ;;  %1458 = vperm.xlu1 %9500, %v16402_v62   ;;  %1462 = vperm.xlu0 %9499, %v16403_v55   ;;  %v16411_v54 = vld [vmem:[#allocation68_spill] sm:$0xff]  ;;  %v16414_v55 = vld [vmem:[#allocation73_spill] sm:$0xff] }
 0x189   : > { %v10784_v56 = vpop.permute.xlu1 %1210  ;;  %v10786_v59 = vpop.permute.xlu0 %1214 }
 0x18a   : > { %16404 = vst [vmem:[#allocation169_spill] sm:$0xff] %v10784_v56  ;;  %16405 = vst [vmem:[#allocation170_spill] sm:$0xff] %v10786_v59  ;;  %1466 = vperm.xlu1 %9500, %v16406_v63   ;;  %1470 = vperm.xlu0 %9499, %v16407_v49   ;;  %v16415_v56 = vld [vmem:[#allocation72_spill] sm:$0xff] }
 0x18d   : > { %v10790_v51 = vpop.permute.xlu1 %1218  ;;  %v10792_v61 = vpop.permute.xlu0 %1222 }
 0x18e   : > { %16408 = vst [vmem:[#allocation171_spill] sm:$0xff] %v10790_v51  ;;  %16409 = vst [vmem:[#allocation172_spill] sm:$0xff] %v10792_v61  ;;  %1474 = vperm.xlu1 %9500, %v16410_v57   ;;  %1478 = vperm.xlu0 %9499, %v16411_v54   ;;  %v16418_v51 = vld [vmem:[#allocation76_spill] sm:$0xff] }
 0x191   : > { %v10796_v53 = vpop.permute.xlu1 %1226  ;;  %v10798_v62 = vpop.permute.xlu0 %1230 }
 0x192   : > { %16412 = vst [vmem:[#allocation69_spill] sm:$0xff] %v10796_v53  ;;  %16413 = vst [vmem:[#allocation68_spill] sm:$0xff] %v10798_v62  ;;  %1482 = vperm.xlu1 %9500, %v16414_v55   ;;  %1486 = vperm.xlu0 %9499, %v16415_v56   ;;  %v9982_v56 = vmov 2  }
 0x195   : > { %v10802_v59 = vpop.permute.xlu1 %1234  ;;  %v10804_v63 = vpop.permute.xlu0 %1238 }
 0x196   : > { %16416 = vst [vmem:[#allocation73_spill] sm:$0xff] %v10802_v59  ;;  %16417 = vst [vmem:[#allocation173_spill] sm:$0xff] %v10804_v63  ;;  %1490 = vperm.xlu1 %9500, %v10500_v0   ;;  %1494 = vperm.xlu0 %9499, %v16418_v51  }
 0x199   : > { %v10808_v61 = vpop.permute.xlu1 %1242  ;;  %v10810_v49 = vpop.permute.xlu0 %1246 }
 0x19a   : > { %16419 = vst [vmem:[#allocation76_spill] sm:$0xff] %v10808_v61  ;;  %16420 = vst [vmem:[#allocation174_spill] sm:$0xff] %v10810_v49  ;;  %1498 = vperm.xlu1 %9500, %v10512_v60   ;;  %1502 = vperm.xlu0 %9499, %v10509_v58  }
 0x19d   : > { %v10814_v53 = vpop.permute.xlu1 %1250  ;;  %v10816_v62 = vpop.permute.xlu0 %1254 }
 0x19e   : > { %16421 = vst [vmem:[#allocation175_spill] sm:$0xff] %v10814_v53  ;;  %16422 = vst [vmem:[#allocation176_spill] sm:$0xff] %v10816_v62  ;;  %9501 = vset.pattern.permute.xlu1 %v9982_v56  ;;  %9502 = vset.pattern.permute.xlu0 %v9982_v56 }
 0x19f   : > { %1706 = vperm.xlu1 %9501, %v10064_v2   ;;  %1710 = vperm.xlu0 %9502, %v10072_v4  }
 0x1a1   : > { %v10820_v63 = vpop.permute.xlu1 %1258  ;;  %v10822_v61 = vpop.permute.xlu0 %1262 }
 0x1a2   : > { %16423 = vst [vmem:[#allocation177_spill] sm:$0xff] %v10820_v63  ;;  %16424 = vst [vmem:[#allocation178_spill] sm:$0xff] %v10822_v61 }
 0x1a3   : > { %1714 = vperm.xlu1 %9501, %v10061_v1   ;;  %1722 = vperm.xlu0 %9502, %v10080_v6  }
 0x1a5   : > { %v10826_v49 = vpop.permute.xlu1 %1266  ;;  %v10828_v53 = vpop.permute.xlu0 %1270 }
 0x1a6   : > { %16425 = vst [vmem:[#allocation179_spill] sm:$0xff] %v10826_v49  ;;  %16426 = vst [vmem:[#allocation180_spill] sm:$0xff] %v10828_v53 }
 0x1a7   : > { %1718 = vperm.xlu1 %9501, %v10069_v3   ;;  %1730 = vperm.xlu0 %9502, %v10088_v8  }
 0x1a9   : > { %v10832_v56 = vpop.permute.xlu1 %1274  ;;  %v10834_v2 = vpop.permute.xlu0 %1278 }
 0x1aa   : > { %16427 = vst [vmem:[#allocation181_spill] sm:$0xff] %v10832_v56  ;;  %16428 = vst [vmem:[#allocation182_spill] sm:$0xff] %v10834_v2  ;;  %v11185_v2 = vld [vmem:[%s10058_s8 + $0x50] sm:$0xff] }
 0x1ab   : > { %1726 = vperm.xlu1 %9501, %v10077_v5   ;;  %1738 = vperm.xlu0 %9502, %v10096_v10  }
 0x1ad   : > { %v10838_v4 = vpop.permute.xlu1 %1282  ;;  %v10840_v1 = vpop.permute.xlu0 %1286 }
 0x1ae   : > { %16429 = vst [vmem:[#allocation183_spill] sm:$0xff] %v10838_v4  ;;  %16430 = vst [vmem:[#allocation184_spill] sm:$0xff] %v10840_v1  ;;  %v11173_v4 = vld [vmem:[%s10058_s8 + $0x40] sm:$0xff] }
 0x1af   : > { %1734 = vperm.xlu1 %9501, %v10085_v7   ;;  %1746 = vperm.xlu0 %9502, %v10104_v12  }
 0x1b1   : > { %v10844_v6 = vpop.permute.xlu1 %1290  ;;  %v10846_v3 = vpop.permute.xlu0 %1294 }
 0x1b2   : > { %16431 = vst [vmem:[#allocation185_spill] sm:$0xff] %v10844_v6  ;;  %16432 = vst [vmem:[#allocation186_spill] sm:$0xff] %v10846_v3  ;;  %v11161_v3 = vld [vmem:[%s10058_s8 + $0x30] sm:$0xff]  ;;  %v11165_v6 = vld [vmem:[%s10058_s8 + $0x58] sm:$0xff] }
 0x1b3   : > { %1742 = vperm.xlu1 %9501, %v10093_v9   ;;  %1754 = vperm.xlu0 %9502, %v10112_v14  }
 0x1b5   : > { %v10850_v8 = vpop.permute.xlu1 %1298  ;;  %v10852_v5 = vpop.permute.xlu0 %1302 }
 0x1b6   : > { %16433 = vst [vmem:[#allocation187_spill] sm:$0xff] %v10850_v8  ;;  %16434 = vst [vmem:[#allocation188_spill] sm:$0xff] %v10852_v5 }
 0x1b7   : > { %1750 = vperm.xlu1 %9501, %v10101_v11   ;;  %1762 = vperm.xlu0 %9502, %v10120_v16  }
 0x1b9   : > { %v10856_v10 = vpop.permute.xlu1 %1306  ;;  %v10858_v7 = vpop.permute.xlu0 %1310 }
 0x1ba   : > { %16435 = vst [vmem:[#allocation189_spill] sm:$0xff] %v10856_v10  ;;  %16436 = vst [vmem:[#allocation190_spill] sm:$0xff] %v10858_v7  ;;  %v11149_v7 = vld [vmem:[%s10058_s8 + $0x20] sm:$0xff]  ;;  %v11153_v10 = vld [vmem:[%s10058_s8 + $0x48] sm:$0xff] }
 0x1bb   : > { %1758 = vperm.xlu1 %9501, %v10109_v13   ;;  %1770 = vperm.xlu0 %9502, %v10126_v18   ;;  %16569 = vst [vmem:[#allocation241_spill] sm:$0xff] %v11149_v7 }
 0x1bd   : > { %v10862_v12 = vpop.permute.xlu1 %1314  ;;  %v10864_v9 = vpop.permute.xlu0 %1318 }
 0x1be   : > { %16437 = vst [vmem:[#allocation191_spill] sm:$0xff] %v10862_v12  ;;  %16438 = vst [vmem:[#allocation192_spill] sm:$0xff] %v10864_v9  ;;  %v11141_v9 = vld [vmem:[%s10058_s8 + $0x38] sm:$0xff] }
 0x1bf   : > { %1766 = vperm.xlu1 %9501, %v10117_v15   ;;  %1778 = vperm.xlu0 %9502, %v10136_v20  }
 0x1c1   : > { %v10868_v14 = vpop.permute.xlu1 %1322  ;;  %v10870_v11 = vpop.permute.xlu0 %1326 }
 0x1c2   : > { %16439 = vst [vmem:[#allocation193_spill] sm:$0xff] %v10868_v14  ;;  %16440 = vst [vmem:[#allocation194_spill] sm:$0xff] %v10870_v11  ;;  %v11137_v14 = vld [vmem:[%s10058_s8 + $0x10] sm:$0xff] }
 0x1c3   : > { %1774 = vperm.xlu1 %9501, %v10123_v17   ;;  %1786 = vperm.xlu0 %9502, %v10144_v22  }
 0x1c5   : > { %v10874_v16 = vpop.permute.xlu1 %1330  ;;  %v10876_v13 = vpop.permute.xlu0 %1334 }
 0x1c6   : > { %16441 = vst [vmem:[#allocation195_spill] sm:$0xff] %v10874_v16  ;;  %16442 = vst [vmem:[#allocation196_spill] sm:$0xff] %v10876_v13  ;;  %v11125_v13 = vld [vmem:[%s10058_s8 + $0x8] sm:$0xff] }
 0x1c7   : > { %1782 = vperm.xlu1 %9501, %v10133_v19   ;;  %1794 = vperm.xlu0 %9502, %v10152_v24   ;;  %16564 = vst [vmem:[#allocation236_spill] sm:$0xff] %v11125_v13  ;;  %v11129_v16 = vld [vmem:[%s10058_s8 + $0x28] sm:$0xff] }
 0x1c9   : > { %v10880_v18 = vpop.permute.xlu1 %1338  ;;  %v10882_v15 = vpop.permute.xlu0 %1342 }
 0x1ca   : > { %16443 = vst [vmem:[#allocation197_spill] sm:$0xff] %v10880_v18  ;;  %16444 = vst [vmem:[#allocation198_spill] sm:$0xff] %v10882_v15  ;;  %v11108_v15 = vld [vmem:[%s10058_s8] sm:$0xff] }
 0x1cb   : > { %1790 = vperm.xlu1 %9501, %v10141_v21   ;;  %1802 = vperm.xlu0 %9502, %v10160_v26  }
 0x1cd   : > { %v10886_v20 = vpop.permute.xlu1 %1346  ;;  %v10888_v17 = vpop.permute.xlu0 %1350 }
 0x1ce   : > { %16445 = vst [vmem:[#allocation199_spill] sm:$0xff] %v10886_v20  ;;  %16446 = vst [vmem:[#allocation200_spill] sm:$0xff] %v10888_v17  ;;  %v16557_v20 = vld [vmem:[#allocation72_spill] sm:$0xff] }
 0x1cf   : > { %1798 = vperm.xlu1 %9501, %v10149_v23   ;;  %1810 = vperm.xlu0 %9502, %v10168_v28  }
 0x1d1   : > { %v10892_v22 = vpop.permute.xlu1 %1354  ;;  %v10894_v19 = vpop.permute.xlu0 %1358 }
 0x1d2   : > { %16447 = vst [vmem:[#allocation201_spill] sm:$0xff] %v10892_v22  ;;  %16448 = vst [vmem:[#allocation202_spill] sm:$0xff] %v10894_v19  ;;  %v16546_v19 = vld [vmem:[#allocation65_spill] sm:$0xff] }
 0x1d3   : > { %1806 = vperm.xlu1 %9501, %v10157_v25   ;;  %1818 = vperm.xlu0 %9502, %v10176_v30  }
 0x1d5   : > { %v10898_v24 = vpop.permute.xlu1 %1362  ;;  %v10900_v21 = vpop.permute.xlu0 %1366 }
 0x1d6   : > { %16449 = vst [vmem:[#allocation203_spill] sm:$0xff] %v10898_v24  ;;  %16450 = vst [vmem:[#allocation204_spill] sm:$0xff] %v10900_v21  ;;  %v16542_v21 = vld [vmem:[#allocation61_spill] sm:$0xff] }
 0x1d7   : > { %1814 = vperm.xlu1 %9501, %v10165_v27   ;;  %1826 = vperm.xlu0 %9502, %v10184_v32  }
 0x1d9   : > { %v10904_v26 = vpop.permute.xlu1 %1370  ;;  %v10906_v23 = vpop.permute.xlu0 %1374 }
 0x1da   : > { %16451 = vst [vmem:[#allocation205_spill] sm:$0xff] %v10904_v26  ;;  %16452 = vst [vmem:[#allocation206_spill] sm:$0xff] %v10906_v23  ;;  %v16538_v23 = vld [vmem:[#allocation57_spill] sm:$0xff] }
 0x1db   : > { %1822 = vperm.xlu1 %9501, %v10173_v29   ;;  %1834 = vperm.xlu0 %9502, %v10192_v34  }
 0x1dd   : > { %v10910_v28 = vpop.permute.xlu1 %1378  ;;  %v10912_v25 = vpop.permute.xlu0 %1382 }
 0x1de   : > { %16453 = vst [vmem:[#allocation207_spill] sm:$0xff] %v10910_v28  ;;  %16454 = vst [vmem:[#allocation208_spill] sm:$0xff] %v10912_v25  ;;  %v16534_v25 = vld [vmem:[#allocation53_spill] sm:$0xff] }
 0x1df   : > { %1830 = vperm.xlu1 %9501, %v10181_v31   ;;  %1842 = vperm.xlu0 %9502, %v10200_v36  }
 0x1e1   : > { %v10916_v30 = vpop.permute.xlu1 %1386  ;;  %v10918_v27 = vpop.permute.xlu0 %1390 }
 0x1e2   : > { %16455 = vst [vmem:[#allocation209_spill] sm:$0xff] %v10916_v30  ;;  %16456 = vst [vmem:[#allocation210_spill] sm:$0xff] %v10918_v27  ;;  %v16530_v27 = vld [vmem:[#allocation49_spill] sm:$0xff] }
 0x1e3   : > { %1838 = vperm.xlu1 %9501, %v10189_v33   ;;  %1850 = vperm.xlu0 %9502, %v10208_v38  }
 0x1e5   : > { %v10922_v32 = vpop.permute.xlu1 %1394  ;;  %v10924_v29 = vpop.permute.xlu0 %1398 }
 0x1e6   : > { %16457 = vst [vmem:[#allocation211_spill] sm:$0xff] %v10922_v32  ;;  %16458 = vst [vmem:[#allocation212_spill] sm:$0xff] %v10924_v29  ;;  %v16526_v29 = vld [vmem:[#allocation45_spill] sm:$0xff] }
 0x1e7   : > { %1846 = vperm.xlu1 %9501, %v10197_v35   ;;  %1858 = vperm.xlu0 %9502, %v10216_v40  }
 0x1e9   : > { %v10928_v34 = vpop.permute.xlu1 %1402  ;;  %v10930_v31 = vpop.permute.xlu0 %1406 }
 0x1ea   : > { %16459 = vst [vmem:[#allocation213_spill] sm:$0xff] %v10928_v34  ;;  %16460 = vst [vmem:[#allocation214_spill] sm:$0xff] %v10930_v31  ;;  %v16522_v31 = vld [vmem:[#allocation41_spill] sm:$0xff] }
 0x1eb   : > { %1854 = vperm.xlu1 %9501, %v10205_v37   ;;  %1866 = vperm.xlu0 %9502, %v10224_v42  }
 0x1ed   : > { %v10934_v36 = vpop.permute.xlu1 %1410  ;;  %v10936_v33 = vpop.permute.xlu0 %1414 }
 0x1ee   : > { %16461 = vst [vmem:[#allocation215_spill] sm:$0xff] %v10934_v36  ;;  %16462 = vst [vmem:[#allocation216_spill] sm:$0xff] %v10936_v33  ;;  %v16518_v33 = vld [vmem:[#allocation37_spill] sm:$0xff] }
 0x1ef   : > { %1862 = vperm.xlu1 %9501, %v10213_v39   ;;  %1874 = vperm.xlu0 %9502, %v10232_v44  }
 0x1f1   : > { %v10940_v38 = vpop.permute.xlu1 %1418  ;;  %v10942_v35 = vpop.permute.xlu0 %1422 }
 0x1f2   : > { %16463 = vst [vmem:[#allocation217_spill] sm:$0xff] %v10940_v38  ;;  %16464 = vst [vmem:[#allocation218_spill] sm:$0xff] %v10942_v35  ;;  %v16514_v35 = vld [vmem:[#allocation33_spill] sm:$0xff] }
 0x1f3   : > { %1870 = vperm.xlu1 %9501, %v10221_v41   ;;  %1882 = vperm.xlu0 %9502, %v10240_v46  }
 0x1f5   : > { %v10946_v40 = vpop.permute.xlu1 %1426  ;;  %v10948_v37 = vpop.permute.xlu0 %1430 }
 0x1f6   : > { %16465 = vst [vmem:[#allocation219_spill] sm:$0xff] %v10946_v40  ;;  %16466 = vst [vmem:[#allocation220_spill] sm:$0xff] %v10948_v37  ;;  %v16510_v37 = vld [vmem:[#allocation29_spill] sm:$0xff] }
 0x1f7   : > { %1878 = vperm.xlu1 %9501, %v10229_v43   ;;  %1890 = vperm.xlu0 %9502, %v10248_v48   ;;  %v16473_v48 = vld [vmem:[#allocation2_spill] sm:$0xff] }
 0x1f9   : > { %v10952_v42 = vpop.permute.xlu1 %1434  ;;  %v10954_v39 = vpop.permute.xlu0 %1438 }
 0x1fa   : > { %16467 = vst [vmem:[#allocation221_spill] sm:$0xff] %v10952_v42  ;;  %16468 = vst [vmem:[#allocation222_spill] sm:$0xff] %v10954_v39  ;;  %v16474_v42 = vld [vmem:[#allocation5_spill] sm:$0xff] }
 0x1fb   : > { %1886 = vperm.xlu1 %9501, %v10237_v45   ;;  %1898 = vperm.xlu0 %9502, %v10256_v50   ;;  %v16477_v50 = vld [vmem:[#allocation3_spill] sm:$0xff] }
 0x1fd   : > { %v10958_v44 = vpop.permute.xlu1 %1442  ;;  %v10960_v41 = vpop.permute.xlu0 %1446 }
 0x1fe   : > { %16469 = vst [vmem:[#allocation223_spill] sm:$0xff] %v10958_v44  ;;  %16470 = vst [vmem:[#allocation224_spill] sm:$0xff] %v10960_v41  ;;  %v16478_v44 = vld [vmem:[#allocation7_spill] sm:$0xff] }
 0x1ff   : > { %1894 = vperm.xlu1 %9501, %v10245_v47   ;;  %1906 = vperm.xlu0 %9502, %v10264_v52   ;;  %v16481_v52 = vld [vmem:[#allocation4_spill] sm:$0xff] }
 0x201   : > { %v10964_v46 = vpop.permute.xlu1 %1450  ;;  %v10966_v43 = vpop.permute.xlu0 %1454 }
 0x202   : > { %16471 = vst [vmem:[#allocation225_spill] sm:$0xff] %v10964_v46  ;;  %16472 = vst [vmem:[#allocation226_spill] sm:$0xff] %v10966_v43  ;;  %v16482_v46 = vld [vmem:[#allocation9_spill] sm:$0xff] }
 0x203   : > { %1902 = vperm.xlu1 %9501, %v16473_v48   ;;  %1914 = vperm.xlu0 %9502, %v16474_v42   ;;  %v16485_v42 = vld [vmem:[#allocation6_spill] sm:$0xff] }
 0x205   : > { %v10970_v39 = vpop.permute.xlu1 %1458  ;;  %v10972_v45 = vpop.permute.xlu0 %1462 }
 0x206   : > { %16475 = vst [vmem:[#allocation2_spill] sm:$0xff] %v10970_v39  ;;  %16476 = vst [vmem:[#allocation5_spill] sm:$0xff] %v10972_v45  ;;  %v16486_v39 = vld [vmem:[#allocation11_spill] sm:$0xff] }
 0x207   : > { %1910 = vperm.xlu1 %9501, %v16477_v50   ;;  %1922 = vperm.xlu0 %9502, %v16478_v44   ;;  %v16489_v44 = vld [vmem:[#allocation8_spill] sm:$0xff] }
 0x209   : > { %v10976_v41 = vpop.permute.xlu1 %1466  ;;  %v10978_v47 = vpop.permute.xlu0 %1470 }
 0x20a   : > { %16479 = vst [vmem:[#allocation3_spill] sm:$0xff] %v10976_v41  ;;  %16480 = vst [vmem:[#allocation7_spill] sm:$0xff] %v10978_v47  ;;  %v16490_v41 = vld [vmem:[#allocation13_spill] sm:$0xff] }
 0x20b   : > { %1918 = vperm.xlu1 %9501, %v16481_v52   ;;  %1930 = vperm.xlu0 %9502, %v16482_v46   ;;  %v16493_v46 = vld [vmem:[#allocation10_spill] sm:$0xff] }
 0x20d   : > { %v10982_v43 = vpop.permute.xlu1 %1474  ;;  %v10984_v48 = vpop.permute.xlu0 %1478 }
 0x20e   : > { %16483 = vst [vmem:[#allocation4_spill] sm:$0xff] %v10982_v43  ;;  %16484 = vst [vmem:[#allocation9_spill] sm:$0xff] %v10984_v48  ;;  %v16494_v43 = vld [vmem:[#allocation15_spill] sm:$0xff] }
 0x20f   : > { %1926 = vperm.xlu1 %9501, %v16485_v42   ;;  %1938 = vperm.xlu0 %9502, %v16486_v39   ;;  %v16497_v39 = vld [vmem:[#allocation12_spill] sm:$0xff] }
 0x211   : > { %v10988_v45 = vpop.permute.xlu1 %1482  ;;  %v10990_v50 = vpop.permute.xlu0 %1486 }
 0x212   : > { %16487 = vst [vmem:[#allocation6_spill] sm:$0xff] %v10988_v45  ;;  %16488 = vst [vmem:[#allocation11_spill] sm:$0xff] %v10990_v50  ;;  %v16498_v45 = vld [vmem:[#allocation17_spill] sm:$0xff] }
 0x213   : > { %1934 = vperm.xlu1 %9501, %v16489_v44   ;;  %1946 = vperm.xlu0 %9502, %v16490_v41   ;;  %v16501_v41 = vld [vmem:[#allocation14_spill] sm:$0xff] }
 0x215   : > { %v10994_v47 = vpop.permute.xlu1 %1490  ;;  %v10996_v52 = vpop.permute.xlu0 %1494 }
 0x216   : > { %16491 = vst [vmem:[#allocation8_spill] sm:$0xff] %v10994_v47  ;;  %16492 = vst [vmem:[#allocation13_spill] sm:$0xff] %v10996_v52  ;;  %v16502_v47 = vld [vmem:[#allocation21_spill] sm:$0xff] }
 0x217   : > { %1942 = vperm.xlu1 %9501, %v16493_v46   ;;  %1954 = vperm.xlu0 %9502, %v16494_v43   ;;  %v16505_v43 = vld [vmem:[#allocation16_spill] sm:$0xff] }
 0x219   : > { %v11000_v48 = vpop.permute.xlu1 %1498  ;;  %v11002_v42 = vpop.permute.xlu0 %1502 }
 0x21a   : > { %16495 = vst [vmem:[#allocation10_spill] sm:$0xff] %v11000_v48  ;;  %16496 = vst [vmem:[#allocation15_spill] sm:$0xff] %v11002_v42  ;;  %v16506_v48 = vld [vmem:[#allocation25_spill] sm:$0xff] }
 0x21b   : > { %1950 = vperm.xlu1 %9501, %v16497_v39   ;;  %1962 = vperm.xlu0 %9502, %v16498_v45   ;;  %v16509_v45 = vld [vmem:[#allocation20_spill] sm:$0xff] }
 0x21e   : > { %v11006_v50 = vpop.permute.xlu1 %1706  ;;  %v11008_v44 = vpop.permute.xlu0 %1710 }
 0x21f   : > { %16499 = vst [vmem:[#allocation12_spill] sm:$0xff] %v11006_v50  ;;  %16500 = vst [vmem:[#allocation17_spill] sm:$0xff] %v11008_v44  ;;  %1958 = vperm.xlu1 %9501, %v16501_v41   ;;  %1970 = vperm.xlu0 %9502, %v16502_v47   ;;  %v16513_v47 = vld [vmem:[#allocation24_spill] sm:$0xff]  ;;  %v11461_v50 = vld [vmem:[%s10058_s8 + $0x1c0] sm:$0xff] }
 0x220   : > { %16630 = vst [vmem:[#allocation302_spill] sm:$0xff] %v11461_v50 }
 0x222   : > { %v11012_v52 = vpop.permute.xlu1 %1714  ;;  %v11014_v46 = vpop.permute.xlu0 %1722 }
 0x223   : > { %16503 = vst [vmem:[#allocation14_spill] sm:$0xff] %v11012_v52  ;;  %16504 = vst [vmem:[#allocation21_spill] sm:$0xff] %v11014_v46  ;;  %1966 = vperm.xlu1 %9501, %v16505_v43   ;;  %1978 = vperm.xlu0 %9502, %v16506_v48   ;;  %v16517_v48 = vld [vmem:[#allocation28_spill] sm:$0xff]  ;;  %v11437_v46 = vld [vmem:[%s10058_s8 + $0x1a0] sm:$0xff] }
 0x224   : > { %16622 = vst [vmem:[#allocation294_spill] sm:$0xff] %v11437_v46 }
 0x226   : > { %v11018_v42 = vpop.permute.xlu1 %1718  ;;  %v11020_v39 = vpop.permute.xlu0 %1730 }
 0x227   : > { %16507 = vst [vmem:[#allocation16_spill] sm:$0xff] %v11018_v42  ;;  %16508 = vst [vmem:[#allocation25_spill] sm:$0xff] %v11020_v39  ;;  %1974 = vperm.xlu1 %9501, %v16509_v45   ;;  %1986 = vperm.xlu0 %9502, %v16510_v37   ;;  %v16521_v37 = vld [vmem:[#allocation32_spill] sm:$0xff] }
 0x228   : > { %v11449_v42 = vld [vmem:[%s10058_s8 + $0x1b0] sm:$0xff] }
 0x229   : > { %16626 = vst [vmem:[#allocation298_spill] sm:$0xff] %v11449_v42 }
 0x22a   : > { %v11024_v40 = vpop.permute.xlu1 %1726  ;;  %v11026_v41 = vpop.permute.xlu0 %1738 }
 0x22b   : > { %16511 = vst [vmem:[#allocation20_spill] sm:$0xff] %v11024_v40  ;;  %16512 = vst [vmem:[#allocation29_spill] sm:$0xff] %v11026_v41  ;;  %1982 = vperm.xlu1 %9501, %v16513_v47   ;;  %1994 = vperm.xlu0 %9502, %v16514_v35   ;;  %v16525_v35 = vld [vmem:[#allocation36_spill] sm:$0xff]  ;;  %v11413_v41 = vld [vmem:[%s10058_s8 + $0x180] sm:$0xff] }
 0x22c   : > { %16614 = vst [vmem:[#allocation286_spill] sm:$0xff] %v11413_v41 }
 0x22e   : > { %v11030_v38 = vpop.permute.xlu1 %1734  ;;  %v11032_v43 = vpop.permute.xlu0 %1746 }
 0x22f   : > { %16515 = vst [vmem:[#allocation24_spill] sm:$0xff] %v11030_v38  ;;  %16516 = vst [vmem:[#allocation33_spill] sm:$0xff] %v11032_v43  ;;  %1990 = vperm.xlu1 %9501, %v16517_v48   ;;  %2002 = vperm.xlu0 %9502, %v16518_v33   ;;  %v16529_v33 = vld [vmem:[#allocation40_spill] sm:$0xff] }
 0x230   : > { %v11425_v38 = vld [vmem:[%s10058_s8 + $0x190] sm:$0xff] }
 0x231   : > { %16618 = vst [vmem:[#allocation290_spill] sm:$0xff] %v11425_v38 }
 0x232   : > { %v11036_v36 = vpop.permute.xlu1 %1742  ;;  %v11038_v45 = vpop.permute.xlu0 %1754 }
 0x233   : > { %16519 = vst [vmem:[#allocation28_spill] sm:$0xff] %v11036_v36  ;;  %16520 = vst [vmem:[#allocation37_spill] sm:$0xff] %v11038_v45  ;;  %1998 = vperm.xlu1 %9501, %v16521_v37   ;;  %2010 = vperm.xlu0 %9502, %v16522_v31   ;;  %v16533_v31 = vld [vmem:[#allocation44_spill] sm:$0xff]  ;;  %v11389_v45 = vld [vmem:[%s10058_s8 + $0x160] sm:$0xff] }
 0x236   : > { %v11042_v34 = vpop.permute.xlu1 %1750  ;;  %v11044_v47 = vpop.permute.xlu0 %1762 }
 0x237   : > { %16523 = vst [vmem:[#allocation32_spill] sm:$0xff] %v11042_v34  ;;  %16524 = vst [vmem:[#allocation41_spill] sm:$0xff] %v11044_v47  ;;  %2006 = vperm.xlu1 %9501, %v16525_v35   ;;  %2018 = vperm.xlu0 %9502, %v16526_v29   ;;  %v16537_v29 = vld [vmem:[#allocation48_spill] sm:$0xff] }
 0x238   : > { %v11401_v34 = vld [vmem:[%s10058_s8 + $0x170] sm:$0xff] }
 0x23a   : > { %v11048_v32 = vpop.permute.xlu1 %1758  ;;  %v11050_v48 = vpop.permute.xlu0 %1770 }
 0x23b   : > { %16527 = vst [vmem:[#allocation36_spill] sm:$0xff] %v11048_v32  ;;  %16528 = vst [vmem:[#allocation45_spill] sm:$0xff] %v11050_v48  ;;  %2014 = vperm.xlu1 %9501, %v16529_v33   ;;  %2026 = vperm.xlu0 %9502, %v16530_v27   ;;  %v16541_v27 = vld [vmem:[#allocation52_spill] sm:$0xff]  ;;  %v11365_v48 = vld [vmem:[%s10058_s8 + $0x140] sm:$0xff] }
 0x23e   : > { %v11054_v30 = vpop.permute.xlu1 %1766  ;;  %v11056_v37 = vpop.permute.xlu0 %1778 }
 0x23f   : > { %16531 = vst [vmem:[#allocation40_spill] sm:$0xff] %v11054_v30  ;;  %16532 = vst [vmem:[#allocation49_spill] sm:$0xff] %v11056_v37  ;;  %2022 = vperm.xlu1 %9501, %v16533_v31   ;;  %2034 = vperm.xlu0 %9502, %v16534_v25   ;;  %v16545_v25 = vld [vmem:[#allocation56_spill] sm:$0xff] }
 0x240   : > { %v11377_v30 = vld [vmem:[%s10058_s8 + $0x150] sm:$0xff] }
 0x242   : > { %v11060_v28 = vpop.permute.xlu1 %1774  ;;  %v11062_v35 = vpop.permute.xlu0 %1786 }
 0x243   : > { %16535 = vst [vmem:[#allocation44_spill] sm:$0xff] %v11060_v28  ;;  %16536 = vst [vmem:[#allocation53_spill] sm:$0xff] %v11062_v35  ;;  %2030 = vperm.xlu1 %9501, %v16537_v29   ;;  %2042 = vperm.xlu0 %9502, %v16538_v23   ;;  %v16549_v23 = vld [vmem:[#allocation60_spill] sm:$0xff]  ;;  %v11341_v35 = vld [vmem:[%s10058_s8 + $0x120] sm:$0xff] }
 0x246   : > { %v11066_v26 = vpop.permute.xlu1 %1782  ;;  %v11068_v33 = vpop.permute.xlu0 %1794 }
 0x247   : > { %16539 = vst [vmem:[#allocation48_spill] sm:$0xff] %v11066_v26  ;;  %16540 = vst [vmem:[#allocation57_spill] sm:$0xff] %v11068_v33  ;;  %2038 = vperm.xlu1 %9501, %v16541_v27   ;;  %2050 = vperm.xlu0 %9502, %v16542_v21   ;;  %v16552_v21 = vld [vmem:[#allocation64_spill] sm:$0xff] }
 0x248   : > { %v11353_v26 = vld [vmem:[%s10058_s8 + $0x130] sm:$0xff] }
 0x24a   : > { %v11072_v24 = vpop.permute.xlu1 %1790  ;;  %v11074_v31 = vpop.permute.xlu0 %1802 }
 0x24b   : > { %16543 = vst [vmem:[#allocation52_spill] sm:$0xff] %v11072_v24  ;;  %16544 = vst [vmem:[#allocation61_spill] sm:$0xff] %v11074_v31  ;;  %2046 = vperm.xlu1 %9501, %v16545_v25   ;;  %2058 = vperm.xlu0 %9502, %v16546_v19   ;;  %v11317_v31 = vld [vmem:[%s10058_s8 + $0x100] sm:$0xff] }
 0x24e   : > { %v11078_v22 = vpop.permute.xlu1 %1798  ;;  %v11080_v29 = vpop.permute.xlu0 %1810 }
 0x24f   : > { %16547 = vst [vmem:[#allocation56_spill] sm:$0xff] %v11078_v22  ;;  %16548 = vst [vmem:[#allocation65_spill] sm:$0xff] %v11080_v29  ;;  %2054 = vperm.xlu1 %9501, %v16549_v23   ;;  %2066 = vperm.xlu0 %9502, %v16410_v57   ;;  %v11329_v22 = vld [vmem:[%s10058_s8 + $0x110] sm:$0xff] }
 0x252   : > { %v11084_v17 = vpop.permute.xlu1 %1806  ;;  %v11086_v27 = vpop.permute.xlu0 %1818 }
 0x253   : > { %16550 = vst [vmem:[#allocation60_spill] sm:$0xff] %v11084_v17  ;;  %16551 = vst [vmem:[#allocation227_spill] sm:$0xff] %v11086_v27  ;;  %2062 = vperm.xlu1 %9501, %v16552_v21   ;;  %2074 = vperm.xlu0 %9502, %v16414_v55   ;;  %v11293_v27 = vld [vmem:[%s10058_s8 + $0xe0] sm:$0xff] }
 0x256   : > { %v11090_v25 = vpop.permute.xlu1 %1814  ;;  %v11092_v19 = vpop.permute.xlu0 %1826 }
 0x257   : > { %16553 = vst [vmem:[#allocation64_spill] sm:$0xff] %v11090_v25  ;;  %16554 = vst [vmem:[#allocation228_spill] sm:$0xff] %v11092_v19  ;;  %2070 = vperm.xlu1 %9501, %v16411_v54   ;;  %2082 = vperm.xlu0 %9502, %v10500_v0   ;;  %v9983_v54 = vmov 3   ;;  %v11281_v19 = vld [vmem:[%s10058_s8 + $0xd0] sm:$0xff] }
 0x258   : > { %v11305_v25 = vld [vmem:[%s10058_s8 + $0xf0] sm:$0xff] }
 0x25a   : > { %v11096_v23 = vpop.permute.xlu1 %1822  ;;  %v11098_v57 = vpop.permute.xlu0 %1834 }
 0x25b   : > { %16555 = vst [vmem:[#allocation229_spill] sm:$0xff] %v11096_v23  ;;  %16556 = vst [vmem:[#allocation230_spill] sm:$0xff] %v11098_v57  ;;  %2078 = vperm.xlu1 %9501, %v16557_v20   ;;  %2090 = vperm.xlu0 %9502, %v10512_v60   ;;  %v11117_v60 = vld [vmem:[%s10058_s8 + $0x18] sm:$0xff] }
 0x25e   : > { %v11102_v21 = vpop.permute.xlu1 %1830  ;;  %v11104_v55 = vpop.permute.xlu0 %1842 }
 0x25f   : > { %16558 = vst [vmem:[#allocation72_spill] sm:$0xff] %v11102_v21  ;;  %16559 = vst [vmem:[#allocation231_spill] sm:$0xff] %v11104_v55  ;;  %2086 = vperm.xlu1 %9501, %v16418_v51   ;;  %9503 = vset.pattern.permute.xlu0 %v9983_v54  ;;  %v11257_v55 = vld [vmem:[%s10058_s8 + $0xb0] sm:$0xff] }
 0x260   : > { %2298 = vperm.xlu0 %9503, %v11108_v15  }
 0x262   : > { %v11111_v0 = vpop.permute.xlu1 %1838  ;;  %v11113_v20 = vpop.permute.xlu0 %1850 }
 0x263   : > { %16560 = vst [vmem:[#allocation232_spill] sm:$0xff] %v11111_v0  ;;  %16561 = vst [vmem:[#allocation233_spill] sm:$0xff] %v11113_v20  ;;  %2094 = vperm.xlu1 %9501, %v10509_v58   ;;  %v11221_v20 = vld [vmem:[%s10058_s8 + $0x80] sm:$0xff] }
 0x264   : > { %2310 = vperm.xlu0 %9503, %v11117_v60   ;;  %v11269_v0 = vld [vmem:[%s10058_s8 + $0xc0] sm:$0xff] }
 0x266   : > { %v11120_v51 = vpop.permute.xlu1 %1846  ;;  %v11122_v18 = vpop.permute.xlu0 %1858 }
 0x267   : > { %16562 = vst [vmem:[#allocation234_spill] sm:$0xff] %v11120_v51  ;;  %16563 = vst [vmem:[#allocation235_spill] sm:$0xff] %v11122_v18  ;;  %9504 = vset.pattern.permute.xlu1 %v9983_v54  ;;  %v11209_v18 = vld [vmem:[%s10058_s8 + $0x70] sm:$0xff]  ;;  %v11245_v51 = vld [vmem:[%s10058_s8 + $0xa0] sm:$0xff] }
 0x268   : > { %2302 = vperm.xlu1 %9504, %v11125_v13   ;;  %2318 = vperm.xlu0 %9503, %v11129_v16  }
 0x26a   : > { %v11132_v58 = vpop.permute.xlu1 %1854  ;;  %v11134_v11 = vpop.permute.xlu0 %1866 }
 0x26b   : > { %16565 = vst [vmem:[#allocation237_spill] sm:$0xff] %v11132_v58  ;;  %16566 = vst [vmem:[#allocation238_spill] sm:$0xff] %v11134_v11  ;;  %v11177_v11 = vld [vmem:[%s10058_s8 + $0x68] sm:$0xff]  ;;  %v11233_v58 = vld [vmem:[%s10058_s8 + $0x90] sm:$0xff] }
 0x26c   : > { %2306 = vperm.xlu1 %9504, %v11137_v14   ;;  %2326 = vperm.xlu0 %9503, %v11141_v9  }
 0x26e   : > { %v11144_v54 = vpop.permute.xlu1 %1862  ;;  %v11146_v12 = vpop.permute.xlu0 %1874 }
 0x26f   : > { %16567 = vst [vmem:[#allocation239_spill] sm:$0xff] %v11144_v54  ;;  %16568 = vst [vmem:[#allocation240_spill] sm:$0xff] %v11146_v12  ;;  %v11197_v54 = vld [vmem:[%s10058_s8 + $0x60] sm:$0xff] }
 0x270   : > { %2314 = vperm.xlu1 %9504, %v11149_v7   ;;  %2334 = vperm.xlu0 %9503, %v11153_v10  }
 0x272   : > { %v11156_v5 = vpop.permute.xlu1 %1870  ;;  %v11158_v8 = vpop.permute.xlu0 %1882 }
 0x273   : > { %16570 = vst [vmem:[#allocation242_spill] sm:$0xff] %v11156_v5  ;;  %16571 = vst [vmem:[#allocation243_spill] sm:$0xff] %v11158_v8 }
 0x274   : > { %2322 = vperm.xlu1 %9504, %v11161_v3   ;;  %2342 = vperm.xlu0 %9503, %v11165_v6  }
 0x276   : > { %v11168_v1 = vpop.permute.xlu1 %1878  ;;  %v11170_v12 = vpop.permute.xlu0 %1890 }
 0x277   : > { %16572 = vst [vmem:[#allocation244_spill] sm:$0xff] %v11168_v1  ;;  %16573 = vst [vmem:[#allocation245_spill] sm:$0xff] %v11170_v12  ;;  %v11189_v1 = vld [vmem:[%s10058_s8 + $0x78] sm:$0xff] }
 0x278   : > { %2330 = vperm.xlu1 %9504, %v11173_v4   ;;  %2350 = vperm.xlu0 %9503, %v11177_v11  }
 0x27a   : > { %v11180_v8 = vpop.permute.xlu1 %1886  ;;  %v11182_v5 = vpop.permute.xlu0 %1898 }
 0x27b   : > { %16574 = vst [vmem:[#allocation246_spill] sm:$0xff] %v11180_v8  ;;  %16575 = vst [vmem:[#allocation247_spill] sm:$0xff] %v11182_v5  ;;  %v11201_v8 = vld [vmem:[%s10058_s8 + $0x88] sm:$0xff] }
 0x27c   : > { %2338 = vperm.xlu1 %9504, %v11185_v2   ;;  %2358 = vperm.xlu0 %9503, %v11189_v1  }
 0x27e   : > { %v11192_v12 = vpop.permute.xlu1 %1894  ;;  %v11194_v56 = vpop.permute.xlu0 %1906 }
 0x27f   : > { %16576 = vst [vmem:[#allocation248_spill] sm:$0xff] %v11192_v12  ;;  %16577 = vst [vmem:[#allocation249_spill] sm:$0xff] %v11194_v56  ;;  %v11213_v12 = vld [vmem:[%s10058_s8 + $0x98] sm:$0xff] }
 0x280   : > { %2346 = vperm.xlu1 %9504, %v11197_v54   ;;  %2366 = vperm.xlu0 %9503, %v11201_v8  }
 0x282   : > { %v11204_v5 = vpop.permute.xlu1 %1902  ;;  %v11206_v53 = vpop.permute.xlu0 %1914 }
 0x283   : > { %16578 = vst [vmem:[#allocation250_spill] sm:$0xff] %v11204_v5  ;;  %16579 = vst [vmem:[#allocation251_spill] sm:$0xff] %v11206_v53  ;;  %v11225_v5 = vld [vmem:[%s10058_s8 + $0xa8] sm:$0xff] }
 0x284   : > { %2354 = vperm.xlu1 %9504, %v11209_v18   ;;  %2374 = vperm.xlu0 %9503, %v11213_v12  }
 0x286   : > { %v11216_v56 = vpop.permute.xlu1 %1910  ;;  %v11218_v49 = vpop.permute.xlu0 %1922 }
 0x287   : > { %16580 = vst [vmem:[#allocation252_spill] sm:$0xff] %v11216_v56  ;;  %16581 = vst [vmem:[#allocation253_spill] sm:$0xff] %v11218_v49  ;;  %v11237_v56 = vld [vmem:[%s10058_s8 + $0xb8] sm:$0xff] }
 0x288   : > { %2362 = vperm.xlu1 %9504, %v11221_v20   ;;  %2382 = vperm.xlu0 %9503, %v11225_v5  }
 0x28a   : > { %v11228_v53 = vpop.permute.xlu1 %1918  ;;  %v11230_v63 = vpop.permute.xlu0 %1930 }
 0x28b   : > { %16582 = vst [vmem:[#allocation254_spill] sm:$0xff] %v11228_v53  ;;  %16583 = vst [vmem:[#allocation255_spill] sm:$0xff] %v11230_v63  ;;  %v11249_v53 = vld [vmem:[%s10058_s8 + $0xc8] sm:$0xff] }
 0x28c   : > { %2370 = vperm.xlu1 %9504, %v11233_v58   ;;  %2390 = vperm.xlu0 %9503, %v11237_v56  }
 0x28e   : > { %v11240_v49 = vpop.permute.xlu1 %1926  ;;  %v11242_v61 = vpop.permute.xlu0 %1938 }
 0x28f   : > { %16584 = vst [vmem:[#allocation256_spill] sm:$0xff] %v11240_v49  ;;  %16585 = vst [vmem:[#allocation257_spill] sm:$0xff] %v11242_v61  ;;  %v11261_v49 = vld [vmem:[%s10058_s8 + $0xd8] sm:$0xff] }
 0x290   : > { %2378 = vperm.xlu1 %9504, %v11245_v51   ;;  %2398 = vperm.xlu0 %9503, %v11249_v53  }
 0x292   : > { %v11252_v63 = vpop.permute.xlu1 %1934  ;;  %v11254_v62 = vpop.permute.xlu0 %1946 }
 0x293   : > { %16586 = vst [vmem:[#allocation258_spill] sm:$0xff] %v11252_v63  ;;  %16587 = vst [vmem:[#allocation259_spill] sm:$0xff] %v11254_v62  ;;  %v11273_v63 = vld [vmem:[%s10058_s8 + $0xe8] sm:$0xff] }
 0x294   : > { %2386 = vperm.xlu1 %9504, %v11257_v55   ;;  %2406 = vperm.xlu0 %9503, %v11261_v49  }
 0x296   : > { %v11264_v61 = vpop.permute.xlu1 %1942  ;;  %v11266_v57 = vpop.permute.xlu0 %1954 }
 0x297   : > { %16588 = vst [vmem:[#allocation260_spill] sm:$0xff] %v11264_v61  ;;  %16589 = vst [vmem:[#allocation261_spill] sm:$0xff] %v11266_v57  ;;  %v11285_v61 = vld [vmem:[%s10058_s8 + $0xf8] sm:$0xff] }
 0x298   : > { %2394 = vperm.xlu1 %9504, %v11269_v0   ;;  %2414 = vperm.xlu0 %9503, %v11273_v63  }
 0x29a   : > { %v11276_v62 = vpop.permute.xlu1 %1950  ;;  %v11278_v21 = vpop.permute.xlu0 %1962 }
 0x29b   : > { %16590 = vst [vmem:[#allocation262_spill] sm:$0xff] %v11276_v62  ;;  %16591 = vst [vmem:[#allocation263_spill] sm:$0xff] %v11278_v21  ;;  %v11297_v62 = vld [vmem:[%s10058_s8 + $0x108] sm:$0xff] }
 0x29c   : > { %2402 = vperm.xlu1 %9504, %v11281_v19   ;;  %2422 = vperm.xlu0 %9503, %v11285_v61  }
 0x29e   : > { %v11288_v57 = vpop.permute.xlu1 %1958  ;;  %v11290_v59 = vpop.permute.xlu0 %1970 }
 0x29f   : > { %16592 = vst [vmem:[#allocation264_spill] sm:$0xff] %v11288_v57  ;;  %16593 = vst [vmem:[#allocation265_spill] sm:$0xff] %v11290_v59  ;;  %v11309_v57 = vld [vmem:[%s10058_s8 + $0x118] sm:$0xff] }
 0x2a0   : > { %2410 = vperm.xlu1 %9504, %v11293_v27   ;;  %2430 = vperm.xlu0 %9503, %v11297_v62  }
 0x2a2   : > { %v11300_v21 = vpop.permute.xlu1 %1966  ;;  %v11302_v23 = vpop.permute.xlu0 %1978 }
 0x2a3   : > { %16594 = vst [vmem:[#allocation266_spill] sm:$0xff] %v11300_v21  ;;  %16595 = vst [vmem:[#allocation267_spill] sm:$0xff] %v11302_v23  ;;  %v11321_v21 = vld [vmem:[%s10058_s8 + $0x128] sm:$0xff] }
 0x2a4   : > { %2418 = vperm.xlu1 %9504, %v11305_v25   ;;  %2438 = vperm.xlu0 %9503, %v11309_v57  }
 0x2a6   : > { %v11312_v59 = vpop.permute.xlu1 %1974  ;;  %v11314_v29 = vpop.permute.xlu0 %1986 }
 0x2a7   : > { %16596 = vst [vmem:[#allocation268_spill] sm:$0xff] %v11312_v59  ;;  %16597 = vst [vmem:[#allocation269_spill] sm:$0xff] %v11314_v29  ;;  %v11333_v59 = vld [vmem:[%s10058_s8 + $0x138] sm:$0xff] }
 0x2a8   : > { %2426 = vperm.xlu1 %9504, %v11317_v31   ;;  %2446 = vperm.xlu0 %9503, %v11321_v21  }
 0x2aa   : > { %v11324_v23 = vpop.permute.xlu1 %1982  ;;  %v11326_v17 = vpop.permute.xlu0 %1994 }
 0x2ab   : > { %16598 = vst [vmem:[#allocation270_spill] sm:$0xff] %v11324_v23  ;;  %16599 = vst [vmem:[#allocation271_spill] sm:$0xff] %v11326_v17  ;;  %v11345_v23 = vld [vmem:[%s10058_s8 + $0x148] sm:$0xff] }
 0x2ac   : > { %2434 = vperm.xlu1 %9504, %v11329_v22   ;;  %2454 = vperm.xlu0 %9503, %v11333_v59  }
 0x2ae   : > { %v11336_v29 = vpop.permute.xlu1 %1990  ;;  %v11338_v33 = vpop.permute.xlu0 %2002 }
 0x2af   : > { %16600 = vst [vmem:[#allocation272_spill] sm:$0xff] %v11336_v29  ;;  %16601 = vst [vmem:[#allocation273_spill] sm:$0xff] %v11338_v33  ;;  %v11357_v29 = vld [vmem:[%s10058_s8 + $0x158] sm:$0xff] }
 0x2b0   : > { %2442 = vperm.xlu1 %9504, %v11341_v35   ;;  %2462 = vperm.xlu0 %9503, %v11345_v23  }
 0x2b2   : > { %v11348_v17 = vpop.permute.xlu1 %1998  ;;  %v11350_v24 = vpop.permute.xlu0 %2010 }
 0x2b3   : > { %16602 = vst [vmem:[#allocation274_spill] sm:$0xff] %v11348_v17  ;;  %16603 = vst [vmem:[#allocation275_spill] sm:$0xff] %v11350_v24  ;;  %v11369_v17 = vld [vmem:[%s10058_s8 + $0x168] sm:$0xff] }
 0x2b4   : > { %2450 = vperm.xlu1 %9504, %v11353_v26   ;;  %2470 = vperm.xlu0 %9503, %v11357_v29  }
 0x2b6   : > { %v11360_v33 = vpop.permute.xlu1 %2006  ;;  %v11362_v37 = vpop.permute.xlu0 %2018 }
 0x2b7   : > { %16604 = vst [vmem:[#allocation276_spill] sm:$0xff] %v11360_v33  ;;  %16605 = vst [vmem:[#allocation277_spill] sm:$0xff] %v11362_v37  ;;  %v11381_v33 = vld [vmem:[%s10058_s8 + $0x178] sm:$0xff] }
 0x2b8   : > { %2458 = vperm.xlu1 %9504, %v11365_v48   ;;  %2478 = vperm.xlu0 %9503, %v11369_v17  }
 0x2ba   : > { %v11372_v24 = vpop.permute.xlu1 %2014  ;;  %v11374_v28 = vpop.permute.xlu0 %2026 }
 0x2bb   : > { %16606 = vst [vmem:[#allocation278_spill] sm:$0xff] %v11372_v24  ;;  %16607 = vst [vmem:[#allocation279_spill] sm:$0xff] %v11374_v28  ;;  %v11393_v24 = vld [vmem:[%s10058_s8 + $0x188] sm:$0xff] }
 0x2bc   : > { %2466 = vperm.xlu1 %9504, %v11377_v30   ;;  %2486 = vperm.xlu0 %9503, %v11381_v33  }
 0x2be   : > { %v11384_v37 = vpop.permute.xlu1 %2022  ;;  %v11386_v47 = vpop.permute.xlu0 %2034 }
 0x2bf   : > { %16608 = vst [vmem:[#allocation280_spill] sm:$0xff] %v11384_v37  ;;  %16609 = vst [vmem:[#allocation281_spill] sm:$0xff] %v11386_v47  ;;  %v11405_v37 = vld [vmem:[%s10058_s8 + $0x198] sm:$0xff] }
 0x2c0   : > { %2474 = vperm.xlu1 %9504, %v11389_v45   ;;  %2494 = vperm.xlu0 %9503, %v11393_v24  }
 0x2c2   : > { %v11396_v28 = vpop.permute.xlu1 %2030  ;;  %v11398_v32 = vpop.permute.xlu0 %2042 }
 0x2c3   : > { %16610 = vst [vmem:[#allocation282_spill] sm:$0xff] %v11396_v28  ;;  %16611 = vst [vmem:[#allocation283_spill] sm:$0xff] %v11398_v32  ;;  %v11417_v28 = vld [vmem:[%s10058_s8 + $0x1a8] sm:$0xff] }
 0x2c4   : > { %2482 = vperm.xlu1 %9504, %v11401_v34   ;;  %2502 = vperm.xlu0 %9503, %v11405_v37   ;;  %16615 = vst [vmem:[#allocation287_spill] sm:$0xff] %v11417_v28 }
 0x2c6   : > { %v11408_v47 = vpop.permute.xlu1 %2038  ;;  %v11410_v43 = vpop.permute.xlu0 %2050 }
 0x2c7   : > { %16612 = vst [vmem:[#allocation284_spill] sm:$0xff] %v11408_v47  ;;  %16613 = vst [vmem:[#allocation285_spill] sm:$0xff] %v11410_v43  ;;  %v11429_v47 = vld [vmem:[%s10058_s8 + $0x1b8] sm:$0xff] }
 0x2c8   : > { %2490 = vperm.xlu1 %9504, %v11413_v41   ;;  %2510 = vperm.xlu0 %9503, %v11417_v28   ;;  %16619 = vst [vmem:[#allocation291_spill] sm:$0xff] %v11429_v47  ;;  %v11665_v28 = vld [vmem:[%s10058_s8 + $0x2d0] sm:$0xff] }
 0x2c9   : > { %16698 = vst [vmem:[#allocation370_spill] sm:$0xff] %v11665_v28 }
 0x2ca   : > { %v11420_v32 = vpop.permute.xlu1 %2046  ;;  %v11422_v36 = vpop.permute.xlu0 %2058 }
 0x2cb   : > { %16616 = vst [vmem:[#allocation288_spill] sm:$0xff] %v11420_v32  ;;  %16617 = vst [vmem:[#allocation289_spill] sm:$0xff] %v11422_v36  ;;  %v11441_v32 = vld [vmem:[%s10058_s8 + $0x1c8] sm:$0xff] }
 0x2cc   : > { %2498 = vperm.xlu1 %9504, %v11425_v38   ;;  %2518 = vperm.xlu0 %9503, %v11429_v47   ;;  %16623 = vst [vmem:[#allocation295_spill] sm:$0xff] %v11441_v32 }
 0x2ce   : > { %v11432_v43 = vpop.permute.xlu1 %2054  ;;  %v11434_v39 = vpop.permute.xlu0 %2066 }
 0x2cf   : > { %16620 = vst [vmem:[#allocation292_spill] sm:$0xff] %v11432_v43  ;;  %16621 = vst [vmem:[#allocation293_spill] sm:$0xff] %v11434_v39  ;;  %v11453_v43 = vld [vmem:[%s10058_s8 + $0x1d8] sm:$0xff] }
 0x2d0   : > { %2506 = vperm.xlu1 %9504, %v11437_v46   ;;  %2526 = vperm.xlu0 %9503, %v11441_v32   ;;  %16627 = vst [vmem:[#allocation299_spill] sm:$0xff] %v11453_v43 }
 0x2d2   : > { %v11444_v36 = vpop.permute.xlu1 %2062  ;;  %v11446_v40 = vpop.permute.xlu0 %2074 }
 0x2d3   : > { %16624 = vst [vmem:[#allocation296_spill] sm:$0xff] %v11444_v36  ;;  %16625 = vst [vmem:[#allocation297_spill] sm:$0xff] %v11446_v40  ;;  %v11465_v36 = vld [vmem:[%s10058_s8 + $0x1e8] sm:$0xff] }
 0x2d4   : > { %2514 = vperm.xlu1 %9504, %v11449_v42   ;;  %2534 = vperm.xlu0 %9503, %v11453_v43   ;;  %16631 = vst [vmem:[#allocation303_spill] sm:$0xff] %v11465_v36  ;;  %v11473_v43 = vld [vmem:[%s10058_s8 + $0x1d0] sm:$0xff] }
 0x2d5   : > { %16634 = vst [vmem:[#allocation306_spill] sm:$0xff] %v11473_v43 }
 0x2d6   : > { %v11456_v39 = vpop.permute.xlu1 %2070  ;;  %v11458_v52 = vpop.permute.xlu0 %2082 }
 0x2d7   : > { %16628 = vst [vmem:[#allocation300_spill] sm:$0xff] %v11456_v39  ;;  %16629 = vst [vmem:[#allocation301_spill] sm:$0xff] %v11458_v52  ;;  %v11477_v39 = vld [vmem:[%s10058_s8 + $0x1f8] sm:$0xff] }
 0x2d8   : > { %2522 = vperm.xlu1 %9504, %v11461_v50   ;;  %2542 = vperm.xlu0 %9503, %v11465_v36   ;;  %16635 = vst [vmem:[#allocation307_spill] sm:$0xff] %v11477_v39  ;;  %v11485_v36 = vld [vmem:[%s10058_s8 + $0x1e0] sm:$0xff] }
 0x2d9   : > { %16638 = vst [vmem:[#allocation310_spill] sm:$0xff] %v11485_v36 }
 0x2da   : > { %v11468_v40 = vpop.permute.xlu1 %2078  ;;  %v11470_v44 = vpop.permute.xlu0 %2090 }
 0x2db   : > { %16632 = vst [vmem:[#allocation304_spill] sm:$0xff] %v11468_v40  ;;  %16633 = vst [vmem:[#allocation305_spill] sm:$0xff] %v11470_v44  ;;  %v11489_v40 = vld [vmem:[%s10058_s8 + $0x208] sm:$0xff] }
 0x2dc   : > { %2530 = vperm.xlu1 %9504, %v11473_v43   ;;  %2550 = vperm.xlu0 %9503, %v11477_v39   ;;  %16639 = vst [vmem:[#allocation311_spill] sm:$0xff] %v11489_v40  ;;  %v11497_v39 = vld [vmem:[%s10058_s8 + $0x1f0] sm:$0xff] }
 0x2dd   : > { %16642 = vst [vmem:[#allocation314_spill] sm:$0xff] %v11497_v39 }
 0x2de   : > { %v11480_v52 = vpop.permute.xlu1 %2086 }
 0x2df   : > { %16636 = vst [vmem:[#allocation308_spill] sm:$0xff] %v11480_v52  ;;  %v11482_v32 = vpop.permute.xlu0 %2298  ;;  %v11501_v52 = vld [vmem:[%s10058_s8 + $0x218] sm:$0xff] }
 0x2e0   : > { %16637 = vst [vmem:[#allocation309_spill] sm:$0xff] %v11482_v32  ;;  %2538 = vperm.xlu1 %9504, %v11485_v36   ;;  %2558 = vperm.xlu0 %9503, %v11489_v40   ;;  %16643 = vst [vmem:[#allocation315_spill] sm:$0xff] %v11501_v52  ;;  %v11509_v40 = vld [vmem:[%s10058_s8 + $0x200] sm:$0xff] }
 0x2e1   : > { %16646 = vst [vmem:[#allocation318_spill] sm:$0xff] %v11509_v40 }
 0x2e2   : > { %v11492_v44 = vpop.permute.xlu1 %2094 }
 0x2e3   : > { %16640 = vst [vmem:[#allocation312_spill] sm:$0xff] %v11492_v44  ;;  %v11494_v47 = vpop.permute.xlu0 %2310  ;;  %v11513_v44 = vld [vmem:[%s10058_s8 + $0x228] sm:$0xff] }
 0x2e4   : > { %16641 = vst [vmem:[#allocation313_spill] sm:$0xff] %v11494_v47  ;;  %2546 = vperm.xlu1 %9504, %v11497_v39   ;;  %2566 = vperm.xlu0 %9503, %v11501_v52   ;;  %16647 = vst [vmem:[#allocation319_spill] sm:$0xff] %v11513_v44  ;;  %v11521_v52 = vld [vmem:[%s10058_s8 + $0x210] sm:$0xff] }
 0x2e5   : > { %16650 = vst [vmem:[#allocation322_spill] sm:$0xff] %v11521_v52 }
 0x2e7   : > { %v11504_v32 = vpop.permute.xlu1 %2302  ;;  %v11506_v36 = vpop.permute.xlu0 %2318 }
 0x2e8   : > { %16644 = vst [vmem:[#allocation316_spill] sm:$0xff] %v11504_v32  ;;  %16645 = vst [vmem:[#allocation317_spill] sm:$0xff] %v11506_v36  ;;  %2554 = vperm.xlu1 %9504, %v11509_v40   ;;  %2574 = vperm.xlu0 %9503, %v11513_v44   ;;  %v11525_v32 = vld [vmem:[%s10058_s8 + $0x238] sm:$0xff]  ;;  %v11533_v44 = vld [vmem:[%s10058_s8 + $0x220] sm:$0xff] }
 0x2e9   : > { %16651 = vst [vmem:[#allocation323_spill] sm:$0xff] %v11525_v32  ;;  %16654 = vst [vmem:[#allocation326_spill] sm:$0xff] %v11533_v44 }
 0x2eb   : > { %v11516_v47 = vpop.permute.xlu1 %2306  ;;  %v11518_v39 = vpop.permute.xlu0 %2326 }
 0x2ec   : > { %16648 = vst [vmem:[#allocation320_spill] sm:$0xff] %v11516_v47  ;;  %16649 = vst [vmem:[#allocation321_spill] sm:$0xff] %v11518_v39  ;;  %2562 = vperm.xlu1 %9504, %v11521_v52   ;;  %2582 = vperm.xlu0 %9503, %v11525_v32   ;;  %v11537_v47 = vld [vmem:[%s10058_s8 + $0x248] sm:$0xff]  ;;  %v11545_v32 = vld [vmem:[%s10058_s8 + $0x230] sm:$0xff] }
 0x2ed   : > { %16655 = vst [vmem:[#allocation327_spill] sm:$0xff] %v11537_v47  ;;  %16658 = vst [vmem:[#allocation330_spill] sm:$0xff] %v11545_v32 }
 0x2ef   : > { %v11528_v36 = vpop.permute.xlu1 %2314  ;;  %v11530_v40 = vpop.permute.xlu0 %2334 }
 0x2f0   : > { %16652 = vst [vmem:[#allocation324_spill] sm:$0xff] %v11528_v36  ;;  %16653 = vst [vmem:[#allocation325_spill] sm:$0xff] %v11530_v40  ;;  %2570 = vperm.xlu1 %9504, %v11533_v44   ;;  %2590 = vperm.xlu0 %9503, %v11537_v47   ;;  %v11549_v36 = vld [vmem:[%s10058_s8 + $0x258] sm:$0xff]  ;;  %v11557_v47 = vld [vmem:[%s10058_s8 + $0x240] sm:$0xff] }
 0x2f1   : > { %16659 = vst [vmem:[#allocation331_spill] sm:$0xff] %v11549_v36  ;;  %16662 = vst [vmem:[#allocation334_spill] sm:$0xff] %v11557_v47 }
 0x2f3   : > { %v11540_v39 = vpop.permute.xlu1 %2322  ;;  %v11542_v52 = vpop.permute.xlu0 %2342 }
 0x2f4   : > { %16656 = vst [vmem:[#allocation328_spill] sm:$0xff] %v11540_v39  ;;  %16657 = vst [vmem:[#allocation329_spill] sm:$0xff] %v11542_v52  ;;  %2578 = vperm.xlu1 %9504, %v11545_v32   ;;  %2598 = vperm.xlu0 %9503, %v11549_v36   ;;  %v11561_v39 = vld [vmem:[%s10058_s8 + $0x268] sm:$0xff]  ;;  %v11569_v36 = vld [vmem:[%s10058_s8 + $0x250] sm:$0xff] }
 0x2f5   : > { %16663 = vst [vmem:[#allocation335_spill] sm:$0xff] %v11561_v39  ;;  %16666 = vst [vmem:[#allocation338_spill] sm:$0xff] %v11569_v36 }
 0x2f7   : > { %v11552_v40 = vpop.permute.xlu1 %2330  ;;  %v11554_v44 = vpop.permute.xlu0 %2350 }
 0x2f8   : > { %16660 = vst [vmem:[#allocation332_spill] sm:$0xff] %v11552_v40  ;;  %16661 = vst [vmem:[#allocation333_spill] sm:$0xff] %v11554_v44  ;;  %2586 = vperm.xlu1 %9504, %v11557_v47   ;;  %2606 = vperm.xlu0 %9503, %v11561_v39   ;;  %v11573_v40 = vld [vmem:[%s10058_s8 + $0x278] sm:$0xff]  ;;  %v11581_v39 = vld [vmem:[%s10058_s8 + $0x260] sm:$0xff] }
 0x2f9   : > { %16667 = vst [vmem:[#allocation339_spill] sm:$0xff] %v11573_v40  ;;  %16670 = vst [vmem:[#allocation342_spill] sm:$0xff] %v11581_v39 }
 0x2fb   : > { %v11564_v52 = vpop.permute.xlu1 %2338  ;;  %v11566_v32 = vpop.permute.xlu0 %2358 }
 0x2fc   : > { %16664 = vst [vmem:[#allocation336_spill] sm:$0xff] %v11564_v52  ;;  %16665 = vst [vmem:[#allocation337_spill] sm:$0xff] %v11566_v32  ;;  %2594 = vperm.xlu1 %9504, %v11569_v36   ;;  %2614 = vperm.xlu0 %9503, %v11573_v40   ;;  %v11585_v52 = vld [vmem:[%s10058_s8 + $0x288] sm:$0xff]  ;;  %v11593_v40 = vld [vmem:[%s10058_s8 + $0x270] sm:$0xff] }
 0x2fd   : > { %16671 = vst [vmem:[#allocation343_spill] sm:$0xff] %v11585_v52  ;;  %16674 = vst [vmem:[#allocation346_spill] sm:$0xff] %v11593_v40 }
 0x2ff   : > { %v11576_v44 = vpop.permute.xlu1 %2346  ;;  %v11578_v47 = vpop.permute.xlu0 %2366 }
 0x300   : > { %16668 = vst [vmem:[#allocation340_spill] sm:$0xff] %v11576_v44  ;;  %16669 = vst [vmem:[#allocation341_spill] sm:$0xff] %v11578_v47  ;;  %2602 = vperm.xlu1 %9504, %v11581_v39   ;;  %2622 = vperm.xlu0 %9503, %v11585_v52   ;;  %v11597_v44 = vld [vmem:[%s10058_s8 + $0x298] sm:$0xff]  ;;  %v11605_v52 = vld [vmem:[%s10058_s8 + $0x280] sm:$0xff] }
 0x301   : > { %16675 = vst [vmem:[#allocation347_spill] sm:$0xff] %v11597_v44  ;;  %16678 = vst [vmem:[#allocation350_spill] sm:$0xff] %v11605_v52 }
 0x303   : > { %v11588_v32 = vpop.permute.xlu1 %2354  ;;  %v11590_v36 = vpop.permute.xlu0 %2374 }
 0x304   : > { %16672 = vst [vmem:[#allocation344_spill] sm:$0xff] %v11588_v32  ;;  %16673 = vst [vmem:[#allocation345_spill] sm:$0xff] %v11590_v36  ;;  %2610 = vperm.xlu1 %9504, %v11593_v40   ;;  %2630 = vperm.xlu0 %9503, %v11597_v44   ;;  %v11609_v32 = vld [vmem:[%s10058_s8 + $0x2a8] sm:$0xff]  ;;  %v11617_v44 = vld [vmem:[%s10058_s8 + $0x290] sm:$0xff] }
 0x305   : > { %16679 = vst [vmem:[#allocation351_spill] sm:$0xff] %v11609_v32  ;;  %16682 = vst [vmem:[#allocation354_spill] sm:$0xff] %v11617_v44 }
 0x307   : > { %v11600_v47 = vpop.permute.xlu1 %2362  ;;  %v11602_v39 = vpop.permute.xlu0 %2382 }
 0x308   : > { %16676 = vst [vmem:[#allocation348_spill] sm:$0xff] %v11600_v47  ;;  %16677 = vst [vmem:[#allocation349_spill] sm:$0xff] %v11602_v39  ;;  %2618 = vperm.xlu1 %9504, %v11605_v52   ;;  %2638 = vperm.xlu0 %9503, %v11609_v32   ;;  %v11621_v47 = vld [vmem:[%s10058_s8 + $0x2b8] sm:$0xff]  ;;  %v11629_v32 = vld [vmem:[%s10058_s8 + $0x2a0] sm:$0xff] }
 0x309   : > { %16683 = vst [vmem:[#allocation355_spill] sm:$0xff] %v11621_v47  ;;  %16686 = vst [vmem:[#allocation358_spill] sm:$0xff] %v11629_v32 }
 0x30b   : > { %v11612_v36 = vpop.permute.xlu1 %2370  ;;  %v11614_v40 = vpop.permute.xlu0 %2390 }
 0x30c   : > { %16680 = vst [vmem:[#allocation352_spill] sm:$0xff] %v11612_v36  ;;  %16681 = vst [vmem:[#allocation353_spill] sm:$0xff] %v11614_v40  ;;  %2626 = vperm.xlu1 %9504, %v11617_v44   ;;  %2646 = vperm.xlu0 %9503, %v11621_v47   ;;  %v11633_v36 = vld [vmem:[%s10058_s8 + $0x2c8] sm:$0xff]  ;;  %v11641_v47 = vld [vmem:[%s10058_s8 + $0x2b0] sm:$0xff] }
 0x30d   : > { %16687 = vst [vmem:[#allocation359_spill] sm:$0xff] %v11633_v36  ;;  %16690 = vst [vmem:[#allocation362_spill] sm:$0xff] %v11641_v47 }
 0x30f   : > { %v11624_v39 = vpop.permute.xlu1 %2378  ;;  %v11626_v52 = vpop.permute.xlu0 %2398 }
 0x310   : > { %16684 = vst [vmem:[#allocation356_spill] sm:$0xff] %v11624_v39  ;;  %16685 = vst [vmem:[#allocation357_spill] sm:$0xff] %v11626_v52  ;;  %2634 = vperm.xlu1 %9504, %v11629_v32   ;;  %2654 = vperm.xlu0 %9503, %v11633_v36   ;;  %v11645_v39 = vld [vmem:[%s10058_s8 + $0x2d8] sm:$0xff]  ;;  %v11653_v36 = vld [vmem:[%s10058_s8 + $0x2c0] sm:$0xff] }
 0x311   : > { %16691 = vst [vmem:[#allocation363_spill] sm:$0xff] %v11645_v39  ;;  %16694 = vst [vmem:[#allocation366_spill] sm:$0xff] %v11653_v36 }
 0x313   : > { %v11636_v40 = vpop.permute.xlu1 %2386  ;;  %v11638_v44 = vpop.permute.xlu0 %2406 }
 0x314   : > { %16688 = vst [vmem:[#allocation360_spill] sm:$0xff] %v11636_v40  ;;  %16689 = vst [vmem:[#allocation361_spill] sm:$0xff] %v11638_v44  ;;  %2642 = vperm.xlu1 %9504, %v11641_v47   ;;  %2662 = vperm.xlu0 %9503, %v11645_v39   ;;  %v11657_v40 = vld [vmem:[%s10058_s8 + $0x2e8] sm:$0xff] }
 0x315   : > { %16695 = vst [vmem:[#allocation367_spill] sm:$0xff] %v11657_v40 }
 0x317   : > { %v11648_v52 = vpop.permute.xlu1 %2394  ;;  %v11650_v32 = vpop.permute.xlu0 %2414 }
 0x318   : > { %16692 = vst [vmem:[#allocation364_spill] sm:$0xff] %v11648_v52  ;;  %16693 = vst [vmem:[#allocation365_spill] sm:$0xff] %v11650_v32  ;;  %2650 = vperm.xlu1 %9504, %v11653_v36   ;;  %2670 = vperm.xlu0 %9503, %v11657_v40   ;;  %v11669_v52 = vld [vmem:[%s10058_s8 + $0x2f8] sm:$0xff]  ;;  %v11677_v36 = vld [vmem:[%s10058_s8 + $0x2e0] sm:$0xff] }
 0x319   : > { %16699 = vst [vmem:[#allocation371_spill] sm:$0xff] %v11669_v52  ;;  %16702 = vst [vmem:[#allocation374_spill] sm:$0xff] %v11677_v36 }
 0x31b   : > { %v11660_v44 = vpop.permute.xlu1 %2402  ;;  %v11662_v47 = vpop.permute.xlu0 %2422 }
 0x31c   : > { %16696 = vst [vmem:[#allocation368_spill] sm:$0xff] %v11660_v44  ;;  %16697 = vst [vmem:[#allocation369_spill] sm:$0xff] %v11662_v47  ;;  %2658 = vperm.xlu1 %9504, %v11665_v28   ;;  %2678 = vperm.xlu0 %9503, %v11669_v52   ;;  %v11681_v44 = vld [vmem:[%s10058_s8 + $0x308] sm:$0xff]  ;;  %v11689_v28 = vld [vmem:[%s10058_s8 + $0x2f0] sm:$0xff]  ;;  %v9984_v52 = vmov 4  }
 0x31f   : > { %v11672_v32 = vpop.permute.xlu1 %2410  ;;  %v11674_v39 = vpop.permute.xlu0 %2430 }
 0x320   : > { %16700 = vst [vmem:[#allocation372_spill] sm:$0xff] %v11672_v32  ;;  %16701 = vst [vmem:[#allocation373_spill] sm:$0xff] %v11674_v39  ;;  %2666 = vperm.xlu1 %9504, %v11677_v36   ;;  %2686 = vperm.xlu0 %9503, %v11681_v44   ;;  %v11698_v36 = vld [vmem:[%s10058_s8 + $0x300] sm:$0xff] }
 0x323   : > { %v11684_v47 = vpop.permute.xlu1 %2418  ;;  %v11686_v40 = vpop.permute.xlu0 %2438 }
 0x324   : > { %16703 = vst [vmem:[#allocation375_spill] sm:$0xff] %v11684_v47  ;;  %16704 = vst [vmem:[#allocation376_spill] sm:$0xff] %v11686_v40  ;;  %2674 = vperm.xlu1 %9504, %v11689_v28   ;;  %9506 = vset.pattern.permute.xlu0 %v9984_v52 }
 0x325   : > { %2894 = vperm.xlu0 %9506, %v11125_v13  }
 0x327   : > { %v11693_v39 = vpop.permute.xlu1 %2426  ;;  %v11695_v32 = vpop.permute.xlu0 %2446 }
 0x328   : > { %16705 = vst [vmem:[#allocation377_spill] sm:$0xff] %v11693_v39  ;;  %16706 = vst [vmem:[#allocation378_spill] sm:$0xff] %v11695_v32  ;;  %2682 = vperm.xlu1 %9504, %v11698_v36  }
 0x329   : > { %2906 = vperm.xlu0 %9506, %v11149_v7  }
 0x32b   : > { %v11702_v47 = vpop.permute.xlu1 %2434  ;;  %v11704_v40 = vpop.permute.xlu0 %2454 }
 0x32c   : > { %16707 = vst [vmem:[#allocation379_spill] sm:$0xff] %v11702_v47  ;;  %16708 = vst [vmem:[#allocation380_spill] sm:$0xff] %v11704_v40  ;;  %9505 = vset.pattern.permute.xlu1 %v9984_v52  ;;  %v16763_v47 = vld [vmem:[#allocation287_spill] sm:$0xff] }
 0x32d   : > { %2890 = vperm.xlu1 %9505, %v11108_v15   ;;  %2914 = vperm.xlu0 %9506, %v11161_v3  }
 0x32f   : > { %v11708_v13 = vpop.permute.xlu1 %2442  ;;  %v11710_v39 = vpop.permute.xlu0 %2462 }
 0x330   : > { %16709 = vst [vmem:[#allocation381_spill] sm:$0xff] %v11708_v13  ;;  %16710 = vst [vmem:[#allocation382_spill] sm:$0xff] %v11710_v39 }
 0x331   : > { %2898 = vperm.xlu1 %9505, %v11137_v14   ;;  %2922 = vperm.xlu0 %9506, %v11173_v4  }
 0x333   : > { %v11714_v32 = vpop.permute.xlu1 %2450  ;;  %v11716_v7 = vpop.permute.xlu0 %2470 }
 0x334   : > { %16711 = vst [vmem:[#allocation383_spill] sm:$0xff] %v11714_v32  ;;  %16712 = vst [vmem:[#allocation384_spill] sm:$0xff] %v11716_v7 }
 0x335   : > { %2902 = vperm.xlu1 %9505, %v11117_v60   ;;  %2930 = vperm.xlu0 %9506, %v11185_v2  }
 0x337   : > { %v11720_v52 = vpop.permute.xlu1 %2458  ;;  %v11722_v40 = vpop.permute.xlu0 %2478 }
 0x338   : > { %16713 = vst [vmem:[#allocation385_spill] sm:$0xff] %v11720_v52  ;;  %16714 = vst [vmem:[#allocation386_spill] sm:$0xff] %v11722_v40 }
 0x339   : > { %2910 = vperm.xlu1 %9505, %v11129_v16   ;;  %2938 = vperm.xlu0 %9506, %v11197_v54  }
 0x33b   : > { %v11726_v39 = vpop.permute.xlu1 %2466  ;;  %v11728_v13 = vpop.permute.xlu0 %2486 }
 0x33c   : > { %16715 = vst [vmem:[#allocation387_spill] sm:$0xff] %v11726_v39  ;;  %16716 = vst [vmem:[#allocation388_spill] sm:$0xff] %v11728_v13 }
 0x33d   : > { %2918 = vperm.xlu1 %9505, %v11141_v9   ;;  %2946 = vperm.xlu0 %9506, %v11209_v18  }
 0x33f   : > { %v11732_v7 = vpop.permute.xlu1 %2474  ;;  %v11734_v32 = vpop.permute.xlu0 %2494 }
 0x340   : > { %16717 = vst [vmem:[#allocation389_spill] sm:$0xff] %v11732_v7  ;;  %16718 = vst [vmem:[#allocation390_spill] sm:$0xff] %v11734_v32 }
 0x341   : > { %2926 = vperm.xlu1 %9505, %v11153_v10   ;;  %2954 = vperm.xlu0 %9506, %v11221_v20  }
 0x343   : > { %v11738_v40 = vpop.permute.xlu1 %2482  ;;  %v11740_v52 = vpop.permute.xlu0 %2502 }
 0x344   : > { %16719 = vst [vmem:[#allocation391_spill] sm:$0xff] %v11738_v40  ;;  %16720 = vst [vmem:[#allocation392_spill] sm:$0xff] %v11740_v52 }
 0x345   : > { %2934 = vperm.xlu1 %9505, %v11165_v6   ;;  %2962 = vperm.xlu0 %9506, %v11233_v58  }
 0x347   : > { %v11744_v13 = vpop.permute.xlu1 %2490  ;;  %v11746_v39 = vpop.permute.xlu0 %2510 }
 0x348   : > { %16721 = vst [vmem:[#allocation393_spill] sm:$0xff] %v11744_v13  ;;  %16722 = vst [vmem:[#allocation394_spill] sm:$0xff] %v11746_v39 }
 0x349   : > { %2942 = vperm.xlu1 %9505, %v11177_v11   ;;  %2970 = vperm.xlu0 %9506, %v11245_v51  }
 0x34b   : > { %v11750_v32 = vpop.permute.xlu1 %2498  ;;  %v11752_v7 = vpop.permute.xlu0 %2518 }
 0x34c   : > { %16723 = vst [vmem:[#allocation395_spill] sm:$0xff] %v11750_v32  ;;  %16724 = vst [vmem:[#allocation396_spill] sm:$0xff] %v11752_v7 }
 0x34d   : > { %2950 = vperm.xlu1 %9505, %v11189_v1   ;;  %2978 = vperm.xlu0 %9506, %v11257_v55  }
 0x34f   : > { %v11756_v52 = vpop.permute.xlu1 %2506  ;;  %v11758_v40 = vpop.permute.xlu0 %2526 }
 0x350   : > { %16725 = vst [vmem:[#allocation397_spill] sm:$0xff] %v11756_v52  ;;  %16726 = vst [vmem:[#allocation398_spill] sm:$0xff] %v11758_v40 }
 0x351   : > { %2958 = vperm.xlu1 %9505, %v11201_v8   ;;  %2986 = vperm.xlu0 %9506, %v11269_v0  }
 0x353   : > { %v11762_v39 = vpop.permute.xlu1 %2514  ;;  %v11764_v13 = vpop.permute.xlu0 %2534 }
 0x354   : > { %16727 = vst [vmem:[#allocation399_spill] sm:$0xff] %v11762_v39  ;;  %16728 = vst [vmem:[#allocation400_spill] sm:$0xff] %v11764_v13 }
 0x355   : > { %2966 = vperm.xlu1 %9505, %v11213_v12   ;;  %2994 = vperm.xlu0 %9506, %v11281_v19  }
 0x357   : > { %v11768_v7 = vpop.permute.xlu1 %2522  ;;  %v11770_v32 = vpop.permute.xlu0 %2542 }
 0x358   : > { %16729 = vst [vmem:[#allocation401_spill] sm:$0xff] %v11768_v7  ;;  %16730 = vst [vmem:[#allocation402_spill] sm:$0xff] %v11770_v32 }
 0x359   : > { %2974 = vperm.xlu1 %9505, %v11225_v5   ;;  %3002 = vperm.xlu0 %9506, %v11293_v27  }
 0x35b   : > { %v11774_v40 = vpop.permute.xlu1 %2530  ;;  %v11776_v52 = vpop.permute.xlu0 %2550 }
 0x35c   : > { %16731 = vst [vmem:[#allocation403_spill] sm:$0xff] %v11774_v40  ;;  %16732 = vst [vmem:[#allocation404_spill] sm:$0xff] %v11776_v52 }
 0x35d   : > { %2982 = vperm.xlu1 %9505, %v11237_v56   ;;  %3010 = vperm.xlu0 %9506, %v11305_v25  }
 0x35f   : > { %v11780_v13 = vpop.permute.xlu1 %2538  ;;  %v11782_v39 = vpop.permute.xlu0 %2558 }
 0x360   : > { %16733 = vst [vmem:[#allocation405_spill] sm:$0xff] %v11780_v13  ;;  %16734 = vst [vmem:[#allocation406_spill] sm:$0xff] %v11782_v39 }
 0x361   : > { %2990 = vperm.xlu1 %9505, %v11249_v53   ;;  %3018 = vperm.xlu0 %9506, %v11317_v31  }
 0x363   : > { %v11786_v32 = vpop.permute.xlu1 %2546  ;;  %v11788_v7 = vpop.permute.xlu0 %2566 }
 0x364   : > { %16735 = vst [vmem:[#allocation407_spill] sm:$0xff] %v11786_v32  ;;  %16736 = vst [vmem:[#allocation408_spill] sm:$0xff] %v11788_v7 }
 0x365   : > { %2998 = vperm.xlu1 %9505, %v11261_v49   ;;  %3026 = vperm.xlu0 %9506, %v11329_v22  }
 0x367   : > { %v11792_v52 = vpop.permute.xlu1 %2554  ;;  %v11794_v40 = vpop.permute.xlu0 %2574 }
 0x368   : > { %16737 = vst [vmem:[#allocation409_spill] sm:$0xff] %v11792_v52  ;;  %16738 = vst [vmem:[#allocation410_spill] sm:$0xff] %v11794_v40 }
 0x369   : > { %3006 = vperm.xlu1 %9505, %v11273_v63   ;;  %3034 = vperm.xlu0 %9506, %v11341_v35  }
 0x36b   : > { %v11798_v39 = vpop.permute.xlu1 %2562  ;;  %v11800_v13 = vpop.permute.xlu0 %2582 }
 0x36c   : > { %16739 = vst [vmem:[#allocation411_spill] sm:$0xff] %v11798_v39  ;;  %16740 = vst [vmem:[#allocation412_spill] sm:$0xff] %v11800_v13 }
 0x36d   : > { %3014 = vperm.xlu1 %9505, %v11285_v61   ;;  %3042 = vperm.xlu0 %9506, %v11353_v26  }
 0x36f   : > { %v11804_v7 = vpop.permute.xlu1 %2570  ;;  %v11806_v32 = vpop.permute.xlu0 %2590 }
 0x370   : > { %16741 = vst [vmem:[#allocation413_spill] sm:$0xff] %v11804_v7  ;;  %16742 = vst [vmem:[#allocation414_spill] sm:$0xff] %v11806_v32 }
 0x371   : > { %3022 = vperm.xlu1 %9505, %v11297_v62   ;;  %3050 = vperm.xlu0 %9506, %v11365_v48  }
 0x373   : > { %v11810_v40 = vpop.permute.xlu1 %2578  ;;  %v11812_v52 = vpop.permute.xlu0 %2598 }
 0x374   : > { %16743 = vst [vmem:[#allocation415_spill] sm:$0xff] %v11810_v40  ;;  %16744 = vst [vmem:[#allocation416_spill] sm:$0xff] %v11812_v52 }
 0x375   : > { %3030 = vperm.xlu1 %9505, %v11309_v57   ;;  %3058 = vperm.xlu0 %9506, %v11377_v30  }
 0x377   : > { %v11816_v13 = vpop.permute.xlu1 %2586  ;;  %v11818_v39 = vpop.permute.xlu0 %2606 }
 0x378   : > { %16745 = vst [vmem:[#allocation417_spill] sm:$0xff] %v11816_v13  ;;  %16746 = vst [vmem:[#allocation418_spill] sm:$0xff] %v11818_v39 }
 0x379   : > { %3038 = vperm.xlu1 %9505, %v11321_v21   ;;  %3066 = vperm.xlu0 %9506, %v11389_v45  }
 0x37b   : > { %v11822_v32 = vpop.permute.xlu1 %2594  ;;  %v11824_v7 = vpop.permute.xlu0 %2614 }
 0x37c   : > { %16747 = vst [vmem:[#allocation419_spill] sm:$0xff] %v11822_v32  ;;  %16748 = vst [vmem:[#allocation420_spill] sm:$0xff] %v11824_v7 }
 0x37d   : > { %3046 = vperm.xlu1 %9505, %v11333_v59   ;;  %3074 = vperm.xlu0 %9506, %v11401_v34  }
 0x37f   : > { %v11828_v52 = vpop.permute.xlu1 %2602  ;;  %v11830_v40 = vpop.permute.xlu0 %2622 }
 0x380   : > { %16749 = vst [vmem:[#allocation421_spill] sm:$0xff] %v11828_v52  ;;  %16750 = vst [vmem:[#allocation422_spill] sm:$0xff] %v11830_v40 }
 0x381   : > { %3054 = vperm.xlu1 %9505, %v11345_v23   ;;  %3082 = vperm.xlu0 %9506, %v11413_v41  }
 0x383   : > { %v11834_v39 = vpop.permute.xlu1 %2610  ;;  %v11836_v13 = vpop.permute.xlu0 %2630 }
 0x384   : > { %16751 = vst [vmem:[#allocation423_spill] sm:$0xff] %v11834_v39  ;;  %16752 = vst [vmem:[#allocation424_spill] sm:$0xff] %v11836_v13 }
 0x385   : > { %3062 = vperm.xlu1 %9505, %v11357_v29   ;;  %3090 = vperm.xlu0 %9506, %v11425_v38  }
 0x387   : > { %v11840_v7 = vpop.permute.xlu1 %2618  ;;  %v11842_v32 = vpop.permute.xlu0 %2638 }
 0x388   : > { %16753 = vst [vmem:[#allocation425_spill] sm:$0xff] %v11840_v7  ;;  %16754 = vst [vmem:[#allocation426_spill] sm:$0xff] %v11842_v32 }
 0x389   : > { %3070 = vperm.xlu1 %9505, %v11369_v17   ;;  %3098 = vperm.xlu0 %9506, %v11437_v46  }
 0x38b   : > { %v11846_v40 = vpop.permute.xlu1 %2626  ;;  %v11848_v52 = vpop.permute.xlu0 %2646 }
 0x38c   : > { %16755 = vst [vmem:[#allocation427_spill] sm:$0xff] %v11846_v40  ;;  %16756 = vst [vmem:[#allocation428_spill] sm:$0xff] %v11848_v52 }
 0x38d   : > { %3078 = vperm.xlu1 %9505, %v11381_v33   ;;  %3106 = vperm.xlu0 %9506, %v11449_v42  }
 0x38f   : > { %v11852_v13 = vpop.permute.xlu1 %2634  ;;  %v11854_v39 = vpop.permute.xlu0 %2654 }
 0x390   : > { %16757 = vst [vmem:[#allocation429_spill] sm:$0xff] %v11852_v13  ;;  %16758 = vst [vmem:[#allocation430_spill] sm:$0xff] %v11854_v39  ;;  %v16764_v13 = vld [vmem:[#allocation310_spill] sm:$0xff] }
 0x391   : > { %3086 = vperm.xlu1 %9505, %v11393_v24   ;;  %3114 = vperm.xlu0 %9506, %v11461_v50   ;;  %v16767_v50 = vld [vmem:[#allocation291_spill] sm:$0xff] }
 0x393   : > { %v11858_v32 = vpop.permute.xlu1 %2642  ;;  %v11860_v7 = vpop.permute.xlu0 %2662 }
 0x394   : > { %16759 = vst [vmem:[#allocation431_spill] sm:$0xff] %v11858_v32  ;;  %16760 = vst [vmem:[#allocation432_spill] sm:$0xff] %v11860_v7  ;;  %v16768_v32 = vld [vmem:[#allocation314_spill] sm:$0xff] }
 0x395   : > { %3094 = vperm.xlu1 %9505, %v11405_v37   ;;  %3122 = vperm.xlu0 %9506, %v11473_v43   ;;  %v16771_v43 = vld [vmem:[#allocation295_spill] sm:$0xff] }
 0x397   : > { %v11864_v52 = vpop.permute.xlu1 %2650  ;;  %v11866_v40 = vpop.permute.xlu0 %2670 }
 0x398   : > { %16761 = vst [vmem:[#allocation433_spill] sm:$0xff] %v11864_v52  ;;  %16762 = vst [vmem:[#allocation434_spill] sm:$0xff] %v11866_v40  ;;  %v16772_v52 = vld [vmem:[#allocation318_spill] sm:$0xff] }
 0x399   : > { %3102 = vperm.xlu1 %9505, %v16763_v47   ;;  %3130 = vperm.xlu0 %9506, %v16764_v13   ;;  %v16775_v13 = vld [vmem:[#allocation299_spill] sm:$0xff] }
 0x39b   : > { %v11870_v39 = vpop.permute.xlu1 %2658  ;;  %v11872_v42 = vpop.permute.xlu0 %2678 }
 0x39c   : > { %16765 = vst [vmem:[#allocation287_spill] sm:$0xff] %v11870_v39  ;;  %16766 = vst [vmem:[#allocation435_spill] sm:$0xff] %v11872_v42  ;;  %v16776_v39 = vld [vmem:[#allocation322_spill] sm:$0xff] }
 0x39d   : > { %3110 = vperm.xlu1 %9505, %v16767_v50   ;;  %3138 = vperm.xlu0 %9506, %v16768_v32   ;;  %v16779_v32 = vld [vmem:[#allocation303_spill] sm:$0xff] }
 0x39f   : > { %v11876_v7 = vpop.permute.xlu1 %2666  ;;  %v11878_v46 = vpop.permute.xlu0 %2686 }
 0x3a0   : > { %16769 = vst [vmem:[#allocation291_spill] sm:$0xff] %v11876_v7  ;;  %16770 = vst [vmem:[#allocation436_spill] sm:$0xff] %v11878_v46  ;;  %v16780_v7 = vld [vmem:[#allocation326_spill] sm:$0xff] }
 0x3a1   : > { %3118 = vperm.xlu1 %9505, %v16771_v43   ;;  %3146 = vperm.xlu0 %9506, %v16772_v52   ;;  %v16783_v52 = vld [vmem:[#allocation307_spill] sm:$0xff] }
 0x3a3   : > { %v11882_v40 = vpop.permute.xlu1 %2674 }
 0x3a4   : > { %16773 = vst [vmem:[#allocation437_spill] sm:$0xff] %v11882_v40  ;;  %v11884_v38 = vpop.permute.xlu0 %2894  ;;  %v16784_v40 = vld [vmem:[#allocation330_spill] sm:$0xff] }
 0x3a5   : > { %16774 = vst [vmem:[#allocation438_spill] sm:$0xff] %v11884_v38  ;;  %3126 = vperm.xlu1 %9505, %v16775_v13   ;;  %3154 = vperm.xlu0 %9506, %v16776_v39   ;;  %v16787_v39 = vld [vmem:[#allocation311_spill] sm:$0xff] }
 0x3a7   : > { %v11888_v42 = vpop.permute.xlu1 %2682 }
 0x3a8   : > { %16777 = vst [vmem:[#allocation322_spill] sm:$0xff] %v11888_v42  ;;  %v11890_v41 = vpop.permute.xlu0 %2906  ;;  %v16788_v42 = vld [vmem:[#allocation334_spill] sm:$0xff] }
 0x3a9   : > { %16778 = vst [vmem:[#allocation439_spill] sm:$0xff] %v11890_v41  ;;  %3134 = vperm.xlu1 %9505, %v16779_v32   ;;  %3162 = vperm.xlu0 %9506, %v16780_v7   ;;  %v16791_v7 = vld [vmem:[#allocation315_spill] sm:$0xff] }
 0x3ac   : > { %v11894_v46 = vpop.permute.xlu1 %2890  ;;  %v11896_v43 = vpop.permute.xlu0 %2914 }
 0x3ad   : > { %16781 = vst [vmem:[#allocation326_spill] sm:$0xff] %v11894_v46  ;;  %16782 = vst [vmem:[#allocation440_spill] sm:$0xff] %v11896_v43  ;;  %3142 = vperm.xlu1 %9505, %v16783_v52   ;;  %3170 = vperm.xlu0 %9506, %v16784_v40   ;;  %v16792_v46 = vld [vmem:[#allocation338_spill] sm:$0xff]  ;;  %v16795_v40 = vld [vmem:[#allocation319_spill] sm:$0xff] }
 0x3b0   : > { %v11900_v38 = vpop.permute.xlu1 %2898  ;;  %v11902_v13 = vpop.permute.xlu0 %2922 }
 0x3b1   : > { %16785 = vst [vmem:[#allocation307_spill] sm:$0xff] %v11900_v38  ;;  %16786 = vst [vmem:[#allocation330_spill] sm:$0xff] %v11902_v13  ;;  %3150 = vperm.xlu1 %9505, %v16787_v39   ;;  %3178 = vperm.xlu0 %9506, %v16788_v42   ;;  %v16796_v38 = vld [vmem:[#allocation342_spill] sm:$0xff]  ;;  %v16799_v42 = vld [vmem:[#allocation323_spill] sm:$0xff] }
 0x3b4   : > { %v11906_v41 = vpop.permute.xlu1 %2902  ;;  %v11908_v32 = vpop.permute.xlu0 %2930 }
 0x3b5   : > { %16789 = vst [vmem:[#allocation311_spill] sm:$0xff] %v11906_v41  ;;  %16790 = vst [vmem:[#allocation334_spill] sm:$0xff] %v11908_v32  ;;  %3158 = vperm.xlu1 %9505, %v16791_v7   ;;  %3186 = vperm.xlu0 %9506, %v16792_v46   ;;  %v16800_v41 = vld [vmem:[#allocation346_spill] sm:$0xff]  ;;  %v16803_v46 = vld [vmem:[#allocation327_spill] sm:$0xff] }
 0x3b8   : > { %v11912_v43 = vpop.permute.xlu1 %2910  ;;  %v11914_v52 = vpop.permute.xlu0 %2938 }
 0x3b9   : > { %16793 = vst [vmem:[#allocation315_spill] sm:$0xff] %v11912_v43  ;;  %16794 = vst [vmem:[#allocation338_spill] sm:$0xff] %v11914_v52  ;;  %3166 = vperm.xlu1 %9505, %v16795_v40   ;;  %3194 = vperm.xlu0 %9506, %v16796_v38   ;;  %v16804_v43 = vld [vmem:[#allocation350_spill] sm:$0xff]  ;;  %v16807_v38 = vld [vmem:[#allocation331_spill] sm:$0xff] }
 0x3bc   : > { %v11918_v13 = vpop.permute.xlu1 %2918  ;;  %v11920_v39 = vpop.permute.xlu0 %2946 }
 0x3bd   : > { %16797 = vst [vmem:[#allocation319_spill] sm:$0xff] %v11918_v13  ;;  %16798 = vst [vmem:[#allocation342_spill] sm:$0xff] %v11920_v39  ;;  %3174 = vperm.xlu1 %9505, %v16799_v42   ;;  %3202 = vperm.xlu0 %9506, %v16800_v41   ;;  %v16808_v13 = vld [vmem:[#allocation354_spill] sm:$0xff]  ;;  %v16811_v41 = vld [vmem:[#allocation335_spill] sm:$0xff] }
 0x3c0   : > { %v11924_v32 = vpop.permute.xlu1 %2926  ;;  %v11926_v7 = vpop.permute.xlu0 %2954 }
 0x3c1   : > { %16801 = vst [vmem:[#allocation323_spill] sm:$0xff] %v11924_v32  ;;  %16802 = vst [vmem:[#allocation346_spill] sm:$0xff] %v11926_v7  ;;  %3182 = vperm.xlu1 %9505, %v16803_v46   ;;  %3210 = vperm.xlu0 %9506, %v16804_v43   ;;  %v16812_v32 = vld [vmem:[#allocation358_spill] sm:$0xff]  ;;  %v16815_v43 = vld [vmem:[#allocation339_spill] sm:$0xff] }
 0x3c4   : > { %v11930_v52 = vpop.permute.xlu1 %2934  ;;  %v11932_v40 = vpop.permute.xlu0 %2962 }
 0x3c5   : > { %16805 = vst [vmem:[#allocation327_spill] sm:$0xff] %v11930_v52  ;;  %16806 = vst [vmem:[#allocation350_spill] sm:$0xff] %v11932_v40  ;;  %3190 = vperm.xlu1 %9505, %v16807_v38   ;;  %3218 = vperm.xlu0 %9506, %v16808_v13   ;;  %v16816_v52 = vld [vmem:[#allocation362_spill] sm:$0xff]  ;;  %v16819_v13 = vld [vmem:[#allocation343_spill] sm:$0xff] }
 0x3c8   : > { %v11936_v39 = vpop.permute.xlu1 %2942  ;;  %v11938_v42 = vpop.permute.xlu0 %2970 }
 0x3c9   : > { %16809 = vst [vmem:[#allocation331_spill] sm:$0xff] %v11936_v39  ;;  %16810 = vst [vmem:[#allocation354_spill] sm:$0xff] %v11938_v42  ;;  %3198 = vperm.xlu1 %9505, %v16811_v41   ;;  %3226 = vperm.xlu0 %9506, %v16812_v32   ;;  %v16820_v39 = vld [vmem:[#allocation366_spill] sm:$0xff]  ;;  %v16823_v32 = vld [vmem:[#allocation347_spill] sm:$0xff] }
 0x3cc   : > { %v11942_v7 = vpop.permute.xlu1 %2950  ;;  %v11944_v46 = vpop.permute.xlu0 %2978 }
 0x3cd   : > { %16813 = vst [vmem:[#allocation335_spill] sm:$0xff] %v11942_v7  ;;  %16814 = vst [vmem:[#allocation358_spill] sm:$0xff] %v11944_v46  ;;  %3206 = vperm.xlu1 %9505, %v16815_v43   ;;  %3234 = vperm.xlu0 %9506, %v16816_v52   ;;  %v16824_v7 = vld [vmem:[#allocation370_spill] sm:$0xff]  ;;  %v16827_v52 = vld [vmem:[#allocation351_spill] sm:$0xff] }
 0x3d0   : > { %v11948_v40 = vpop.permute.xlu1 %2958  ;;  %v11950_v38 = vpop.permute.xlu0 %2986 }
 0x3d1   : > { %16817 = vst [vmem:[#allocation339_spill] sm:$0xff] %v11948_v40  ;;  %16818 = vst [vmem:[#allocation362_spill] sm:$0xff] %v11950_v38  ;;  %3214 = vperm.xlu1 %9505, %v16819_v13   ;;  %3242 = vperm.xlu0 %9506, %v16820_v39   ;;  %v16828_v40 = vld [vmem:[#allocation374_spill] sm:$0xff]  ;;  %v16831_v39 = vld [vmem:[#allocation355_spill] sm:$0xff] }
 0x3d4   : > { %v11954_v42 = vpop.permute.xlu1 %2966  ;;  %v11956_v41 = vpop.permute.xlu0 %2994 }
 0x3d5   : > { %16821 = vst [vmem:[#allocation343_spill] sm:$0xff] %v11954_v42  ;;  %16822 = vst [vmem:[#allocation366_spill] sm:$0xff] %v11956_v41  ;;  %3222 = vperm.xlu1 %9505, %v16823_v32   ;;  %3250 = vperm.xlu0 %9506, %v16824_v7   ;;  %v16834_v7 = vld [vmem:[#allocation359_spill] sm:$0xff]  ;;  %v16981_v42 = vld [vmem:[#allocation309_spill] sm:$0xff] }
 0x3d8   : > { %v11960_v46 = vpop.permute.xlu1 %2974  ;;  %v11962_v43 = vpop.permute.xlu0 %3002 }
 0x3d9   : > { %16825 = vst [vmem:[#allocation347_spill] sm:$0xff] %v11960_v46  ;;  %16826 = vst [vmem:[#allocation370_spill] sm:$0xff] %v11962_v43  ;;  %3230 = vperm.xlu1 %9505, %v16827_v52   ;;  %3258 = vperm.xlu0 %9506, %v16828_v40   ;;  %v16837_v40 = vld [vmem:[#allocation363_spill] sm:$0xff]  ;;  %v16978_v46 = vld [vmem:[#allocation438_spill] sm:$0xff] }
 0x3dc   : > { %v11966_v38 = vpop.permute.xlu1 %2982  ;;  %v11968_v13 = vpop.permute.xlu0 %3010 }
 0x3dd   : > { %16829 = vst [vmem:[#allocation351_spill] sm:$0xff] %v11966_v38  ;;  %16830 = vst [vmem:[#allocation374_spill] sm:$0xff] %v11968_v13  ;;  %3238 = vperm.xlu1 %9505, %v16831_v39   ;;  %3266 = vperm.xlu0 %9506, %v11689_v28   ;;  %v16188_v38 = vmov 5  }
 0x3e0   : > { %v11972_v41 = vpop.permute.xlu1 %2990  ;;  %v11974_v32 = vpop.permute.xlu0 %3018 }
 0x3e1   : > { %16832 = vst [vmem:[#allocation355_spill] sm:$0xff] %v11972_v41  ;;  %16833 = vst [vmem:[#allocation441_spill] sm:$0xff] %v11974_v32  ;;  %3246 = vperm.xlu1 %9505, %v16834_v7   ;;  %3274 = vperm.xlu0 %9506, %v11698_v36   ;;  %v16840_v32 = vld [vmem:[#allocation367_spill] sm:$0xff] }
 0x3e4   : > { %v11978_v43 = vpop.permute.xlu1 %2998  ;;  %v11980_v52 = vpop.permute.xlu0 %3026 }
 0x3e5   : > { %16835 = vst [vmem:[#allocation359_spill] sm:$0xff] %v11978_v43  ;;  %16836 = vst [vmem:[#allocation442_spill] sm:$0xff] %v11980_v52  ;;  %3254 = vperm.xlu1 %9505, %v16837_v40   ;;  %9507 = vset.pattern.permute.xlu0 %v16188_v38  ;;  %v16843_v52 = vld [vmem:[#allocation371_spill] sm:$0xff] }
 0x3e6   : > { %3482 = vperm.xlu0 %9507, %v11108_v15  }
 0x3e8   : > { %v11985_v28 = vpop.permute.xlu1 %3006  ;;  %v11987_v39 = vpop.permute.xlu0 %3034 }
 0x3e9   : > { %16838 = vst [vmem:[#allocation363_spill] sm:$0xff] %v11985_v28  ;;  %16839 = vst [vmem:[#allocation443_spill] sm:$0xff] %v11987_v39  ;;  %3262 = vperm.xlu1 %9505, %v16840_v32   ;;  %v16849_v39 = vld [vmem:[#allocation236_spill] sm:$0xff] }
 0x3ea   : > { %3494 = vperm.xlu0 %9507, %v11117_v60   ;;  %v16848_v60 = vmov 5  }
 0x3ec   : > { %v11991_v36 = vpop.permute.xlu1 %3014  ;;  %v11993_v7 = vpop.permute.xlu0 %3042 }
 0x3ed   : > { %16841 = vst [vmem:[#allocation367_spill] sm:$0xff] %v11991_v36  ;;  %16842 = vst [vmem:[#allocation444_spill] sm:$0xff] %v11993_v7  ;;  %3270 = vperm.xlu1 %9505, %v16843_v52   ;;  %v9821_v7 = vld [vmem:[%s10058_s8 + $0x58] sm:$0xff] }
 0x3ee   : > { %3502 = vperm.xlu0 %9507, %v11129_v16   ;;  %v9835_v36 = vld [vmem:[%s10058_s8 + $0x98] sm:$0xff] }
 0x3f0   : > { %v11997_v40 = vpop.permute.xlu1 %3022  ;;  %v11999_v38 = vpop.permute.xlu0 %3050 }
 0x3f1   : > { %16844 = vst [vmem:[#allocation371_spill] sm:$0xff] %v11997_v40  ;;  %16845 = vst [vmem:[#allocation445_spill] sm:$0xff] %v11999_v38  ;;  %3278 = vperm.xlu1 %9505, %v11681_v44   ;;  %v16854_v38 = vld [vmem:[#allocation241_spill] sm:$0xff] }
 0x3f2   : > { %3510 = vperm.xlu0 %9507, %v11141_v9  }
 0x3f4   : > { %v12003_v15 = vpop.permute.xlu1 %3030  ;;  %v12005_v32 = vpop.permute.xlu0 %3058 }
 0x3f5   : > { %16846 = vst [vmem:[#allocation446_spill] sm:$0xff] %v12003_v15  ;;  %16847 = vst [vmem:[#allocation447_spill] sm:$0xff] %v12005_v32  ;;  %9508 = vset.pattern.permute.xlu1 %v16848_v60 }
 0x3f6   : > { %3486 = vperm.xlu1 %9508, %v16849_v39   ;;  %3518 = vperm.xlu0 %9507, %v11153_v10  }
 0x3f8   : > { %v12010_v52 = vpop.permute.xlu1 %3038  ;;  %v12012_v16 = vpop.permute.xlu0 %3066 }
 0x3f9   : > { %16850 = vst [vmem:[#allocation236_spill] sm:$0xff] %v12010_v52  ;;  %16851 = vst [vmem:[#allocation448_spill] sm:$0xff] %v12012_v16  ;;  %v12373_v52 = vld [vmem:[%s10058_s8 + $0xc8] sm:$0xff] }
 0x3fa   : > { %3490 = vperm.xlu1 %9508, %v11137_v14   ;;  %3526 = vperm.xlu0 %9507, %v11165_v6  }
 0x3fc   : > { %v12016_v44 = vpop.permute.xlu1 %3046  ;;  %v12018_v9 = vpop.permute.xlu0 %3074 }
 0x3fd   : > { %16852 = vst [vmem:[#allocation449_spill] sm:$0xff] %v12016_v44  ;;  %16853 = vst [vmem:[#allocation450_spill] sm:$0xff] %v12018_v9  ;;  %v12361_v44 = vld [vmem:[%s10058_s8 + $0xe0] sm:$0xff] }
 0x3fe   : > { %3498 = vperm.xlu1 %9508, %v16854_v38   ;;  %3534 = vperm.xlu0 %9507, %v11177_v11  }
 0x400   : > { %v12022_v32 = vpop.permute.xlu1 %3054  ;;  %v12024_v39 = vpop.permute.xlu0 %3082 }
 0x401   : > { %16855 = vst [vmem:[#allocation241_spill] sm:$0xff] %v12022_v32  ;;  %16856 = vst [vmem:[#allocation451_spill] sm:$0xff] %v12024_v39 }
 0x402   : > { %3506 = vperm.xlu1 %9508, %v11161_v3   ;;  %3542 = vperm.xlu0 %9507, %v11189_v1  }
 0x404   : > { %v12028_v10 = vpop.permute.xlu1 %3062  ;;  %v12030_v14 = vpop.permute.xlu0 %3090 }
 0x405   : > { %16857 = vst [vmem:[#allocation452_spill] sm:$0xff] %v12028_v10  ;;  %16858 = vst [vmem:[#allocation453_spill] sm:$0xff] %v12030_v14  ;;  %v12330_v14 = vld [vmem:[%s10058_s8 + $0xa8] sm:$0xff]  ;;  %v12352_v10 = vld [vmem:[%s10058_s8 + $0xc0] sm:$0xff] }
 0x406   : > { %3514 = vperm.xlu1 %9508, %v11173_v4   ;;  %3550 = vperm.xlu0 %9507, %v11201_v8  }
 0x408   : > { %v12034_v6 = vpop.permute.xlu1 %3070  ;;  %v12036_v9 = vpop.permute.xlu0 %3098 }
 0x409   : > { %16859 = vst [vmem:[#allocation454_spill] sm:$0xff] %v12034_v6  ;;  %16860 = vst [vmem:[#allocation455_spill] sm:$0xff] %v12036_v9 }
 0x40a   : > { %3522 = vperm.xlu1 %9508, %v11185_v2   ;;  %3558 = vperm.xlu0 %9507, %v11213_v12  }
 0x40c   : > { %v12040_v11 = vpop.permute.xlu1 %3078  ;;  %v12042_v3 = vpop.permute.xlu0 %3106 }
 0x40d   : > { %16861 = vst [vmem:[#allocation456_spill] sm:$0xff] %v12040_v11  ;;  %16862 = vst [vmem:[#allocation457_spill] sm:$0xff] %v12042_v3  ;;  %v12339_v11 = vld [vmem:[%s10058_s8 + $0xb0] sm:$0xff] }
 0x40e   : > { %3530 = vperm.xlu1 %9508, %v11197_v54   ;;  %3566 = vperm.xlu0 %9507, %v11225_v5  }
 0x410   : > { %v12046_v1 = vpop.permute.xlu1 %3086  ;;  %v12048_v4 = vpop.permute.xlu0 %3114 }
 0x411   : > { %16863 = vst [vmem:[#allocation458_spill] sm:$0xff] %v12046_v1  ;;  %16864 = vst [vmem:[#allocation459_spill] sm:$0xff] %v12048_v4 }
 0x412   : > { %3538 = vperm.xlu1 %9508, %v11209_v18   ;;  %3574 = vperm.xlu0 %9507, %v11237_v56  }
 0x414   : > { %v12052_v8 = vpop.permute.xlu1 %3094  ;;  %v12054_v2 = vpop.permute.xlu0 %3122 }
 0x415   : > { %16865 = vst [vmem:[#allocation460_spill] sm:$0xff] %v12052_v8  ;;  %16866 = vst [vmem:[#allocation461_spill] sm:$0xff] %v12054_v2  ;;  %v12301_v2 = vld [vmem:[%s10058_s8 + $0xa0] sm:$0xff] }
 0x416   : > { %3546 = vperm.xlu1 %9508, %v11221_v20   ;;  %3582 = vperm.xlu0 %9507, %v11249_v53  }
 0x418   : > { %v12058_v12 = vpop.permute.xlu1 %3102  ;;  %v12060_v54 = vpop.permute.xlu0 %3130 }
 0x419   : > { %16867 = vst [vmem:[#allocation462_spill] sm:$0xff] %v12058_v12  ;;  %16868 = vst [vmem:[#allocation463_spill] sm:$0xff] %v12060_v54  ;;  %v12321_v12 = vld [vmem:[%s10058_s8 + $0x90] sm:$0xff] }
 0x41a   : > { %3554 = vperm.xlu1 %9508, %v11233_v58   ;;  %3590 = vperm.xlu0 %9507, %v11261_v49  }
 0x41c   : > { %v12064_v5 = vpop.permute.xlu1 %3110  ;;  %v12066_v18 = vpop.permute.xlu0 %3138 }
 0x41d   : > { %16869 = vst [vmem:[#allocation464_spill] sm:$0xff] %v12064_v5  ;;  %16870 = vst [vmem:[#allocation465_spill] sm:$0xff] %v12066_v18  ;;  %v9815_v5 = vld [vmem:[%s10058_s8 + $0x38] sm:$0xff] }
 0x41e   : > { %3562 = vperm.xlu1 %9508, %v11245_v51   ;;  %3598 = vperm.xlu0 %9507, %v11273_v63  }
 0x420   : > { %v12070_v56 = vpop.permute.xlu1 %3118  ;;  %v12072_v20 = vpop.permute.xlu0 %3146 }
 0x421   : > { %16871 = vst [vmem:[#allocation466_spill] sm:$0xff] %v12070_v56  ;;  %16872 = vst [vmem:[#allocation467_spill] sm:$0xff] %v12072_v20 }
 0x422   : > { %3570 = vperm.xlu1 %9508, %v11257_v55   ;;  %3606 = vperm.xlu0 %9507, %v11285_v61  }
 0x424   : > { %v12076_v53 = vpop.permute.xlu1 %3126  ;;  %v12078_v58 = vpop.permute.xlu0 %3154 }
 0x425   : > { %16873 = vst [vmem:[#allocation468_spill] sm:$0xff] %v12076_v53  ;;  %16874 = vst [vmem:[#allocation469_spill] sm:$0xff] %v12078_v58  ;;  %v9808_v58 = vld [vmem:[%s10058_s8 + $0x50] sm:$0xff] }
 0x426   : > { %3578 = vperm.xlu1 %9508, %v11269_v0   ;;  %3614 = vperm.xlu0 %9507, %v11297_v62  }
 0x428   : > { %v12082_v49 = vpop.permute.xlu1 %3134  ;;  %v12084_v51 = vpop.permute.xlu0 %3162 }
 0x429   : > { %16875 = vst [vmem:[#allocation470_spill] sm:$0xff] %v12082_v49  ;;  %16876 = vst [vmem:[#allocation471_spill] sm:$0xff] %v12084_v51  ;;  %v9812_v49 = vld [vmem:[%s10058_s8 + $0x20] sm:$0xff] }
 0x42a   : > { %3586 = vperm.xlu1 %9508, %v11281_v19   ;;  %3622 = vperm.xlu0 %9507, %v11309_v57  }
 0x42c   : > { %v12088_v63 = vpop.permute.xlu1 %3142  ;;  %v12090_v55 = vpop.permute.xlu0 %3170 }
 0x42d   : > { %16877 = vst [vmem:[#allocation472_spill] sm:$0xff] %v12088_v63  ;;  %16878 = vst [vmem:[#allocation473_spill] sm:$0xff] %v12090_v55  ;;  %v12282_v63 = vld [vmem:[%s10058_s8 + $0x70] sm:$0xff] }
 0x42e   : > { %3594 = vperm.xlu1 %9508, %v11293_v27   ;;  %3630 = vperm.xlu0 %9507, %v11321_v21  }
 0x430   : > { %v12094_v61 = vpop.permute.xlu1 %3150  ;;  %v12096_v0 = vpop.permute.xlu0 %3178 }
 0x431   : > { %16879 = vst [vmem:[#allocation474_spill] sm:$0xff] %v12094_v61  ;;  %16880 = vst [vmem:[#allocation475_spill] sm:$0xff] %v12096_v0  ;;  %v12243_v0 = vld [vmem:[%s10058_s8 + $0x60] sm:$0xff]  ;;  %v12273_v61 = vld [vmem:[%s10058_s8 + $0x68] sm:$0xff] }
 0x432   : > { %3602 = vperm.xlu1 %9508, %v11305_v25   ;;  %3638 = vperm.xlu0 %9507, %v11333_v59  }
 0x434   : > { %v12100_v62 = vpop.permute.xlu1 %3158  ;;  %v12102_v19 = vpop.permute.xlu0 %3186 }
 0x435   : > { %16881 = vst [vmem:[#allocation476_spill] sm:$0xff] %v12100_v62  ;;  %16882 = vst [vmem:[#allocation477_spill] sm:$0xff] %v12102_v19  ;;  %v16922_v19 = vmov 7  }
 0x436   : > { %3610 = vperm.xlu1 %9508, %v11317_v31   ;;  %3646 = vperm.xlu0 %9507, %v11345_v23  }
 0x438   : > { %v12106_v57 = vpop.permute.xlu1 %3166  ;;  %v12108_v27 = vpop.permute.xlu0 %3194 }
 0x439   : > { %16883 = vst [vmem:[#allocation478_spill] sm:$0xff] %v12106_v57  ;;  %16884 = vst [vmem:[#allocation479_spill] sm:$0xff] %v12108_v27  ;;  %v9646_v27 = vld [vmem:[%s16040_s3 + $0x10] ss:$8 sps:$4 sm:$0xff]  }
 0x43a   : > { %3618 = vperm.xlu1 %9508, %v11329_v22   ;;  %3654 = vperm.xlu0 %9507, %v11357_v29   ;;  %v9807_v57 = vld [vmem:[%s10058_s8 + $0x18] sm:$0xff] }
 0x43c   : > { %v12112_v21 = vpop.permute.xlu1 %3174  ;;  %v12114_v25 = vpop.permute.xlu0 %3202 }
 0x43d   : > { %16885 = vst [vmem:[#allocation480_spill] sm:$0xff] %v12112_v21  ;;  %16886 = vst [vmem:[#allocation481_spill] sm:$0xff] %v12114_v25  ;;  %v9650_v21 = vld [vmem:[%s16040_s3 + $0x34] ss:$8 sps:$4 sm:$0xff]  }
 0x43e   : > { %3626 = vperm.xlu1 %9508, %v11341_v35   ;;  %3662 = vperm.xlu0 %9507, %v11369_v17  }
 0x440   : > { %v12118_v59 = vpop.permute.xlu1 %3182  ;;  %v12120_v31 = vpop.permute.xlu0 %3210 }
 0x441   : > { %16887 = vst [vmem:[#allocation482_spill] sm:$0xff] %v12118_v59  ;;  %16888 = vst [vmem:[#allocation483_spill] sm:$0xff] %v12120_v31  ;;  %v16920_v31 = vld [vmem:[#allocation318_spill] sm:$0xff] }
 0x442   : > { %3634 = vperm.xlu1 %9508, %v11353_v26   ;;  %3670 = vperm.xlu0 %9507, %v11381_v33   ;;  %v9649_v59 = vld [vmem:[%s16040_s3 + $0x20] ss:$8 sps:$4 sm:$0xff]  }
 0x444   : > { %v12124_v23 = vpop.permute.xlu1 %3190  ;;  %v12126_v22 = vpop.permute.xlu0 %3218 }
 0x445   : > { %16889 = vst [vmem:[#allocation484_spill] sm:$0xff] %v12124_v23  ;;  %16890 = vst [vmem:[#allocation485_spill] sm:$0xff] %v12126_v22  ;;  %v12228_v23 = vld [vmem:[%s10058_s8 + $0x40] sm:$0xff] }
 0x446   : > { %3642 = vperm.xlu1 %9508, %v11365_v48   ;;  %3678 = vperm.xlu0 %9507, %v11393_v24  }
 0x448   : > { %v12130_v29 = vpop.permute.xlu1 %3198  ;;  %v12132_v35 = vpop.permute.xlu0 %3226 }
 0x449   : > { %16891 = vst [vmem:[#allocation486_spill] sm:$0xff] %v12130_v29  ;;  %16892 = vst [vmem:[#allocation487_spill] sm:$0xff] %v12132_v35  ;;  %v16903_v35 = vld [vmem:[#allocation290_spill] sm:$0xff]  ;;  %v9644_v29 = vld [vmem:[%s16040_s3 + $0x14] ss:$8 sps:$4 sm:$0xff]  }
 0x44a   : > { %3650 = vperm.xlu1 %9508, %v11377_v30   ;;  %3686 = vperm.xlu0 %9507, %v11405_v37   ;;  %v16899_v37 = vld [vmem:[#allocation286_spill] sm:$0xff] }
 0x44c   : > { %v12136_v17 = vpop.permute.xlu1 %3206  ;;  %v12138_v26 = vpop.permute.xlu0 %3234 }
 0x44d   : > { %16893 = vst [vmem:[#allocation488_spill] sm:$0xff] %v12136_v17  ;;  %16894 = vst [vmem:[#allocation489_spill] sm:$0xff] %v12138_v26  ;;  %v16900_v26 = vld [vmem:[#allocation295_spill] sm:$0xff]  ;;  %v12210_v17 = vld [vmem:[%s10058_s8 + $0x30] sm:$0xff] }
 0x44e   : > { %3658 = vperm.xlu1 %9508, %v11389_v45   ;;  %3694 = vperm.xlu0 %9507, %v16763_v47  }
 0x450   : > { %v12142_v33 = vpop.permute.xlu1 %3214  ;;  %v12144_v48 = vpop.permute.xlu0 %3242 }
 0x451   : > { %16895 = vst [vmem:[#allocation490_spill] sm:$0xff] %v12142_v33  ;;  %16896 = vst [vmem:[#allocation491_spill] sm:$0xff] %v12144_v48  ;;  %v16904_v48 = vld [vmem:[#allocation299_spill] sm:$0xff]  ;;  %v16919_v33 = vld [vmem:[#allocation314_spill] sm:$0xff] }
 0x452   : > { %3666 = vperm.xlu1 %9508, %v11401_v34   ;;  %3702 = vperm.xlu0 %9507, %v16767_v50  }
 0x454   : > { %v12148_v24 = vpop.permute.xlu1 %3222  ;;  %v12150_v30 = vpop.permute.xlu0 %3250 }
 0x455   : > { %16897 = vst [vmem:[#allocation492_spill] sm:$0xff] %v12148_v24  ;;  %16898 = vst [vmem:[#allocation493_spill] sm:$0xff] %v12150_v30  ;;  %v16907_v24 = vld [vmem:[#allocation294_spill] sm:$0xff]  ;;  %v16908_v30 = vld [vmem:[#allocation303_spill] sm:$0xff] }
 0x456   : > { %3674 = vperm.xlu1 %9508, %v16899_v37   ;;  %3710 = vperm.xlu0 %9507, %v16900_v26   ;;  %v16911_v26 = vld [vmem:[#allocation298_spill] sm:$0xff] }
 0x458   : > { %v12154_v45 = vpop.permute.xlu1 %3230  ;;  %v12156_v47 = vpop.permute.xlu0 %3258 }
 0x459   : > { %16901 = vst [vmem:[#allocation286_spill] sm:$0xff] %v12154_v45  ;;  %16902 = vst [vmem:[#allocation295_spill] sm:$0xff] %v12156_v47  ;;  %v16190_v47 = vmov 6   ;;  %v9801_v45 = vld [vmem:[%s10058_s8 + $0x10] sm:$0xff] }
 0x45a   : > { %3682 = vperm.xlu1 %9508, %v16903_v35   ;;  %3718 = vperm.xlu0 %9507, %v16904_v48   ;;  %v9799_v35 = vld [vmem:[%s10058_s8] sm:$0xff] }
 0x45c   : > { %v12160_v34 = vpop.permute.xlu1 %3238  ;;  %v12162_v50 = vpop.permute.xlu0 %3266 }
 0x45d   : > { %16905 = vst [vmem:[#allocation290_spill] sm:$0xff] %v12160_v34  ;;  %16906 = vst [vmem:[#allocation299_spill] sm:$0xff] %v12162_v50  ;;  %v9800_v34 = vld [vmem:[%s10058_s8 + $0x8] sm:$0xff] }
 0x45e   : > { %3690 = vperm.xlu1 %9508, %v16907_v24   ;;  %3726 = vperm.xlu0 %9507, %v16908_v30   ;;  %v16913_v24 = vld [vmem:[#allocation302_spill] sm:$0xff] }
 0x460   : > { %v12166_v22 = vpop.permute.xlu1 %3246  ;;  %v12168_v37 = vpop.permute.xlu0 %3274 }
 0x461   : > { %16909 = vst [vmem:[#allocation294_spill] sm:$0xff] %v12166_v22  ;;  %16910 = vst [vmem:[#allocation303_spill] sm:$0xff] %v12168_v37  ;;  %v16192_v22 = vmov 7  }
 0x462   : > { %3698 = vperm.xlu1 %9508, %v16911_v26   ;;  %9509 = vset.pattern.permute.xlu0 %v16190_v47  ;;  %v16915_v26 = vld [vmem:[#allocation306_spill] sm:$0xff] }
 0x463   : > { %4074 = vperm.xlu0 %9509, %v9799_v35  }
 0x464   : > { %v12173_v48 = vpop.permute.xlu1 %3254 }
 0x465   : > { %16912 = vst [vmem:[#allocation298_spill] sm:$0xff] %v12173_v48  ;;  %v12175_v50 = vpop.permute.xlu0 %3482 }
 0x466   : > { %3706 = vperm.xlu1 %9508, %v16913_v24   ;;  %v16917_v24 = vld [vmem:[#allocation310_spill] sm:$0xff] }
 0x467   : > { %4090 = vperm.xlu0 %9509, %v16854_v38  }
 0x468   : > { %v12179_v30 = vpop.permute.xlu1 %3262 }
 0x469   : > { %16914 = vst [vmem:[#allocation302_spill] sm:$0xff] %v12179_v30  ;;  %v12181_v37 = vpop.permute.xlu0 %3494 }
 0x46a   : > { %3714 = vperm.xlu1 %9508, %v16915_v26   ;;  %v9802_v26 = vld [vmem:[%s10058_s8 + $0x28] sm:$0xff] }
 0x46b   : > { %9514 = vset.pattern.permute.xlu0 %v16192_v22 }
 0x46c   : > { %v12185_v47 = vpop.permute.xlu1 %3270  ;;  %4670 = vperm.xlu0 %9514, %v9800_v34  }
 0x46d   : > { %16916 = vst [vmem:[#allocation306_spill] sm:$0xff] %v12185_v47  ;;  %v12188_v48 = vpop.permute.xlu0 %3502 }
 0x46e   : > { %3722 = vperm.xlu1 %9508, %v16917_v24   ;;  %v9641_v24 = vld [vmem:[%s16040_s3 + $0x4] ss:$8 sps:$4 sm:$0xff]  }
 0x46f   : > { %5808 = vmatprep.subr.bf16.mxu0 %v9641_v24 }
 0x470   : > { %v12191_v38 = vpop.permute.xlu1 %3278  ;;  %4674 = vperm.xlu0 %9514, %v9801_v45  }
 0x471   : > { %16918 = vst [vmem:[#allocation310_spill] sm:$0xff] %v12191_v38  ;;  %v12194_v30 = vpop.permute.xlu0 %3510  ;;  %v9643_v38 = vld [vmem:[%s16040_s3] ss:$8 sps:$4 sm:$0xff]  }
 0x472   : > { %3730 = vperm.xlu1 %9508, %v16919_v33   ;;  %5809 = vmatpush1.bf16.msra.mxu0 %v9643_v38 }
 0x473   : > { %5810 = vmatprep.subr.bf16.mxu0 %v9644_v29 }
 0x474   : > { %4686 = vperm.xlu0 %9514, %v9802_v26  }
 0x475   : > { %v12198_v22 = vpop.permute.xlu1 %3486  ;;  %v12200_v47 = vpop.permute.xlu0 %3518 }
 0x476   : > { %3738 = vperm.xlu1 %9508, %v16920_v31   ;;  %v16921_v31 = vmov 6   ;;  %5811 = vmatpush1.bf16.msra.mxu0 %v9646_v27 }
 0x478   : > { %4690 = vperm.xlu0 %9514, %v12210_v17  }
 0x479   : > { %v12213_v33 = vpop.permute.xlu1 %3490  ;;  %v12215_v25 = vpop.permute.xlu0 %3526 }
 0x47a   : > { %9510 = vset.pattern.permute.xlu1 %v16921_v31 }
 0x47b   : > { %4078 = vperm.xlu1 %9510, %v9800_v34   ;;  %v9647_v34 = vld [vmem:[%s16040_s3 + $0x24] ss:$8 sps:$4 sm:$0xff]  }
 0x47c   : > { %9519 = vset.pattern.permute.xlu0 %v16921_v31  ;;  %5812 = vmatprep.subr.bf16.mxu0 %v9647_v34 }
 0x47d   : > { %v12225_v24 = vpop.permute.xlu1 %3498  ;;  %4106 = vperm.xlu0 %9519, %v12228_v23   ;;  %v12231_v38 = vpop.permute.xlu0 %3534  ;;  %5813 = vmatpush1.bf16.msra.mxu0 %v9649_v59  ;;  %v9806_v59 = vld [vmem:[%s10058_s8 + $0x48] sm:$0xff] }
 0x47e   : > { %5814 = vmatprep.subr.bf16.mxu0 %v9650_v21 }
 0x47f   : > { %9511 = vset.pattern.permute.xlu1 %v16922_v19 }
 0x480   : > { %4666 = vperm.xlu1 %9511, %v9799_v35   ;;  %v9652_v35 = vld [vmem:[%s16040_s3 + $0x30] ss:$8 sps:$4 sm:$0xff]  }
 0x481   : > { %v12240_v29 = vpop.permute.xlu1 %3506  ;;  %4122 = vperm.xlu0 %9519, %v12243_v0   ;;  %v12246_v27 = vpop.permute.xlu0 %3542  ;;  %5815 = vmatpush1.bf16.msra.mxu0 %v9652_v35 }
 0x484   : > { %9512 = vset.pattern.permute.xlu1 %v16921_v31 }
 0x485   : > { %4082 = vperm.xlu1 %9512, %v9801_v45   ;;  %v12255_v34 = vpop.permute.xlu1 %3514  ;;  %9524 = vset.pattern.permute.xlu0 %v16922_v19  ;;  %v12258_v55 = vpop.permute.xlu0 %3550 }
 0x486   : > { %4702 = vperm.xlu0 %9524, %v9806_v59  }
 0x489   : > { %4086 = vperm.xlu1 %9512, %v9807_v57   ;;  %v12262_v51 = vpop.permute.xlu1 %3522  ;;  %v12264_v62 = vpop.permute.xlu0 %3558 }
 0x48a   : > { %16923 = vst [vmem:[#allocation314_spill] sm:$0xff] %v12264_v62  ;;  %4706 = vperm.xlu0 %9524, %v9808_v58  }
 0x48d   : > { %9513 = vset.pattern.permute.xlu1 %v16922_v19  ;;  %v12268_v21 = vpop.permute.xlu1 %3530  ;;  %v12270_v45 = vpop.permute.xlu0 %3566 }
 0x48e   : > { %16924 = vst [vmem:[#allocation318_spill] sm:$0xff] %v12270_v45  ;;  %4678 = vperm.xlu1 %9513, %v9807_v57   ;;  %4718 = vperm.xlu0 %9524, %v12273_v61   ;;  %v12292_v57 = vld [vmem:[%s10058_s8 + $0x80] sm:$0xff]  ;;  %v9838_v45 = vld [vmem:[%s10058_s8 + $0x170] sm:$0xff] }
 0x491   : > { %v12276_v35 = vpop.permute.xlu1 %3538  ;;  %v12278_v20 = vpop.permute.xlu0 %3574 }
 0x492   : > { %16925 = vst [vmem:[#allocation494_spill] sm:$0xff] %v12278_v20  ;;  %9515 = vset.pattern.permute.xlu1 %v16921_v31  ;;  %4722 = vperm.xlu0 %9524, %v12282_v63  }
 0x493   : > { %4094 = vperm.xlu1 %9515, %v9802_v26  }
 0x495   : > { %v12285_v18 = vpop.permute.xlu1 %3546  ;;  %v12287_v54 = vpop.permute.xlu0 %3582 }
 0x496   : > { %16926 = vst [vmem:[#allocation495_spill] sm:$0xff] %v12287_v54  ;;  %9529 = vset.pattern.permute.xlu0 %v16921_v31 }
 0x497   : > { %9516 = vset.pattern.permute.xlu1 %v16922_v19  ;;  %4138 = vperm.xlu0 %9529, %v12292_v57  }
 0x498   : > { %4682 = vperm.xlu1 %9516, %v9812_v49   ;;  %v12312_v49 = vld [vmem:[%s10058_s8 + $0x88] sm:$0xff] }
 0x499   : > { %v12296_v53 = vpop.permute.xlu1 %3554  ;;  %v12298_v26 = vpop.permute.xlu0 %3590 }
 0x49a   : > { %16927 = vst [vmem:[#allocation496_spill] sm:$0xff] %v12296_v53  ;;  %16928 = vst [vmem:[#allocation497_spill] sm:$0xff] %v12298_v26 }
 0x49b   : > { %4154 = vperm.xlu0 %9529, %v12301_v2  }
 0x49c   : > { %9517 = vset.pattern.permute.xlu1 %v16921_v31 }
 0x49d   : > { %4098 = vperm.xlu1 %9517, %v12210_v17   ;;  %v12306_v4 = vpop.permute.xlu1 %3562  ;;  %v12308_v56 = vpop.permute.xlu0 %3598 }
 0x49e   : > { %16929 = vst [vmem:[#allocation498_spill] sm:$0xff] %v12306_v4  ;;  %16930 = vst [vmem:[#allocation499_spill] sm:$0xff] %v12308_v56  ;;  %v9836_v56 = vld [vmem:[%s10058_s8 + $0x150] sm:$0xff] }
 0x49f   : > { %9534 = vset.pattern.permute.xlu0 %v16922_v19 }
 0x4a0   : > { %4734 = vperm.xlu0 %9534, %v12312_v49  }
 0x4a1   : > { %4102 = vperm.xlu1 %9517, %v9815_v5   ;;  %v12316_v3 = vpop.permute.xlu1 %3570  ;;  %v12318_v9 = vpop.permute.xlu0 %3606 }
 0x4a2   : > { %16931 = vst [vmem:[#allocation500_spill] sm:$0xff] %v12316_v3  ;;  %16932 = vst [vmem:[#allocation501_spill] sm:$0xff] %v12318_v9 }
 0x4a4   : > { %4738 = vperm.xlu0 %9534, %v12321_v12  }
 0x4a5   : > { %9518 = vset.pattern.permute.xlu1 %v16922_v19  ;;  %v12325_v17 = vpop.permute.xlu1 %3578  ;;  %v12327_v8 = vpop.permute.xlu0 %3614 }
 0x4a6   : > { %16933 = vst [vmem:[#allocation502_spill] sm:$0xff] %v12325_v17  ;;  %16934 = vst [vmem:[#allocation503_spill] sm:$0xff] %v12327_v8  ;;  %4694 = vperm.xlu1 %9518, %v9815_v5   ;;  %v16973_v17 = vld [vmem:[#allocation17_spill] sm:$0xff] }
 0x4a8   : > { %4750 = vperm.xlu0 %9534, %v12330_v14  }
 0x4a9   : > { %v12333_v39 = vpop.permute.xlu1 %3586  ;;  %v12335_v1 = vpop.permute.xlu0 %3622 }
 0x4aa   : > { %16935 = vst [vmem:[#allocation504_spill] sm:$0xff] %v12333_v39  ;;  %16936 = vst [vmem:[#allocation505_spill] sm:$0xff] %v12335_v1  ;;  %9520 = vset.pattern.permute.xlu1 %v16921_v31  ;;  %v9837_v39 = vld [vmem:[%s10058_s8 + $0x168] sm:$0xff] }
 0x4ab   : > { %4110 = vperm.xlu1 %9520, %v9806_v59  }
 0x4ac   : > { %4754 = vperm.xlu0 %9534, %v12339_v11  }
 0x4ad   : > { %v12342_v16 = vpop.permute.xlu1 %3594  ;;  %v12344_v5 = vpop.permute.xlu0 %3630 }
 0x4ae   : > { %16937 = vst [vmem:[#allocation506_spill] sm:$0xff] %v12342_v16  ;;  %16938 = vst [vmem:[#allocation507_spill] sm:$0xff] %v12344_v5 }
 0x4af   : > { %9521 = vset.pattern.permute.xlu1 %v16922_v19 }
 0x4b0   : > { %4698 = vperm.xlu1 %9521, %v12228_v23   ;;  %9539 = vset.pattern.permute.xlu0 %v16921_v31 }
 0x4b1   : > { %v12349_v6 = vpop.permute.xlu1 %3602  ;;  %4170 = vperm.xlu0 %9539, %v12352_v10   ;;  %v12355_v59 = vpop.permute.xlu0 %3638 }
 0x4b2   : > { %16939 = vst [vmem:[#allocation508_spill] sm:$0xff] %v12349_v6  ;;  %16940 = vst [vmem:[#allocation509_spill] sm:$0xff] %v12355_v59 }
 0x4b4   : > { %9522 = vset.pattern.permute.xlu1 %v16921_v31 }
 0x4b5   : > { %4114 = vperm.xlu1 %9522, %v9808_v58   ;;  %v12358_v32 = vpop.permute.xlu1 %3610  ;;  %4186 = vperm.xlu0 %9539, %v12361_v44   ;;  %v12364_v23 = vpop.permute.xlu0 %3646 }
 0x4b6   : > { %16941 = vst [vmem:[#allocation510_spill] sm:$0xff] %v12358_v32  ;;  %16942 = vst [vmem:[#allocation511_spill] sm:$0xff] %v12364_v23  ;;  %v12382_v23 = vld [vmem:[%s10058_s8 + $0xd0] sm:$0xff] }
 0x4b9   : > { %4118 = vperm.xlu1 %9522, %v9821_v7   ;;  %v12367_v5 = vpop.permute.xlu1 %3618  ;;  %9544 = vset.pattern.permute.xlu0 %v16922_v19  ;;  %v12370_v59 = vpop.permute.xlu0 %3654 }
 0x4ba   : > { %16943 = vst [vmem:[#allocation512_spill] sm:$0xff] %v12367_v5  ;;  %16944 = vst [vmem:[#allocation513_spill] sm:$0xff] %v12370_v59  ;;  %4766 = vperm.xlu0 %9544, %v12373_v52   ;;  %v12391_v5 = vld [vmem:[%s10058_s8 + $0xe8] sm:$0xff] }
 0x4bd   : > { %9523 = vset.pattern.permute.xlu1 %v16922_v19  ;;  %v12377_v58 = vpop.permute.xlu1 %3626  ;;  %v12379_v1 = vpop.permute.xlu0 %3662 }
 0x4be   : > { %16945 = vst [vmem:[#allocation514_spill] sm:$0xff] %v12377_v58  ;;  %16946 = vst [vmem:[#allocation515_spill] sm:$0xff] %v12379_v1  ;;  %4710 = vperm.xlu1 %9523, %v9821_v7   ;;  %4770 = vperm.xlu0 %9544, %v12382_v23   ;;  %v12400_v58 = vld [vmem:[%s10058_s8 + $0xf0] sm:$0xff] }
 0x4c1   : > { %v12385_v15 = vpop.permute.xlu1 %3634  ;;  %v12387_v59 = vpop.permute.xlu0 %3670 }
 0x4c2   : > { %16947 = vst [vmem:[#allocation516_spill] sm:$0xff] %v12385_v15  ;;  %16948 = vst [vmem:[#allocation517_spill] sm:$0xff] %v12387_v59  ;;  %9525 = vset.pattern.permute.xlu1 %v16921_v31  ;;  %4782 = vperm.xlu0 %9544, %v12391_v5   ;;  %v12408_v15 = vld [vmem:[%s10058_s8 + $0x108] sm:$0xff] }
 0x4c3   : > { %4126 = vperm.xlu1 %9525, %v12273_v61  }
 0x4c5   : > { %v12395_v1 = vpop.permute.xlu1 %3642  ;;  %v12397_v7 = vpop.permute.xlu0 %3678 }
 0x4c6   : > { %16949 = vst [vmem:[#allocation518_spill] sm:$0xff] %v12395_v1  ;;  %16950 = vst [vmem:[#allocation519_spill] sm:$0xff] %v12397_v7  ;;  %4786 = vperm.xlu0 %9544, %v12400_v58   ;;  %v12419_v1 = vld [vmem:[%s10058_s8 + $0x100] sm:$0xff] }
 0x4c7   : > { %9526 = vset.pattern.permute.xlu1 %v16922_v19 }
 0x4c8   : > { %4714 = vperm.xlu1 %9526, %v12243_v0   ;;  %v9828_v0 = vld [vmem:[%s10058_s8 + $0x78] sm:$0xff] }
 0x4c9   : > { %v12405_v59 = vpop.permute.xlu1 %3650  ;;  %v12411_v61 = vpop.permute.xlu0 %3686 }
 0x4ca   : > { %16951 = vst [vmem:[#allocation520_spill] sm:$0xff] %v12405_v59  ;;  %4798 = vperm.xlu0 %9544, %v12408_v15   ;;  %16952 = vst [vmem:[#allocation521_spill] sm:$0xff] %v12411_v61  ;;  %v12428_v61 = vld [vmem:[%s10058_s8 + $0x120] sm:$0xff] }
 0x4cc   : > { %9527 = vset.pattern.permute.xlu1 %v16921_v31 }
 0x4cd   : > { %4130 = vperm.xlu1 %9527, %v12282_v63   ;;  %v12415_v7 = vpop.permute.xlu1 %3658  ;;  %v12425_v32 = vpop.permute.xlu0 %3694 }
 0x4ce   : > { %16953 = vst [vmem:[#allocation522_spill] sm:$0xff] %v12415_v7  ;;  %9551 = vset.pattern.permute.xlu0 %v16921_v31  ;;  %16955 = vst [vmem:[#allocation524_spill] sm:$0xff] %v12425_v32  ;;  %v9830_v7 = vld [vmem:[%s10058_s8 + $0x140] sm:$0xff]  ;;  %v12443_v32 = vld [vmem:[%s10058_s8 + $0x110] sm:$0xff] }
 0x4cf   : > { %4202 = vperm.xlu0 %9551, %v12419_v1  }
 0x4d1   : > { %4134 = vperm.xlu1 %9527, %v9828_v0   ;;  %v12423_v59 = vpop.permute.xlu1 %3666  ;;  %v12435_v8 = vpop.permute.xlu0 %3702 }
 0x4d2   : > { %16954 = vst [vmem:[#allocation523_spill] sm:$0xff] %v12423_v59  ;;  %16957 = vst [vmem:[#allocation526_spill] sm:$0xff] %v12435_v8 }
 0x4d3   : > { %4218 = vperm.xlu0 %9551, %v12428_v61  }
 0x4d5   : > { %9528 = vset.pattern.permute.xlu1 %v16922_v19  ;;  %v12432_v63 = vpop.permute.xlu1 %3674 }
 0x4d6   : > { %16956 = vst [vmem:[#allocation525_spill] sm:$0xff] %v12432_v63  ;;  %4726 = vperm.xlu1 %9528, %v9828_v0   ;;  %v16194_v63 = vlaneseq  ;;  %v12448_v0 = vpop.permute.xlu0 %3710 }
 0x4d7   : > { %4234 = vperm.xlu0 %9551, %v9830_v7   ;;  %16960 = vst [vmem:[#allocation529_spill] sm:$0xff] %v12448_v0  ;;  %v12453_v7 = vld [vmem:[%s10058_s8 + $0x128] sm:$0xff]  ;;  %v9833_v0 = vld [vmem:[%s10058_s8 + $0x130] sm:$0xff] }
 0x4d9   : > { %v12437_v40 = vpop.permute.xlu1 %3682 }
 0x4da   : > { %16958 = vst [vmem:[#allocation527_spill] sm:$0xff] %v12437_v40  ;;  %9530 = vset.pattern.permute.xlu1 %v16921_v31  ;;  %v12461_v40 = vpop.permute.xlu0 %3718 }
 0x4db   : > { %4142 = vperm.xlu1 %9530, %v12312_v49   ;;  %9558 = vset.pattern.permute.xlu0 %v16922_v19  ;;  %v12457_v49 = vshrl.u32 %v16194_v63, 7  ;;  %16963 = vst [vmem:[#allocation532_spill] sm:$0xff] %v12461_v40  ;;  %v414_v63 = vld [vmem:[%s16038_s1] sm:$0xff]  ;;  %v9834_v40 = vld [vmem:[%s10058_s8 + $0x148] sm:$0xff] }
 0x4dc   : > { %4802 = vperm.xlu0 %9558, %v12443_v32  }
 0x4dd   : > { %v12446_v59 = vpop.permute.xlu1 %3690  ;;  %16961 = vst [vmem:[#allocation530_spill] sm:$0xff] %v12457_v49  ;;  %v3283_v28 = vsub.s32 4, %v12457_v49  ;;  %v3875_v20 = vsub.s32 5, %v12457_v49 }
 0x4de   : > { %16959 = vst [vmem:[#allocation528_spill] sm:$0xff] %v12446_v59  ;;  %v12466_v59 = vsub.s32 0, %v12457_v49 }
 0x4df   : > { %9531 = vset.pattern.permute.xlu1 %v16922_v19  ;;  %v12515_v41 = vrot.slane %v414_v63, %v3283_v28  ;;  %v16977_v28 = vld [vmem:[#allocation12_spill] sm:$0xff]  ;;  %v12534_v62 = vrot.slane %v414_v63, %v3875_v20  ;;  %v16982_v20 = vld [vmem:[#allocation326_spill] sm:$0xff] }
 0x4e0   : > { %4730 = vperm.xlu1 %9531, %v12292_v57   ;;  %4814 = vperm.xlu0 %9558, %v12453_v7   ;;  %16964 = vst [vmem:[#allocation533_spill] sm:$0xff] %v12466_v59  ;;  %v12479_v9 = vrot.slane %v414_v63, %v12466_v59  ;;  %v2691_v59 = vsub.s32 3, %v12457_v49 }
 0x4e1   : > { %v12459_v8 = vpop.permute.xlu1 %3698 }
 0x4e2   : > { %16962 = vst [vmem:[#allocation531_spill] sm:$0xff] %v12459_v8  ;;  %v12475_v8 = vsub.s32 1, %v12457_v49  ;;  %v12513_v54 = vrot.slane %v414_v63, %v2691_v59 }
 0x4e4   : > { %9532 = vset.pattern.permute.xlu1 %v16921_v31  ;;  %4818 = vperm.xlu0 %9558, %v9833_v0   ;;  %16966 = vst [vmem:[#allocation535_spill] sm:$0xff] %v12475_v8  ;;  %v2099_v0 = vsub.s32 2, %v12457_v49  ;;  %v12490_v16 = vrot.slane %v414_v63, %v12475_v8 }
 0x4e5   : > { %4146 = vperm.xlu1 %9532, %v12321_v12   ;;  %v12469_v57 = vpop.permute.xlu1 %3706  ;;  %v12485_v12 = vpop.permute.xlu0 %3726 }
 0x4e6   : > { %16965 = vst [vmem:[#allocation534_spill] sm:$0xff] %v12469_v57  ;;  %16968 = vst [vmem:[#allocation537_spill] sm:$0xff] %v12485_v12  ;;  %v16969_v57 = vld [vmem:[#allocation23_spill] sm:$0xff]  ;;  %v12503_v12 = vld [vmem:[%s16039_s2] ss:$0 sm:$0xff] }
 0x4e7   : > { %v918_v13 = vmul.f32 %v12479_v9, %v16969_v57  ;;  %v16971_v57 = vld [vmem:[#allocation19_spill] sm:$0xff] }
 0x4e8   : > { %4830 = vperm.xlu0 %9558, %v9834_v40   ;;  %v12493_v40 = vrot.slane %v414_v63, %v2099_v0  ;;  %v917_v8 = vmul.f32 %v12479_v9, %v16971_v57  ;;  %v16972_v0 = vld [vmem:[#allocation145_spill] sm:$0xff] }
 0x4e9   : > { %4150 = vperm.xlu1 %9532, %v9835_v36   ;;  %v12483_v6 = vpop.permute.xlu1 %3714  ;;  %v1510_v26 = vmul.f32 %v12490_v16, %v16972_v0  ;;  %v4075_v43 = vpop.permute.xlu0 %4074 }
 0x4ea   : > { %16967 = vst [vmem:[#allocation536_spill] sm:$0xff] %v12483_v6  ;;  %v2101_v59 = vmul.f32 %v12493_v40, %v16977_v28  ;;  %v2693_v28 = vmul.f32 %v12513_v54, %v16981_v42  ;;  %v16983_v42 = vld [vmem:[#allocation147_spill] sm:$0xff] }
 0x4ec   : > { %4834 = vperm.xlu0 %9558, %v9836_v56   ;;  %v1016_v56 = vadd.f32 %v12503_v12, %v918_v13  ;;  %v1015_v13 = vadd.f32 %v12503_v12, %v917_v8 }
 0x4ed   : > { %9533 = vset.pattern.permute.xlu1 %v16922_v19  ;;  %v12498_v6 = vpop.permute.xlu1 %3722  ;;  %v12542_v53 = vpop.permute.xlu0 %4090 }
 0x4ee   : > { %16970 = vst [vmem:[#allocation23_spill] sm:$0xff] %v12498_v6  ;;  %4742 = vperm.xlu1 %9533, %v9835_v36   ;;  %v2102_v6 = vmul.f32 %v12493_v40, %v16973_v17  ;;  %v16975_v36 = vld [vmem:[#allocation146_spill] sm:$0xff]  ;;  %v1608_v3 = vadd.f32 %v1510_v26, %v1016_v56  ;;  %v5059_v17 = vsub.s32 7, %v12457_v49 }
 0x4ef   : > { %v1509_v0 = vmul.f32 %v12490_v16, %v16975_v36  ;;  %v3286_v36 = vmul.f32 %v12515_v41, %v16978_v46  ;;  %v16980_v56 = vld [vmem:[#allocation18_spill] sm:$0xff] }
 0x4f0   : > { %4846 = vperm.xlu0 %9558, %v9837_v39   ;;  %v16976_v39 = vld [vmem:[#allocation316_spill] sm:$0xff]  ;;  %v2200_v8 = vadd.f32 %v2102_v6, %v1608_v3  ;;  %v3878_v6 = vmul.f32 %v12534_v62, %v12198_v22  ;;  %v12546_v3 = vrot.slane %v414_v63, %v5059_v17 }
 0x4f1   : > { %v12518_v57 = vpop.permute.xlu1 %3730  ;;  %v2694_v4 = vmul.f32 %v12513_v54, %v16976_v39  ;;  %v919_v39 = vmul.f32 %v12479_v9, %v16980_v56 }
 0x4f2   : > { %16974 = vst [vmem:[#allocation19_spill] sm:$0xff] %v12518_v57  ;;  %9535 = vset.pattern.permute.xlu1 %v16921_v31  ;;  %v4467_v57 = vsub.s32 6, %v12457_v49 }
 0x4f3   : > { %4158 = vperm.xlu1 %9535, %v12330_v14   ;;  %v1607_v14 = vadd.f32 %v1509_v0, %v1015_v13  ;;  %v2792_v49 = vadd.f32 %v2694_v4, %v2200_v8  ;;  %v1511_v4 = vmul.f32 %v12490_v16, %v16983_v42  ;;  %v9839_v0 = vld [vmem:[%s10058_s8 + $0x160] sm:$0xff]  ;;  %v1017_v22 = vadd.f32 %v12503_v12, %v919_v39  ;;  %v4671_v8 = vpop.permute.xlu0 %4670 }
 0x4f4   : > { %4850 = vperm.xlu0 %9558, %v9838_v45   ;;  %v3285_v45 = vmul.f32 %v12515_v41, %v16982_v20 }
 0x4f5   : > { %v12536_v26 = vpop.permute.xlu1 %3738  ;;  %v2199_v46 = vadd.f32 %v2101_v59, %v1607_v14  ;;  %v3384_v13 = vadd.f32 %v3286_v36, %v2792_v49  ;;  %v3877_v59 = vmul.f32 %v12534_v62, %v12175_v50  ;;  %v5062_v14 = vmul.f32 %v12546_v3, %v4671_v8  ;;  %v16985_v49 = vld [vmem:[#allocation22_spill] sm:$0xff]  ;;  %v16986_v50 = vld [vmem:[#allocation320_spill] sm:$0xff] }
 0x4f6   : > { %16979 = vst [vmem:[#allocation145_spill] sm:$0xff] %v12536_v26  ;;  %v12551_v26 = vrot.slane %v414_v63, %v4467_v57  ;;  %v16984_v57 = vld [vmem:[#allocation14_spill] sm:$0xff]  ;;  %v920_v36 = vmul.f32 %v12479_v9, %v16985_v49  ;;  %v16987_v8 = vld [vmem:[#allocation148_spill] sm:$0xff] }
 0x4f7   : > { %9536 = vset.pattern.permute.xlu1 %v16922_v19  ;;  %v2791_v17 = vadd.f32 %v2693_v28, %v2199_v46  ;;  %v3976_v56 = vadd.f32 %v3878_v6, %v3384_v13  ;;  %v1609_v28 = vadd.f32 %v1511_v4, %v1017_v22  ;;  %v2695_v46 = vmul.f32 %v12513_v54, %v16986_v50  ;;  %v9840_v6 = vld [vmem:[%s10058_s8 + $0x180] sm:$0xff] }
 0x4f8   : > { %4746 = vperm.xlu1 %9536, %v12301_v2   ;;  %9566 = vset.pattern.permute.xlu0 %v16921_v31  ;;  %v2103_v2 = vmul.f32 %v12493_v40, %v16984_v57  ;;  %v4469_v39 = vmul.f32 %v12551_v26, %v4075_v43  ;;  %v16988_v57 = vld [vmem:[#allocation307_spill] sm:$0xff] }
 0x4f9   : > { %4250 = vperm.xlu0 %9566, %v9839_v0   ;;  %v3383_v42 = vadd.f32 %v3285_v45, %v2791_v17  ;;  %v3287_v4 = vmul.f32 %v12515_v41, %v16988_v57 }
 0x4fa   : > { %v4079_v63 = vpop.permute.xlu1 %4078  ;;  %v2201_v45 = vadd.f32 %v2103_v2, %v1609_v28  ;;  %v3879_v2 = vmul.f32 %v12534_v62, %v12213_v33  ;;  %v16991_v28 = vld [vmem:[#allocation27_spill] sm:$0xff]  ;;  %v16202_v33 = vmov 0.0  }
 0x4fb   : > { %v4470_v20 = vmul.f32 %v12551_v26, %v4079_v63  ;;  %v3975_v13 = vadd.f32 %v3877_v59, %v3383_v42  ;;  %v1512_v63 = vmul.f32 %v12490_v16, %v16987_v8  ;;  %v9842_v59 = vld [vmem:[%s10058_s8 + $0x1a0] sm:$0xff]  ;;  %v16993_v8 = vld [vmem:[#allocation313_spill] sm:$0xff] }
 0x4fc   : > { %9537 = vset.pattern.permute.xlu1 %v16921_v31  ;;  %v2793_v50 = vadd.f32 %v2695_v46, %v2201_v45  ;;  %v16990_v42 = vld [vmem:[#allocation26_spill] sm:$0xff]  ;;  %v2696_v45 = vmul.f32 %v12513_v54, %v16993_v8  ;;  %v4675_v8 = vpop.permute.xlu0 %4674 }
 0x4fd   : > { %v4568_v0 = vadd.f32 %v4470_v20, %v3976_v56  ;;  %4162 = vperm.xlu1 %9537, %v12339_v11   ;;  %4266 = vperm.xlu0 %9566, %v9840_v6   ;;  %v4567_v22 = vadd.f32 %v4469_v39, %v3975_v13  ;;  %v1018_v56 = vadd.f32 %v12503_v12, %v920_v36  ;;  %v16989_v20 = vld [vmem:[#allocation16_spill] sm:$0xff]  ;;  %v9841_v6 = vld [vmem:[%s10058_s8 + $0xb8] sm:$0xff]  ;;  %v16992_v13 = vld [vmem:[#allocation150_spill] sm:$0xff] }
 0x4fe   : > { %v2104_v11 = vmul.f32 %v12493_v40, %v16989_v20  ;;  %v922_v39 = vmul.f32 %v12479_v9, %v16990_v42  ;;  %v921_v36 = vmul.f32 %v12479_v9, %v16991_v28  ;;  %v1514_v46 = vmul.f32 %v12490_v16, %v16992_v13  ;;  %v9843_v20 = vld [vmem:[%s10058_s8 + $0x1c0] sm:$0xff]  ;;  %v16995_v28 = vld [vmem:[#allocation20_spill] sm:$0xff] }
 0x4ff   : > { %v5160_v17 = vadd.f32 %v5062_v14, %v4568_v0  ;;  %v4667_v43 = vpop.permute.xlu1 %4666  ;;  %v1610_v0 = vadd.f32 %v1512_v63, %v1018_v56  ;;  %v16994_v56 = vld [vmem:[#allocation311_spill] sm:$0xff]  ;;  %v2106_v13 = vmul.f32 %v12493_v40, %v16995_v28 }
 0x500   : > { %v5061_v49 = vmul.f32 %v12546_v3, %v4667_v43  ;;  %v3385_v43 = vadd.f32 %v3287_v4, %v2793_v50  ;;  %v1020_v50 = vadd.f32 %v12503_v12, %v922_v39 }
 0x501   : > { %4166 = vperm.xlu1 %9537, %v9841_v6   ;;  %4282 = vperm.xlu0 %9566, %v9842_v59   ;;  %vm5258_vm0 = vcmp.ge.f32.partialorder %v5160_v17, 1.0  ;;  %v2202_v63 = vadd.f32 %v2104_v11, %v1610_v0  ;;  %v3288_v59 = vmul.f32 %v12515_v41, %v16994_v56  ;;  %v5063_v11 = vmul.f32 %v12546_v3, %v4675_v8  ;;  %v17001_v8 = vld [vmem:[#allocation31_spill] sm:$0xff] }
 0x502   : > { %v5159_v14 = vadd.f32 %v5061_v49, %v4567_v22  ;;  %v8653_v22 = vsel %vm5258_vm0, 1.0, %v16202_v33  ;;  %v3977_v42 = vadd.f32 %v3879_v2, %v3385_v43  ;;  %v16996_v2 = vld [vmem:[#allocation149_spill] sm:$0xff]  ;;  %v1612_v39 = vadd.f32 %v1514_v46, %v1020_v50  ;;  %v17000_v46 = vld [vmem:[#allocation315_spill] sm:$0xff] }
 0x503   : > { %v16997_v43 = vld [vmem:[#allocation317_spill] sm:$0xff] }
 0x504   : > { %vm5257_vm1 = vcmp.ge.f32.partialorder %v5159_v14, 1.0  ;;  %v4083_v57 = vpop.permute.xlu1 %4082  ;;  %v1019_v14 = vadd.f32 %v12503_v12, %v921_v36  ;;  %v2698_v36 = vmul.f32 %v12513_v54, %v16997_v43  ;;  %v17002_v43 = vld [vmem:[#allocation324_spill] sm:$0xff] }
 0x505   : > { %v8652_v17 = vsel %vm5257_vm1, 1.0, %v16202_v33  ;;  %v4471_v49 = vmul.f32 %v12551_v26, %v4083_v57  ;;  %9538 = vset.pattern.permute.xlu1 %v16922_v19  ;;  %4298 = vperm.xlu0 %9566, %v9843_v20   ;;  %v2794_v57 = vadd.f32 %v2696_v45, %v2202_v63  ;;  %v3880_v20 = vmul.f32 %v12534_v62, %v12181_v37 }
 0x506   : > { %v5551_v4 = vpack.c.bf16 %v8653_v22, %v8652_v17  ;;  %4758 = vperm.xlu1 %9538, %v9841_v6   ;;  %v1513_v6 = vmul.f32 %v12490_v16, %v16996_v2  ;;  %v9844_v17 = vld [vmem:[%s10058_s8 + $0x1e0] sm:$0xff]  ;;  %v16998_v22 = vmov 0   ;;  %v923_v2 = vmul.f32 %v12479_v9, %v17001_v8  ;;  %v9846_v8 = vld [vmem:[%s10058_s8 + $0x190] sm:$0xff] }
 0x507   : > { %v4569_v0 = vadd.f32 %v4471_v49, %v3977_v42  ;;  %v3386_v45 = vadd.f32 %v3288_v59, %v2794_v57  ;;  %v16999_v49 = vld [vmem:[#allocation21_spill] sm:$0xff]  ;;  %v2204_v42 = vadd.f32 %v2106_v13, %v1612_v39  ;;  %v3882_v13 = vmul.f32 %v12534_v62, %v12188_v48  ;;  %v17004_v48 = vld [vmem:[#allocation151_spill] sm:$0xff] }
 0x508   : > { %v4087_v56 = vpop.permute.xlu1 %4086  ;;  %8758 = vmatmul.mubr.msk.bf16.vlgmr.msra.gmra.mrb[0].mxu0 %vm5660_vm2, %v5551_v4  ;;  %v2105_v63 = vmul.f32 %v12493_v40, %v16999_v49  ;;  %v3290_v4 = vmul.f32 %v12515_v41, %v17000_v46  ;;  %v1611_v59 = vadd.f32 %v1513_v6, %v1019_v14  ;;  %v9845_v49 = vld [vmem:[%s10058_s8 + $0x188] sm:$0xff]  ;;  %v4687_v46 = vpop.permute.xlu0 %4686 }
 0x509   : > { %4314 = vperm.xlu0 %9566, %v9844_v17   ;;  %5850 = vmatprep.mubr.bf16.mxu0 %v16998_v22  ;;  %v4472_v37 = vmul.f32 %v12551_v26, %v4087_v56  ;;  %v3978_v50 = vadd.f32 %v3880_v20, %v3386_v45  ;;  %v5161_v28 = vadd.f32 %v5063_v11, %v4569_v0  ;;  %v17003_v14 = vld [vmem:[#allocation439_spill] sm:$0xff] }
 0x50a   : > { %9540 = vset.pattern.permute.xlu1 %v16921_v31  ;;  %v2796_v57 = vadd.f32 %v2698_v36, %v2204_v42  ;;  %v2697_v17 = vmul.f32 %v12513_v54, %v17002_v43  ;;  %v2203_v20 = vadd.f32 %v2105_v63, %v1611_v59  ;;  %v3289_v11 = vmul.f32 %v12515_v41, %v17003_v14  ;;  %v17005_v59 = vld [vmem:[#allocation25_spill] sm:$0xff] }
 0x50b   : > { %4174 = vperm.xlu1 %9540, %v12373_v52   ;;  %v4570_v52 = vadd.f32 %v4472_v37, %v3978_v50  ;;  %vm5259_vm3 = vcmp.ge.f32.partialorder %v5161_v28, 1.0  ;;  %v1021_v36 = vadd.f32 %v12503_v12, %v923_v2  ;;  %v1515_v45 = vmul.f32 %v12490_v16, %v17004_v48 }
 0x50c   : > { %v3388_v0 = vadd.f32 %v3290_v4, %v2796_v57  ;;  %v2795_v37 = vadd.f32 %v2697_v17, %v2203_v20  ;;  %v3881_v63 = vmul.f32 %v12534_v62, %v12225_v24  ;;  %v5066_v4 = vmul.f32 %v12546_v3, %v4687_v46  ;;  %v17006_v17 = vld [vmem:[#allocation30_spill] sm:$0xff]  ;;  %v17010_v46 = vld [vmem:[#allocation24_spill] sm:$0xff] }
 0x50d   : > { %v4679_v56 = vpop.permute.xlu1 %4678  ;;  %9580 = vset.pattern.permute.xlu0 %v16922_v19  ;;  %v2107_v57 = vmul.f32 %v12493_v40, %v17005_v59  ;;  %v4473_v24 = vmul.f32 %v12551_v26, %v12542_v53  ;;  %v17008_v53 = vld [vmem:[#allocation152_spill] sm:$0xff] }
 0x50e   : > { %v5064_v39 = vmul.f32 %v12546_v3, %v4679_v56  ;;  %4862 = vperm.xlu0 %9580, %v9845_v49   ;;  %v3980_v42 = vadd.f32 %v3882_v13, %v3388_v0  ;;  %v3387_v56 = vadd.f32 %v3289_v11, %v2795_v37  ;;  %v924_v13 = vmul.f32 %v12479_v9, %v17006_v17  ;;  %v17007_v49 = vld [vmem:[#allocation328_spill] sm:$0xff]  ;;  %v9847_v0 = vld [vmem:[%s10058_s8 + $0x1a8] sm:$0xff] }
 0x50f   : > { %9541 = vset.pattern.permute.xlu1 %v16922_v19  ;;  %v2699_v20 = vmul.f32 %v12513_v54, %v17007_v49  ;;  %v1516_v11 = vmul.f32 %v12490_v16, %v17008_v53  ;;  %v9849_v59 = vld [vmem:[%s10058_s8 + $0x1b0] sm:$0xff] }
 0x510   : > { %v5162_v6 = vadd.f32 %v5064_v39, %v4570_v52  ;;  %4762 = vperm.xlu1 %9541, %v12352_v10   ;;  %v8654_v10 = vsel %vm5259_vm3, 1.0, %v16202_v33  ;;  %v1613_v39 = vadd.f32 %v1515_v45, %v1021_v36  ;;  %v3979_v14 = vadd.f32 %v3881_v63, %v3387_v56 }
 0x511   : > { %v1022_v63 = vadd.f32 %v12503_v12, %v924_v13  ;;  %v17013_v13 = vld [vmem:[#allocation154_spill] sm:$0xff] }
 0x512   : > { %vm5260_vm4 = vcmp.ge.f32.partialorder %v5162_v6, 1.0  ;;  %v4095_v50 = vpop.permute.xlu1 %4094  ;;  %4866 = vperm.xlu0 %9580, %v9846_v8   ;;  %v2205_v37 = vadd.f32 %v2107_v57, %v1613_v39  ;;  %v4571_v45 = vadd.f32 %v4473_v24, %v3979_v14  ;;  %v9848_v8 = vld [vmem:[%s10058_s8 + $0xd8] sm:$0xff]  ;;  %v17011_v57 = vld [vmem:[#allocation34_spill] sm:$0xff]  ;;  %v17012_v24 = vld [vmem:[#allocation35_spill] sm:$0xff] }
 0x513   : > { %v8655_v28 = vsel %vm5260_vm4, 1.0, %v16202_v33  ;;  %v4474_v2 = vmul.f32 %v12551_v26, %v4095_v50  ;;  %v2108_v50 = vmul.f32 %v12493_v40, %v17010_v46  ;;  %v926_v56 = vmul.f32 %v12479_v9, %v17011_v57  ;;  %v17014_v39 = vld [vmem:[#allocation321_spill] sm:$0xff] }
 0x514   : > { %v5552_v43 = vpack.c.bf16 %v8655_v28, %v8654_v10  ;;  %9542 = vset.pattern.permute.xlu1 %v16921_v31  ;;  %v2797_v10 = vadd.f32 %v2699_v20, %v2205_v37  ;;  %v4691_v28 = vpop.permute.xlu0 %4690  ;;  %v1614_v17 = vadd.f32 %v1516_v11, %v1022_v63  ;;  %v2700_v49 = vmul.f32 %v12513_v54, %v17014_v39 }
 0x515   : > { %v4572_v52 = vadd.f32 %v4474_v2, %v3980_v42  ;;  %4178 = vperm.xlu1 %9542, %v12382_v23   ;;  %v17009_v23 = vld [vmem:[#allocation440_spill] sm:$0xff] }
 0x516   : > { %4878 = vperm.xlu0 %9580, %v9847_v0   ;;  %8759 = vmatmul.mubr.msk.bf16.gmra.mrb[4].mxu0 %vm5660_vm2, %v5552_v43  ;;  %v3291_v36 = vmul.f32 %v12515_v41, %v17009_v23  ;;  %v925_v43 = vmul.f32 %v12479_v9, %v17012_v24  ;;  %v2206_v14 = vadd.f32 %v2108_v50, %v1614_v17  ;;  %v17018_v17 = vld [vmem:[#allocation325_spill] sm:$0xff] }
 0x517   : > { %v5164_v6 = vadd.f32 %v5066_v4, %v4572_v52  ;;  %v4683_v48 = vpop.permute.xlu1 %4682  ;;  %5860 = vmatprep.mubr.bf16.mxu0 %v16998_v22  ;;  %v3883_v4 = vmul.f32 %v12534_v62, %v12240_v29  ;;  %v1518_v52 = vmul.f32 %v12490_v16, %v17013_v13  ;;  %v3884_v50 = vmul.f32 %v12534_v62, %v12194_v30 }
 0x518   : > { %v5065_v42 = vmul.f32 %v12546_v3, %v4683_v48  ;;  %v3389_v29 = vadd.f32 %v3291_v36, %v2797_v10  ;;  %v17015_v48 = vld [vmem:[#allocation319_spill] sm:$0xff]  ;;  %v1024_v36 = vadd.f32 %v12503_v12, %v926_v56  ;;  %v2798_v46 = vadd.f32 %v2700_v49, %v2206_v14  ;;  %v17019_v49 = vld [vmem:[#allocation29_spill] sm:$0xff] }
 0x519   : > { %4182 = vperm.xlu1 %9542, %v9848_v8   ;;  %vm5262_vm5 = vcmp.ge.f32.partialorder %v5164_v6, 1.0  ;;  %v3292_v11 = vmul.f32 %v12515_v41, %v17015_v48  ;;  %v5067_v10 = vmul.f32 %v12546_v3, %v4691_v28  ;;  %v2702_v13 = vmul.f32 %v12513_v54, %v17018_v17  ;;  %v9851_v28 = vld [vmem:[%s10058_s8 + $0x1d0] sm:$0xff] }
 0x51a   : > { %v5163_v2 = vadd.f32 %v5065_v42, %v4571_v45  ;;  %4882 = vperm.xlu0 %9580, %v9849_v59   ;;  %v8657_v53 = vsel %vm5262_vm5, 1.0, %v16202_v33  ;;  %v3981_v37 = vadd.f32 %v3883_v4, %v3389_v29  ;;  %v9850_v45 = vld [vmem:[%s10058_s8 + $0x1c8] sm:$0xff]  ;;  %v17016_v42 = vld [vmem:[#allocation28_spill] sm:$0xff]  ;;  %v17017_v4 = vld [vmem:[#allocation153_spill] sm:$0xff]  ;;  %v1616_v24 = vadd.f32 %v1518_v52, %v1024_v36 }
 0x51b   : > { %v2110_v63 = vmul.f32 %v12493_v40, %v17016_v42  ;;  %v1517_v56 = vmul.f32 %v12490_v16, %v17017_v4  ;;  %v3390_v39 = vadd.f32 %v3292_v11, %v2798_v46  ;;  %v17020_v52 = vld [vmem:[#allocation323_spill] sm:$0xff]  ;;  %v3886_v36 = vmul.f32 %v12534_v62, %v12200_v47 }
 0x51c   : > { %vm5261_vm6 = vcmp.ge.f32.partialorder %v5163_v2, 1.0  ;;  %v4099_v20 = vpop.permute.xlu1 %4098  ;;  %v4107_v2 = vpop.permute.xlu0 %4106  ;;  %v9852_v46 = vld [vmem:[%s10058_s8 + $0x1e8] sm:$0xff] }
 0x51d   : > { %v8656_v0 = vsel %vm5261_vm6, 1.0, %v16202_v33  ;;  %v4475_v6 = vmul.f32 %v12551_v26, %v4099_v20  ;;  %9543 = vset.pattern.permute.xlu1 %v16922_v19  ;;  %v2208_v29 = vadd.f32 %v2110_v63, %v1616_v24  ;;  %v3294_v20 = vmul.f32 %v12515_v41, %v17020_v52  ;;  %v17024_v4 = vld [vmem:[#allocation155_spill] sm:$0xff]  ;;  %v17025_v52 = vld [vmem:[#allocation33_spill] sm:$0xff] }
 0x51e   : > { %v5553_v23 = vpack.c.bf16 %v8657_v53, %v8656_v0  ;;  %4774 = vperm.xlu1 %9543, %v9848_v8   ;;  %4894 = vperm.xlu0 %9580, %v9850_v45   ;;  %v1023_v8 = vadd.f32 %v12503_v12, %v925_v43  ;;  %v2109_v43 = vmul.f32 %v12493_v40, %v17019_v49  ;;  %v17021_v53 = vld [vmem:[#allocation39_spill] sm:$0xff] }
 0x51f   : > { %v4573_v59 = vadd.f32 %v4475_v6, %v3981_v37  ;;  %v3982_v14 = vadd.f32 %v3884_v50, %v3390_v39  ;;  %v927_v6 = vmul.f32 %v12479_v9, %v17021_v53  ;;  %v2800_v11 = vadd.f32 %v2702_v13, %v2208_v29  ;;  %v17026_v53 = vld [vmem:[#allocation38_spill] sm:$0xff] }
 0x520   : > { %v4103_v57 = vpop.permute.xlu1 %4102  ;;  %8760 = vmatmul.mubr.msk.bf16.gmra.mrb[8].mxu0 %vm5660_vm2, %v5553_v23  ;;  %v1615_v48 = vadd.f32 %v1517_v56, %v1023_v8  ;;  %v17022_v23 = vld [vmem:[#allocation332_spill] sm:$0xff]  ;;  %v12711_v42 = vpop.permute.xlu0 %4122  ;;  %v1519_v56 = vmul.f32 %v12490_v16, %v17024_v4  ;;  %v3885_v13 = vmul.f32 %v12534_v62, %v12255_v34  ;;  %v4477_v34 = vmul.f32 %v12551_v26, %v4107_v2 }
 0x521   : > { %5870 = vmatprep.mubr.bf16.mxu0 %v16998_v22  ;;  %v4476_v30 = vmul.f32 %v12551_v26, %v4103_v57  ;;  %v5165_v0 = vadd.f32 %v5067_v10, %v4573_v59  ;;  %v2701_v45 = vmul.f32 %v12513_v54, %v17022_v23  ;;  %v17023_v10 = vld [vmem:[#allocation330_spill] sm:$0xff]  ;;  %v3392_v57 = vadd.f32 %v3294_v20, %v2800_v11  ;;  %v17028_v2 = vld [vmem:[#allocation156_spill] sm:$0xff] }
 0x522   : > { %9545 = vset.pattern.permute.xlu1 %v16921_v31  ;;  %4898 = vperm.xlu0 %9580, %v9851_v28   ;;  %v2207_v50 = vadd.f32 %v2109_v43, %v1615_v48  ;;  %v3293_v59 = vmul.f32 %v12515_v41, %v17023_v10  ;;  %v1025_v47 = vadd.f32 %v12503_v12, %v927_v6  ;;  %v9853_v28 = vld [vmem:[%s10058_s8 + $0x1f0] sm:$0xff] }
 0x523   : > { %4190 = vperm.xlu1 %9545, %v12391_v5   ;;  %v4574_v5 = vadd.f32 %v4476_v30, %v3982_v14  ;;  %vm5263_vm7 = vcmp.ge.f32.partialorder %v5165_v0, 1.0  ;;  %v3984_v17 = vadd.f32 %v3886_v36, %v3392_v57  ;;  %v2111_v20 = vmul.f32 %v12493_v40, %v17025_v52  ;;  %v9854_v36 = vld [vmem:[%s10058_s8 + $0x200] sm:$0xff] }
 0x524   : > { %v2799_v24 = vadd.f32 %v2701_v45, %v2207_v50  ;;  %v4703_v39 = vpop.permute.xlu0 %4702  ;;  %v928_v6 = vmul.f32 %v12479_v9, %v17026_v53  ;;  %v1617_v11 = vadd.f32 %v1519_v56, %v1025_v47  ;;  %v17030_v47 = vld [vmem:[#allocation32_spill] sm:$0xff]  ;;  %v9855_v56 = vld [vmem:[%s10058_s8 + $0xf8] sm:$0xff]  ;;  %v17033_v52 = vld [vmem:[#allocation158_spill] sm:$0xff] }
 0x525   : > { %v4695_v37 = vpop.permute.xlu1 %4694  ;;  %v5070_v49 = vmul.f32 %v12546_v3, %v4703_v39  ;;  %v2112_v4 = vmul.f32 %v12493_v40, %v17030_v47 }
 0x526   : > { %v5068_v63 = vmul.f32 %v12546_v3, %v4695_v37  ;;  %4910 = vperm.xlu0 %9580, %v9852_v46   ;;  %v3391_v14 = vadd.f32 %v3293_v59, %v2799_v24  ;;  %v17027_v37 = vld [vmem:[#allocation336_spill] sm:$0xff]  ;;  %v2209_v50 = vadd.f32 %v2111_v20, %v1617_v11  ;;  %v1522_v20 = vmul.f32 %v12490_v16, %v17033_v52 }
 0x527   : > { %9546 = vset.pattern.permute.xlu1 %v16922_v19  ;;  %v2703_v23 = vmul.f32 %v12513_v54, %v17027_v37  ;;  %v17035_v37 = vld [vmem:[#allocation327_spill] sm:$0xff] }
 0x528   : > { %v5166_v8 = vadd.f32 %v5068_v63, %v4574_v5  ;;  %4778 = vperm.xlu1 %9546, %v12361_v44   ;;  %v8658_v44 = vsel %vm5263_vm7, 1.0, %v16202_v33  ;;  %v3983_v45 = vadd.f32 %v3885_v13, %v3391_v14  ;;  %v1520_v5 = vmul.f32 %v12490_v16, %v17028_v2  ;;  %v4707_v13 = vpop.permute.xlu0 %4706  ;;  %v17034_v14 = vld [vmem:[#allocation329_spill] sm:$0xff]  ;;  %v9857_v2 = vld [vmem:[%s10058_s8 + $0x220] sm:$0xff] }
 0x529   : > { %v2801_v24 = vadd.f32 %v2703_v23, %v2209_v50  ;;  %v3296_v23 = vmul.f32 %v12515_v41, %v17035_v37 }
 0x52a   : > { %vm5264_vm8 = vcmp.ge.f32.partialorder %v5166_v8, 1.0  ;;  %v4111_v30 = vpop.permute.xlu1 %4110  ;;  %4914 = vperm.xlu0 %9580, %v9853_v28   ;;  %v4575_v59 = vadd.f32 %v4477_v34, %v3983_v45  ;;  %v1026_v8 = vadd.f32 %v12503_v12, %v928_v6  ;;  %v17031_v28 = vld [vmem:[#allocation42_spill] sm:$0xff]  ;;  %v2704_v34 = vmul.f32 %v12513_v54, %v17034_v14  ;;  %v17041_v14 = vld [vmem:[#allocation47_spill] sm:$0xff] }
 0x52b   : > { %v8659_v43 = vsel %vm5264_vm8, 1.0, %v16202_v33  ;;  %v4478_v29 = vmul.f32 %v12551_v26, %v4111_v30  ;;  %v9856_v30 = vld [vmem:[%s10058_s8 + $0x210] sm:$0xff] }
 0x52c   : > { %v5554_v0 = vpack.c.bf16 %v8659_v43, %v8658_v44  ;;  %9547 = vset.pattern.permute.xlu1 %v16921_v31  ;;  %v17032_v44 = vld [vmem:[#allocation43_spill] sm:$0xff] }
 0x52d   : > { %v4576_v48 = vadd.f32 %v4478_v29, %v3984_v17  ;;  %4194 = vperm.xlu1 %9547, %v12400_v58   ;;  %v17029_v58 = vld [vmem:[#allocation334_spill] sm:$0xff]  ;;  %v3887_v17 = vmul.f32 %v12534_v62, %v12262_v51  ;;  %v929_v43 = vmul.f32 %v12479_v9, %v17032_v44  ;;  %v1618_v29 = vadd.f32 %v1520_v5, %v1026_v8 }
 0x52e   : > { %4922 = vperm.xlu0 %9580, %v9854_v36   ;;  %8761 = vmatmul.mubr.msk.bf16.gmra.mrb[12].mxu0 %vm5660_vm2, %v5554_v0  ;;  %v3295_v10 = vmul.f32 %v12515_v41, %v17029_v58  ;;  %v3888_v58 = vmul.f32 %v12534_v62, %v12215_v25 }
 0x52f   : > { %v5168_v63 = vadd.f32 %v5070_v49, %v4576_v48  ;;  %v4699_v46 = vpop.permute.xlu1 %4698  ;;  %5880 = vmatprep.mubr.bf16.mxu0 %v16998_v22  ;;  %v930_v49 = vmul.f32 %v12479_v9, %v17031_v28  ;;  %v2210_v53 = vadd.f32 %v2112_v4, %v1618_v29  ;;  %v1027_v47 = vadd.f32 %v12503_v12, %v929_v43  ;;  %v17037_v4 = vld [vmem:[#allocation157_spill] sm:$0xff]  ;;  %v17040_v43 = vld [vmem:[#allocation331_spill] sm:$0xff] }
 0x530   : > { %v5069_v57 = vmul.f32 %v12546_v3, %v4699_v46  ;;  %v3393_v51 = vadd.f32 %v3295_v10, %v2801_v24  ;;  %v5071_v10 = vmul.f32 %v12546_v3, %v4707_v13  ;;  %v9858_v13 = vld [vmem:[%s10058_s8 + $0x230] sm:$0xff]  ;;  %v17039_v28 = vld [vmem:[#allocation37_spill] sm:$0xff]  ;;  %v3298_v29 = vmul.f32 %v12515_v41, %v17040_v43 }
 0x531   : > { %4198 = vperm.xlu1 %9547, %v9855_v56   ;;  %vm5266_vm9 = vcmp.ge.f32.partialorder %v5168_v63, 1.0  ;;  %v1028_v5 = vadd.f32 %v12503_v12, %v930_v49  ;;  %v17036_v63 = vld [vmem:[#allocation36_spill] sm:$0xff]  ;;  %v2802_v50 = vadd.f32 %v2704_v34, %v2210_v53  ;;  %v2113_v49 = vmul.f32 %v12493_v40, %v17039_v28 }
 0x532   : > { %v5167_v39 = vadd.f32 %v5069_v57, %v4575_v59  ;;  %4930 = vperm.xlu0 %9580, %v9856_v30   ;;  %v8661_v48 = vsel %vm5266_vm9, 1.0, %v16202_v33  ;;  %v3985_v45 = vadd.f32 %v3887_v17, %v3393_v51  ;;  %v2114_v46 = vmul.f32 %v12493_v40, %v17036_v63  ;;  %v4719_v59 = vpop.permute.xlu0 %4718  ;;  %v17038_v17 = vld [vmem:[#allocation333_spill] sm:$0xff] }
 0x533   : > { %v1620_v24 = vadd.f32 %v1522_v20, %v1028_v5  ;;  %v3394_v30 = vadd.f32 %v3296_v23, %v2802_v50  ;;  %v931_v34 = vmul.f32 %v12479_v9, %v17041_v14  ;;  %v17044_v50 = vld [vmem:[#allocation159_spill] sm:$0xff] }
 0x534   : > { %vm5265_vm10 = vcmp.ge.f32.partialorder %v5167_v39, 1.0  ;;  %v4115_v0 = vpop.permute.xlu1 %4114  ;;  %v2706_v39 = vmul.f32 %v12513_v54, %v17038_v17  ;;  %v9860_v17 = vld [vmem:[%s10058_s8 + $0x208] sm:$0xff] }
 0x535   : > { %v8660_v6 = vsel %vm5265_vm10, 1.0, %v16202_v33  ;;  %v4479_v11 = vmul.f32 %v12551_v26, %v4115_v0  ;;  %9548 = vset.pattern.permute.xlu1 %v16922_v19  ;;  %v2212_v44 = vadd.f32 %v2114_v46, %v1620_v24  ;;  %v3986_v52 = vadd.f32 %v3888_v58, %v3394_v30 }
 0x536   : > { %v5555_v36 = vpack.c.bf16 %v8661_v48, %v8660_v6  ;;  %4790 = vperm.xlu1 %9548, %v9855_v56   ;;  %4938 = vperm.xlu0 %9580, %v9857_v2   ;;  %v1521_v56 = vmul.f32 %v12490_v16, %v17037_v4  ;;  %v17042_v6 = vld [vmem:[#allocation340_spill] sm:$0xff]  ;;  %v12795_v37 = vpop.permute.xlu0 %4722  ;;  %v17043_v2 = vld [vmem:[#allocation338_spill] sm:$0xff]  ;;  %v1523_v58 = vmul.f32 %v12490_v16, %v17044_v50 }
 0x537   : > { %v4577_v57 = vadd.f32 %v4479_v11, %v3985_v45  ;;  %v2804_v0 = vadd.f32 %v2706_v39, %v2212_v44  ;;  %v2705_v48 = vmul.f32 %v12513_v54, %v17042_v6  ;;  %v3890_v11 = vmul.f32 %v12534_v62, %v12231_v38  ;;  %v17045_v39 = vld [vmem:[#allocation41_spill] sm:$0xff] }
 0x538   : > { %v4119_v8 = vpop.permute.xlu1 %4118  ;;  %8762 = vmatmul.mubr.msk.bf16.gmra.mrb[16].mxu0 %vm5660_vm2, %v5555_v36  ;;  %v1619_v51 = vadd.f32 %v1521_v56, %v1027_v47  ;;  %v9859_v36 = vld [vmem:[%s10058_s8 + $0x1f8] sm:$0xff]  ;;  %v3297_v5 = vmul.f32 %v12515_v41, %v17043_v2  ;;  %v1029_v38 = vadd.f32 %v12503_v12, %v931_v34  ;;  %v5074_v4 = vmul.f32 %v12546_v3, %v4719_v59  ;;  %v17046_v59 = vld [vmem:[#allocation46_spill] sm:$0xff]  ;;  %v17049_v34 = vld [vmem:[#allocation160_spill] sm:$0xff] }
 0x539   : > { %5890 = vmatprep.mubr.bf16.mxu0 %v16998_v22  ;;  %v4480_v25 = vmul.f32 %v12551_v26, %v4119_v8  ;;  %v5169_v20 = vadd.f32 %v5071_v10, %v4577_v57  ;;  %v3396_v63 = vadd.f32 %v3298_v29, %v2804_v0  ;;  %v3889_v8 = vmul.f32 %v12534_v62, %v12268_v21  ;;  %v17047_v29 = vld [vmem:[#allocation344_spill] sm:$0xff]  ;;  %v9861_v6 = vld [vmem:[%s10058_s8 + $0x218] sm:$0xff] }
 0x53a   : > { %9549 = vset.pattern.permute.xlu1 %v16921_v31  ;;  %4946 = vperm.xlu0 %9580, %v9858_v13   ;;  %v2211_v45 = vadd.f32 %v2113_v49, %v1619_v51  ;;  %v2115_v30 = vmul.f32 %v12493_v40, %v17045_v39  ;;  %v4481_v21 = vmul.f32 %v12551_v26, %v12711_v42  ;;  %v12818_v13 = vpop.permute.xlu0 %4138  ;;  %v17048_v42 = vld [vmem:[#allocation50_spill] sm:$0xff]  ;;  %v17051_v2 = vld [vmem:[#allocation40_spill] sm:$0xff] }
 0x53b   : > { %4206 = vperm.xlu1 %9549, %v12408_v15   ;;  %v4578_v15 = vadd.f32 %v4480_v25, %v3986_v52  ;;  %vm5267_vm11 = vcmp.ge.f32.partialorder %v5169_v20, 1.0  ;;  %v3988_v57 = vadd.f32 %v3890_v11, %v3396_v63  ;;  %v932_v49 = vmul.f32 %v12479_v9, %v17046_v59  ;;  %v9862_v63 = vld [vmem:[%s10058_s8 + $0x118] sm:$0xff] }
 0x53c   : > { %v2803_v10 = vadd.f32 %v2705_v48, %v2211_v45  ;;  %v8662_v56 = vsel %vm5267_vm11, 1.0, %v16202_v33  ;;  %v1621_v43 = vadd.f32 %v1523_v58, %v1029_v38  ;;  %v2707_v52 = vmul.f32 %v12513_v54, %v17047_v29  ;;  %v17050_v48 = vld [vmem:[#allocation342_spill] sm:$0xff] }
 0x53d   : > { %v4711_v53 = vpop.permute.xlu1 %4710  ;;  %v934_v14 = vmul.f32 %v12479_v9, %v17048_v42  ;;  %v1524_v51 = vmul.f32 %v12490_v16, %v17049_v34  ;;  %v3299_v11 = vmul.f32 %v12515_v41, %v17050_v48  ;;  %v9653_v45 = vld [vmem:[%s16042_s5 + $0x4] ss:$8 sps:$4 sm:$0xff]   ;;  %v3891_v50 = vmul.f32 %v12534_v62, %v12276_v35  ;;  %v17056_v34 = vld [vmem:[#allocation44_spill] sm:$0xff] }
 0x53e   : > { %v5072_v23 = vmul.f32 %v12546_v3, %v4711_v53  ;;  %9595 = vset.pattern.permute.xlu0 %v16848_v60  ;;  %v3395_v25 = vadd.f32 %v3297_v5, %v2803_v10  ;;  %v2116_v5 = vmul.f32 %v12493_v40, %v17051_v2  ;;  %v12848_v58 = vpop.permute.xlu0 %4154  ;;  %9429 = vmatprep.subr.bf16.mxu1 %v9653_v45  ;;  %v17058_v2 = vld [vmem:[#allocation341_spill] sm:$0xff] }
 0x53f   : > { %9550 = vset.pattern.permute.xlu1 %v16922_v19  ;;  %3734 = vperm.xlu0 %9595, %v9859_v36   ;;  %v1030_v36 = vadd.f32 %v12503_v12, %v932_v49 }
 0x540   : > { %v5170_v46 = vadd.f32 %v5072_v23, %v4578_v15  ;;  %4794 = vperm.xlu1 %9550, %v12419_v1   ;;  %v3987_v20 = vadd.f32 %v3889_v8, %v3395_v25  ;;  %7221 = vmatprep.subr.bf16.mxu0 %v9653_v45  ;;  %v9656_v25 = vld [vmem:[%s16042_s5 + $0x14] ss:$8 sps:$4 sm:$0xff]  }
 0x542   : > { %vm5268_vm12 = vcmp.ge.f32.partialorder %v5170_v46, 1.0  ;;  %v4127_v47 = vpop.permute.xlu1 %4126  ;;  %v4579_v15 = vadd.f32 %v4481_v21, %v3987_v20  ;;  %v9655_v46 = vld [vmem:[%s16042_s5] ss:$8 sps:$4 sm:$0xff]   ;;  %v12871_v20 = vpop.permute.xlu0 %4734 }
 0x543   : > { %v8663_v24 = vsel %vm5268_vm12, 1.0, %v16202_v33  ;;  %v4482_v1 = vmul.f32 %v12551_v26, %v4127_v47  ;;  %3742 = vperm.xlu0 %9595, %v9860_v17   ;;  %v1622_v47 = vadd.f32 %v1524_v51, %v1030_v36  ;;  %9445 = vmatpush1.bf16.msra.mxu1 %v9655_v46  ;;  %v17054_v17 = vld [vmem:[#allocation162_spill] sm:$0xff]  ;;  %v2118_v51 = vmul.f32 %v12493_v40, %v17056_v34 }
 0x544   : > { %v5556_v28 = vpack.c.bf16 %v8663_v24, %v8662_v56  ;;  %9552 = vset.pattern.permute.xlu1 %v16921_v31  ;;  %v9863_v24 = vld [vmem:[%s10058_s8 + $0x228] sm:$0xff]  ;;  %v1526_v35 = vmul.f32 %v12490_v16, %v17054_v17  ;;  %7222 = vmatpush1.bf16.msra.mxu0 %v9655_v46  ;;  %v17059_v46 = vld [vmem:[#allocation45_spill] sm:$0xff] }
 0x545   : > { %v4580_v44 = vadd.f32 %v4482_v1, %v3988_v57  ;;  %4210 = vperm.xlu1 %9552, %v12443_v32   ;;  %v2213_v32 = vadd.f32 %v2115_v30, %v1621_v43  ;;  %v17052_v57 = vld [vmem:[#allocation51_spill] sm:$0xff]  ;;  %v1032_v1 = vadd.f32 %v12503_v12, %v934_v14  ;;  %v2214_v21 = vadd.f32 %v2116_v5, %v1622_v47 }
 0x546   : > { %8763 = vmatmul.mubr.msk.bf16.gmra.mrb[20].mxu0 %vm5660_vm2, %v5556_v28  ;;  %v933_v8 = vmul.f32 %v12479_v9, %v17052_v57  ;;  %v17055_v43 = vld [vmem:[#allocation335_spill] sm:$0xff]  ;;  %9430 = vmatprep.subr.bf16.mxu1 %v9656_v25 }
 0x547   : > { %v5172_v0 = vadd.f32 %v5074_v4, %v4580_v44  ;;  %v4715_v53 = vpop.permute.xlu1 %4714  ;;  %3750 = vperm.xlu0 %9595, %v9861_v6   ;;  %5900 = vmatprep.mubr.bf16.mxu0 %v16998_v22  ;;  %v2805_v38 = vadd.f32 %v2707_v52, %v2213_v32  ;;  %v17053_v4 = vld [vmem:[#allocation337_spill] sm:$0xff]  ;;  %v3300_v29 = vmul.f32 %v12515_v41, %v17055_v43  ;;  %v17060_v57 = vld [vmem:[#allocation339_spill] sm:$0xff] }
 0x548   : > { %v5073_v23 = vmul.f32 %v12546_v3, %v4715_v53  ;;  %v2708_v56 = vmul.f32 %v12513_v54, %v17053_v4  ;;  %v9658_v44 = vld [vmem:[%s16042_s5 + $0x10] ss:$8 sps:$4 sm:$0xff]   ;;  %v1031_v14 = vadd.f32 %v12503_v12, %v933_v8  ;;  %v3892_v6 = vmul.f32 %v12534_v62, %v12246_v27  ;;  %7223 = vmatprep.subr.bf16.mxu0 %v9656_v25  ;;  %v12901_v4 = vpop.permute.xlu0 %4738 }
 0x549   : > { %4214 = vperm.xlu1 %9552, %v9862_v63   ;;  %vm5270_vm13 = vcmp.ge.f32.partialorder %v5172_v0, 1.0  ;;  %v3397_v39 = vadd.f32 %v3299_v11, %v2805_v38  ;;  %v9864_v53 = vld [vmem:[%s10058_s8 + $0x238] sm:$0xff]  ;;  %9446 = vmatpush1.bf16.msra.mxu1 %v9658_v44  ;;  %v5075_v32 = vmul.f32 %v12546_v3, %v12795_v37  ;;  %v1624_v36 = vadd.f32 %v1526_v35, %v1032_v1  ;;  %v9661_v37 = vld [vmem:[%s16042_s5 + $0x20] ss:$8 sps:$4 sm:$0xff]  }
 0x54a   : > { %v5171_v10 = vadd.f32 %v5073_v23, %v4579_v15  ;;  %v8665_v59 = vsel %vm5270_vm13, 1.0, %v16202_v33  ;;  %v2806_v0 = vadd.f32 %v2708_v56, %v2214_v21  ;;  %v9659_v15 = vld [vmem:[%s16042_s5 + $0x24] ss:$8 sps:$4 sm:$0xff]   ;;  %v17057_v23 = vld [vmem:[#allocation161_spill] sm:$0xff]  ;;  %v2710_v27 = vmul.f32 %v12513_v54, %v17058_v2  ;;  %7224 = vmatpush1.bf16.msra.mxu0 %v9658_v44 }
 0x54b   : > { %3758 = vperm.xlu0 %9595, %v9863_v24   ;;  %v3989_v52 = vadd.f32 %v3891_v50, %v3397_v39  ;;  %v1525_v45 = vmul.f32 %v12490_v16, %v17057_v23  ;;  %9431 = vmatprep.subr.bf16.mxu1 %v9659_v15  ;;  %v2117_v38 = vmul.f32 %v12493_v40, %v17059_v46  ;;  %v9662_v24 = vld [vmem:[%s16042_s5 + $0x34] ss:$8 sps:$4 sm:$0xff]   ;;  %v17061_v1 = vld [vmem:[#allocation55_spill] sm:$0xff]  ;;  %v9664_v21 = vld [vmem:[%s16042_s5 + $0x30] ss:$8 sps:$4 sm:$0xff]  }
 0x54c   : > { %vm5269_vm14 = vcmp.ge.f32.partialorder %v5171_v10, 1.0  ;;  %v4131_v30 = vpop.permute.xlu1 %4130  ;;  %v3398_v5 = vadd.f32 %v3300_v29, %v2806_v0  ;;  %v2216_v50 = vadd.f32 %v2118_v51, %v1624_v36  ;;  %v9865_v10 = vld [vmem:[%s10058_s8 + $0x248] sm:$0xff]  ;;  %v3302_v8 = vmul.f32 %v12515_v41, %v17060_v57  ;;  %7225 = vmatprep.subr.bf16.mxu0 %v9659_v15  ;;  %v17062_v39 = vld [vmem:[#allocation348_spill] sm:$0xff]  ;;  %v9866_v43 = vld [vmem:[%s10058_s8 + $0x258] sm:$0xff]  ;;  %v12934_v15 = vpop.permute.xlu0 %4750 }
 0x54d   : > { %v8664_v28 = vsel %vm5269_vm14, 1.0, %v16202_v33  ;;  %v4483_v49 = vmul.f32 %v12551_v26, %v4131_v30  ;;  %9553 = vset.pattern.permute.xlu1 %v16922_v19  ;;  %9447 = vmatpush1.bf16.msra.mxu1 %v9661_v37  ;;  %v935_v17 = vmul.f32 %v12479_v9, %v17061_v1  ;;  %v2709_v30 = vmul.f32 %v12513_v54, %v17062_v39  ;;  %v17063_v29 = vld [vmem:[#allocation346_spill] sm:$0xff]  ;;  %v17064_v51 = vld [vmem:[#allocation163_spill] sm:$0xff]  ;;  %v17069_v1 = vld [vmem:[#allocation164_spill] sm:$0xff] }
 0x54e   : > { %v5557_v42 = vpack.c.bf16 %v8665_v59, %v8664_v28  ;;  %4806 = vperm.xlu1 %9553, %v9862_v63   ;;  %v3990_v47 = vadd.f32 %v3892_v6, %v3398_v5  ;;  %v2808_v35 = vadd.f32 %v2710_v27, %v2216_v50  ;;  %7226 = vmatpush1.bf16.msra.mxu0 %v9661_v37  ;;  %v9867_v27 = vld [vmem:[%s10058_s8 + $0x268] sm:$0xff]  ;;  %v17067_v57 = vld [vmem:[#allocation58_spill] sm:$0xff] }
 0x54f   : > { %3766 = vperm.xlu0 %9595, %v9864_v53   ;;  %v4581_v48 = vadd.f32 %v4483_v49, %v3989_v52  ;;  %v3894_v28 = vmul.f32 %v12534_v62, %v12258_v55  ;;  %9432 = vmatprep.subr.bf16.mxu1 %v9662_v24  ;;  %v3301_v52 = vmul.f32 %v12515_v41, %v17063_v29  ;;  %v9665_v55 = vld [vmem:[%s16042_s5 + $0x44] ss:$8 sps:$4 sm:$0xff]   ;;  %v17065_v53 = vld [vmem:[#allocation49_spill] sm:$0xff] }
 0x550   : > { %v4135_v11 = vpop.permute.xlu1 %4134  ;;  %8764 = vmatmul.mubr.msk.bf16.gmra.mrb[24].mxu0 %vm5660_vm2, %v5557_v42  ;;  %7227 = vmatprep.subr.bf16.mxu0 %v9662_v24  ;;  %v3400_v42 = vadd.f32 %v3302_v8, %v2808_v35  ;;  %v1033_v34 = vadd.f32 %v12503_v12, %v935_v17  ;;  %v1527_v0 = vmul.f32 %v12490_v16, %v17064_v51  ;;  %v17072_v51 = vld [vmem:[#allocation496_spill] sm:$0xff] }
 0x551   : > { %5910 = vmatprep.mubr.bf16.mxu0 %v16998_v22  ;;  %v4484_v63 = vmul.f32 %v12551_v26, %v4135_v11  ;;  %v5173_v56 = vadd.f32 %v5075_v32, %v4581_v48  ;;  %9448 = vmatpush1.bf16.msra.mxu1 %v9664_v21  ;;  %v2119_v6 = vmul.f32 %v12493_v40, %v17065_v53  ;;  %v9667_v32 = vld [vmem:[%s16042_s5 + $0x40] ss:$8 sps:$4 sm:$0xff]  }
 0x552   : > { %9554 = vset.pattern.permute.xlu1 %v16921_v31  ;;  %7228 = vmatpush1.bf16.msra.mxu0 %v9664_v21  ;;  %v3992_v48 = vadd.f32 %v3894_v28, %v3400_v42  ;;  %v3893_v11 = vmul.f32 %v12534_v62, %v12285_v18  ;;  %v5078_v23 = vmul.f32 %v12546_v3, %v12871_v20  ;;  %v9668_v20 = vld [vmem:[%s16042_s5 + $0x54] ss:$8 sps:$4 sm:$0xff]  }
 0x553   : > { %4222 = vperm.xlu1 %9554, %v12453_v7   ;;  %3774 = vperm.xlu0 %9595, %v9865_v10   ;;  %v1623_v7 = vadd.f32 %v1525_v45, %v1031_v14  ;;  %v4582_v59 = vadd.f32 %v4484_v63, %v3990_v47  ;;  %vm5271_vm15 = vcmp.ge.f32.partialorder %v5173_v56, 1.0  ;;  %v4485_v37 = vmul.f32 %v12551_v26, %v12818_v13  ;;  %v17066_v63 = vld [vmem:[#allocation54_spill] sm:$0xff]  ;;  %v9868_v10 = vld [vmem:[%s10058_s8 + $0x130] sm:$0xff] }
 0x554   : > { %9433 = vmatprep.subr.bf16.mxu1 %v9665_v55  ;;  %7229 = vmatprep.subr.bf16.mxu0 %v9665_v55  ;;  %v8666_v45 = vsel %vm5271_vm15, 1.0, %v16202_v33  ;;  %v936_v46 = vmul.f32 %v12479_v9, %v17066_v63  ;;  %v9670_v13 = vld [vmem:[%s16042_s5 + $0x50] ss:$8 sps:$4 sm:$0xff]   ;;  %v938_v8 = vmul.f32 %v12479_v9, %v17067_v57  ;;  %v1528_v17 = vmul.f32 %v12490_v16, %v17069_v1  ;;  %v9673_v55 = vld [vmem:[%s16042_s5 + $0x60] ss:$8 sps:$4 sm:$0xff]  }
 0x555   : > { %v4727_v25 = vpop.permute.xlu1 %4726  ;;  %v2215_v44 = vadd.f32 %v2117_v38, %v1623_v7  ;;  %9449 = vmatpush1.bf16.msra.mxu1 %v9667_v32  ;;  %v1625_v38 = vadd.f32 %v1527_v0, %v1033_v34  ;;  %v17068_v47 = vld [vmem:[#allocation352_spill] sm:$0xff]  ;;  %v3895_v0 = vmul.f32 %v12534_v62, %v17072_v51  ;;  %v17078_v1 = vld [vmem:[#allocation314_spill] sm:$0xff]  ;;  %v9874_v51 = vld [vmem:[%s10058_s8 + $0x148] sm:$0xff] }
 0x556   : > { %v5076_v49 = vmul.f32 %v12546_v3, %v4727_v25  ;;  %7230 = vmatpush1.bf16.msra.mxu0 %v9667_v32  ;;  %v2711_v56 = vmul.f32 %v12513_v54, %v17068_v47  ;;  %9434 = vmatprep.subr.bf16.mxu1 %v9668_v20  ;;  %v17070_v25 = vld [vmem:[#allocation350_spill] sm:$0xff]  ;;  %v17077_v47 = vld [vmem:[#allocation52_spill] sm:$0xff] }
 0x557   : > { %9555 = vset.pattern.permute.xlu1 %v16922_v19  ;;  %3782 = vperm.xlu0 %9595, %v9866_v43   ;;  %v2217_v7 = vadd.f32 %v2119_v6, %v1625_v38  ;;  %v3303_v21 = vmul.f32 %v12515_v41, %v17070_v25  ;;  %v12975_v43 = vld [vmem:[%s16039_s2] ss:$0 sm:$0xff]  ;;  %v17073_v6 = vld [vmem:[#allocation59_spill] sm:$0xff] }
 0x558   : > { %v5174_v14 = vadd.f32 %v5076_v49, %v4582_v59  ;;  %4810 = vperm.xlu1 %9555, %v12428_v61   ;;  %v2807_v61 = vadd.f32 %v2709_v30, %v2215_v44  ;;  %v9869_v30 = vld [vmem:[%s10058_s8 + $0x278] sm:$0xff]  ;;  %v12966_v59 = vpop.permute.xlu0 %4754  ;;  %v9671_v44 = vld [vmem:[%s16042_s5 + $0x64] ss:$8 sps:$4 sm:$0xff]   ;;  %7231 = vmatprep.subr.bf16.mxu0 %v9668_v20  ;;  %v1034_v29 = vadd.f32 %v12975_v43, %v936_v46 }
 0x559   : > { %9450 = vmatpush1.bf16.msra.mxu1 %v9670_v13  ;;  %v2809_v34 = vadd.f32 %v2711_v56, %v2217_v7  ;;  %v937_v32 = vmul.f32 %v12479_v9, %v17073_v6  ;;  %v9676_v46 = vld [vmem:[%s16042_s5 + $0x70] ss:$8 sps:$4 sm:$0xff]   ;;  %v17076_v38 = vld [vmem:[#allocation343_spill] sm:$0xff]  ;;  %v2122_v56 = vmul.f32 %v12493_v40, %v17077_v47  ;;  %v5079_v7 = vmul.f32 %v12546_v3, %v12901_v4 }
 0x55a   : > { %vm5272_vm0 = vcmp.ge.f32.partialorder %v5174_v14, 1.0  ;;  %v4143_v12 = vpop.permute.xlu1 %4142  ;;  %v3399_v18 = vadd.f32 %v3301_v52, %v2807_v61  ;;  %v17071_v52 = vld [vmem:[#allocation48_spill] sm:$0xff]  ;;  %v9871_v14 = vld [vmem:[%s10058_s8 + $0x138] sm:$0xff]  ;;  %7232 = vmatpush1.bf16.msra.mxu0 %v9670_v13  ;;  %9435 = vmatprep.subr.bf16.mxu1 %v9671_v44  ;;  %v1626_v61 = vadd.f32 %v1528_v17, %v1034_v29  ;;  %v3896_v17 = vmul.f32 %v12534_v62, %v17078_v1  ;;  %v9677_v25 = vld [vmem:[%s16042_s5 + $0x84] ss:$8 sps:$4 sm:$0xff]  }
 0x55b   : > { %v8667_v36 = vsel %vm5272_vm0, 1.0, %v16202_v33  ;;  %v4486_v2 = vmul.f32 %v12551_v26, %v4143_v12  ;;  %3790 = vperm.xlu0 %9595, %v9867_v27   ;;  %v2120_v42 = vmul.f32 %v12493_v40, %v17071_v52  ;;  %7233 = vmatprep.subr.bf16.mxu0 %v9671_v44  ;;  %v9872_v12 = vld [vmem:[%s10058_s8 + $0x288] sm:$0xff]  ;;  %v17080_v44 = vld [vmem:[#allocation349_spill] sm:$0xff] }
 0x55c   : > { %v5558_v5 = vpack.c.bf16 %v8667_v36, %v8666_v45  ;;  %9556 = vset.pattern.permute.xlu1 %v16921_v31  ;;  %v3991_v24 = vadd.f32 %v3893_v11, %v3399_v18  ;;  %v17075_v45 = vld [vmem:[#allocation166_spill] sm:$0xff]  ;;  %v9674_v18 = vld [vmem:[%s16042_s5 + $0x74] ss:$8 sps:$4 sm:$0xff]   ;;  %v13007_v13 = vpop.permute.xlu0 %4170  ;;  %v2714_v29 = vmul.f32 %v12513_v54, %v17080_v44 }
 0x55d   : > { %v4584_v50 = vadd.f32 %v4486_v2, %v3992_v48  ;;  %4226 = vperm.xlu1 %9556, %v9868_v10   ;;  %v17074_v48 = vld [vmem:[#allocation345_spill] sm:$0xff]  ;;  %v1530_v36 = vmul.f32 %v12490_v16, %v17075_v45  ;;  %v3401_v2 = vadd.f32 %v3303_v21, %v2809_v34  ;;  %9451 = vmatpush1.bf16.msra.mxu1 %v9673_v55  ;;  %v9679_v4 = vld [vmem:[%s16042_s5 + $0x80] ss:$8 sps:$4 sm:$0xff]   ;;  %v9683_v1 = vld [vmem:[%s16042_s5 + $0xa4] ss:$8 sps:$4 sm:$0xff]  }
 0x55e   : > { %8765 = vmatmul.mubr.msk.bf16.gmra.mrb[28].mxu0 %vm5660_vm2, %v5558_v5  ;;  %v4583_v28 = vadd.f32 %v4485_v37, %v3991_v24  ;;  %v2712_v11 = vmul.f32 %v12513_v54, %v17074_v48  ;;  %v2218_v37 = vadd.f32 %v2120_v42, %v1626_v61  ;;  %9436 = vmatprep.subr.bf16.mxu1 %v9674_v18  ;;  %v17079_v21 = vld [vmem:[#allocation165_spill] sm:$0xff]  ;;  %v9875_v48 = vld [vmem:[%s10058_s8 + $0x250] sm:$0xff] }
 0x55f   : > { %v5176_v35 = vadd.f32 %v5078_v23, %v4584_v50  ;;  %v4731_v39 = vpop.permute.xlu1 %4730  ;;  %3798 = vperm.xlu0 %9595, %v9869_v30   ;;  %5920 = vmatprep.mubr.bf16.mxu0 %v16998_v22  ;;  %v1036_v23 = vadd.f32 %v12975_v43, %v938_v8  ;;  %v3304_v50 = vmul.f32 %v12515_v41, %v17076_v38  ;;  %v9873_v30 = vld [vmem:[%s10058_s8 + $0x240] sm:$0xff] }
 0x560   : > { %v5077_v49 = vmul.f32 %v12546_v3, %v4731_v39  ;;  %7234 = vmatpush1.bf16.msra.mxu0 %v9673_v55  ;;  %v3993_v10 = vadd.f32 %v3895_v0, %v3401_v2  ;;  %v1035_v8 = vadd.f32 %v12975_v43, %v937_v32  ;;  %v2810_v24 = vadd.f32 %v2712_v11, %v2218_v37  ;;  %v17082_v0 = vld [vmem:[#allocation347_spill] sm:$0xff]  ;;  %v13037_v32 = vpop.permute.xlu0 %4186  ;;  %v9680_v11 = vld [vmem:[%s16042_s5 + $0x94] ss:$8 sps:$4 sm:$0xff]  }
 0x561   : > { %4230 = vperm.xlu1 %9556, %v9871_v14   ;;  %vm5274_vm1 = vcmp.ge.f32.partialorder %v5176_v35, 1.0  ;;  %7235 = vmatprep.subr.bf16.mxu0 %v9674_v18  ;;  %v17084_v18 = vld [vmem:[#allocation356_spill] sm:$0xff] }
 0x562   : > { %v5175_v53 = vadd.f32 %v5077_v49, %v4583_v28  ;;  %v8669_v20 = vsel %vm5274_vm1, 1.0, %v16202_v33  ;;  %v1529_v28 = vmul.f32 %v12490_v16, %v17079_v21  ;;  %v1628_v49 = vadd.f32 %v1530_v36, %v1036_v23  ;;  %9452 = vmatpush1.bf16.msra.mxu1 %v9676_v46 }
 0x563   : > { %3806 = vperm.xlu0 %9595, %v9872_v12   ;;  %v3402_v52 = vadd.f32 %v3304_v50, %v2810_v24  ;;  %9437 = vmatprep.subr.bf16.mxu1 %v9677_v25  ;;  %v17083_v12 = vld [vmem:[#allocation63_spill] sm:$0xff]  ;;  %v2713_v37 = vmul.f32 %v12513_v54, %v17084_v18  ;;  %v17086_v50 = vld [vmem:[#allocation354_spill] sm:$0xff] }
 0x564   : > { %vm5273_vm3 = vcmp.ge.f32.partialorder %v5175_v53, 1.0  ;;  %v4147_v27 = vpop.permute.xlu1 %4146  ;;  %v2220_v34 = vadd.f32 %v2122_v56, %v1628_v49  ;;  %7236 = vmatpush1.bf16.msra.mxu0 %v9676_v46  ;;  %v3306_v53 = vmul.f32 %v12515_v41, %v17082_v0  ;;  %v939_v23 = vmul.f32 %v12479_v9, %v17083_v12  ;;  %v9876_v56 = vld [vmem:[%s10058_s8 + $0x140] sm:$0xff]  ;;  %v9878_v0 = vld [vmem:[%s10058_s8 + $0x270] sm:$0xff] }
 0x565   : > { %v8668_v5 = vsel %vm5273_vm3, 1.0, %v16202_v33  ;;  %v4487_v63 = vmul.f32 %v12551_v26, %v4147_v27  ;;  %9557 = vset.pattern.permute.xlu1 %v16922_v19  ;;  %v3994_v6 = vadd.f32 %v3896_v17, %v3402_v52  ;;  %7237 = vmatprep.subr.bf16.mxu0 %v9677_v25  ;;  %v1627_v45 = vadd.f32 %v1529_v28, %v1035_v8  ;;  %v9682_v27 = vld [vmem:[%s16042_s5 + $0x90] ss:$8 sps:$4 sm:$0xff]   ;;  %v13056_v8 = vpop.permute.xlu0 %4766  ;;  %v9877_v24 = vld [vmem:[%s10058_s8 + $0x260] sm:$0xff] }
 0x566   : > { %v5559_v57 = vpack.c.bf16 %v8669_v20, %v8668_v5  ;;  %4822 = vperm.xlu1 %9557, %v9871_v14   ;;  %v17081_v14 = vld [vmem:[#allocation53_spill] sm:$0xff]  ;;  %v2812_v36 = vadd.f32 %v2714_v29, %v2220_v34  ;;  %9453 = vmatpush1.bf16.msra.mxu1 %v9679_v4  ;;  %v17085_v5 = vld [vmem:[#allocation318_spill] sm:$0xff]  ;;  %v1037_v17 = vadd.f32 %v12975_v43, %v939_v23  ;;  %v17091_v12 = vld [vmem:[#allocation360_spill] sm:$0xff] }
 0x567   : > { %9610 = vset.pattern.permute.xlu0 %v16922_v19  ;;  %v4585_v35 = vadd.f32 %v4487_v63, %v3993_v10  ;;  %v2121_v55 = vmul.f32 %v12493_v40, %v17081_v14  ;;  %v3898_v20 = vmul.f32 %v12534_v62, %v17085_v5  ;;  %9438 = vmatprep.subr.bf16.mxu1 %v9680_v11  ;;  %v9685_v25 = vld [vmem:[%s16042_s5 + $0xa0] ss:$8 sps:$4 sm:$0xff]  }
 0x568   : > { %v4151_v39 = vpop.permute.xlu1 %4150  ;;  %4954 = vperm.xlu0 %9610, %v9873_v30   ;;  %8766 = vmatmul.mubr.msk.bf16.gmra.mrb[32].mxu0 %vm5660_vm2, %v5559_v57  ;;  %v3305_v10 = vmul.f32 %v12515_v41, %v17086_v50  ;;  %v3404_v57 = vadd.f32 %v3306_v53, %v2812_v36  ;;  %v17089_v49 = vld [vmem:[#allocation498_spill] sm:$0xff]  ;;  %v4489_v34 = vmul.f32 %v12551_v26, %v12848_v58  ;;  %v9688_v58 = vld [vmem:[%s16042_s5 + $0xb0] ss:$8 sps:$4 sm:$0xff]  }
 0x569   : > { %5930 = vmatprep.mubr.bf16.mxu0 %v16998_v22  ;;  %v4488_v42 = vmul.f32 %v12551_v26, %v4151_v39  ;;  %v5177_v61 = vadd.f32 %v5079_v7, %v4585_v35  ;;  %v2219_v38 = vadd.f32 %v2121_v55, %v1627_v45  ;;  %7238 = vmatpush1.bf16.msra.mxu0 %v9679_v4  ;;  %v17087_v7 = vld [vmem:[#allocation167_spill] sm:$0xff]  ;;  %v17088_v39 = vld [vmem:[#allocation57_spill] sm:$0xff]  ;;  %v17090_v53 = vld [vmem:[#allocation62_spill] sm:$0xff]  ;;  %v13094_v36 = vpop.permute.xlu0 %4770 }
 0x56a   : > { %9559 = vset.pattern.permute.xlu1 %v16921_v31  ;;  %v1531_v35 = vmul.f32 %v12490_v16, %v17087_v7  ;;  %v2123_v30 = vmul.f32 %v12493_v40, %v17088_v39  ;;  %9454 = vmatpush1.bf16.msra.mxu1 %v9682_v27  ;;  %v3996_v28 = vadd.f32 %v3898_v20, %v3404_v57  ;;  %v17093_v20 = vld [vmem:[#allocation358_spill] sm:$0xff]  ;;  %v17095_v7 = vld [vmem:[#allocation500_spill] sm:$0xff] }
 0x56b   : > { %4238 = vperm.xlu1 %9559, %v9874_v51   ;;  %v4586_v63 = vadd.f32 %v4488_v42, %v3994_v6  ;;  %vm5275_vm4 = vcmp.ge.f32.partialorder %v5177_v61, 1.0  ;;  %7239 = vmatprep.subr.bf16.mxu0 %v9680_v11  ;;  %v2811_v21 = vadd.f32 %v2713_v37, %v2219_v38  ;;  %v3897_v44 = vmul.f32 %v12534_v62, %v17089_v49  ;;  %v9879_v11 = vld [vmem:[%s10058_s8 + $0x150] sm:$0xff]  ;;  %v9880_v50 = vld [vmem:[%s10058_s8 + $0x280] sm:$0xff] }
 0x56c   : > { %4962 = vperm.xlu0 %9610, %v9875_v48   ;;  %9439 = vmatprep.subr.bf16.mxu1 %v9683_v1  ;;  %v5082_v4 = vmul.f32 %v12546_v3, %v12934_v15  ;;  %v8670_v52 = vsel %vm5275_vm4, 1.0, %v16202_v33  ;;  %v9686_v15 = vld [vmem:[%s16042_s5 + $0xb4] ss:$8 sps:$4 sm:$0xff]   ;;  %v940_v6 = vmul.f32 %v12479_v9, %v17090_v53  ;;  %v1629_v61 = vadd.f32 %v1531_v35, %v1037_v17 }
 0x56d   : > { %v4743_v2 = vpop.permute.xlu1 %4742  ;;  %7240 = vmatpush1.bf16.msra.mxu0 %v9682_v27  ;;  %v3403_v55 = vadd.f32 %v3305_v10, %v2811_v21  ;;  %v2715_v23 = vmul.f32 %v12513_v54, %v17091_v12  ;;  %v9689_v10 = vld [vmem:[%s16042_s5 + $0xc4] ss:$8 sps:$4 sm:$0xff]   ;;  %v3899_v35 = vmul.f32 %v12534_v62, %v17095_v7 }
 0x56e   : > { %v5080_v46 = vmul.f32 %v12546_v3, %v4743_v2  ;;  %9455 = vmatpush1.bf16.msra.mxu1 %v9685_v25  ;;  %v17092_v2 = vld [vmem:[#allocation168_spill] sm:$0xff]  ;;  %v2221_v18 = vadd.f32 %v2123_v30, %v1629_v61  ;;  %7241 = vmatprep.subr.bf16.mxu0 %v9683_v1  ;;  %v1038_v57 = vadd.f32 %v12975_v43, %v940_v6  ;;  %v9691_v1 = vld [vmem:[%s16042_s5 + $0xc0] ss:$8 sps:$4 sm:$0xff]  }
 0x56f   : > { %9560 = vset.pattern.permute.xlu1 %v16922_v19  ;;  %v3995_v45 = vadd.f32 %v3897_v44, %v3403_v55  ;;  %9440 = vmatprep.subr.bf16.mxu1 %v9686_v15  ;;  %v1532_v27 = vmul.f32 %v12490_v16, %v17092_v2  ;;  %v17096_v30 = vld [vmem:[#allocation66_spill] sm:$0xff]  ;;  %v17097_v21 = vld [vmem:[#allocation67_spill] sm:$0xff]  ;;  %v17098_v44 = vld [vmem:[#allocation353_spill] sm:$0xff] }
 0x570   : > { %v5178_v47 = vadd.f32 %v5080_v46, %v4586_v63  ;;  %4826 = vperm.xlu1 %9560, %v9876_v56   ;;  %4970 = vperm.xlu0 %9610, %v9877_v24   ;;  %v3307_v63 = vmul.f32 %v12515_v41, %v17093_v20  ;;  %v9881_v24 = vld [vmem:[%s10058_s8 + $0x158] sm:$0xff]  ;;  %v2813_v17 = vadd.f32 %v2715_v23, %v2221_v18  ;;  %v17101_v2 = vld [vmem:[#allocation60_spill] sm:$0xff] }
 0x571   : > { %v4587_v46 = vadd.f32 %v4489_v34, %v3995_v45  ;;  %7242 = vmatpush1.bf16.msra.mxu0 %v9685_v25  ;;  %v942_v25 = vmul.f32 %v12479_v9, %v17096_v30  ;;  %v1630_v49 = vadd.f32 %v1532_v27, %v1038_v57  ;;  %v9882_v34 = vld [vmem:[%s10058_s8 + $0x290] sm:$0xff]  ;;  %v2126_v27 = vmul.f32 %v12493_v40, %v17101_v2  ;;  %v17103_v57 = vld [vmem:[#allocation169_spill] sm:$0xff] }
 0x572   : > { %vm5276_vm5 = vcmp.ge.f32.partialorder %v5178_v47, 1.0  ;;  %v4159_v29 = vpop.permute.xlu1 %4158  ;;  %v17094_v47 = vld [vmem:[#allocation56_spill] sm:$0xff]  ;;  %9456 = vmatpush1.bf16.msra.mxu1 %v9688_v58  ;;  %7243 = vmatprep.subr.bf16.mxu0 %v9686_v15  ;;  %v5083_v20 = vmul.f32 %v12546_v3, %v12966_v59  ;;  %v9697_v59 = vld [vmem:[%s16042_s5 + $0xe0] ss:$8 sps:$4 sm:$0xff]  }
 0x573   : > { %v8671_v42 = vsel %vm5276_vm5, 1.0, %v16202_v33  ;;  %v4490_v14 = vmul.f32 %v12551_v26, %v4159_v29  ;;  %v2124_v56 = vmul.f32 %v12493_v40, %v17094_v47  ;;  %9441 = vmatprep.subr.bf16.mxu1 %v9689_v10  ;;  %v2716_v29 = vmul.f32 %v12513_v54, %v17098_v44  ;;  %v9694_v61 = vld [vmem:[%s16042_s5 + $0xd0] ss:$8 sps:$4 sm:$0xff]  }
 0x574   : > { %v5560_v51 = vpack.c.bf16 %v8671_v42, %v8670_v52  ;;  %9561 = vset.pattern.permute.xlu1 %v16921_v31  ;;  %4978 = vperm.xlu0 %9610, %v9878_v0   ;;  %v3405_v42 = vadd.f32 %v3307_v63, %v2813_v17  ;;  %v1040_v23 = vadd.f32 %v12975_v43, %v942_v25 }
 0x575   : > { %v4588_v48 = vadd.f32 %v4490_v14, %v3996_v28  ;;  %4242 = vperm.xlu1 %9561, %v9879_v11   ;;  %v941_v28 = vmul.f32 %v12479_v9, %v17097_v21  ;;  %v13124_v14 = vpop.permute.xlu0 %4782  ;;  %7244 = vmatpush1.bf16.msra.mxu0 %v9688_v58  ;;  %v2222_v0 = vadd.f32 %v2124_v56, %v1630_v49  ;;  %v17104_v56 = vld [vmem:[#allocation357_spill] sm:$0xff]  ;;  %v9884_v21 = vld [vmem:[%s10058_s8 + $0x168] sm:$0xff] }
 0x576   : > { %8767 = vmatmul.mubr.msk.bf16.gmra.mrb[36].mxu0 %vm5660_vm2, %v5560_v51  ;;  %v9692_v51 = vld [vmem:[%s16042_s5 + $0xd4] ss:$8 sps:$4 sm:$0xff]   ;;  %9457 = vmatpush1.bf16.msra.mxu1 %v9691_v1  ;;  %v3997_v58 = vadd.f32 %v3899_v35, %v3405_v42  ;;  %v17107_v42 = vld [vmem:[#allocation71_spill] sm:$0xff] }
 0x577   : > { %v5180_v37 = vadd.f32 %v5082_v4, %v4588_v48  ;;  %v4747_v5 = vpop.permute.xlu1 %4746  ;;  %5940 = vmatprep.mubr.bf16.mxu0 %v16998_v22  ;;  %v17099_v4 = vld [vmem:[#allocation170_spill] sm:$0xff]  ;;  %v17100_v48 = vld [vmem:[#allocation351_spill] sm:$0xff]  ;;  %9442 = vmatprep.subr.bf16.mxu1 %v9692_v51  ;;  %v1039_v45 = vadd.f32 %v12975_v43, %v941_v28  ;;  %v2814_v18 = vadd.f32 %v2716_v29, %v2222_v0 }
 0x578   : > { %v5081_v38 = vmul.f32 %v12546_v3, %v4747_v5  ;;  %4986 = vperm.xlu0 %9610, %v9880_v50   ;;  %v1534_v52 = vmul.f32 %v12490_v16, %v17099_v4  ;;  %v3308_v11 = vmul.f32 %v12515_v41, %v17100_v48  ;;  %7245 = vmatprep.subr.bf16.mxu0 %v9689_v10  ;;  %v9695_v50 = vld [vmem:[%s16042_s5 + $0xe4] ss:$8 sps:$4 sm:$0xff]   ;;  %v9885_v4 = vld [vmem:[%s10058_s8 + $0x2b0] sm:$0xff] }
 0x579   : > { %4246 = vperm.xlu1 %9561, %v9881_v24   ;;  %vm5278_vm6 = vcmp.ge.f32.partialorder %v5180_v37, 1.0  ;;  %v17102_v37 = vld [vmem:[#allocation494_spill] sm:$0xff]  ;;  %v1533_v10 = vmul.f32 %v12490_v16, %v17103_v57  ;;  %v13161_v7 = vpop.permute.xlu0 %4786  ;;  %7246 = vmatpush1.bf16.msra.mxu0 %v9691_v1  ;;  %v17106_v28 = vld [vmem:[#allocation355_spill] sm:$0xff]  ;;  %v9700_v1 = vld [vmem:[%s16042_s5 + $0xf0] ss:$8 sps:$4 sm:$0xff]  }
 0x57a   : > { %v5179_v39 = vadd.f32 %v5081_v38, %v4587_v46  ;;  %v8673_v53 = vsel %vm5278_vm6, 1.0, %v16202_v33  ;;  %v3900_v5 = vmul.f32 %v12534_v62, %v17102_v37  ;;  %v9883_v38 = vld [vmem:[%s10058_s8 + $0x2a0] sm:$0xff]  ;;  %v1632_v47 = vadd.f32 %v1534_v52, %v1040_v23  ;;  %9458 = vmatpush1.bf16.msra.mxu1 %v9694_v61  ;;  %v9698_v52 = vld [vmem:[%s16042_s5 + $0xf4] ss:$8 sps:$4 sm:$0xff]   ;;  %7247 = vmatprep.subr.bf16.mxu0 %v9692_v51  ;;  %v17109_v48 = vld [vmem:[#allocation495_spill] sm:$0xff] }
 0x57b   : > { %v3406_v17 = vadd.f32 %v3308_v11, %v2814_v18  ;;  %9443 = vmatprep.subr.bf16.mxu1 %v9695_v50  ;;  %v3310_v49 = vmul.f32 %v12515_v41, %v17106_v28  ;;  %v3902_v11 = vmul.f32 %v12534_v62, %v17109_v48  ;;  %v17110_v23 = vld [vmem:[#allocation362_spill] sm:$0xff] }
 0x57c   : > { %vm5277_vm7 = vcmp.ge.f32.partialorder %v5179_v39, 1.0  ;;  %v4163_v55 = vpop.permute.xlu1 %4162  ;;  %4994 = vperm.xlu0 %9610, %v9882_v34   ;;  %v17105_v39 = vld [vmem:[#allocation61_spill] sm:$0xff]  ;;  %v2224_v25 = vadd.f32 %v2126_v27, %v1632_v47  ;;  %v1631_v34 = vadd.f32 %v1533_v10, %v1039_v45  ;;  %v3309_v45 = vmul.f32 %v12515_v41, %v17110_v23  ;;  %v9886_v37 = vld [vmem:[%s10058_s8 + $0x160] sm:$0xff] }
 0x57d   : > { %v8672_v15 = vsel %vm5277_vm7, 1.0, %v16202_v33  ;;  %v4491_v6 = vmul.f32 %v12551_v26, %v4163_v55  ;;  %9562 = vset.pattern.permute.xlu1 %v16922_v19  ;;  %v2125_v30 = vmul.f32 %v12493_v40, %v17105_v39  ;;  %v3998_v44 = vadd.f32 %v3900_v5, %v3406_v17  ;;  %7248 = vmatpush1.bf16.msra.mxu0 %v9694_v61  ;;  %v13187_v27 = vpop.permute.xlu0 %4798  ;;  %v17113_v47 = vld [vmem:[#allocation502_spill] sm:$0xff] }
 0x57e   : > { %v5561_v12 = vpack.c.bf16 %v8673_v53, %v8672_v15  ;;  %4838 = vperm.xlu1 %9562, %v9881_v24   ;;  %v2718_v24 = vmul.f32 %v12513_v54, %v17104_v56  ;;  %v943_v55 = vmul.f32 %v12479_v9, %v17107_v42  ;;  %9459 = vmatpush1.bf16.msra.mxu1 %v9697_v59  ;;  %v17108_v53 = vld [vmem:[#allocation364_spill] sm:$0xff] }
 0x57f   : > { %v4589_v63 = vadd.f32 %v4491_v6, %v3997_v58  ;;  %v2717_v6 = vmul.f32 %v12513_v54, %v17108_v53  ;;  %9444 = vmatprep.subr.bf16.mxu1 %v9698_v52  ;;  %v3901_v56 = vmul.f32 %v12534_v62, %v17113_v47  ;;  %7249 = vmatprep.subr.bf16.mxu0 %v9695_v50  ;;  %v17114_v50 = vld [vmem:[#allocation70_spill] sm:$0xff]  ;;  %v17115_v42 = vld [vmem:[#allocation368_spill] sm:$0xff] }
 0x580   : > { %v4167_v46 = vpop.permute.xlu1 %4166  ;;  %8768 = vmatmul.mubr.msk.bf16.gmra.mrb[40].mxu0 %vm5660_vm2, %v5561_v12  ;;  %5002 = vperm.xlu0 %9610, %v9883_v38   ;;  %v2816_v0 = vadd.f32 %v2718_v24, %v2224_v25  ;;  %v2223_v12 = vadd.f32 %v2125_v30, %v1631_v34  ;;  %v1041_v5 = vadd.f32 %v12975_v43, %v943_v55  ;;  %v9887_v38 = vld [vmem:[%s10058_s8 + $0x298] sm:$0xff] }
 0x581   : > { %5950 = vmatprep.mubr.bf16.mxu0 %v16998_v22  ;;  %v4492_v35 = vmul.f32 %v12551_v26, %v4167_v46  ;;  %v5181_v29 = vadd.f32 %v5083_v20, %v4589_v63  ;;  %v17111_v20 = vld [vmem:[#allocation171_spill] sm:$0xff]  ;;  %v17112_v46 = vld [vmem:[#allocation65_spill] sm:$0xff]  ;;  %v5086_v17 = vmul.f32 %v12546_v3, %v13056_v8  ;;  %7250 = vmatpush1.bf16.msra.mxu0 %v9697_v59 }
 0x582   : > { %9563 = vset.pattern.permute.xlu1 %v16921_v31  ;;  %v3408_v2 = vadd.f32 %v3310_v49, %v2816_v0  ;;  %v1535_v63 = vmul.f32 %v12490_v16, %v17111_v20  ;;  %v2127_v61 = vmul.f32 %v12493_v40, %v17112_v46  ;;  %9460 = vmatpush1.bf16.msra.mxu1 %v9700_v1  ;;  %v17120_v20 = vld [vmem:[#allocation74_spill] sm:$0xff]  ;;  %v17121_v46 = vld [vmem:[#allocation75_spill] sm:$0xff] }
 0x583   : > { %4254 = vperm.xlu1 %9563, %v9884_v21   ;;  %v4590_v58 = vadd.f32 %v4492_v35, %v3998_v44  ;;  %vm5279_vm8 = vcmp.ge.f32.partialorder %v5181_v29, 1.0  ;;  %v2815_v57 = vadd.f32 %v2717_v6, %v2223_v12  ;;  %v4493_v21 = vmul.f32 %v12551_v26, %v13007_v13  ;;  %7251 = vmatprep.subr.bf16.mxu0 %v9698_v52  ;;  %v9888_v44 = vld [vmem:[%s10058_s8 + $0x170] sm:$0xff]  ;;  %v9889_v29 = vld [vmem:[%s10058_s8 + $0x2a8] sm:$0xff]  ;;  %v13214_v13 = vpop.permute.xlu0 %4202  ;;  %v17117_v6 = vld [vmem:[#allocation366_spill] sm:$0xff] }
 0x584   : > { %5010 = vperm.xlu0 %9610, %v9885_v4   ;;  %v4000_v10 = vadd.f32 %v3902_v11, %v3408_v2  ;;  %v8674_v35 = vsel %vm5279_vm8, 1.0, %v16202_v33  ;;  %v944_v49 = vmul.f32 %v12479_v9, %v17114_v50  ;;  %v1633_v4 = vadd.f32 %v1535_v63, %v1041_v5  ;;  %v17116_v52 = vld [vmem:[#allocation172_spill] sm:$0xff]  ;;  %v9891_v2 = vld [vmem:[%s10058_s8 + $0x2b8] sm:$0xff]  ;;  %v17124_v50 = vld [vmem:[#allocation359_spill] sm:$0xff] }
 0x585   : > { %v4759_v15 = vpop.permute.xlu1 %4758  ;;  %v3407_v25 = vadd.f32 %v3309_v45, %v2815_v57  ;;  %v2719_v59 = vmul.f32 %v12513_v54, %v17115_v42  ;;  %v1536_v34 = vmul.f32 %v12490_v16, %v17116_v52  ;;  %7252 = vmatpush1.bf16.msra.mxu0 %v9700_v1  ;;  %v3311_v48 = vmul.f32 %v12515_v41, %v17117_v6  ;;  %v17118_v12 = vld [vmem:[#allocation64_spill] sm:$0xff]  ;;  %v9890_v45 = vld [vmem:[%s10058_s8 + $0x178] sm:$0xff] }
 0x586   : > { %v5084_v51 = vmul.f32 %v12546_v3, %v4759_v15  ;;  %v2225_v53 = vadd.f32 %v2127_v61, %v1633_v4  ;;  %v2128_v23 = vmul.f32 %v12493_v40, %v17118_v12  ;;  %v946_v63 = vmul.f32 %v12479_v9, %v17120_v20  ;;  %v17122_v57 = vld [vmem:[#allocation361_spill] sm:$0xff] }
 0x587   : > { %9564 = vset.pattern.permute.xlu1 %v16922_v19  ;;  %v3999_v55 = vadd.f32 %v3901_v56, %v3407_v25  ;;  %v945_v61 = vmul.f32 %v12479_v9, %v17121_v46  ;;  %v13236_v56 = vpop.permute.xlu0 %4218  ;;  %v17125_v42 = vld [vmem:[#allocation229_spill] sm:$0xff] }
 0x588   : > { %v5182_v18 = vadd.f32 %v5084_v51, %v4590_v58  ;;  %4842 = vperm.xlu1 %9564, %v9886_v37   ;;  %9621 = vset.pattern.permute.xlu0 %v16848_v60  ;;  %v1042_v51 = vadd.f32 %v12975_v43, %v944_v49  ;;  %v17119_v37 = vld [vmem:[#allocation504_spill] sm:$0xff]  ;;  %v3312_v49 = vmul.f32 %v12515_v41, %v17124_v50  ;;  %v17126_v52 = vld [vmem:[#allocation497_spill] sm:$0xff] }
 0x589   : > { %3814 = vperm.xlu0 %9621, %v9887_v38   ;;  %v4591_v11 = vadd.f32 %v4493_v21, %v3999_v55  ;;  %v3903_v1 = vmul.f32 %v12534_v62, %v17119_v37  ;;  %v9892_v21 = vld [vmem:[%s10058_s8 + $0x2c8] sm:$0xff]  ;;  %v1043_v4 = vadd.f32 %v12975_v43, %v945_v61  ;;  %v17127_v6 = vld [vmem:[#allocation69_spill] sm:$0xff]  ;;  %v17131_v61 = vld [vmem:[#allocation78_spill] sm:$0xff] }
 0x58a   : > { %vm5280_vm9 = vcmp.ge.f32.partialorder %v5182_v18, 1.0  ;;  %v4175_v24 = vpop.permute.xlu1 %4174  ;;  %v2817_v18 = vadd.f32 %v2719_v59, %v2225_v53  ;;  %v1634_v38 = vadd.f32 %v1536_v34, %v1042_v51  ;;  %v2130_v59 = vmul.f32 %v12493_v40, %v17125_v42  ;;  %v9893_v12 = vld [vmem:[%s10058_s8 + $0x2d8] sm:$0xff] }
 0x58b   : > { %v8675_v39 = vsel %vm5280_vm9, 1.0, %v16202_v33  ;;  %v4494_v30 = vmul.f32 %v12551_v26, %v4175_v24  ;;  %v3904_v34 = vmul.f32 %v12534_v62, %v17126_v52 }
 0x58c   : > { %v5562_v28 = vpack.c.bf16 %v8675_v39, %v8674_v35  ;;  %9565 = vset.pattern.permute.xlu1 %v16921_v31  ;;  %v3409_v47 = vadd.f32 %v3311_v48, %v2817_v18  ;;  %v1537_v48 = vmul.f32 %v12490_v16, %v17127_v6  ;;  %v9897_v6 = vld [vmem:[%s10058_s8 + $0x2c0] sm:$0xff] }
 0x58d   : > { %v4592_v8 = vadd.f32 %v4494_v30, %v4000_v10  ;;  %4258 = vperm.xlu1 %9565, %v9888_v44   ;;  %3822 = vperm.xlu0 %9621, %v9889_v29   ;;  %v2720_v10 = vmul.f32 %v12513_v54, %v17122_v57  ;;  %v1044_v29 = vadd.f32 %v12975_v43, %v946_v63 }
 0x58e   : > { %8769 = vmatmul.mubr.msk.bf16.gmra.mrb[44].mxu0 %vm5660_vm2, %v5562_v28  ;;  %v2226_v28 = vadd.f32 %v2128_v23, %v1634_v38  ;;  %v947_v38 = vmul.f32 %v12479_v9, %v17131_v61  ;;  %v1635_v57 = vadd.f32 %v1537_v48, %v1043_v4  ;;  %v9896_v4 = vld [vmem:[%s10058_s8 + $0x180] sm:$0xff]  ;;  %v5090_v48 = vmul.f32 %v12546_v3, %v13124_v14  ;;  %v17138_v14 = vld [vmem:[#allocation77_spill] sm:$0xff] }
 0x58f   : > { %v5184_v0 = vadd.f32 %v5086_v17, %v4592_v8  ;;  %v4763_v15 = vpop.permute.xlu1 %4762  ;;  %5960 = vmatprep.mubr.bf16.mxu0 %v16998_v22  ;;  %v17123_v17 = vld [vmem:[#allocation68_spill] sm:$0xff]  ;;  %v4001_v8 = vadd.f32 %v3903_v1, %v3409_v47  ;;  %v9894_v1 = vld [vmem:[%s10058_s8 + $0x188] sm:$0xff] }
 0x590   : > { %v5085_v58 = vmul.f32 %v12546_v3, %v4763_v15  ;;  %v1538_v35 = vmul.f32 %v12490_v16, %v17123_v17  ;;  %v2818_v55 = vadd.f32 %v2720_v10, %v2226_v28  ;;  %v17132_v17 = vld [vmem:[#allocation372_spill] sm:$0xff]  ;;  %v1045_v42 = vadd.f32 %v12975_v43, %v947_v38 }
 0x591   : > { %4262 = vperm.xlu1 %9565, %v9890_v45   ;;  %3830 = vperm.xlu0 %9621, %v9891_v2   ;;  %vm5282_vm10 = vcmp.ge.f32.partialorder %v5184_v0, 1.0  ;;  %v5087_v0 = vmul.f32 %v12546_v3, %v13094_v36  ;;  %v17129_v2 = vld [vmem:[#allocation227_spill] sm:$0xff] }
 0x592   : > { %v5183_v5 = vadd.f32 %v5085_v58, %v4591_v11  ;;  %v8677_v30 = vsel %vm5282_vm10, 1.0, %v16202_v33  ;;  %v1636_v11 = vadd.f32 %v1538_v35, %v1044_v29  ;;  %v17128_v58 = vld [vmem:[#allocation365_spill] sm:$0xff]  ;;  %v3410_v23 = vadd.f32 %v3312_v49, %v2818_v55  ;;  %v17134_v49 = vld [vmem:[#allocation370_spill] sm:$0xff] }
 0x593   : > { %v2722_v51 = vmul.f32 %v12513_v54, %v17128_v58  ;;  %v2129_v18 = vmul.f32 %v12493_v40, %v17129_v2  ;;  %v2721_v35 = vmul.f32 %v12513_v54, %v17132_v17  ;;  %v4497_v2 = vmul.f32 %v12551_v26, %v13037_v32  ;;  %v9899_v32 = vld [vmem:[%s10058_s8 + $0x2d0] sm:$0xff] }
 0x594   : > { %vm5281_vm11 = vcmp.ge.f32.partialorder %v5183_v5, 1.0  ;;  %v4179_v24 = vpop.permute.xlu1 %4178  ;;  %v2228_v37 = vadd.f32 %v2130_v59, %v1636_v11  ;;  %v17130_v5 = vld [vmem:[#allocation363_spill] sm:$0xff]  ;;  %v4002_v63 = vadd.f32 %v3904_v34, %v3410_v23  ;;  %v17135_v59 = vld [vmem:[#allocation73_spill] sm:$0xff] }
 0x595   : > { %v8676_v39 = vsel %vm5281_vm11, 1.0, %v16202_v33  ;;  %v4495_v25 = vmul.f32 %v12551_v26, %v4179_v24  ;;  %9567 = vset.pattern.permute.xlu1 %v16922_v19  ;;  %3838 = vperm.xlu0 %9621, %v9892_v21   ;;  %v3314_v20 = vmul.f32 %v12515_v41, %v17130_v5  ;;  %v9895_v24 = vld [vmem:[%s10058_s8 + $0x2e8] sm:$0xff]  ;;  %v2227_v50 = vadd.f32 %v2129_v18, %v1635_v57  ;;  %v17140_v57 = vld [vmem:[#allocation173_spill] sm:$0xff] }
 0x596   : > { %v5563_v44 = vpack.c.bf16 %v8677_v30, %v8676_v39  ;;  %4854 = vperm.xlu1 %9567, %v9890_v45   ;;  %v13262_v45 = vpop.permute.xlu0 %4234  ;;  %v2820_v10 = vadd.f32 %v2722_v51, %v2228_v37  ;;  %v17133_v39 = vld [vmem:[#allocation499_spill] sm:$0xff]  ;;  %v1539_v55 = vmul.f32 %v12490_v16, %v17135_v59 }
 0x597   : > { %v4593_v15 = vadd.f32 %v4495_v25, %v4001_v8  ;;  %v3906_v30 = vmul.f32 %v12534_v62, %v17133_v39  ;;  %v3313_v8 = vmul.f32 %v12515_v41, %v17134_v49  ;;  %v2819_v52 = vadd.f32 %v2721_v35, %v2227_v50  ;;  %v17141_v35 = vld [vmem:[#allocation374_spill] sm:$0xff]  ;;  %v17142_v50 = vld [vmem:[#allocation72_spill] sm:$0xff] }
 0x598   : > { %v4183_v53 = vpop.permute.xlu1 %4182  ;;  %8770 = vmatmul.mubr.msk.bf16.gmra.mrb[48].mxu0 %vm5660_vm2, %v5563_v44  ;;  %v3412_v44 = vadd.f32 %v3314_v20, %v2820_v10  ;;  %v9898_v20 = vld [vmem:[%s10058_s8 + $0x190] sm:$0xff]  ;;  %v1540_v10 = vmul.f32 %v12490_v16, %v17140_v57  ;;  %v3315_v39 = vmul.f32 %v12515_v41, %v17141_v35  ;;  %v2132_v49 = vmul.f32 %v12493_v40, %v17142_v50  ;;  %v17150_v57 = vld [vmem:[#allocation501_spill] sm:$0xff] }
 0x599   : > { %3846 = vperm.xlu0 %9621, %v9893_v12   ;;  %5970 = vmatprep.mubr.bf16.mxu0 %v16998_v22  ;;  %v4496_v36 = vmul.f32 %v12551_v26, %v4183_v53  ;;  %v5185_v46 = vadd.f32 %v5087_v0, %v4593_v15  ;;  %v17136_v0 = vld [vmem:[#allocation506_spill] sm:$0xff]  ;;  %v17137_v12 = vld [vmem:[#allocation228_spill] sm:$0xff]  ;;  %v17152_v50 = vld [vmem:[#allocation373_spill] sm:$0xff] }
 0x59a   : > { %9568 = vset.pattern.permute.xlu1 %v16921_v31  ;;  %v13278_v25 = vpop.permute.xlu0 %4802  ;;  %v4004_v34 = vadd.f32 %v3906_v30, %v3412_v44  ;;  %v3905_v15 = vmul.f32 %v12534_v62, %v17136_v0  ;;  %v2131_v23 = vmul.f32 %v12493_v40, %v17137_v12  ;;  %v17145_v0 = vld [vmem:[#allocation80_spill] sm:$0xff] }
 0x59b   : > { %4270 = vperm.xlu1 %9568, %v9894_v1   ;;  %v4594_v21 = vadd.f32 %v4496_v36, %v4002_v63  ;;  %vm5283_vm12 = vcmp.ge.f32.partialorder %v5185_v46, 1.0  ;;  %v3411_v36 = vadd.f32 %v3313_v8, %v2819_v52  ;;  %v948_v1 = vmul.f32 %v12479_v9, %v17138_v14  ;;  %v17139_v46 = vld [vmem:[#allocation375_spill] sm:$0xff]  ;;  %v9900_v8 = vld [vmem:[%s10058_s8 + $0x198] sm:$0xff] }
 0x59c   : > { %v8678_v11 = vsel %vm5283_vm12, 1.0, %v16202_v33  ;;  %v1637_v63 = vadd.f32 %v1539_v55, %v1045_v42  ;;  %v2723_v61 = vmul.f32 %v12513_v54, %v17139_v46  ;;  %v9901_v55 = vld [vmem:[%s10058_s8 + $0x2e0] sm:$0xff]  ;;  %v17144_v52 = vld [vmem:[#allocation79_spill] sm:$0xff] }
 0x59d   : > { %v4775_v47 = vpop.permute.xlu1 %4774  ;;  %3854 = vperm.xlu0 %9621, %v9895_v24   ;;  %v4003_v38 = vadd.f32 %v3905_v15, %v3411_v36  ;;  %v949_v15 = vmul.f32 %v12479_v9, %v17145_v0  ;;  %v17148_v14 = vld [vmem:[#allocation367_spill] sm:$0xff] }
 0x59e   : > { %v5088_v28 = vmul.f32 %v12546_v3, %v4775_v47  ;;  %v13301_v18 = vpop.permute.xlu0 %4814  ;;  %v2229_v17 = vadd.f32 %v2131_v23, %v1637_v63  ;;  %v9902_v63 = vld [vmem:[%s10058_s8 + $0x2f0] sm:$0xff] }
 0x59f   : > { %9569 = vset.pattern.permute.xlu1 %v16922_v19  ;;  %v4595_v30 = vadd.f32 %v4497_v2, %v4003_v38 }
 0x5a0   : > { %v5186_v29 = vadd.f32 %v5088_v28, %v4594_v21  ;;  %4858 = vperm.xlu1 %9569, %v9896_v4   ;;  %v1046_v28 = vadd.f32 %v12975_v43, %v948_v1  ;;  %v2821_v44 = vadd.f32 %v2723_v61, %v2229_v17  ;;  %v3316_v1 = vmul.f32 %v12515_v41, %v17148_v14  ;;  %v17149_v61 = vld [vmem:[#allocation232_spill] sm:$0xff] }
 0x5a1   : > { %9630 = vset.pattern.permute.xlu0 %v16922_v19  ;;  %v2134_v38 = vmul.f32 %v12493_v40, %v17149_v61 }
 0x5a2   : > { %vm5284_vm13 = vcmp.ge.f32.partialorder %v5186_v29, 1.0  ;;  %v4191_v53 = vpop.permute.xlu1 %4190  ;;  %5018 = vperm.xlu0 %9630, %v9897_v6   ;;  %v17143_v29 = vld [vmem:[#allocation508_spill] sm:$0xff]  ;;  %v13323_v42 = vpop.permute.xlu0 %4818  ;;  %v17146_v6 = vld [vmem:[#allocation174_spill] sm:$0xff] }
 0x5a3   : > { %v8679_v58 = vsel %vm5284_vm13, 1.0, %v16202_v33  ;;  %v4498_v51 = vmul.f32 %v12551_v26, %v4191_v53  ;;  %v3907_v4 = vmul.f32 %v12534_v62, %v17143_v29  ;;  %v1638_v53 = vadd.f32 %v1540_v10, %v1046_v28 }
 0x5a4   : > { %v5564_v37 = vpack.c.bf16 %v8679_v58, %v8678_v11  ;;  %9570 = vset.pattern.permute.xlu1 %v16921_v31  ;;  %v17147_v11 = vld [vmem:[#allocation369_spill] sm:$0xff]  ;;  %v3908_v10 = vmul.f32 %v12534_v62, %v17150_v57  ;;  %v17159_v57 = vld [vmem:[#allocation175_spill] sm:$0xff] }
 0x5a5   : > { %v4596_v5 = vadd.f32 %v4498_v51, %v4004_v34  ;;  %4274 = vperm.xlu1 %9570, %v9898_v20   ;;  %v950_v34 = vmul.f32 %v12479_v9, %v17144_v52  ;;  %v2724_v58 = vmul.f32 %v12513_v54, %v17147_v11  ;;  %v3413_v51 = vadd.f32 %v3315_v39, %v2821_v44  ;;  %v17153_v44 = vld [vmem:[#allocation230_spill] sm:$0xff]  ;;  %v17154_v52 = vld [vmem:[#allocation371_spill] sm:$0xff] }
 0x5a6   : > { %8771 = vmatmul.mubr.msk.bf16.gmra.mrb[52].mxu0 %vm5660_vm2, %v5564_v37  ;;  %5026 = vperm.xlu0 %9630, %v9899_v32   ;;  %v2230_v23 = vadd.f32 %v2132_v49, %v1638_v53  ;;  %v1047_v39 = vadd.f32 %v12975_v43, %v949_v15  ;;  %v2726_v49 = vmul.f32 %v12513_v54, %v17152_v50  ;;  %v17155_v53 = vld [vmem:[#allocation82_spill] sm:$0xff] }
 0x5a7   : > { %v5188_v47 = vadd.f32 %v5090_v48, %v4596_v5  ;;  %v4779_v24 = vpop.permute.xlu1 %4778  ;;  %5980 = vmatprep.mubr.bf16.mxu0 %v16998_v22  ;;  %v1542_v48 = vmul.f32 %v12490_v16, %v17146_v6  ;;  %v4005_v5 = vadd.f32 %v3907_v4, %v3413_v51  ;;  %v1048_v46 = vadd.f32 %v12975_v43, %v950_v34  ;;  %v17156_v51 = vld [vmem:[#allocation377_spill] sm:$0xff] }
 0x5a8   : > { %v5089_v21 = vmul.f32 %v12546_v3, %v4779_v24  ;;  %v2822_v32 = vadd.f32 %v2724_v58, %v2230_v23  ;;  %v13348_v24 = vpop.permute.xlu0 %4830  ;;  %v2133_v29 = vmul.f32 %v12493_v40, %v17153_v44  ;;  %v3318_v34 = vmul.f32 %v12515_v41, %v17154_v52  ;;  %v17157_v23 = vld [vmem:[#allocation503_spill] sm:$0xff] }
 0x5a9   : > { %4278 = vperm.xlu1 %9570, %v9900_v8   ;;  %vm5286_vm14 = vcmp.ge.f32.partialorder %v5188_v47, 1.0  ;;  %v5091_v47 = vmul.f32 %v12546_v3, %v13161_v7  ;;  %v1640_v28 = vadd.f32 %v1542_v48, %v1048_v46  ;;  %v951_v6 = vmul.f32 %v12479_v9, %v17155_v53  ;;  %v17163_v53 = vld [vmem:[#allocation379_spill] sm:$0xff] }
 0x5aa   : > { %v5187_v59 = vadd.f32 %v5089_v21, %v4595_v30  ;;  %5034 = vperm.xlu0 %9630, %v9901_v55   ;;  %v8681_v2 = vsel %vm5286_vm14, 1.0, %v16202_v33  ;;  %v17151_v30 = vld [vmem:[#allocation76_spill] sm:$0xff]  ;;  %v3414_v7 = vadd.f32 %v3316_v1, %v2822_v32  ;;  %v9904_v55 = vld [vmem:[%s10058_s8 + $0x2f8] sm:$0xff]  ;;  %v5094_v50 = vmul.f32 %v12546_v3, %v13187_v27 }
 0x5ab   : > { %v1541_v21 = vmul.f32 %v12490_v16, %v17151_v30  ;;  %v2232_v4 = vadd.f32 %v2134_v38, %v1640_v28  ;;  %v9906_v38 = vld [vmem:[%s10058_s8 + $0x1a0] sm:$0xff]  ;;  %v1049_v32 = vadd.f32 %v12975_v43, %v951_v6  ;;  %v17162_v27 = vld [vmem:[#allocation81_spill] sm:$0xff]  ;;  %v2727_v6 = vmul.f32 %v12513_v54, %v17163_v53 }
 0x5ac   : > { %vm5285_vm15 = vcmp.ge.f32.partialorder %v5187_v59, 1.0  ;;  %v4195_v12 = vpop.permute.xlu1 %4194  ;;  %v9903_v59 = vld [vmem:[%s10058_s8 + $0x1a8] sm:$0xff]  ;;  %v4006_v0 = vadd.f32 %v3908_v10, %v3414_v7  ;;  %v1543_v10 = vmul.f32 %v12490_v16, %v17159_v57  ;;  %v17161_v30 = vld [vmem:[#allocation510_spill] sm:$0xff]  ;;  %v952_v52 = vmul.f32 %v12479_v9, %v17162_v27 }
 0x5ad   : > { %v8680_v36 = vsel %vm5285_vm15, 1.0, %v16202_v33  ;;  %v4499_v37 = vmul.f32 %v12551_v26, %v4195_v12  ;;  %9571 = vset.pattern.permute.xlu1 %v16922_v19  ;;  %v1639_v48 = vadd.f32 %v1541_v21, %v1047_v39  ;;  %v2824_v11 = vadd.f32 %v2726_v49, %v2232_v4  ;;  %v17168_v57 = vld [vmem:[#allocation83_spill] sm:$0xff] }
 0x5ae   : > { %v5565_v20 = vpack.c.bf16 %v8681_v2, %v8680_v36  ;;  %4870 = vperm.xlu1 %9571, %v9900_v8   ;;  %5042 = vperm.xlu0 %9630, %v9902_v63   ;;  %v2725_v12 = vmul.f32 %v12513_v54, %v17156_v51  ;;  %v3910_v36 = vmul.f32 %v12534_v62, %v17157_v23  ;;  %v13372_v2 = vpop.permute.xlu0 %4834  ;;  %v17165_v23 = vld [vmem:[#allocation442_spill] sm:$0xff] }
 0x5af   : > { %v4597_v17 = vadd.f32 %v4499_v37, %v4005_v5  ;;  %v2231_v1 = vadd.f32 %v2133_v29, %v1639_v48  ;;  %v9905_v5 = vld [vmem:[%s10058_s8 + $0x308] sm:$0xff]  ;;  %v3416_v46 = vadd.f32 %v3318_v34, %v2824_v11  ;;  %v3909_v21 = vmul.f32 %v12534_v62, %v17161_v30 }
 0x5b0   : > { %v4199_v35 = vpop.permute.xlu1 %4198  ;;  %8772 = vmatmul.mubr.msk.bf16.gmra.mrb[56].mxu0 %vm5660_vm2, %v5565_v20  ;;  %v17158_v20 = vld [vmem:[#allocation441_spill] sm:$0xff]  ;;  %v4501_v29 = vmul.f32 %v12551_v26, %v13214_v13  ;;  %v17164_v13 = vld [vmem:[#allocation176_spill] sm:$0xff] }
 0x5b1   : > { %5990 = vmatprep.mubr.bf16.mxu0 %v16998_v22  ;;  %v4500_v8 = vmul.f32 %v12551_v26, %v4199_v35  ;;  %v5189_v15 = vadd.f32 %v5091_v47, %v4597_v17  ;;  %v3317_v63 = vmul.f32 %v12515_v41, %v17158_v20  ;;  %v17160_v47 = vld [vmem:[#allocation231_spill] sm:$0xff]  ;;  %v2823_v35 = vadd.f32 %v2725_v12, %v2231_v1 }
 0x5b2   : > { %9572 = vset.pattern.permute.xlu1 %v16921_v31  ;;  %9635 = vset.pattern.permute.xlu0 %v16848_v60  ;;  %v2135_v17 = vmul.f32 %v12493_v40, %v17160_v47  ;;  %v4008_v39 = vadd.f32 %v3910_v36, %v3416_v46  ;;  %v13395_v4 = vpop.permute.xlu0 %4846  ;;  %v1544_v11 = vmul.f32 %v12490_v16, %v17164_v13  ;;  %v17169_v47 = vld [vmem:[#allocation84_spill] sm:$0xff] }
 0x5b3   : > { %4286 = vperm.xlu1 %9572, %v9903_v59   ;;  %3862 = vperm.xlu0 %9635, %v9904_v55   ;;  %v4598_v37 = vadd.f32 %v4500_v8, %v4006_v0  ;;  %vm5287_vm0 = vcmp.ge.f32.partialorder %v5189_v15, 1.0  ;;  %v3415_v44 = vadd.f32 %v3317_v63, %v2823_v35  ;;  %v9907_v55 = vld [vmem:[%s10058_s8 + $0x300] sm:$0xff]  ;;  %v9908_v0 = vld [vmem:[%s10058_s8 + $0x1b0] sm:$0xff]  ;;  %v1641_v15 = vadd.f32 %v1543_v10, %v1049_v32  ;;  %v9909_v63 = vld [vmem:[%s10058_s8 + $0x1b8] sm:$0xff] }
 0x5b4   : > { %v8682_v49 = vsel %vm5287_vm0, 1.0, %v16202_v33  ;;  %v3319_v36 = vmul.f32 %v12515_v41, %v17165_v23  ;;  %v1050_v1 = vadd.f32 %v12975_v43, %v952_v52  ;;  %v954_v10 = vmul.f32 %v12479_v9, %v17168_v57  ;;  %v17179_v57 = vld [vmem:[#allocation86_spill] sm:$0xff] }
 0x5b5   : > { %v4791_v58 = vpop.permute.xlu1 %4790  ;;  %v4007_v48 = vadd.f32 %v3909_v21, %v3415_v44  ;;  %v2233_v12 = vadd.f32 %v2135_v17, %v1641_v15  ;;  %v953_v17 = vmul.f32 %v12479_v9, %v17169_v47  ;;  %v5095_v13 = vmul.f32 %v12546_v3, %v13278_v25  ;;  %v17177_v25 = vld [vmem:[#allocation233_spill] sm:$0xff] }
 0x5b6   : > { %v5092_v14 = vmul.f32 %v12546_v3, %v4791_v58  ;;  %v1642_v35 = vadd.f32 %v1544_v11, %v1050_v1 }
 0x5b7   : > { %9573 = vset.pattern.permute.xlu1 %v16922_v19  ;;  %3870 = vperm.xlu0 %9635, %v9905_v5   ;;  %v17166_v5 = vld [vmem:[#allocation234_spill] sm:$0xff]  ;;  %v2825_v46 = vadd.f32 %v2727_v6, %v2233_v12  ;;  %v17174_v6 = vld [vmem:[#allocation505_spill] sm:$0xff] }
 0x5b8   : > { %v5190_v61 = vadd.f32 %v5092_v14, %v4598_v37  ;;  %4874 = vperm.xlu1 %9573, %v9906_v38   ;;  %v4599_v37 = vadd.f32 %v4501_v29, %v4007_v48  ;;  %v2136_v20 = vmul.f32 %v12493_v40, %v17166_v5  ;;  %v3912_v48 = vmul.f32 %v12534_v62, %v17174_v6  ;;  %v17175_v12 = vld [vmem:[#allocation177_spill] sm:$0xff]  ;;  %v17185_v6 = vld [vmem:[#allocation235_spill] sm:$0xff] }
 0x5b9   : > { %v3417_v21 = vadd.f32 %v3319_v36, %v2825_v46  ;;  %v1545_v23 = vmul.f32 %v12490_v16, %v17175_v12  ;;  %v9910_v46 = vld [vmem:[%s10058_s8 + $0x1c8] sm:$0xff] }
 0x5ba   : > { %vm5288_vm1 = vcmp.ge.f32.partialorder %v5190_v61, 1.0  ;;  %v4207_v28 = vpop.permute.xlu1 %4206  ;;  %v17167_v61 = vld [vmem:[#allocation512_spill] sm:$0xff]  ;;  %v2234_v29 = vadd.f32 %v2136_v20, %v1642_v35  ;;  %v2137_v20 = vmul.f32 %v12493_v40, %v17177_v25 }
 0x5bb   : > { %v8683_v7 = vsel %vm5288_vm1, 1.0, %v16202_v33  ;;  %v4502_v8 = vmul.f32 %v12551_v26, %v4207_v28  ;;  %9639 = vset.pattern.permute.xlu0 %v16922_v19  ;;  %v3911_v38 = vmul.f32 %v12534_v62, %v17167_v61 }
 0x5bc   : > { %v5566_v59 = vpack.c.bf16 %v8683_v7, %v8682_v49  ;;  %9574 = vset.pattern.permute.xlu1 %v16921_v31  ;;  %5050 = vperm.xlu0 %9639, %v9907_v55  }
 0x5bd   : > { %v4600_v34 = vadd.f32 %v4502_v8, %v4008_v39  ;;  %4290 = vperm.xlu1 %9574, %v9908_v0   ;;  %v17170_v39 = vld [vmem:[#allocation376_spill] sm:$0xff]  ;;  %v4009_v27 = vadd.f32 %v3911_v38, %v3417_v21  ;;  %v17173_v0 = vld [vmem:[#allocation237_spill] sm:$0xff]  ;;  %v17181_v21 = vld [vmem:[#allocation507_spill] sm:$0xff] }
 0x5be   : > { %8773 = vmatmul.mubr.msk.bf16.gmra.mrb[60].mxu0 %vm5660_vm2, %v5566_v59  ;;  %v2728_v30 = vmul.f32 %v12513_v54, %v17170_v39  ;;  %v17172_v59 = vld [vmem:[#allocation446_spill] sm:$0xff]  ;;  %v2138_v15 = vmul.f32 %v12493_v40, %v17173_v0  ;;  %v17180_v39 = vld [vmem:[#allocation381_spill] sm:$0xff] }
 0x5bf   : > { %v5192_v58 = vadd.f32 %v5094_v50, %v4600_v34  ;;  %v4795_v51 = vpop.permute.xlu1 %4794  ;;  %6000 = vmatprep.mubr.bf16.mxu0 %v16998_v22  ;;  %v17171_v50 = vld [vmem:[#allocation178_spill] sm:$0xff]  ;;  %v3320_v55 = vmul.f32 %v12515_v41, %v17172_v59  ;;  %v1052_v34 = vadd.f32 %v12975_v43, %v954_v10  ;;  %v955_v10 = vmul.f32 %v12479_v9, %v17179_v57 }
 0x5c0   : > { %v5093_v14 = vmul.f32 %v12546_v3, %v4795_v51  ;;  %v1546_v49 = vmul.f32 %v12490_v16, %v17171_v50  ;;  %v2826_v53 = vadd.f32 %v2728_v30, %v2234_v29  ;;  %v1051_v51 = vadd.f32 %v12975_v43, %v953_v17  ;;  %v17178_v43 = vld [vmem:[#allocation236_spill] sm:$0xff] }
 0x5c1   : > { %4294 = vperm.xlu1 %9574, %v9909_v63   ;;  %vm5290_vm3 = vcmp.ge.f32.partialorder %v5192_v58, 1.0  ;;  %v3322_v61 = vmul.f32 %v12515_v41, %v17178_v43  ;;  %v2729_v30 = vmul.f32 %v12513_v54, %v17180_v39  ;;  %v17188_v43 = vld [vmem:[#allocation180_spill] sm:$0xff] }
 0x5c2   : > { %v5191_v32 = vadd.f32 %v5093_v14, %v4599_v37  ;;  %v8685_v8 = vsel %vm5290_vm3, 1.0, %v16202_v33  ;;  %v1644_v36 = vadd.f32 %v1546_v49, %v1052_v34  ;;  %v17176_v37 = vld [vmem:[#allocation378_spill] sm:$0xff]  ;;  %v3418_v1 = vadd.f32 %v3320_v55, %v2826_v53 }
 0x5c3   : > { %v2730_v14 = vmul.f32 %v12513_v54, %v17176_v37  ;;  %v1643_v47 = vadd.f32 %v1545_v23, %v1051_v51  ;;  %v9911_v55 = vld [vmem:[%s10058_s8 + $0x1c0] sm:$0xff]  ;;  %v5098_v23 = vmul.f32 %v12546_v3, %v13301_v18  ;;  %v1548_v18 = vmul.f32 %v12490_v16, %v17188_v43 }
 0x5c4   : > { %vm5289_vm4 = vcmp.ge.f32.partialorder %v5191_v32, 1.0  ;;  %v4211_v28 = vpop.permute.xlu1 %4210  ;;  %v4010_v38 = vadd.f32 %v3912_v48, %v3418_v1  ;;  %v13468_v34 = vld [vmem:[%s16039_s2] ss:$0 sm:$0xff]  ;;  %v2139_v48 = vmul.f32 %v12493_v40, %v17185_v6  ;;  %v17195_v6 = vld [vmem:[#allocation516_spill] sm:$0xff] }
 0x5c5   : > { %v8684_v7 = vsel %vm5289_vm4, 1.0, %v16202_v33  ;;  %v4503_v44 = vmul.f32 %v12551_v26, %v4211_v28  ;;  %9575 = vset.pattern.permute.xlu1 %v16922_v19  ;;  %v3914_v28 = vmul.f32 %v12534_v62, %v17181_v21  ;;  %v1053_v0 = vadd.f32 %v13468_v34, %v955_v10 }
 0x5c6   : > { %v5567_v52 = vpack.c.bf16 %v8685_v8, %v8684_v7  ;;  %4886 = vperm.xlu1 %9575, %v9909_v63   ;;  %v2236_v63 = vadd.f32 %v2138_v15, %v1644_v36  ;;  %v2235_v7 = vadd.f32 %v2137_v20, %v1643_v47  ;;  %v17182_v8 = vld [vmem:[#allocation443_spill] sm:$0xff] }
 0x5c7   : > { %v4601_v11 = vadd.f32 %v4503_v44, %v4009_v27  ;;  %v3321_v44 = vmul.f32 %v12515_v41, %v17182_v8  ;;  %v17183_v27 = vld [vmem:[#allocation85_spill] sm:$0xff]  ;;  %v17184_v15 = vld [vmem:[#allocation179_spill] sm:$0xff] }
 0x5c8   : > { %v4215_v58 = vpop.permute.xlu1 %4214  ;;  %8774 = vmatmul.mubr.msk.bf16.gmra.mrb[64].mxu0 %vm5660_vm2, %v5567_v52  ;;  %v2828_v17 = vadd.f32 %v2730_v14, %v2236_v63  ;;  %v956_v52 = vmul.f32 %v12479_v9, %v17183_v27  ;;  %v1547_v53 = vmul.f32 %v12490_v16, %v17184_v15  ;;  %v17187_v20 = vld [vmem:[#allocation87_spill] sm:$0xff] }
 0x5c9   : > { %6010 = vmatprep.mubr.bf16.mxu0 %v16998_v22  ;;  %v4504_v5 = vmul.f32 %v12551_v26, %v4215_v58  ;;  %v5193_v32 = vadd.f32 %v5095_v13, %v4601_v11  ;;  %v2827_v13 = vadd.f32 %v2729_v30, %v2235_v7  ;;  %v17186_v58 = vld [vmem:[#allocation514_spill] sm:$0xff]  ;;  %v958_v63 = vmul.f32 %v12479_v9, %v17187_v20  ;;  %v17191_v30 = vld [vmem:[#allocation239_spill] sm:$0xff] }
 0x5ca   : > { %9576 = vset.pattern.permute.xlu1 %v16921_v31  ;;  %v3420_v29 = vadd.f32 %v3322_v61, %v2828_v17  ;;  %v3913_v51 = vmul.f32 %v12534_v62, %v17186_v58  ;;  %v1054_v57 = vadd.f32 %v13468_v34, %v956_v52  ;;  %v17190_v17 = vld [vmem:[#allocation88_spill] sm:$0xff]  ;;  %v2140_v21 = vmul.f32 %v12493_v40, %v17191_v30  ;;  %v9914_v52 = vld [vmem:[%s10058_s8 + $0x1d8] sm:$0xff] }
 0x5cb   : > { %4302 = vperm.xlu1 %9576, %v9910_v46   ;;  %v4602_v50 = vadd.f32 %v4504_v5, %v4010_v38  ;;  %vm5291_vm5 = vcmp.ge.f32.partialorder %v5193_v32, 1.0  ;;  %v3419_v1 = vadd.f32 %v3321_v44, %v2827_v13  ;;  %v4505_v5 = vmul.f32 %v12551_v26, %v13236_v56  ;;  %v9913_v38 = vld [vmem:[%s10058_s8 + $0x1d0] sm:$0xff]  ;;  %v5608_v32 = vld [vmem:[%s16041_s4] sm:$0x3]  ;;  %v17189_v56 = vld [vmem:[#allocation383_spill] sm:$0xff] }
 0x5cc   : > { %v4012_v11 = vadd.f32 %v3914_v28, %v3420_v29  ;;  %v8686_v36 = vsel %vm5291_vm5, 1.0, %v16202_v33  ;;  %v1645_v46 = vadd.f32 %v1547_v53, %v1053_v0  ;;  %v2731_v10 = vmul.f32 %v12513_v54, %v17189_v56  ;;  %v17193_v29 = vld [vmem:[#allocation533_spill] sm:$0xff]  ;;  %v17194_v0 = vld [vmem:[#allocation535_spill] sm:$0xff] }
 0x5cd   : > { %v4807_v35 = vpop.permute.xlu1 %4806  ;;  %v4011_v47 = vadd.f32 %v3913_v51, %v3419_v1  ;;  %v1646_v27 = vadd.f32 %v1548_v18, %v1054_v57  ;;  %v13511_v15 = vrot.slane %v5608_v32, %v17194_v0  ;;  %v17196_v58 = vld [vmem:[#allocation181_spill] sm:$0xff] }
 0x5ce   : > { %v5096_v49 = vmul.f32 %v12546_v3, %v4807_v35  ;;  %v957_v35 = vmul.f32 %v12479_v9, %v17190_v17  ;;  %v2237_v39 = vadd.f32 %v2139_v48, %v1645_v46  ;;  %v3915_v48 = vmul.f32 %v12534_v62, %v17195_v6 }
 0x5cf   : > { %9577 = vset.pattern.permute.xlu1 %v16922_v19  ;;  %v4603_v8 = vadd.f32 %v4505_v5, %v4011_v47  ;;  %v1549_v51 = vmul.f32 %v12490_v16, %v17196_v58  ;;  %v2238_v1 = vadd.f32 %v2140_v21, %v1646_v27  ;;  %v17201_v21 = vld [vmem:[#allocation509_spill] sm:$0xff]  ;;  %v17202_v27 = vld [vmem:[#allocation382_spill] sm:$0xff] }
 0x5d0   : > { %v5194_v59 = vadd.f32 %v5096_v49, %v4602_v50  ;;  %4890 = vperm.xlu1 %9577, %v9911_v55   ;;  %v17192_v49 = vld [vmem:[#allocation444_spill] sm:$0xff]  ;;  %v1056_v55 = vadd.f32 %v13468_v34, %v958_v63  ;;  %v2829_v53 = vadd.f32 %v2731_v10, %v2237_v39  ;;  %v17208_v58 = vld [vmem:[#allocation90_spill] sm:$0xff] }
 0x5d1   : > { %v3323_v7 = vmul.f32 %v12515_v41, %v17192_v49  ;;  %v5099_v49 = vmul.f32 %v12546_v3, %v13323_v42  ;;  %v17205_v42 = vld [vmem:[#allocation89_spill] sm:$0xff] }
 0x5d2   : > { %vm5292_vm6 = vcmp.ge.f32.partialorder %v5194_v59, 1.0  ;;  %v4223_v12 = vpop.permute.xlu1 %4222  ;;  %v13506_v59 = vrot.slane %v5608_v32, %v17193_v29  ;;  %v17199_v32 = vld [vmem:[#allocation449_spill] sm:$0xff]  ;;  %v960_v6 = vmul.f32 %v12479_v9, %v17205_v42 }
 0x5d3   : > { %v8687_v37 = vsel %vm5292_vm6, 1.0, %v16202_v33  ;;  %v4506_v14 = vmul.f32 %v12551_v26, %v4223_v12  ;;  %v17197_v12 = vld [vmem:[#allocation182_spill] sm:$0xff]  ;;  %v3421_v5 = vadd.f32 %v3323_v7, %v2829_v53  ;;  %v3324_v57 = vmul.f32 %v12515_v41, %v17199_v32 }
 0x5d4   : > { %v5568_v25 = vpack.c.bf16 %v8687_v37, %v8686_v36  ;;  %9578 = vset.pattern.permute.xlu1 %v16921_v31  ;;  %v17198_v36 = vld [vmem:[#allocation380_spill] sm:$0xff] }
 0x5d5   : > { %v4604_v61 = vadd.f32 %v4506_v14, %v4012_v11  ;;  %4306 = vperm.xlu1 %9578, %v9913_v38   ;;  %v1055_v11 = vadd.f32 %v13468_v34, %v957_v35  ;;  %v2732_v37 = vmul.f32 %v12513_v54, %v17198_v36  ;;  %v4013_v56 = vadd.f32 %v3915_v48, %v3421_v5  ;;  %v17200_v35 = vld [vmem:[#allocation242_spill] sm:$0xff]  ;;  %v9915_v5 = vld [vmem:[%s10058_s8 + $0x1e8] sm:$0xff] }
 0x5d6   : > { %8775 = vmatmul.mubr.msk.bf16.gmra.mrb[68].mxu0 %vm5660_vm2, %v5568_v25  ;;  %v2142_v39 = vmul.f32 %v12493_v40, %v17200_v35 }
 0x5d7   : > { %v5196_v28 = vadd.f32 %v5098_v23, %v4604_v61  ;;  %v4811_v50 = vpop.permute.xlu1 %4810  ;;  %6020 = vmatprep.mubr.bf16.mxu0 %v16998_v22  ;;  %v1550_v23 = vmul.f32 %v12490_v16, %v17197_v12  ;;  %v2830_v30 = vadd.f32 %v2732_v37, %v2238_v1  ;;  %v959_v12 = vmul.f32 %v12479_v9, %v17208_v58 }
 0x5d8   : > { %v5097_v44 = vmul.f32 %v12546_v3, %v4811_v50  ;;  %v5102_v58 = vmul.f32 %v12546_v3, %v13348_v24 }
 0x5d9   : > { %4310 = vperm.xlu1 %9578, %v9914_v52   ;;  %vm5294_vm7 = vcmp.ge.f32.partialorder %v5196_v28, 1.0  ;;  %v3916_v28 = vmul.f32 %v12534_v62, %v17201_v21  ;;  %v3422_v48 = vadd.f32 %v3324_v57, %v2830_v30  ;;  %v1058_v57 = vadd.f32 %v13468_v34, %v960_v6  ;;  %v17215_v21 = vld [vmem:[#allocation445_spill] sm:$0xff] }
 0x5da   : > { %v5195_v13 = vadd.f32 %v5097_v44, %v4603_v8  ;;  %v8689_v43 = vsel %vm5294_vm7, 1.0, %v16202_v33  ;;  %v1648_v44 = vadd.f32 %v1550_v23, %v1056_v55  ;;  %v17209_v23 = vld [vmem:[#allocation238_spill] sm:$0xff] }
 0x5db   : > { %v5842_v14 = vpop.f32.mrb[0].mxu0  ;;  %v2141_v36 = vmul.f32 %v12493_v40, %v17209_v23 }
 0x5dc   : > { %vm5293_vm8 = vcmp.ge.f32.partialorder %v5195_v13, 1.0  ;;  %v5843_v25 = vadd.f32 %v5842_v14, %v13506_v59  ;;  %v4227_v20 = vpop.permute.xlu1 %4226  ;;  %v5844_v63 = vpop.f32.mrb[1].mxu0  ;;  %v2240_v37 = vadd.f32 %v2142_v39, %v1648_v44  ;;  %v17210_v14 = vld [vmem:[#allocation241_spill] sm:$0xff]  ;;  %v17214_v39 = vld [vmem:[#allocation92_spill] sm:$0xff] }
 0x5dd   : > { %v8688_v46 = vsel %vm5293_vm8, 1.0, %v16202_v33  ;;  %v4507_v18 = vmul.f32 %v12551_v26, %v4227_v20  ;;  %v5845_v61 = vadd.f32 %v5844_v63, %v13511_v15  ;;  %9579 = vset.pattern.permute.xlu1 %v16922_v19  ;;  %v5846_v38 = vpop.f32.mrb[2].mxu0  ;;  %v3326_v1 = vmul.f32 %v12515_v41, %v17210_v14  ;;  %v17217_v44 = vld [vmem:[#allocation240_spill] sm:$0xff] }
 0x5de   : > { %v5569_v10 = vpack.c.bf16 %v8689_v43, %v8688_v46  ;;  %v5847_v47 = vadd.f32 %v5846_v38, %v13506_v59  ;;  %4902 = vperm.xlu1 %9579, %v9914_v52   ;;  %v5848_v17 = vpop.f32.mrb[3].mxu0  ;;  %vm6331_vm9 = vcmp.ge.f32.partialorder %v5843_v25, 1.0  ;;  %v2734_v52 = vmul.f32 %v12513_v54, %v17202_v27  ;;  %v17211_v43 = vld [vmem:[#allocation385_spill] sm:$0xff] }
 0x5df   : > { %v5849_v50 = vadd.f32 %v5848_v17, %v13511_v15  ;;  %v4605_v7 = vadd.f32 %v4507_v18, %v4013_v56  ;;  %vm6332_vm11 = vcmp.ge.f32.partialorder %v5845_v61, 1.0  ;;  %v4014_v25 = vadd.f32 %v3916_v28, %v3422_v48  ;;  %v17212_v61 = vld [vmem:[#allocation511_spill] sm:$0xff]  ;;  %v17218_v48 = vld [vmem:[#allocation518_spill] sm:$0xff] }
 0x5e0   : > { %vm6333_vm10 = vcmp.ge.f32.partialorder %v5847_v47, 1.0  ;;  %v4231_v8 = vpop.permute.xlu1 %4230  ;;  %8776 = vmatmul.mubr.msk.bf16.gmra.mrb[72].mxu0 %vm5660_vm2, %v5569_v10  ;;  %v1647_v63 = vadd.f32 %v1549_v51, %v1055_v11  ;;  %v2832_v46 = vadd.f32 %v2734_v52, %v2240_v37  ;;  %v2733_v18 = vmul.f32 %v12513_v54, %v17211_v43  ;;  %v17213_v17 = vld [vmem:[#allocation91_spill] sm:$0xff] }
 0x5e1   : > { %vm13541_vm12 = vmpackc.low %vm6333_vm10, %vm6331_vm9  ;;  %vm6334_vm13 = vcmp.ge.f32.partialorder %v5849_v50, 1.0  ;;  %6030 = vmatprep.mubr.bf16.mxu0 %v16998_v22  ;;  %v4508_v55 = vmul.f32 %v12551_v26, %v4231_v8  ;;  %v5197_v20 = vadd.f32 %v5099_v49, %v4605_v7  ;;  %v3918_v38 = vmul.f32 %v12534_v62, %v17212_v61  ;;  %v9916_v49 = vld [vmem:[%s10058_s8 + $0x1e0] sm:$0xff]  ;;  %v17216_v7 = vld [vmem:[#allocation183_spill] sm:$0xff] }
 0x5e2   : > { %vm13548_vm14 = vmpackc.low %vm6334_vm13, %vm6332_vm11  ;;  %9581 = vset.pattern.permute.xlu1 %v16921_v31  ;;  %v1057_v47 = vadd.f32 %v13468_v34, %v959_v12  ;;  %v962_v35 = vmul.f32 %v12479_v9, %v17213_v17  ;;  %v2239_v11 = vadd.f32 %v2141_v36, %v1647_v63  ;;  %v3424_v51 = vadd.f32 %v3326_v1, %v2832_v46  ;;  %v17219_v61 = vld [vmem:[#allocation184_spill] sm:$0xff]  ;;  %v17220_v17 = vld [vmem:[#allocation387_spill] sm:$0xff] }
 0x5e3   : > { %4318 = vperm.xlu1 %9581, %v9915_v5   ;;  %v4606_v56 = vadd.f32 %v4508_v55, %v4014_v25  ;;  %v961_v30 = vmul.f32 %v12479_v9, %v17214_v39  ;;  %v3325_v28 = vmul.f32 %v12515_v41, %v17215_v21  ;;  %vm5295_vm15 = vcmp.ge.f32.partialorder %v5197_v20, 1.0 }
 0x5e4   : > { %v1551_v8 = vmul.f32 %v12490_v16, %v17216_v7  ;;  %v2143_v27 = vmul.f32 %v12493_v40, %v17217_v44  ;;  %v2831_v52 = vadd.f32 %v2733_v18, %v2239_v11  ;;  %v4016_v42 = vadd.f32 %v3918_v38, %v3424_v51 }
 0x5e5   : > { %v4823_v32 = vpop.permute.xlu1 %4822  ;;  %v3917_v55 = vmul.f32 %v12534_v62, %v17218_v48  ;;  %v8690_v37 = vsel %vm5295_vm15, 1.0, %v16202_v33  ;;  %v4509_v63 = vmul.f32 %v12551_v26, %v13262_v45  ;;  %v1552_v38 = vmul.f32 %v12490_v16, %v17219_v61 }
 0x5e6   : > { %v5100_v10 = vmul.f32 %v12546_v3, %v4823_v32  ;;  %v3423_v20 = vadd.f32 %v3325_v28, %v2831_v52  ;;  %v1649_v18 = vadd.f32 %v1551_v8, %v1057_v47  ;;  %v2735_v11 = vmul.f32 %v12513_v54, %v17220_v17  ;;  %v17223_v28 = vld [vmem:[#allocation244_spill] sm:$0xff] }
 0x5e7   : > { %9582 = vset.pattern.permute.xlu1 %v16922_v19  ;;  %v1060_v52 = vadd.f32 %v13468_v34, %v962_v35 }
 0x5e8   : > { %v5198_v50 = vadd.f32 %v5100_v10, %v4606_v56  ;;  %4906 = vperm.xlu1 %9582, %v9916_v49   ;;  %v9917_v10 = vld [vmem:[%s10058_s8 + $0x1f0] sm:$0xff]  ;;  %v4015_v51 = vadd.f32 %v3917_v55, %v3423_v20  ;;  %v2241_v45 = vadd.f32 %v2143_v27, %v1649_v18  ;;  %v17224_v49 = vld [vmem:[#allocation447_spill] sm:$0xff] }
 0x5e9   : > { %v5852_v6 = vpop.f32.mrb[4].mxu0  ;;  %v3327_v7 = vmul.f32 %v12515_v41, %v17224_v49  ;;  %v17227_v55 = vld [vmem:[#allocation520_spill] sm:$0xff]  ;;  %v13638_v49 = vpop.permute.xlu0 %4850 }
 0x5ea   : > { %vm5296_vm0 = vcmp.ge.f32.partialorder %v5198_v50, 1.0  ;;  %v5853_v12 = vadd.f32 %v5852_v6, %v13506_v59  ;;  %v4239_v23 = vpop.permute.xlu1 %4238  ;;  %v5854_v36 = vpop.f32.mrb[5].mxu0  ;;  %v2144_v50 = vmul.f32 %v12493_v40, %v17223_v28  ;;  %v4607_v8 = vadd.f32 %v4509_v63, %v4015_v51  ;;  %v9918_v6 = vld [vmem:[%s10058_s8 + $0x1f8] sm:$0xff] }
 0x5eb   : > { %v8691_v14 = vsel %vm5296_vm0, 1.0, %v16202_v33  ;;  %v4510_v1 = vmul.f32 %v12551_v26, %v4239_v23  ;;  %v5855_v5 = vadd.f32 %v5854_v36, %v13511_v15  ;;  %v5856_v25 = vpop.f32.mrb[6].mxu0  ;;  %v2833_v48 = vadd.f32 %v2735_v11, %v2241_v45  ;;  %v17228_v36 = vld [vmem:[#allocation185_spill] sm:$0xff]  ;;  %v17232_v45 = vld [vmem:[#allocation246_spill] sm:$0xff] }
 0x5ec   : > { %v5570_v24 = vpack.c.bf16 %v8691_v14, %v8690_v37  ;;  %v5857_v46 = vadd.f32 %v5856_v25, %v13506_v59  ;;  %9583 = vset.pattern.permute.xlu1 %v16921_v31  ;;  %v5858_v43 = vpop.f32.mrb[7].mxu0  ;;  %vm6335_vm1 = vcmp.ge.f32.partialorder %v5853_v12, 1.0  ;;  %v1059_v23 = vadd.f32 %v13468_v34, %v961_v30  ;;  %v17229_v14 = vld [vmem:[#allocation186_spill] sm:$0xff]  ;;  %v17233_v28 = vld [vmem:[#allocation513_spill] sm:$0xff] }
 0x5ed   : > { %v4608_v32 = vadd.f32 %v4510_v1, %v4016_v42  ;;  %v5859_v56 = vadd.f32 %v5858_v43, %v13511_v15  ;;  %4322 = vperm.xlu1 %9583, %v9917_v10   ;;  %vm6336_vm4 = vcmp.ge.f32.partialorder %v5855_v5, 1.0  ;;  %v1650_v42 = vadd.f32 %v1552_v38, %v1058_v57  ;;  %v17230_v5 = vld [vmem:[#allocation384_spill] sm:$0xff] }
 0x5ee   : > { %vm6337_vm3 = vcmp.ge.f32.partialorder %v5857_v46, 1.0  ;;  %8777 = vmatmul.mubr.msk.bf16.gmra.mrb[76].mxu0 %vm5660_vm2, %v5570_v24  ;;  %v1553_v37 = vmul.f32 %v12490_v16, %v17228_v36  ;;  %v1554_v1 = vmul.f32 %v12490_v16, %v17229_v14  ;;  %v2736_v35 = vmul.f32 %v12513_v54, %v17230_v5  ;;  %v17238_v36 = vld [vmem:[#allocation94_spill] sm:$0xff] }
 0x5ef   : > { %v5200_v39 = vadd.f32 %v5102_v58, %v4608_v32  ;;  %vm13600_vm5 = vmpackc.low %vm6337_vm3, %vm6335_vm1  ;;  %vm6338_vm6 = vcmp.ge.f32.partialorder %v5859_v56, 1.0  ;;  %v4827_v21 = vpop.permute.xlu1 %4826  ;;  %6040 = vmatprep.mubr.bf16.mxu0 %v16998_v22  ;;  %v3919_v58 = vmul.f32 %v12534_v62, %v17227_v55  ;;  %v2242_v25 = vadd.f32 %v2144_v50, %v1650_v42  ;;  %v17231_v32 = vld [vmem:[#allocation452_spill] sm:$0xff] }
 0x5f0   : > { %vm13609_vm7 = vmpackc.low %vm6338_vm6, %vm6336_vm4  ;;  %v5101_v27 = vmul.f32 %v12546_v3, %v4827_v21  ;;  %v3425_v20 = vadd.f32 %v3327_v7, %v2833_v48  ;;  %v3328_v56 = vmul.f32 %v12515_v41, %v17231_v32  ;;  %v3920_v50 = vmul.f32 %v12534_v62, %v17233_v28  ;;  %v17234_v48 = vld [vmem:[#allocation386_spill] sm:$0xff]  ;;  %v17244_v32 = vld [vmem:[#allocation515_spill] sm:$0xff] }
 0x5f1   : > { %4326 = vperm.xlu1 %9583, %v9918_v6   ;;  %vm5298_vm8 = vcmp.ge.f32.partialorder %v5200_v39, 1.0  ;;  %v2146_v39 = vmul.f32 %v12493_v40, %v17232_v45  ;;  %v2834_v21 = vadd.f32 %v2736_v35, %v2242_v25  ;;  %v2738_v55 = vmul.f32 %v12513_v54, %v17234_v48  ;;  %v17241_v35 = vld [vmem:[#allocation243_spill] sm:$0xff] }
 0x5f2   : > { %v5199_v12 = vadd.f32 %v5101_v27, %v4607_v8  ;;  %v8693_v30 = vsel %vm5298_vm8, 1.0, %v16202_v33  ;;  %v4017_v10 = vadd.f32 %v3919_v58, %v3425_v20  ;;  %v5103_v8 = vmul.f32 %v12546_v3, %v13372_v2  ;;  %v17237_v2 = vld [vmem:[#allocation93_spill] sm:$0xff]  ;;  %v17242_v20 = vld [vmem:[#allocation454_spill] sm:$0xff] }
 0x5f3   : > { %v5862_v57 = vpop.f32.mrb[8].mxu0  ;;  %v963_v14 = vmul.f32 %v12479_v9, %v17238_v36  ;;  %v3426_v5 = vadd.f32 %v3328_v56, %v2834_v21  ;;  %v3922_v56 = vmul.f32 %v12534_v62, %v17244_v32  ;;  %v17245_v21 = vld [vmem:[#allocation95_spill] sm:$0xff]  ;;  %v17250_v36 = vld [vmem:[#allocation245_spill] sm:$0xff] }
 0x5f4   : > { %vm5297_vm9 = vcmp.ge.f32.partialorder %v5199_v12, 1.0  ;;  %v5863_v63 = vadd.f32 %v5862_v57, %v13506_v59  ;;  %v4243_v24 = vpop.permute.xlu1 %4242  ;;  %v5864_v46 = vpop.f32.mrb[9].mxu0  ;;  %v964_v12 = vmul.f32 %v12479_v9, %v17237_v2  ;;  %v2145_v57 = vmul.f32 %v12493_v40, %v17241_v35  ;;  %v17249_v2 = vld [vmem:[#allocation188_spill] sm:$0xff] }
 0x5f5   : > { %v8692_v43 = vsel %vm5297_vm9, 1.0, %v16202_v33  ;;  %v4511_v18 = vmul.f32 %v12551_v26, %v4243_v24  ;;  %v5865_v61 = vadd.f32 %v5864_v46, %v13511_v15  ;;  %9584 = vset.pattern.permute.xlu1 %v16922_v19  ;;  %v5866_v38 = vpop.f32.mrb[10].mxu0  ;;  %v9919_v24 = vld [vmem:[%s10058_s8 + $0x200] sm:$0xff]  ;;  %v4018_v46 = vadd.f32 %v3920_v50, %v3426_v5 }
 0x5f6   : > { %v5571_v17 = vpack.c.bf16 %v8693_v30, %v8692_v43  ;;  %v5867_v11 = vadd.f32 %v5866_v38, %v13506_v59  ;;  %4918 = vperm.xlu1 %9584, %v9918_v6   ;;  %v5868_v51 = vpop.f32.mrb[11].mxu0  ;;  %vm6339_vm10 = vcmp.ge.f32.partialorder %v5863_v63, 1.0  ;;  %v1652_v6 = vadd.f32 %v1554_v1, %v1060_v52 }
 0x5f7   : > { %v5869_v7 = vadd.f32 %v5868_v51, %v13511_v15  ;;  %v4609_v27 = vadd.f32 %v4511_v18, %v4017_v10  ;;  %vm6340_vm13 = vcmp.ge.f32.partialorder %v5865_v61, 1.0  ;;  %v3330_v63 = vmul.f32 %v12515_v41, %v17242_v20  ;;  %v17243_v61 = vld [vmem:[#allocation389_spill] sm:$0xff]  ;;  %v4251_v10 = vpop.permute.xlu0 %4250 }
 0x5f8   : > { %vm6341_vm11 = vcmp.ge.f32.partialorder %v5867_v11, 1.0  ;;  %v4247_v42 = vpop.permute.xlu1 %4246  ;;  %8778 = vmatmul.mubr.msk.bf16.gmra.mrb[80].mxu0 %vm5660_vm2, %v5571_v17  ;;  %v2244_v25 = vadd.f32 %v2146_v39, %v1652_v6  ;;  %v1651_v30 = vadd.f32 %v1553_v37, %v1059_v23  ;;  %v2737_v38 = vmul.f32 %v12513_v54, %v17243_v61  ;;  %v17246_v23 = vld [vmem:[#allocation96_spill] sm:$0xff] }
 0x5f9   : > { %vm13646_vm15 = vmpackc.low %vm6341_vm11, %vm6339_vm10  ;;  %vm6342_vm0 = vcmp.ge.f32.partialorder %v5869_v7, 1.0  ;;  %6050 = vmatprep.mubr.bf16.mxu0 %v16998_v22  ;;  %v4512_v1 = vmul.f32 %v12551_v26, %v4247_v42  ;;  %v5201_v43 = vadd.f32 %v5103_v8, %v4609_v27  ;;  %v1062_v11 = vadd.f32 %v13468_v34, %v964_v12  ;;  %v9920_v8 = vld [vmem:[%s10058_s8 + $0x208] sm:$0xff]  ;;  %v17248_v6 = vld [vmem:[#allocation448_spill] sm:$0xff] }
 0x5fa   : > { %vm13655_vm1 = vmpackc.low %vm6342_vm0, %vm6340_vm13  ;;  %9585 = vset.pattern.permute.xlu1 %v16921_v31  ;;  %v2836_v18 = vadd.f32 %v2738_v55, %v2244_v25  ;;  %v1061_v51 = vadd.f32 %v13468_v34, %v963_v14  ;;  %v966_v28 = vmul.f32 %v12479_v9, %v17245_v21  ;;  %v13677_v37 = vmul.f32 %v12479_v9, %v17246_v23  ;;  %v17247_v27 = vld [vmem:[#allocation187_spill] sm:$0xff] }
 0x5fb   : > { %4330 = vperm.xlu1 %9585, %v9919_v24   ;;  %v4610_v45 = vadd.f32 %v4512_v1, %v4018_v46  ;;  %v2243_v50 = vadd.f32 %v2145_v57, %v1651_v30  ;;  %v1555_v42 = vmul.f32 %v12490_v16, %v17247_v27  ;;  %v3329_v48 = vmul.f32 %v12515_v41, %v17248_v6  ;;  %v17251_v57 = vld [vmem:[#allocation522_spill] sm:$0xff]  ;;  %v17252_v23 = vld [vmem:[#allocation391_spill] sm:$0xff] }
 0x5fc   : > { %v3428_v7 = vadd.f32 %v3330_v63, %v2836_v18  ;;  %vm5299_vm3 = vcmp.ge.f32.partialorder %v5201_v43, 1.0  ;;  %v1556_v12 = vmul.f32 %v12490_v16, %v17249_v2  ;;  %v2147_v14 = vmul.f32 %v12493_v40, %v17250_v36  ;;  %v13693_v43 = vpop.permute.xlu0 %4266  ;;  %v17256_v2 = vld [vmem:[#allocation450_spill] sm:$0xff] }
 0x5fd   : > { %v4839_v17 = vpop.permute.xlu1 %4838  ;;  %v2835_v5 = vadd.f32 %v2737_v38, %v2243_v50  ;;  %v3921_v25 = vmul.f32 %v12534_v62, %v17251_v57  ;;  %v5106_v20 = vmul.f32 %v12546_v3, %v13395_v4  ;;  %v8694_v30 = vsel %vm5299_vm3, 1.0, %v16202_v33 }
 0x5fe   : > { %v5104_v39 = vmul.f32 %v12546_v3, %v4839_v17  ;;  %v4020_v1 = vadd.f32 %v3922_v56, %v3428_v7  ;;  %v4513_v4 = vmul.f32 %v12551_v26, %v4251_v10  ;;  %v1653_v21 = vadd.f32 %v1555_v42, %v1061_v51 }
 0x5ff   : > { %4334 = vperm.xlu1 %9585, %v9920_v8   ;;  %v3427_v56 = vadd.f32 %v3329_v48, %v2835_v5  ;;  %v2739_v50 = vmul.f32 %v12513_v54, %v17252_v23  ;;  %v3331_v36 = vmul.f32 %v12515_v41, %v17256_v2 }
 0x600   : > { %v5202_v55 = vadd.f32 %v5104_v39, %v4610_v45  ;;  %v2245_v48 = vadd.f32 %v2147_v14, %v1653_v21  ;;  %v13718_v57 = vpop.permute.xlu0 %4282 }
 0x601   : > { %v5872_v35 = vpop.f32.mrb[12].mxu0  ;;  %v4019_v6 = vadd.f32 %v3921_v25, %v3427_v56  ;;  %v9921_v25 = vld [vmem:[%s10058_s8 + $0x210] sm:$0xff] }
 0x602   : > { %vm5300_vm4 = vcmp.ge.f32.partialorder %v5202_v55, 1.0  ;;  %v5873_v63 = vadd.f32 %v5872_v35, %v13506_v59  ;;  %v4255_v24 = vpop.permute.xlu1 %4254  ;;  %v5874_v46 = vpop.f32.mrb[13].mxu0  ;;  %v1654_v35 = vadd.f32 %v1556_v12, %v1062_v11  ;;  %v1063_v11 = vadd.f32 %v13468_v34, %v13677_v37 }
 0x603   : > { %v8695_v18 = vsel %vm5300_vm4, 1.0, %v16202_v33  ;;  %v4514_v61 = vmul.f32 %v12551_v26, %v4255_v24  ;;  %v5875_v38 = vadd.f32 %v5874_v46, %v13511_v15  ;;  %9586 = vset.pattern.permute.xlu1 %v16922_v19  ;;  %v5876_v32 = vpop.f32.mrb[14].mxu0  ;;  %v4611_v5 = vadd.f32 %v4513_v4, %v4019_v6  ;;  %v17257_v24 = vld [vmem:[#allocation523_spill] sm:$0xff]  ;;  %v17261_v6 = vld [vmem:[#allocation456_spill] sm:$0xff] }
 0x604   : > { %v5572_v17 = vpack.c.bf16 %v8695_v18, %v8694_v30  ;;  %v5877_v45 = vadd.f32 %v5876_v32, %v13506_v59  ;;  %4926 = vperm.xlu1 %9586, %v9920_v8   ;;  %v5878_v39 = vpop.f32.mrb[15].mxu0  ;;  %vm6343_vm6 = vcmp.ge.f32.partialorder %v5873_v63, 1.0  ;;  %v17255_v8 = vld [vmem:[#allocation248_spill] sm:$0xff]  ;;  %v2837_v63 = vadd.f32 %v2739_v50, %v2245_v48  ;;  %v17259_v18 = vld [vmem:[#allocation190_spill] sm:$0xff] }
 0x605   : > { %v4612_v7 = vadd.f32 %v4514_v61, %v4020_v1  ;;  %v5879_v27 = vadd.f32 %v5878_v39, %v13511_v15  ;;  %vm6344_vm9 = vcmp.ge.f32.partialorder %v5875_v38, 1.0  ;;  %v2148_v42 = vmul.f32 %v12493_v40, %v17255_v8  ;;  %v17260_v38 = vld [vmem:[#allocation388_spill] sm:$0xff] }
 0x606   : > { %vm6345_vm8 = vcmp.ge.f32.partialorder %v5877_v45, 1.0  ;;  %8779 = vmatmul.mubr.msk.bf16.gmra.mrb[84].mxu0 %vm5660_vm2, %v5572_v17  ;;  %v1064_v1 = vadd.f32 %v13468_v34, %v966_v28  ;;  %v3923_v46 = vmul.f32 %v12534_v62, %v17257_v24  ;;  %v17258_v28 = vld [vmem:[#allocation189_spill] sm:$0xff]  ;;  %v1558_v61 = vmul.f32 %v12490_v16, %v17259_v18 }
 0x607   : > { %v5204_v10 = vadd.f32 %v5106_v20, %v4612_v7  ;;  %vm13706_vm10 = vmpackc.low %vm6345_vm8, %vm6343_vm6  ;;  %vm6346_vm11 = vcmp.ge.f32.partialorder %v5879_v27, 1.0  ;;  %v4843_v51 = vpop.permute.xlu1 %4842  ;;  %6060 = vmatprep.mubr.bf16.mxu0 %v16998_v22  ;;  %v16200_v20 = vmov 1.0|1.0   ;;  %v1557_v12 = vmul.f32 %v12490_v16, %v17258_v28  ;;  %v17264_v28 = vld [vmem:[#allocation390_spill] sm:$0xff] }
 0x608   : > { %v5105_v14 = vmul.f32 %v12546_v3, %v4843_v51  ;;  %9587 = vset.pattern.permute.xlu1 %v16848_v60  ;;  %vm9047_vm13 = vmpackc.low %vm6346_vm11, %vm6344_vm9  ;;  %v2740_v32 = vmul.f32 %v12513_v54, %v17260_v38  ;;  %v2246_v4 = vadd.f32 %v2148_v42, %v1654_v35  ;;  %v3429_v17 = vadd.f32 %v3331_v36, %v2837_v63  ;;  %v17262_v42 = vld [vmem:[#allocation250_spill] sm:$0xff]  ;;  %v13748_v35 = vpop.permute.xlu0 %4298  ;;  %v17276_v38 = vld [vmem:[#allocation191_spill] sm:$0xff] }
 0x609   : > { %3746 = vperm.xlu1 %9587, %v9921_v25   ;;  %9048 = vmatprep.mubr.msk.bf16.mxu1 %vm9047_vm13, %v16200_v20  ;;  %vm5302_vm0 = vcmp.ge.f32.partialorder %v5204_v10, 1.0  ;;  %v3332_v48 = vmul.f32 %v12515_v41, %v17261_v6  ;;  %v2150_v2 = vmul.f32 %v12493_v40, %v17262_v42  ;;  %v5107_v24 = vmul.f32 %v12546_v3, %v13638_v49  ;;  %v17267_v49 = vld [vmem:[#allocation97_spill] sm:$0xff] }
 0x60a   : > { %v5203_v30 = vadd.f32 %v5105_v14, %v4611_v5  ;;  %9050 = vmatmul.mubr.msk.bf16.vlgmr.msra.gmra.mrb[0].mxu1 %vm13706_vm10, %v16200_v20  ;;  %v8697_v37 = vsel %vm5302_vm0, 1.0, %v16202_v33  ;;  %v4021_v10 = vadd.f32 %v3923_v46, %v3429_v17  ;;  %v2838_v36 = vadd.f32 %v2740_v32, %v2246_v4  ;;  %v17263_v5 = vld [vmem:[#allocation517_spill] sm:$0xff] }
 0x60b   : > { %v5882_v56 = vpop.f32.mrb[16].mxu0  ;;  %v3924_v14 = vmul.f32 %v12534_v62, %v17263_v5  ;;  %v2742_v18 = vmul.f32 %v12513_v54, %v17264_v28  ;;  %v968_v32 = vmul.f32 %v12479_v9, %v17267_v49  ;;  %v9922_v17 = vld [vmem:[%s10058_s8 + $0x218] sm:$0xff]  ;;  %v1559_v49 = vmul.f32 %v12490_v16, %v17276_v38  ;;  %v17280_v38 = vld [vmem:[#allocation395_spill] sm:$0xff] }
 0x60c   : > { %vm5301_vm3 = vcmp.ge.f32.partialorder %v5203_v30, 1.0  ;;  %v5883_v45 = vadd.f32 %v5882_v56, %v13506_v59  ;;  %v4259_v39 = vpop.permute.xlu1 %4258  ;;  %v5884_v21 = vpop.f32.mrb[17].mxu0  ;;  %v1656_v30 = vadd.f32 %v1558_v61, %v1064_v1  ;;  %v3430_v56 = vadd.f32 %v3332_v48, %v2838_v36  ;;  %v17268_v1 = vld [vmem:[#allocation98_spill] sm:$0xff]  ;;  %v17271_v48 = vld [vmem:[#allocation393_spill] sm:$0xff] }
 0x60d   : > { %v8696_v23 = vsel %vm5301_vm3, 1.0, %v16202_v33  ;;  %v4515_v50 = vmul.f32 %v12551_v26, %v4259_v39  ;;  %v5885_v7 = vadd.f32 %v5884_v21, %v13511_v15  ;;  %9588 = vset.pattern.permute.xlu1 %v16921_v31  ;;  %v5886_v27 = vpop.f32.mrb[18].mxu0  ;;  %v967_v61 = vmul.f32 %v12479_v9, %v17268_v1 }
 0x60e   : > { %v5573_v55 = vpack.c.bf16 %v8697_v37, %v8696_v23  ;;  %v5887_v51 = vadd.f32 %v5886_v27, %v13506_v59  ;;  %4338 = vperm.xlu1 %9588, %v9921_v25   ;;  %v5888_v8 = vpop.f32.mrb[19].mxu0  ;;  %vm6347_vm4 = vcmp.ge.f32.partialorder %v5883_v45, 1.0  ;;  %v17269_v45 = vld [vmem:[#allocation247_spill] sm:$0xff]  ;;  %v2248_v21 = vadd.f32 %v2150_v2, %v1656_v30  ;;  %v17270_v23 = vld [vmem:[#allocation458_spill] sm:$0xff] }
 0x60f   : > { %v5889_v63 = vadd.f32 %v5888_v8, %v13511_v15  ;;  %v4613_v46 = vadd.f32 %v4515_v50, %v4021_v10  ;;  %vm6348_vm8 = vcmp.ge.f32.partialorder %v5885_v7, 1.0  ;;  %v2149_v39 = vmul.f32 %v12493_v40, %v17269_v45  ;;  %v13779_v8 = vpop.permute.xlu0 %4314  ;;  %v17275_v30 = vld [vmem:[#allocation451_spill] sm:$0xff] }
 0x610   : > { %vm6349_vm6 = vcmp.ge.f32.partialorder %v5887_v51, 1.0  ;;  %v4263_v25 = vpop.permute.xlu1 %4262  ;;  %8780 = vmatmul.mubr.msk.bf16.gmra.mrb[88].mxu0 %vm5660_vm2, %v5573_v55  ;;  %v3334_v37 = vmul.f32 %v12515_v41, %v17270_v23  ;;  %v4022_v50 = vadd.f32 %v3924_v14, %v3430_v56  ;;  %v1655_v27 = vadd.f32 %v1557_v12, %v1063_v11  ;;  %v17272_v55 = vld [vmem:[#allocation519_spill] sm:$0xff] }
 0x611   : > { %vm13756_vm9 = vmpackc.low %vm6349_vm6, %vm6347_vm4  ;;  %vm6350_vm10 = vcmp.ge.f32.partialorder %v5889_v63, 1.0  ;;  %6070 = vmatprep.mubr.bf16.mxu0 %v16998_v22  ;;  %v4516_v4 = vmul.f32 %v12551_v26, %v4263_v25  ;;  %v5205_v7 = vadd.f32 %v5107_v24, %v4613_v46  ;;  %v2840_v6 = vadd.f32 %v2742_v18, %v2248_v21  ;;  %v17273_v11 = vld [vmem:[#allocation99_spill] sm:$0xff]  ;;  %v17274_v46 = vld [vmem:[#allocation100_spill] sm:$0xff] }
 0x612   : > { %vm9051_vm11 = vmpackc.low %vm6350_vm10, %vm6348_vm8  ;;  %4342 = vperm.xlu1 %9588, %v9922_v17   ;;  %v2741_v10 = vmul.f32 %v12513_v54, %v17271_v48  ;;  %v3926_v51 = vmul.f32 %v12534_v62, %v17272_v55  ;;  %v1066_v2 = vadd.f32 %v13468_v34, %v968_v32  ;;  %v1065_v14 = vadd.f32 %v13468_v34, %v967_v61  ;;  %v17277_v32 = vld [vmem:[#allocation249_spill] sm:$0xff] }
 0x613   : > { %9052 = vmatprep.mubr.msk.bf16.mxu1 %vm9051_vm11, %v16200_v20  ;;  %v4614_v36 = vadd.f32 %v4516_v4, %v4022_v50  ;;  %v970_v12 = vmul.f32 %v12479_v9, %v17273_v11  ;;  %v2247_v63 = vadd.f32 %v2149_v39, %v1655_v27  ;;  %v3432_v24 = vadd.f32 %v3334_v37, %v2840_v6  ;;  %v4863_v61 = vpop.permute.xlu0 %4862  ;;  %v17278_v39 = vld [vmem:[#allocation525_spill] sm:$0xff] }
 0x614   : > { %9054 = vmatmul.mubr.msk.bf16.gmra.mrb[4].mxu1 %vm13756_vm9, %v16200_v20  ;;  %v969_v25 = vmul.f32 %v12479_v9, %v17274_v46  ;;  %v3333_v28 = vmul.f32 %v12515_v41, %v17275_v30  ;;  %vm5303_vm13 = vcmp.ge.f32.partialorder %v5205_v7, 1.0  ;;  %v2151_v56 = vmul.f32 %v12493_v40, %v17277_v32 }
 0x615   : > { %v4855_v42 = vpop.permute.xlu1 %4854  ;;  %v2839_v4 = vadd.f32 %v2741_v10, %v2247_v63  ;;  %v4024_v1 = vadd.f32 %v3926_v51, %v3432_v24  ;;  %v5110_v21 = vmul.f32 %v12546_v3, %v4863_v61  ;;  %v8698_v7 = vsel %vm5303_vm13, 1.0, %v16202_v33  ;;  %v17279_v24 = vld [vmem:[#allocation192_spill] sm:$0xff] }
 0x616   : > { %v5108_v5 = vmul.f32 %v12546_v3, %v4855_v42  ;;  %9589 = vset.pattern.permute.xlu1 %v16922_v19  ;;  %v4517_v51 = vmul.f32 %v12551_v26, %v13693_v43  ;;  %v1657_v63 = vadd.f32 %v1559_v49, %v1065_v14  ;;  %v1560_v46 = vmul.f32 %v12490_v16, %v17279_v24  ;;  %v17283_v49 = vld [vmem:[#allocation252_spill] sm:$0xff] }
 0x617   : > { %4934 = vperm.xlu1 %9589, %v9922_v17   ;;  %v3925_v17 = vmul.f32 %v12534_v62, %v17278_v39  ;;  %v3431_v55 = vadd.f32 %v3333_v28, %v2839_v4  ;;  %v2743_v32 = vmul.f32 %v12513_v54, %v17280_v38  ;;  %v9924_v38 = vld [vmem:[%s10058_s8 + $0x228] sm:$0xff] }
 0x618   : > { %v5206_v18 = vadd.f32 %v5108_v5, %v4614_v36  ;;  %v9923_v5 = vld [vmem:[%s10058_s8 + $0x220] sm:$0xff]  ;;  %v2249_v43 = vadd.f32 %v2151_v56, %v1657_v63 }
 0x619   : > { %v5892_v45 = vpop.f32.mrb[20].mxu0  ;;  %v4023_v28 = vadd.f32 %v3925_v17, %v3431_v55  ;;  %v17288_v55 = vld [vmem:[#allocation392_spill] sm:$0xff] }
 0x61a   : > { %vm5304_vm0 = vcmp.ge.f32.partialorder %v5206_v18, 1.0  ;;  %v5893_v23 = vadd.f32 %v5892_v45, %v13506_v59  ;;  %v4271_v37 = vpop.permute.xlu1 %4270  ;;  %v5894_v50 = vpop.f32.mrb[21].mxu0  ;;  %v17284_v45 = vld [vmem:[#allocation453_spill] sm:$0xff] }
 0x61b   : > { %v8699_v27 = vsel %vm5304_vm0, 1.0, %v16202_v33  ;;  %v4518_v6 = vmul.f32 %v12551_v26, %v4271_v37  ;;  %v5895_v48 = vadd.f32 %v5894_v50, %v13511_v15  ;;  %9590 = vset.pattern.permute.xlu1 %v16848_v60  ;;  %v5896_v10 = vpop.f32.mrb[22].mxu0  ;;  %v3335_v39 = vmul.f32 %v12515_v41, %v17284_v45  ;;  %v17285_v50 = vld [vmem:[#allocation527_spill] sm:$0xff] }
 0x61c   : > { %v5574_v42 = vpack.c.bf16 %v8699_v27, %v8698_v7  ;;  %v5897_v36 = vadd.f32 %v5896_v10, %v13506_v59  ;;  %3754 = vperm.xlu1 %9590, %v9923_v5   ;;  %v5898_v11 = vpop.f32.mrb[23].mxu0  ;;  %vm6351_vm3 = vcmp.ge.f32.partialorder %v5893_v23, 1.0  ;;  %v4615_v17 = vadd.f32 %v4517_v51, %v4023_v28  ;;  %v17289_v28 = vld [vmem:[#allocation460_spill] sm:$0xff] }
 0x61d   : > { %v4616_v30 = vadd.f32 %v4518_v6, %v4024_v1  ;;  %v5899_v18 = vadd.f32 %v5898_v11, %v13511_v15  ;;  %vm6352_vm6 = vcmp.ge.f32.partialorder %v5895_v48, 1.0  ;;  %v2152_v1 = vmul.f32 %v12493_v40, %v17283_v49  ;;  %v17286_v48 = vld [vmem:[#allocation193_spill] sm:$0xff] }
 0x61e   : > { %vm6353_vm4 = vcmp.ge.f32.partialorder %v5897_v36, 1.0  ;;  %8781 = vmatmul.mubr.msk.bf16.gmra.mrb[92].mxu0 %vm5660_vm2, %v5574_v42  ;;  %v1658_v23 = vadd.f32 %v1560_v46, %v1066_v2  ;;  %v2841_v37 = vadd.f32 %v2743_v32, %v2249_v43  ;;  %v3927_v7 = vmul.f32 %v12534_v62, %v17285_v50  ;;  %v17287_v2 = vld [vmem:[#allocation194_spill] sm:$0xff] }
 0x61f   : > { %v5208_v4 = vadd.f32 %v5110_v21, %v4616_v30  ;;  %vm13814_vm8 = vmpackc.low %vm6353_vm4, %vm6351_vm3  ;;  %vm6354_vm9 = vcmp.ge.f32.partialorder %v5899_v18, 1.0  ;;  %v4859_v14 = vpop.permute.xlu1 %4858  ;;  %6080 = vmatprep.mubr.bf16.mxu0 %v16998_v22  ;;  %v1068_v21 = vadd.f32 %v13468_v34, %v970_v12  ;;  %v1067_v6 = vadd.f32 %v13468_v34, %v969_v25 }
 0x620   : > { %vm9055_vm10 = vmpackc.low %vm6354_vm9, %vm6352_vm6  ;;  %v5109_v56 = vmul.f32 %v12546_v3, %v4859_v14  ;;  %9591 = vset.pattern.permute.xlu1 %v16921_v31  ;;  %v1561_v12 = vmul.f32 %v12490_v16, %v17286_v48  ;;  %v1562_v10 = vmul.f32 %v12490_v16, %v17287_v2  ;;  %v2744_v51 = vmul.f32 %v12513_v54, %v17288_v55  ;;  %v17292_v2 = vld [vmem:[#allocation394_spill] sm:$0xff] }
 0x621   : > { %4346 = vperm.xlu1 %9591, %v9923_v5   ;;  %9056 = vmatprep.mubr.msk.bf16.mxu1 %vm9055_vm10, %v16200_v20  ;;  %vm5306_vm11 = vcmp.ge.f32.partialorder %v5208_v4, 1.0  ;;  %v2250_v36 = vadd.f32 %v2152_v1, %v1658_v23  ;;  %v3433_v5 = vadd.f32 %v3335_v39, %v2841_v37  ;;  %v3336_v43 = vmul.f32 %v12515_v41, %v17289_v28  ;;  %v17290_v1 = vld [vmem:[#allocation254_spill] sm:$0xff]  ;;  %v4867_v23 = vpop.permute.xlu0 %4866 }
 0x622   : > { %v5207_v27 = vadd.f32 %v5109_v56, %v4615_v17  ;;  %9058 = vmatmul.mubr.msk.bf16.gmra.mrb[8].mxu1 %vm13814_vm8, %v16200_v20  ;;  %v8701_v25 = vsel %vm5306_vm11, 1.0, %v16202_v33  ;;  %v2154_v45 = vmul.f32 %v12493_v40, %v17290_v1  ;;  %v17291_v17 = vld [vmem:[#allocation521_spill] sm:$0xff]  ;;  %v5111_v50 = vmul.f32 %v12546_v3, %v4867_v23 }
 0x623   : > { %v5902_v42 = vpop.f32.mrb[24].mxu0  ;;  %v4025_v4 = vadd.f32 %v3927_v7, %v3433_v5  ;;  %v2842_v39 = vadd.f32 %v2744_v51, %v2250_v36  ;;  %v3928_v56 = vmul.f32 %v12534_v62, %v17291_v17  ;;  %v1660_v48 = vadd.f32 %v1562_v10, %v1068_v21  ;;  %v17296_v10 = vld [vmem:[#allocation102_spill] sm:$0xff] }
 0x624   : > { %vm5305_vm13 = vcmp.ge.f32.partialorder %v5207_v27, 1.0  ;;  %v5903_v11 = vadd.f32 %v5902_v42, %v13506_v59  ;;  %v4275_v63 = vpop.permute.xlu1 %4274  ;;  %v5904_v24 = vpop.f32.mrb[25].mxu0  ;;  %v2746_v55 = vmul.f32 %v12513_v54, %v17292_v2  ;;  %v17295_v42 = vld [vmem:[#allocation101_spill] sm:$0xff] }
 0x625   : > { %v8700_v46 = vsel %vm5305_vm13, 1.0, %v16202_v33  ;;  %v4519_v30 = vmul.f32 %v12551_v26, %v4275_v63  ;;  %v5905_v18 = vadd.f32 %v5904_v24, %v13511_v15  ;;  %4350 = vperm.xlu1 %9591, %v9924_v38   ;;  %v5906_v32 = vpop.f32.mrb[26].mxu0  ;;  %v972_v36 = vmul.f32 %v12479_v9, %v17295_v42  ;;  %v17297_v63 = vld [vmem:[#allocation251_spill] sm:$0xff]  ;;  %v17305_v42 = vld [vmem:[#allocation253_spill] sm:$0xff] }
 0x626   : > { %v5575_v61 = vpack.c.bf16 %v8701_v25, %v8700_v46  ;;  %v5907_v14 = vadd.f32 %v5906_v32, %v13506_v59  ;;  %v5908_v49 = vpop.f32.mrb[27].mxu0  ;;  %vm6355_vm0 = vcmp.ge.f32.partialorder %v5903_v11, 1.0  ;;  %v3434_v5 = vadd.f32 %v3336_v43, %v2842_v39  ;;  %v17298_v25 = vld [vmem:[#allocation462_spill] sm:$0xff]  ;;  %v17299_v43 = vld [vmem:[#allocation397_spill] sm:$0xff] }
 0x627   : > { %v5909_v37 = vadd.f32 %v5908_v49, %v13511_v15  ;;  %v4617_v27 = vadd.f32 %v4519_v30, %v4025_v4  ;;  %vm6356_vm4 = vcmp.ge.f32.partialorder %v5905_v18, 1.0  ;;  %v971_v11 = vmul.f32 %v12479_v9, %v17296_v10 }
 0x628   : > { %vm6357_vm3 = vcmp.ge.f32.partialorder %v5907_v14, 1.0  ;;  %v4279_v7 = vpop.permute.xlu1 %4278  ;;  %8782 = vmatmul.mubr.msk.bf16.gmra.mrb[96].mxu0 %vm5660_vm2, %v5575_v61  ;;  %v2153_v24 = vmul.f32 %v12493_v40, %v17297_v63  ;;  %v2252_v46 = vadd.f32 %v2154_v45, %v1660_v48  ;;  %v3338_v30 = vmul.f32 %v12515_v41, %v17298_v25  ;;  %v17300_v61 = vld [vmem:[#allocation524_spill] sm:$0xff] }
 0x629   : > { %vm13857_vm6 = vmpackc.low %vm6357_vm3, %vm6355_vm0  ;;  %vm6358_vm8 = vcmp.ge.f32.partialorder %v5909_v37, 1.0  ;;  %9592 = vset.pattern.permute.xlu1 %v16922_v19  ;;  %6090 = vmatprep.mubr.bf16.mxu0 %v16998_v22  ;;  %v4520_v21 = vmul.f32 %v12551_v26, %v4279_v7  ;;  %v4026_v18 = vadd.f32 %v3928_v56, %v3434_v5  ;;  %v5209_v32 = vadd.f32 %v5111_v50, %v4617_v27  ;;  %v17301_v56 = vld [vmem:[#allocation103_spill] sm:$0xff]  ;;  %v9925_v37 = vld [vmem:[%s10058_s8 + $0x230] sm:$0xff] }
 0x62a   : > { %vm9059_vm9 = vmpackc.low %vm6358_vm8, %vm6356_vm4  ;;  %4942 = vperm.xlu1 %9592, %v9924_v38   ;;  %v1659_v38 = vadd.f32 %v1561_v12, %v1067_v6  ;;  %v2844_v28 = vadd.f32 %v2746_v55, %v2252_v46  ;;  %v2745_v4 = vmul.f32 %v12513_v54, %v17299_v43  ;;  %v3930_v14 = vmul.f32 %v12534_v62, %v17300_v61  ;;  %v17302_v50 = vld [vmem:[#allocation104_spill] sm:$0xff]  ;;  %v17303_v7 = vld [vmem:[#allocation455_spill] sm:$0xff] }
 0x62b   : > { %9060 = vmatprep.mubr.msk.bf16.mxu1 %vm9059_vm9, %v16200_v20  ;;  %v13881_v1 = vadd.f32 %v13468_v34, %v972_v36  ;;  %v4618_v45 = vadd.f32 %v4520_v21, %v4026_v18  ;;  %v1069_v17 = vadd.f32 %v13468_v34, %v971_v11  ;;  %v974_v6 = vmul.f32 %v12479_v9, %v17301_v56  ;;  %v17304_v55 = vld [vmem:[#allocation195_spill] sm:$0xff]  ;;  %v4879_v21 = vpop.permute.xlu0 %4878  ;;  %v17306_v11 = vld [vmem:[#allocation528_spill] sm:$0xff] }
 0x62c   : > { %9062 = vmatmul.mubr.msk.bf16.gmra.mrb[12].mxu1 %vm13857_vm6, %v16200_v20  ;;  %v2251_v12 = vadd.f32 %v2153_v24, %v1659_v38  ;;  %v3436_v23 = vadd.f32 %v3338_v30, %v2844_v28  ;;  %v973_v27 = vmul.f32 %v12479_v9, %v17302_v50  ;;  %v3337_v48 = vmul.f32 %v12515_v41, %v17303_v7  ;;  %v17307_v56 = vld [vmem:[#allocation196_spill] sm:$0xff]  ;;  %v17308_v7 = vld [vmem:[#allocation399_spill] sm:$0xff] }
 0x62d   : > { %v4871_v49 = vpop.permute.xlu1 %4870  ;;  %vm5307_vm10 = vcmp.ge.f32.partialorder %v5209_v32, 1.0  ;;  %v1563_v51 = vmul.f32 %v12490_v16, %v17304_v55  ;;  %v2155_v34 = vmul.f32 %v12493_v40, %v17305_v42  ;;  %v3929_v63 = vmul.f32 %v12534_v62, %v17306_v11  ;;  %v17311_v42 = vld [vmem:[#allocation256_spill] sm:$0xff]  ;;  %v9926_v11 = vld [vmem:[%s10058_s8 + $0x238] sm:$0xff] }
 0x62e   : > { %v5112_v39 = vmul.f32 %v12546_v3, %v4871_v49  ;;  %9593 = vset.pattern.permute.xlu1 %v16848_v60  ;;  %v2843_v36 = vadd.f32 %v2745_v4, %v2251_v12  ;;  %v4028_v5 = vadd.f32 %v3930_v14, %v3436_v23  ;;  %v5114_v24 = vmul.f32 %v12546_v3, %v4879_v21 }
 0x62f   : > { %3762 = vperm.xlu1 %9593, %v9925_v37   ;;  %v8702_v18 = vsel %vm5307_vm10, 1.0, %v16202_v33  ;;  %v4521_v61 = vmul.f32 %v12551_v26, %v13718_v57  ;;  %v1564_v12 = vmul.f32 %v12490_v16, %v17307_v56 }
 0x630   : > { %v5210_v2 = vadd.f32 %v5112_v39, %v4618_v45  ;;  %v3435_v4 = vadd.f32 %v3337_v48, %v2843_v36  ;;  %v1661_v39 = vadd.f32 %v1563_v51, %v1069_v17  ;;  %v4883_v48 = vpop.permute.xlu0 %4882  ;;  %v2156_v36 = vmul.f32 %v12493_v40, %v17311_v42 }
 0x631   : > { %v5912_v10 = vpop.f32.mrb[28].mxu0 }
 0x632   : > { %vm5308_vm11 = vcmp.ge.f32.partialorder %v5210_v2, 1.0  ;;  %v5913_v46 = vadd.f32 %v5912_v10, %v13506_v59  ;;  %v4287_v25 = vpop.permute.xlu1 %4286  ;;  %v5914_v30 = vpop.f32.mrb[29].mxu0  ;;  %v2747_v2 = vmul.f32 %v12513_v54, %v17308_v7  ;;  %v4027_v55 = vadd.f32 %v3929_v63, %v3435_v4  ;;  %v13929_v63 = vld [vmem:[%s16039_s2] ss:$0 sm:$0xff]  ;;  %v17316_v4 = vld [vmem:[#allocation396_spill] sm:$0xff] }
 0x633   : > { %v8703_v32 = vsel %vm5308_vm11, 1.0, %v16202_v33  ;;  %v4522_v38 = vmul.f32 %v12551_v26, %v4287_v25  ;;  %v5915_v28 = vadd.f32 %v5914_v30, %v13511_v15  ;;  %9594 = vset.pattern.permute.xlu1 %v16921_v31  ;;  %v5916_v43 = vpop.f32.mrb[30].mxu0  ;;  %v2253_v57 = vadd.f32 %v2155_v34, %v1661_v39  ;;  %v17313_v30 = vld [vmem:[#allocation531_spill] sm:$0xff] }
 0x634   : > { %v5576_v14 = vpack.c.bf16 %v8703_v32, %v8702_v18  ;;  %v5917_v49 = vadd.f32 %v5916_v43, %v13506_v59  ;;  %4354 = vperm.xlu1 %9594, %v9925_v37   ;;  %v5918_v45 = vpop.f32.mrb[31].mxu0  ;;  %vm6359_vm13 = vcmp.ge.f32.partialorder %v5913_v46, 1.0  ;;  %v4619_v10 = vadd.f32 %v4521_v61, %v4027_v55 }
 0x635   : > { %v4620_v23 = vadd.f32 %v4522_v38, %v4028_v5  ;;  %v5919_v50 = vadd.f32 %v5918_v45, %v13511_v15  ;;  %vm6360_vm3 = vcmp.ge.f32.partialorder %v5915_v28, 1.0  ;;  %v17312_v5 = vld [vmem:[#allocation457_spill] sm:$0xff]  ;;  %v1662_v46 = vadd.f32 %v1564_v12, %v13881_v1 }
 0x636   : > { %vm6361_vm0 = vcmp.ge.f32.partialorder %v5917_v49, 1.0  ;;  %8783 = vmatmul.mubr.msk.bf16.gmra.mrb[100].mxu0 %vm5660_vm2, %v5576_v14  ;;  %v3339_v21 = vmul.f32 %v12515_v41, %v17312_v5  ;;  %v2845_v25 = vadd.f32 %v2747_v2, %v2253_v57  ;;  %v3931_v18 = vmul.f32 %v12534_v62, %v17313_v30  ;;  %v17314_v28 = vld [vmem:[#allocation197_spill] sm:$0xff]  ;;  %v17317_v57 = vld [vmem:[#allocation464_spill] sm:$0xff] }
 0x637   : > { %v5212_v37 = vadd.f32 %v5114_v24, %v4620_v23  ;;  %vm13915_vm4 = vmpackc.low %vm6361_vm0, %vm6359_vm13  ;;  %vm6362_vm6 = vcmp.ge.f32.partialorder %v5919_v50, 1.0  ;;  %v4875_v51 = vpop.permute.xlu1 %4874  ;;  %6100 = vmatprep.mubr.bf16.mxu0 %v16998_v22  ;;  %v1072_v24 = vadd.f32 %v13929_v63, %v974_v6  ;;  %v1071_v38 = vadd.f32 %v13929_v63, %v973_v27  ;;  %v17315_v6 = vld [vmem:[#allocation198_spill] sm:$0xff]  ;;  %v13948_v27 = vpop.permute.xlu0 %4894 }
 0x638   : > { %vm9063_vm8 = vmpackc.low %vm6362_vm6, %vm6360_vm3  ;;  %v5113_v34 = vmul.f32 %v12546_v3, %v4875_v51  ;;  %4358 = vperm.xlu1 %9594, %v9926_v11   ;;  %v1565_v43 = vmul.f32 %v12490_v16, %v17314_v28  ;;  %v1566_v1 = vmul.f32 %v12490_v16, %v17315_v6  ;;  %v2748_v61 = vmul.f32 %v12513_v54, %v17316_v4  ;;  %v17320_v28 = vld [vmem:[#allocation398_spill] sm:$0xff]  ;;  %v17332_v4 = vld [vmem:[#allocation199_spill] sm:$0xff] }
 0x639   : > { %9064 = vmatprep.mubr.msk.bf16.mxu1 %vm9063_vm8, %v16200_v20  ;;  %vm5310_vm9 = vcmp.ge.f32.partialorder %v5212_v37, 1.0  ;;  %v2254_v49 = vadd.f32 %v2156_v36, %v1662_v46  ;;  %v3437_v45 = vadd.f32 %v3339_v21, %v2845_v25  ;;  %v3340_v17 = vmul.f32 %v12515_v41, %v17317_v57  ;;  %v17318_v21 = vld [vmem:[#allocation258_spill] sm:$0xff] }
 0x63a   : > { %v5211_v32 = vadd.f32 %v5113_v34, %v4619_v10  ;;  %9066 = vmatmul.mubr.msk.bf16.gmra.mrb[16].mxu1 %vm13915_vm4, %v16200_v20  ;;  %v8705_v50 = vsel %vm5310_vm9, 1.0, %v16202_v33  ;;  %v2158_v10 = vmul.f32 %v12493_v40, %v17318_v21  ;;  %v17319_v37 = vld [vmem:[#allocation526_spill] sm:$0xff]  ;;  %v2750_v6 = vmul.f32 %v12513_v54, %v17320_v28 }
 0x63b   : > { %v5922_v14 = vpop.f32.mrb[32].mxu0  ;;  %v4029_v51 = vadd.f32 %v3931_v18, %v3437_v45  ;;  %v2846_v34 = vadd.f32 %v2748_v61, %v2254_v49  ;;  %v3932_v46 = vmul.f32 %v12534_v62, %v17319_v37  ;;  %v17324_v49 = vld [vmem:[#allocation106_spill] sm:$0xff]  ;;  %v1663_v57 = vadd.f32 %v1565_v43, %v1071_v38 }
 0x63c   : > { %vm5309_vm10 = vcmp.ge.f32.partialorder %v5211_v32, 1.0  ;;  %v5923_v39 = vadd.f32 %v5922_v14, %v13506_v59  ;;  %9596 = vset.pattern.permute.xlu1 %v16922_v19  ;;  %v4291_v56 = vpop.permute.xlu1 %4290  ;;  %v5924_v12 = vpop.f32.mrb[33].mxu0  ;;  %v1664_v32 = vadd.f32 %v1566_v1, %v1072_v24  ;;  %v9928_v1 = vld [vmem:[%s10058_s8 + $0x240] sm:$0xff]  ;;  %v975_v45 = vmul.f32 %v12479_v9, %v17324_v49 }
 0x63d   : > { %v8704_v23 = vsel %vm5309_vm10, 1.0, %v16202_v33  ;;  %v4523_v7 = vmul.f32 %v12551_v26, %v4291_v56  ;;  %v5925_v2 = vadd.f32 %v5924_v12, %v13511_v15  ;;  %4950 = vperm.xlu1 %9596, %v9926_v11   ;;  %v5926_v55 = vpop.f32.mrb[34].mxu0  ;;  %v5115_v11 = vmul.f32 %v12546_v3, %v4883_v48  ;;  %v17323_v48 = vld [vmem:[#allocation105_spill] sm:$0xff] }
 0x63e   : > { %v5577_v42 = vpack.c.bf16 %v8705_v50, %v8704_v23  ;;  %v5927_v36 = vadd.f32 %v5926_v55, %v13506_v59  ;;  %v5928_v5 = vpop.f32.mrb[35].mxu0  ;;  %vm6363_vm11 = vcmp.ge.f32.partialorder %v5923_v39, 1.0  ;;  %v976_v61 = vmul.f32 %v12479_v9, %v17323_v48  ;;  %v17325_v39 = vld [vmem:[#allocation255_spill] sm:$0xff]  ;;  %v17326_v23 = vld [vmem:[#allocation466_spill] sm:$0xff] }
 0x63f   : > { %v5929_v25 = vadd.f32 %v5928_v5, %v13511_v15  ;;  %v4621_v30 = vadd.f32 %v4523_v7, %v4029_v51  ;;  %vm6364_vm0 = vcmp.ge.f32.partialorder %v5925_v2, 1.0  ;;  %v3438_v14 = vadd.f32 %v3340_v17, %v2846_v34  ;;  %v13983_v7 = vpop.permute.xlu0 %4898  ;;  %v17327_v51 = vld [vmem:[#allocation401_spill] sm:$0xff] }
 0x640   : > { %vm6365_vm13 = vcmp.ge.f32.partialorder %v5927_v36, 1.0  ;;  %v4295_v18 = vpop.permute.xlu1 %4294  ;;  %8784 = vmatmul.mubr.msk.bf16.gmra.mrb[104].mxu0 %vm5660_vm2, %v5577_v42  ;;  %v2157_v56 = vmul.f32 %v12493_v40, %v17325_v39  ;;  %v2256_v12 = vadd.f32 %v2158_v10, %v1664_v32  ;;  %v3342_v50 = vmul.f32 %v12515_v41, %v17326_v23  ;;  %v17328_v36 = vld [vmem:[#allocation529_spill] sm:$0xff]  ;;  %v17331_v32 = vld [vmem:[#allocation459_spill] sm:$0xff]  ;;  %v17334_v39 = vld [vmem:[#allocation534_spill] sm:$0xff] }
 0x641   : > { %vm13967_vm3 = vmpackc.low %vm6365_vm13, %vm6363_vm11  ;;  %vm6366_vm4 = vcmp.ge.f32.partialorder %v5929_v25, 1.0  ;;  %9597 = vset.pattern.permute.xlu1 %v16848_v60  ;;  %6110 = vmatprep.mubr.bf16.mxu0 %v16998_v22  ;;  %v4524_v24 = vmul.f32 %v12551_v26, %v4295_v18  ;;  %v4030_v2 = vadd.f32 %v3932_v46, %v3438_v14  ;;  %v5213_v55 = vadd.f32 %v5115_v11, %v4621_v30  ;;  %v17329_v25 = vld [vmem:[#allocation107_spill] sm:$0xff]  ;;  %v17330_v30 = vld [vmem:[#allocation108_spill] sm:$0xff] }
 0x642   : > { %vm9067_vm6 = vmpackc.low %vm6366_vm4, %vm6364_vm0  ;;  %3770 = vperm.xlu1 %9597, %v9928_v1   ;;  %v2848_v17 = vadd.f32 %v2750_v6, %v2256_v12  ;;  %v2749_v42 = vmul.f32 %v12513_v54, %v17327_v51  ;;  %v3934_v5 = vmul.f32 %v12534_v62, %v17328_v36  ;;  %v1074_v10 = vadd.f32 %v13929_v63, %v976_v61  ;;  %v17333_v61 = vld [vmem:[#allocation257_spill] sm:$0xff] }
 0x643   : > { %9068 = vmatprep.mubr.msk.bf16.mxu1 %vm9067_vm6, %v16200_v20  ;;  %v4622_v34 = vadd.f32 %v4524_v24, %v4030_v2  ;;  %v1073_v46 = vadd.f32 %v13929_v63, %v975_v45  ;;  %v978_v38 = vmul.f32 %v12479_v9, %v17329_v25  ;;  %v2255_v43 = vadd.f32 %v2157_v56, %v1663_v57  ;;  %v14007_v45 = vpop.permute.xlu0 %4910 }
 0x644   : > { %9070 = vmatmul.mubr.msk.bf16.gmra.mrb[20].mxu1 %vm13967_vm3, %v16200_v20  ;;  %v3440_v11 = vadd.f32 %v3342_v50, %v2848_v17  ;;  %v977_v18 = vmul.f32 %v12479_v9, %v17330_v30  ;;  %v3341_v28 = vmul.f32 %v12515_v41, %v17331_v32  ;;  %vm5311_vm8 = vcmp.ge.f32.partialorder %v5213_v55, 1.0 }
 0x645   : > { %v4887_v21 = vpop.permute.xlu1 %4886  ;;  %v1567_v48 = vmul.f32 %v12490_v16, %v17332_v4  ;;  %v2159_v14 = vmul.f32 %v12493_v40, %v17333_v61  ;;  %v2847_v24 = vadd.f32 %v2749_v42, %v2255_v43  ;;  %v3933_v56 = vmul.f32 %v12534_v62, %v17334_v39  ;;  %v9929_v42 = vld [vmem:[%s10058_s8 + $0x248] sm:$0xff]  ;;  %v17335_v43 = vld [vmem:[#allocation200_spill] sm:$0xff]  ;;  %v17340_v39 = vld [vmem:[#allocation461_spill] sm:$0xff] }
 0x646   : > { %v5116_v37 = vmul.f32 %v12546_v3, %v4887_v21  ;;  %9598 = vset.pattern.permute.xlu1 %v16921_v31  ;;  %v4032_v49 = vadd.f32 %v3934_v5, %v3440_v11  ;;  %v5118_v12 = vmul.f32 %v12546_v3, %v13948_v27  ;;  %v8706_v55 = vsel %vm5311_vm8, 1.0, %v16202_v33 }
 0x647   : > { %4362 = vperm.xlu1 %9598, %v9928_v1   ;;  %v3439_v5 = vadd.f32 %v3341_v28, %v2847_v24  ;;  %v4525_v27 = vmul.f32 %v12551_v26, %v13748_v35  ;;  %v1665_v25 = vadd.f32 %v1567_v48, %v1073_v46  ;;  %v1568_v11 = vmul.f32 %v12490_v16, %v17335_v43  ;;  %v14028_v28 = vpop.permute.xlu0 %4914  ;;  %v17345_v46 = vld [vmem:[#allocation468_spill] sm:$0xff] }
 0x648   : > { %v5214_v6 = vadd.f32 %v5116_v37, %v4622_v34 }
 0x649   : > { %v5932_v1 = vpop.f32.mrb[36].mxu0  ;;  %v4031_v61 = vadd.f32 %v3933_v56, %v3439_v5  ;;  %v2257_v35 = vadd.f32 %v2159_v14, %v1665_v25  ;;  %v3343_v14 = vmul.f32 %v12515_v41, %v17340_v39  ;;  %v17343_v5 = vld [vmem:[#allocation202_spill] sm:$0xff] }
 0x64a   : > { %vm5312_vm9 = vcmp.ge.f32.partialorder %v5214_v6, 1.0  ;;  %v5933_v23 = vadd.f32 %v5932_v1, %v13506_v59  ;;  %v4303_v50 = vpop.permute.xlu1 %4302  ;;  %v5934_v2 = vpop.f32.mrb[37].mxu0  ;;  %v17336_v6 = vld [vmem:[#allocation403_spill] sm:$0xff] }
 0x64b   : > { %v8707_v57 = vsel %vm5312_vm9, 1.0, %v16202_v33  ;;  %v4526_v17 = vmul.f32 %v12551_v26, %v4303_v50  ;;  %v5935_v51 = vadd.f32 %v5934_v2, %v13511_v15  ;;  %4366 = vperm.xlu1 %9598, %v9929_v42   ;;  %v5936_v36 = vpop.f32.mrb[38].mxu0  ;;  %v2751_v4 = vmul.f32 %v12513_v54, %v17336_v6 }
 0x64c   : > { %v5578_v21 = vpack.c.bf16 %v8707_v57, %v8706_v55  ;;  %v5937_v34 = vadd.f32 %v5936_v36, %v13506_v59  ;;  %v5938_v37 = vpop.f32.mrb[39].mxu0  ;;  %vm6367_vm10 = vcmp.ge.f32.partialorder %v5933_v23, 1.0  ;;  %v4623_v56 = vadd.f32 %v4525_v27, %v4031_v61  ;;  %v17341_v55 = vld [vmem:[#allocation536_spill] sm:$0xff]  ;;  %v17342_v36 = vld [vmem:[#allocation201_spill] sm:$0xff] }
 0x64d   : > { %v4624_v30 = vadd.f32 %v4526_v17, %v4032_v49  ;;  %v5939_v32 = vadd.f32 %v5938_v37, %v13511_v15  ;;  %vm6368_vm13 = vcmp.ge.f32.partialorder %v5935_v51, 1.0  ;;  %v17339_v49 = vld [vmem:[#allocation260_spill] sm:$0xff]  ;;  %v1076_v23 = vadd.f32 %v13929_v63, %v978_v38 }
 0x64e   : > { %vm6369_vm11 = vcmp.ge.f32.partialorder %v5937_v34, 1.0  ;;  %8785 = vmatmul.mubr.msk.bf16.gmra.mrb[108].mxu0 %vm5660_vm2, %v5578_v21  ;;  %v2160_v1 = vmul.f32 %v12493_v40, %v17339_v49  ;;  %v1666_v50 = vadd.f32 %v1568_v11, %v1074_v10  ;;  %v2849_v2 = vadd.f32 %v2751_v4, %v2257_v35  ;;  %v17344_v38 = vld [vmem:[#allocation400_spill] sm:$0xff]  ;;  %v14057_v11 = vpop.permute.xlu0 %4922 }
 0x64f   : > { %v5216_v24 = vadd.f32 %v5118_v12, %v4624_v30  ;;  %vm14030_vm0 = vmpackc.low %vm6369_vm11, %vm6367_vm10  ;;  %vm6370_vm3 = vcmp.ge.f32.partialorder %v5939_v32, 1.0  ;;  %9599 = vset.pattern.permute.xlu1 %v16922_v19  ;;  %v4891_v48 = vpop.permute.xlu1 %4890  ;;  %6120 = vmatprep.mubr.bf16.mxu0 %v16998_v22  ;;  %v3935_v57 = vmul.f32 %v12534_v62, %v17341_v55  ;;  %v1075_v51 = vadd.f32 %v13929_v63, %v977_v18  ;;  %v9930_v61 = vld [vmem:[%s10058_s8 + $0x250] sm:$0xff] }
 0x650   : > { %vm9071_vm4 = vmpackc.low %vm6370_vm3, %vm6368_vm13  ;;  %v5117_v12 = vmul.f32 %v12546_v3, %v4891_v48  ;;  %4958 = vperm.xlu1 %9599, %v9929_v42   ;;  %v1569_v42 = vmul.f32 %v12490_v16, %v17342_v36  ;;  %v1570_v10 = vmul.f32 %v12490_v16, %v17343_v5  ;;  %v2752_v27 = vmul.f32 %v12513_v54, %v17344_v38  ;;  %v17348_v38 = vld [vmem:[#allocation402_spill] sm:$0xff] }
 0x651   : > { %9072 = vmatprep.mubr.msk.bf16.mxu1 %vm9071_vm4, %v16200_v20  ;;  %vm5314_vm6 = vcmp.ge.f32.partialorder %v5216_v24, 1.0  ;;  %v2258_v34 = vadd.f32 %v2160_v1, %v1666_v50  ;;  %v3441_v37 = vadd.f32 %v3343_v14, %v2849_v2  ;;  %v3344_v48 = vmul.f32 %v12515_v41, %v17345_v46  ;;  %v17347_v50 = vld [vmem:[#allocation532_spill] sm:$0xff] }
 0x652   : > { %v5215_v17 = vadd.f32 %v5117_v12, %v4623_v56  ;;  %9074 = vmatmul.mubr.msk.bf16.gmra.mrb[24].mxu1 %vm14030_vm0, %v16200_v20  ;;  %v8709_v32 = vsel %vm5314_vm6, 1.0, %v16202_v33  ;;  %v17346_v56 = vld [vmem:[#allocation262_spill] sm:$0xff]  ;;  %v3936_v2 = vmul.f32 %v12534_v62, %v17347_v50  ;;  %v1668_v5 = vadd.f32 %v1570_v10, %v1076_v23  ;;  %v9931_v50 = vld [vmem:[%s10058_s8 + $0x258] sm:$0xff] }
 0x653   : > { %v5942_v21 = vpop.f32.mrb[40].mxu0  ;;  %v4033_v49 = vadd.f32 %v3935_v57, %v3441_v37  ;;  %v2162_v12 = vmul.f32 %v12493_v40, %v17346_v56  ;;  %v2850_v24 = vadd.f32 %v2752_v27, %v2258_v34  ;;  %v17352_v10 = vld [vmem:[#allocation110_spill] sm:$0xff] }
 0x654   : > { %vm5313_vm8 = vcmp.ge.f32.partialorder %v5215_v17, 1.0  ;;  %v5943_v25 = vadd.f32 %v5942_v21, %v13506_v59  ;;  %9600 = vset.pattern.permute.xlu1 %v16848_v60  ;;  %v4307_v43 = vpop.permute.xlu1 %4306  ;;  %v5944_v18 = vpop.f32.mrb[41].mxu0  ;;  %v5119_v17 = vmul.f32 %v12546_v3, %v13983_v7  ;;  %v2754_v21 = vmul.f32 %v12513_v54, %v17348_v38  ;;  %v17351_v7 = vld [vmem:[#allocation109_spill] sm:$0xff] }
 0x655   : > { %v8708_v30 = vsel %vm5313_vm8, 1.0, %v16202_v33  ;;  %v4527_v6 = vmul.f32 %v12551_v26, %v4307_v43  ;;  %v5945_v4 = vadd.f32 %v5944_v18, %v13511_v15  ;;  %3778 = vperm.xlu1 %9600, %v9930_v61   ;;  %v5946_v35 = vpop.f32.mrb[42].mxu0  ;;  %v980_v34 = vmul.f32 %v12479_v9, %v17351_v7  ;;  %v17353_v43 = vld [vmem:[#allocation259_spill] sm:$0xff]  ;;  %v17360_v7 = vld [vmem:[#allocation261_spill] sm:$0xff] }
 0x656   : > { %v5579_v1 = vpack.c.bf16 %v8709_v32, %v8708_v30  ;;  %v5947_v39 = vadd.f32 %v5946_v35, %v13506_v59  ;;  %v5948_v14 = vpop.f32.mrb[43].mxu0  ;;  %vm6371_vm9 = vcmp.ge.f32.partialorder %v5943_v25, 1.0  ;;  %v3442_v37 = vadd.f32 %v3344_v48, %v2850_v24  ;;  %v17354_v32 = vld [vmem:[#allocation470_spill] sm:$0xff] }
 0x657   : > { %v5949_v55 = vadd.f32 %v5948_v14, %v13511_v15  ;;  %v4625_v36 = vadd.f32 %v4527_v6, %v4033_v49  ;;  %vm6372_vm11 = vcmp.ge.f32.partialorder %v5945_v4, 1.0  ;;  %v979_v25 = vmul.f32 %v12479_v9, %v17352_v10  ;;  %v14093_v4 = vpop.permute.xlu0 %4930  ;;  %v17355_v49 = vld [vmem:[#allocation405_spill] sm:$0xff] }
 0x658   : > { %vm6373_vm10 = vcmp.ge.f32.partialorder %v5947_v39, 1.0  ;;  %v4311_v57 = vpop.permute.xlu1 %4310  ;;  %8786 = vmatmul.mubr.msk.bf16.gmra.mrb[112].mxu0 %vm5660_vm2, %v5579_v1  ;;  %v2161_v18 = vmul.f32 %v12493_v40, %v17353_v43  ;;  %v2260_v30 = vadd.f32 %v2162_v12, %v1668_v5  ;;  %v3346_v6 = vmul.f32 %v12515_v41, %v17354_v32  ;;  %v17356_v39 = vld [vmem:[#allocation537_spill] sm:$0xff]  ;;  %v17361_v43 = vld [vmem:[#allocation23_spill] sm:$0xff] }
 0x659   : > { %vm14078_vm13 = vmpackc.low %vm6373_vm10, %vm6371_vm9  ;;  %vm6374_vm0 = vcmp.ge.f32.partialorder %v5949_v55, 1.0  ;;  %9601 = vset.pattern.permute.xlu1 %v16921_v31  ;;  %6130 = vmatprep.mubr.bf16.mxu0 %v16998_v22  ;;  %v4528_v23 = vmul.f32 %v12551_v26, %v4311_v57  ;;  %v4034_v35 = vadd.f32 %v3936_v2, %v3442_v37  ;;  %v5217_v46 = vadd.f32 %v5119_v17, %v4625_v36  ;;  %v17358_v57 = vld [vmem:[#allocation463_spill] sm:$0xff] }
 0x65a   : > { %vm9075_vm3 = vmpackc.low %vm6374_vm0, %vm6372_vm11  ;;  %4370 = vperm.xlu1 %9601, %v9930_v61   ;;  %v1667_v61 = vadd.f32 %v1569_v42, %v1075_v51  ;;  %v2852_v48 = vadd.f32 %v2754_v21, %v2260_v30  ;;  %v2753_v1 = vmul.f32 %v12513_v54, %v17355_v49  ;;  %v3938_v14 = vmul.f32 %v12534_v62, %v17356_v39  ;;  %v17357_v51 = vld [vmem:[#allocation112_spill] sm:$0xff]  ;;  %v17359_v21 = vld [vmem:[#allocation203_spill] sm:$0xff] }
 0x65b   : > { %9076 = vmatprep.mubr.msk.bf16.mxu1 %vm9075_vm3, %v16200_v20  ;;  %v4626_v12 = vadd.f32 %v4528_v23, %v4034_v35  ;;  %v1078_v2 = vadd.f32 %v13929_v63, %v980_v34  ;;  %v1077_v55 = vadd.f32 %v13929_v63, %v979_v25  ;;  %v981_v42 = vmul.f32 %v12479_v9, %v17357_v51  ;;  %v14115_v10 = vpop.permute.xlu0 %4938 }
 0x65c   : > { %9078 = vmatmul.mubr.msk.bf16.gmra.mrb[28].mxu1 %vm14078_vm13, %v16200_v20  ;;  %v2259_v17 = vadd.f32 %v2161_v18, %v1667_v61  ;;  %v3444_v36 = vadd.f32 %v3346_v6, %v2852_v48  ;;  %v3345_v5 = vmul.f32 %v12515_v41, %v17358_v57  ;;  %vm5315_vm4 = vcmp.ge.f32.partialorder %v5217_v46, 1.0 }
 0x65d   : > { %v4903_v56 = vpop.permute.xlu1 %4902  ;;  %v1571_v27 = vmul.f32 %v12490_v16, %v17359_v21  ;;  %v2163_v37 = vmul.f32 %v12493_v40, %v17360_v7  ;;  %v3937_v18 = vmul.f32 %v12534_v62, %v17361_v43  ;;  %v5122_v30 = vmul.f32 %v12546_v3, %v14007_v45 }
 0x65e   : > { %v5120_v24 = vmul.f32 %v12546_v3, %v4903_v56  ;;  %4374 = vperm.xlu1 %9601, %v9931_v50   ;;  %v2851_v23 = vadd.f32 %v2753_v1, %v2259_v17  ;;  %v4036_v34 = vadd.f32 %v3938_v14, %v3444_v36  ;;  %v8710_v46 = vsel %vm5315_vm4, 1.0, %v16202_v33  ;;  %v17362_v17 = vld [vmem:[#allocation204_spill] sm:$0xff] }
 0x65f   : > { %v4529_v45 = vmul.f32 %v12551_v26, %v13779_v8  ;;  %v1572_v36 = vmul.f32 %v12490_v16, %v17362_v17 }
 0x660   : > { %v5218_v38 = vadd.f32 %v5120_v24, %v4626_v12  ;;  %v3443_v39 = vadd.f32 %v3345_v5, %v2851_v23  ;;  %v1669_v24 = vadd.f32 %v1571_v27, %v1077_v55  ;;  %v14136_v5 = vpop.permute.xlu0 %4946  ;;  %v17366_v23 = vld [vmem:[#allocation264_spill] sm:$0xff] }
 0x661   : > { %v5952_v25 = vpop.f32.mrb[44].mxu0 }
 0x662   : > { %vm5316_vm6 = vcmp.ge.f32.partialorder %v5218_v38, 1.0  ;;  %v5953_v32 = vadd.f32 %v5952_v25, %v13506_v59  ;;  %9602 = vset.pattern.permute.xlu1 %v16922_v19  ;;  %v4319_v6 = vpop.permute.xlu1 %4318  ;;  %v5954_v35 = vpop.f32.mrb[45].mxu0  ;;  %v17363_v38 = vld [vmem:[#allocation407_spill] sm:$0xff]  ;;  %v2261_v8 = vadd.f32 %v2163_v37, %v1669_v24  ;;  %v17367_v25 = vld [vmem:[#allocation465_spill] sm:$0xff] }
 0x663   : > { %v8711_v61 = vsel %vm5316_vm6, 1.0, %v16202_v33  ;;  %v4530_v48 = vmul.f32 %v12551_v26, %v4319_v6  ;;  %v5955_v49 = vadd.f32 %v5954_v35, %v13511_v15  ;;  %4966 = vperm.xlu1 %9602, %v9931_v50   ;;  %v5956_v1 = vpop.f32.mrb[46].mxu0  ;;  %v2755_v21 = vmul.f32 %v12513_v54, %v17363_v38  ;;  %v17368_v35 = vld [vmem:[#allocation19_spill] sm:$0xff]  ;;  %v17370_v38 = vld [vmem:[#allocation472_spill] sm:$0xff] }
 0x664   : > { %v5580_v14 = vpack.c.bf16 %v8711_v61, %v8710_v46  ;;  %v5957_v56 = vadd.f32 %v5956_v1, %v13506_v59  ;;  %v5958_v12 = vpop.f32.mrb[47].mxu0  ;;  %v4035_v50 = vadd.f32 %v3937_v18, %v3443_v39  ;;  %vm6375_vm8 = vcmp.ge.f32.partialorder %v5953_v32, 1.0  ;;  %v3735_v24 = vpop.permute.xlu0 %3734 }
 0x665   : > { %v4628_v51 = vadd.f32 %v4530_v48, %v4036_v34  ;;  %v5959_v57 = vadd.f32 %v5958_v12, %v13511_v15  ;;  %vm6376_vm10 = vcmp.ge.f32.partialorder %v5955_v49, 1.0  ;;  %v2164_v34 = vmul.f32 %v12493_v40, %v17366_v23  ;;  %v17369_v49 = vld [vmem:[#allocation404_spill] sm:$0xff] }
 0x666   : > { %vm6377_vm9 = vcmp.ge.f32.partialorder %v5957_v56, 1.0  ;;  %8787 = vmatmul.mubr.msk.bf16.gmra.mrb[116].mxu0 %vm5660_vm2, %v5580_v14  ;;  %v3347_v37 = vmul.f32 %v12515_v41, %v17367_v25  ;;  %v4627_v43 = vadd.f32 %v4529_v45, %v4035_v50  ;;  %v1670_v32 = vadd.f32 %v1572_v36, %v1078_v2 }
 0x667   : > { %v5220_v7 = vadd.f32 %v5122_v30, %v4628_v51  ;;  %vm14138_vm11 = vmpackc.low %vm6377_vm9, %vm6375_vm8  ;;  %vm6378_vm13 = vcmp.ge.f32.partialorder %v5959_v57, 1.0  ;;  %9603 = vset.pattern.permute.xlu1 %v16848_v60  ;;  %v4907_v27 = vpop.permute.xlu1 %4906  ;;  %6140 = vmatprep.mubr.bf16.mxu0 %v16998_v22  ;;  %v9932_v30 = vld [vmem:[%s10058_s8 + $0x260] sm:$0xff]  ;;  %v2853_v6 = vadd.f32 %v2755_v21, %v2261_v8  ;;  %v3939_v46 = vmul.f32 %v12534_v62, %v17368_v35  ;;  %v17373_v35 = vld [vmem:[#allocation263_spill] sm:$0xff] }
 0x668   : > { %vm9079_vm0 = vmpackc.low %vm6378_vm13, %vm6376_vm10  ;;  %v5121_v18 = vmul.f32 %v12546_v3, %v4907_v27  ;;  %3786 = vperm.xlu1 %9603, %v9932_v30   ;;  %v1079_v48 = vadd.f32 %v13929_v63, %v981_v42  ;;  %v2756_v1 = vmul.f32 %v12513_v54, %v17369_v49  ;;  %v2262_v45 = vadd.f32 %v2164_v34, %v1670_v32  ;;  %v17371_v27 = vld [vmem:[#allocation205_spill] sm:$0xff]  ;;  %v17372_v32 = vld [vmem:[#allocation111_spill] sm:$0xff] }
 0x669   : > { %9080 = vmatprep.mubr.msk.bf16.mxu1 %vm9079_vm0, %v16200_v20  ;;  %vm5318_vm3 = vcmp.ge.f32.partialorder %v5220_v7, 1.0  ;;  %v3445_v2 = vadd.f32 %v3347_v37, %v2853_v6  ;;  %v3348_v21 = vmul.f32 %v12515_v41, %v17370_v38  ;;  %v1573_v23 = vmul.f32 %v12490_v16, %v17371_v27 }
 0x66a   : > { %v5219_v61 = vadd.f32 %v5121_v18, %v4627_v43  ;;  %9082 = vmatmul.mubr.msk.bf16.gmra.mrb[32].mxu1 %vm14138_vm11, %v16200_v20  ;;  %v8713_v36 = vsel %vm5318_vm3, 1.0, %v16202_v33  ;;  %v2854_v34 = vadd.f32 %v2756_v1, %v2262_v45  ;;  %v5123_v25 = vmul.f32 %v12546_v3, %v14028_v28  ;;  %v9933_v28 = vld [vmem:[%s10058_s8 + $0x268] sm:$0xff] }
 0x66b   : > { %v5962_v39 = vpop.f32.mrb[48].mxu0  ;;  %v4037_v50 = vadd.f32 %v3939_v46, %v3445_v2  ;;  %v3940_v43 = vmul.f32 %v12534_v62, %v3735_v24  ;;  %v982_v6 = vmul.f32 %v12479_v9, %v17372_v32  ;;  %v2165_v46 = vmul.f32 %v12493_v40, %v17373_v35  ;;  %v17375_v2 = vld [vmem:[#allocation409_spill] sm:$0xff] }
 0x66c   : > { %vm5317_vm4 = vcmp.ge.f32.partialorder %v5219_v61, 1.0  ;;  %v5963_v14 = vadd.f32 %v5962_v39, %v13506_v59  ;;  %9604 = vset.pattern.permute.xlu1 %v16921_v31  ;;  %v4323_v56 = vpop.permute.xlu1 %4322  ;;  %v5964_v12 = vpop.f32.mrb[49].mxu0  ;;  %v3446_v61 = vadd.f32 %v3348_v21, %v2854_v34  ;;  %v1671_v1 = vadd.f32 %v1573_v23, %v1079_v48  ;;  %v17374_v39 = vld [vmem:[#allocation206_spill] sm:$0xff] }
 0x66d   : > { %v8712_v17 = vsel %vm5317_vm4, 1.0, %v16202_v33  ;;  %v4531_v42 = vmul.f32 %v12551_v26, %v4323_v56  ;;  %v5965_v51 = vadd.f32 %v5964_v12, %v13511_v15  ;;  %4378 = vperm.xlu1 %9604, %v9932_v30   ;;  %v5966_v57 = vpop.f32.mrb[50].mxu0  ;;  %v1574_v45 = vmul.f32 %v12490_v16, %v17374_v39  ;;  %v17379_v23 = vld [vmem:[#allocation406_spill] sm:$0xff] }
 0x66e   : > { %v5581_v8 = vpack.c.bf16 %v8713_v36, %v8712_v17  ;;  %v5967_v7 = vadd.f32 %v5966_v57, %v13506_v59  ;;  %v5968_v55 = vpop.f32.mrb[51].mxu0  ;;  %vm6379_vm6 = vcmp.ge.f32.partialorder %v5963_v14, 1.0  ;;  %v2757_v14 = vmul.f32 %v12513_v54, %v17375_v2  ;;  %v17380_v39 = vld [vmem:[#allocation474_spill] sm:$0xff] }
 0x66f   : > { %v5969_v37 = vadd.f32 %v5968_v55, %v13511_v15  ;;  %v4629_v18 = vadd.f32 %v4531_v42, %v4037_v50  ;;  %vm6380_vm9 = vcmp.ge.f32.partialorder %v5965_v51, 1.0  ;;  %v4038_v56 = vadd.f32 %v3940_v43, %v3446_v61  ;;  %v17376_v42 = vld [vmem:[#allocation266_spill] sm:$0xff]  ;;  %v17377_v51 = vld [vmem:[#allocation467_spill] sm:$0xff] }
 0x670   : > { %vm6381_vm8 = vcmp.ge.f32.partialorder %v5967_v7, 1.0  ;;  %v4327_v30 = vpop.permute.xlu1 %4326  ;;  %8788 = vmatmul.mubr.msk.bf16.gmra.mrb[120].mxu0 %vm5660_vm2, %v5581_v8  ;;  %v1080_v24 = vadd.f32 %v13929_v63, %v982_v6  ;;  %v2263_v17 = vadd.f32 %v2165_v46, %v1671_v1  ;;  %v2166_v48 = vmul.f32 %v12493_v40, %v17376_v42  ;;  %v17378_v7 = vld [vmem:[#allocation145_spill] sm:$0xff]  ;;  %v3743_v6 = vpop.permute.xlu0 %3742 }
 0x671   : > { %vm9085_vm10 = vmpackc.low %vm6381_vm8, %vm6379_vm6  ;;  %vm6382_vm11 = vcmp.ge.f32.partialorder %v5969_v37, 1.0  ;;  %4382 = vperm.xlu1 %9604, %v9933_v28   ;;  %6150 = vmatprep.mubr.bf16.mxu0 %v16998_v22  ;;  %v4532_v49 = vmul.f32 %v12551_v26, %v4327_v30  ;;  %v5221_v12 = vadd.f32 %v5123_v25, %v4629_v18  ;;  %v3349_v57 = vmul.f32 %v12515_v41, %v17377_v51 }
 0x672   : > { %vm9083_vm13 = vmpackc.low %vm6382_vm11, %vm6380_vm9  ;;  %v1672_v50 = vadd.f32 %v1574_v45, %v1080_v24  ;;  %v2855_v8 = vadd.f32 %v2757_v14, %v2263_v17  ;;  %v3941_v55 = vmul.f32 %v12534_v62, %v17378_v7  ;;  %v2758_v34 = vmul.f32 %v12513_v54, %v17379_v23  ;;  %v17381_v24 = vld [vmem:[#allocation114_spill] sm:$0xff]  ;;  %v17383_v23 = vld [vmem:[#allocation265_spill] sm:$0xff] }
 0x673   : > { %9084 = vmatprep.mubr.msk.bf16.mxu1 %vm9083_vm13, %v16200_v20  ;;  %v4630_v38 = vadd.f32 %v4532_v49, %v4038_v56  ;;  %vm5319_vm0 = vcmp.ge.f32.partialorder %v5221_v12, 1.0  ;;  %v9934_v49 = vld [vmem:[%s10058_s8 + $0x270] sm:$0xff]  ;;  %v3350_v45 = vmul.f32 %v12515_v41, %v17380_v39  ;;  %v983_v17 = vmul.f32 %v12479_v9, %v17381_v24 }
 0x674   : > { %9086 = vmatmul.mubr.msk.bf16.gmra.mrb[36].mxu1 %vm9085_vm10, %v16200_v20  ;;  %v2264_v37 = vadd.f32 %v2166_v48, %v1672_v50  ;;  %v3447_v43 = vadd.f32 %v3349_v57, %v2855_v8  ;;  %v8714_v35 = vsel %vm5319_vm0, 1.0, %v16202_v33  ;;  %v5125_v42 = vmul.f32 %v12546_v3, %v14057_v11  ;;  %v17382_v8 = vld [vmem:[#allocation207_spill] sm:$0xff] }
 0x675   : > { %9605 = vset.pattern.permute.xlu1 %v16922_v19  ;;  %v4919_v36 = vpop.permute.xlu1 %4918  ;;  %v3942_v51 = vmul.f32 %v12534_v62, %v3743_v6  ;;  %v1081_v50 = vadd.f32 %v13929_v63, %v983_v17  ;;  %v1575_v7 = vmul.f32 %v12490_v16, %v17382_v8 }
 0x676   : > { %v5124_v21 = vmul.f32 %v12546_v3, %v4919_v36  ;;  %4974 = vperm.xlu1 %9605, %v9933_v28   ;;  %v4039_v2 = vadd.f32 %v3941_v55, %v3447_v43  ;;  %v2856_v36 = vadd.f32 %v2758_v34, %v2264_v37  ;;  %v2167_v34 = vmul.f32 %v12493_v40, %v17383_v23 }
 0x678   : > { %v5222_v27 = vadd.f32 %v5124_v21, %v4630_v38  ;;  %v3448_v21 = vadd.f32 %v3350_v45, %v2856_v36  ;;  %v17387_v36 = vld [vmem:[#allocation469_spill] sm:$0xff] }
 0x679   : > { %v5972_v25 = vpop.f32.mrb[52].mxu0 }
 0x67a   : > { %vm5320_vm3 = vcmp.ge.f32.partialorder %v5222_v27, 1.0  ;;  %v5973_v18 = vadd.f32 %v5972_v25, %v13506_v59  ;;  %9606 = vset.pattern.permute.xlu1 %v16848_v60  ;;  %v4331_v30 = vpop.permute.xlu1 %4330  ;;  %v5974_v32 = vpop.f32.mrb[53].mxu0  ;;  %v4040_v55 = vadd.f32 %v3942_v51, %v3448_v21 }
 0x67b   : > { %v8715_v46 = vsel %vm5320_vm3, 1.0, %v16202_v33  ;;  %v4533_v28 = vmul.f32 %v12551_v26, %v4331_v30  ;;  %v5975_v61 = vadd.f32 %v5974_v32, %v13511_v15  ;;  %3794 = vperm.xlu1 %9606, %v9934_v49   ;;  %v5976_v1 = vpop.f32.mrb[54].mxu0  ;;  %v9935_v32 = vld [vmem:[%s10058_s8 + $0x278] sm:$0xff] }
 0x67c   : > { %v5582_v14 = vpack.c.bf16 %v8715_v46, %v8714_v35  ;;  %v5977_v56 = vadd.f32 %v5976_v1, %v13506_v59  ;;  %v5978_v12 = vpop.f32.mrb[55].mxu0  ;;  %vm6383_vm4 = vcmp.ge.f32.partialorder %v5973_v18, 1.0  ;;  %v1673_v35 = vadd.f32 %v1575_v7, %v1081_v50 }
 0x67d   : > { %v5979_v48 = vadd.f32 %v5978_v12, %v13511_v15  ;;  %v4631_v57 = vadd.f32 %v4533_v28, %v4039_v2  ;;  %vm6384_vm8 = vcmp.ge.f32.partialorder %v5975_v61, 1.0  ;;  %v17384_v61 = vld [vmem:[#allocation113_spill] sm:$0xff]  ;;  %v17385_v2 = vld [vmem:[#allocation208_spill] sm:$0xff]  ;;  %v17386_v12 = vld [vmem:[#allocation411_spill] sm:$0xff] }
 0x67e   : > { %vm6385_vm6 = vcmp.ge.f32.partialorder %v5977_v56, 1.0  ;;  %v4335_v38 = vpop.permute.xlu1 %4334  ;;  %8789 = vmatmul.mubr.msk.bf16.gmra.mrb[124].mxu0 %vm5660_vm2, %v5582_v14  ;;  %v1576_v14 = vmul.f32 %v12490_v16, %v17385_v2  ;;  %v2265_v56 = vadd.f32 %v2167_v34, %v1673_v35  ;;  %v2759_v24 = vmul.f32 %v12513_v54, %v17386_v12 }
 0x67f   : > { %vm9089_vm9 = vmpackc.low %vm6385_vm6, %vm6383_vm4  ;;  %vm6386_vm10 = vcmp.ge.f32.partialorder %v5979_v48, 1.0  ;;  %9607 = vset.pattern.permute.xlu1 %v16921_v31  ;;  %6160 = vmatprep.mubr.bf16.mxu0 %v16998_v22  ;;  %v4534_v11 = vmul.f32 %v12551_v26, %v4335_v38  ;;  %v5223_v27 = vadd.f32 %v5125_v42, %v4631_v57  ;;  %v3351_v42 = vmul.f32 %v12515_v41, %v17387_v36 }
 0x680   : > { %vm9087_vm11 = vmpackc.low %vm6386_vm10, %vm6384_vm8  ;;  %4386 = vperm.xlu1 %9607, %v9934_v49   ;;  %v984_v49 = vmul.f32 %v12479_v9, %v17384_v61  ;;  %v2857_v8 = vadd.f32 %v2759_v24, %v2265_v56 }
 0x681   : > { %9088 = vmatprep.mubr.msk.bf16.mxu1 %vm9087_vm11, %v16200_v20  ;;  %v4632_v43 = vadd.f32 %v4534_v11, %v4040_v55  ;;  %vm5321_vm13 = vcmp.ge.f32.partialorder %v5223_v27, 1.0  ;;  %v17388_v11 = vld [vmem:[#allocation268_spill] sm:$0xff] }
 0x682   : > { %9090 = vmatmul.mubr.msk.bf16.gmra.mrb[40].mxu1 %vm9089_vm9, %v16200_v20  ;;  %v8716_v51 = vsel %vm5321_vm13, 1.0, %v16202_v33  ;;  %v1082_v21 = vadd.f32 %v13929_v63, %v984_v49  ;;  %v2168_v50 = vmul.f32 %v12493_v40, %v17388_v11  ;;  %v17389_v27 = vld [vmem:[#allocation408_spill] sm:$0xff]  ;;  %v3449_v34 = vadd.f32 %v3351_v42, %v2857_v8 }
 0x683   : > { %v4927_v25 = vpop.permute.xlu1 %4926  ;;  %v5982_v37 = vpop.f32.mrb[56].mxu0  ;;  %v2760_v23 = vmul.f32 %v12513_v54, %v17389_v27 }
 0x684   : > { %v5126_v18 = vmul.f32 %v12546_v3, %v4927_v25  ;;  %v5983_v30 = vadd.f32 %v5982_v37, %v13506_v59  ;;  %4390 = vperm.xlu1 %9607, %v9935_v32   ;;  %v5984_v6 = vpop.f32.mrb[57].mxu0  ;;  %v1674_v55 = vadd.f32 %v1576_v14, %v1082_v21  ;;  %v3751_v37 = vpop.permute.xlu0 %3750 }
 0x685   : > { %v5985_v46 = vadd.f32 %v5984_v6, %v13511_v15  ;;  %v5986_v28 = vpop.f32.mrb[58].mxu0  ;;  %v3944_v61 = vmul.f32 %v12534_v62, %v3751_v37 }
 0x686   : > { %v5224_v1 = vadd.f32 %v5126_v18, %v4632_v43  ;;  %v5987_v39 = vadd.f32 %v5986_v28, %v13506_v59  ;;  %v5988_v45 = vpop.f32.mrb[59].mxu0  ;;  %vm6387_vm3 = vcmp.ge.f32.partialorder %v5983_v30, 1.0  ;;  %v9936_v18 = vld [vmem:[%s10058_s8 + $0x280] sm:$0xff]  ;;  %v2266_v30 = vadd.f32 %v2168_v50, %v1674_v55  ;;  %v17393_v50 = vld [vmem:[#allocation267_spill] sm:$0xff] }
 0x687   : > { %v5989_v17 = vadd.f32 %v5988_v45, %v13511_v15  ;;  %vm6388_vm6 = vcmp.ge.f32.partialorder %v5985_v46, 1.0  ;;  %v5127_v28 = vmul.f32 %v12546_v3, %v14093_v4  ;;  %v17391_v45 = vld [vmem:[#allocation116_spill] sm:$0xff]  ;;  %v2169_v8 = vmul.f32 %v12493_v40, %v17393_v50 }
 0x688   : > { %vm5322_vm0 = vcmp.ge.f32.partialorder %v5224_v1, 1.0  ;;  %vm6389_vm4 = vcmp.ge.f32.partialorder %v5987_v39, 1.0  ;;  %9608 = vset.pattern.permute.xlu1 %v16922_v19  ;;  %v3747_v48 = vpop.permute.xlu1 %3746  ;;  %v2858_v46 = vadd.f32 %v2760_v23, %v2266_v30  ;;  %v985_v2 = vmul.f32 %v12479_v9, %v17391_v45  ;;  %v9937_v23 = vld [vmem:[%s10058_s8 + $0x288] sm:$0xff]  ;;  %v3759_v50 = vpop.permute.xlu0 %3758 }
 0x689   : > { %v8717_v57 = vsel %vm5322_vm0, 1.0, %v16202_v33  ;;  %vm9093_vm8 = vmpackc.low %vm6389_vm4, %vm6387_vm3  ;;  %vm6390_vm9 = vcmp.ge.f32.partialorder %v5989_v17, 1.0  ;;  %4982 = vperm.xlu1 %9608, %v9935_v32   ;;  %v3943_v7 = vmul.f32 %v12534_v62, %v3747_v48  ;;  %v17390_v32 = vld [vmem:[#allocation476_spill] sm:$0xff]  ;;  %v17392_v48 = vld [vmem:[#allocation209_spill] sm:$0xff] }
 0x68a   : > { %v5583_v38 = vpack.c.bf16 %v8717_v57, %v8716_v51  ;;  %vm9091_vm10 = vmpackc.low %vm6390_vm9, %vm6388_vm6  ;;  %v3352_v6 = vmul.f32 %v12515_v41, %v17390_v32  ;;  %v1577_v51 = vmul.f32 %v12490_v16, %v17392_v48  ;;  %v1083_v11 = vadd.f32 %v13929_v63, %v985_v2  ;;  %v17396_v32 = vld [vmem:[#allocation210_spill] sm:$0xff] }
 0x68b   : > { %9092 = vmatprep.mubr.msk.bf16.mxu1 %vm9091_vm10, %v16200_v20  ;;  %v4041_v35 = vadd.f32 %v3943_v7, %v3449_v34  ;;  %v17394_v34 = vld [vmem:[#allocation115_spill] sm:$0xff] }
 0x68c   : > { %8790 = vmatmul.mubr.msk.bf16.gmra.mrb[128].mxu0 %vm5660_vm2, %v5583_v38  ;;  %9094 = vmatmul.mubr.msk.bf16.gmra.mrb[44].mxu1 %vm9093_vm8, %v16200_v20  ;;  %v3450_v12 = vadd.f32 %v3352_v6, %v2858_v46  ;;  %v1675_v37 = vadd.f32 %v1577_v51, %v1083_v11  ;;  %v1578_v6 = vmul.f32 %v12490_v16, %v17396_v32 }
 0x68d   : > { %9609 = vset.pattern.permute.xlu1 %v16848_v60  ;;  %v4339_v25 = vpop.permute.xlu1 %4338  ;;  %6170 = vmatprep.mubr.bf16.mxu0 %v16998_v22 }
 0x68e   : > { %v4535_v43 = vmul.f32 %v12551_v26, %v4339_v25  ;;  %3802 = vperm.xlu1 %9609, %v9936_v18   ;;  %v4042_v57 = vadd.f32 %v3944_v61, %v3450_v12  ;;  %v986_v25 = vmul.f32 %v12479_v9, %v17394_v34  ;;  %v17397_v61 = vld [vmem:[#allocation471_spill] sm:$0xff] }
 0x690   : > { %v4633_v49 = vadd.f32 %v4535_v43, %v4041_v35  ;;  %v2267_v35 = vadd.f32 %v2169_v8, %v1675_v37 }
 0x691   : > { %v4343_v1 = vpop.permute.xlu1 %4342  ;;  %v5992_v39 = vpop.f32.mrb[60].mxu0 }
 0x692   : > { %v5993_v14 = vadd.f32 %v5992_v39, %v13506_v59  ;;  %9611 = vset.pattern.permute.xlu1 %v16921_v31  ;;  %v5994_v56 = vpop.f32.mrb[61].mxu0  ;;  %v4536_v24 = vmul.f32 %v12551_v26, %v4343_v1  ;;  %v5225_v38 = vadd.f32 %v5127_v28, %v4633_v49  ;;  %v3353_v49 = vmul.f32 %v12515_v41, %v17397_v61 }
 0x693   : > { %v5995_v17 = vadd.f32 %v5994_v56, %v13511_v15  ;;  %4394 = vperm.xlu1 %9611, %v9936_v18   ;;  %v5996_v4 = vpop.f32.mrb[62].mxu0  ;;  %v17395_v18 = vld [vmem:[#allocation413_spill] sm:$0xff] }
 0x694   : > { %v5997_v36 = vadd.f32 %v5996_v4, %v13506_v59  ;;  %v5998_v42 = vpop.f32.mrb[63].mxu0  ;;  %vm6391_vm11 = vcmp.ge.f32.partialorder %v5993_v14, 1.0  ;;  %v4634_v55 = vadd.f32 %v4536_v24, %v4042_v57  ;;  %vm5323_vm8 = vcmp.ge.f32.partialorder %v5225_v38, 1.0 }
 0x695   : > { %v5999_v21 = vadd.f32 %v5998_v42, %v13511_v15  ;;  %vm6392_vm0 = vcmp.ge.f32.partialorder %v5995_v17, 1.0  ;;  %v2761_v30 = vmul.f32 %v12513_v54, %v17395_v18  ;;  %v8718_v1 = vsel %vm5323_vm8, 1.0, %v16202_v33  ;;  %v17398_v17 = vld [vmem:[#allocation270_spill] sm:$0xff] }
 0x696   : > { %vm6393_vm13 = vcmp.ge.f32.partialorder %v5997_v36, 1.0  ;;  %v4935_v7 = vpop.permute.xlu1 %4934  ;;  %v1084_v14 = vadd.f32 %v13929_v63, %v986_v25  ;;  %v2170_v4 = vmul.f32 %v12493_v40, %v17398_v17  ;;  %v17399_v63 = vld [vmem:[#allocation410_spill] sm:$0xff]  ;;  %v3946_v18 = vmul.f32 %v12534_v62, %v3759_v50 }
 0x697   : > { %vm9097_vm3 = vmpackc.low %vm6393_vm13, %vm6391_vm11  ;;  %vm6394_vm4 = vcmp.ge.f32.partialorder %v5999_v21, 1.0  ;;  %v5128_v27 = vmul.f32 %v12546_v3, %v4935_v7  ;;  %4398 = vperm.xlu1 %9611, %v9937_v23   ;;  %v2859_v36 = vadd.f32 %v2761_v30, %v2267_v35  ;;  %v2762_v21 = vmul.f32 %v12513_v54, %v17399_v63  ;;  %v17404_v63 = vld [vmem:[#allocation117_spill] sm:$0xff] }
 0x698   : > { %vm9095_vm6 = vmpackc.low %vm6394_vm4, %vm6392_vm0  ;;  %v1676_v57 = vadd.f32 %v1578_v6, %v1084_v14  ;;  %v17401_v6 = vld [vmem:[#allocation118_spill] sm:$0xff]  ;;  %v17403_v14 = vld [vmem:[#allocation269_spill] sm:$0xff] }
 0x699   : > { %v5226_v43 = vadd.f32 %v5128_v27, %v4634_v55  ;;  %9096 = vmatprep.mubr.msk.bf16.mxu1 %vm9095_vm6, %v16200_v20  ;;  %v3451_v11 = vadd.f32 %v3353_v49, %v2859_v36  ;;  %v9938_v55 = vld [vmem:[%s10058_s8 + $0x290] sm:$0xff]  ;;  %v987_v35 = vmul.f32 %v12479_v9, %v17401_v6  ;;  %v17402_v49 = vld [vmem:[#allocation211_spill] sm:$0xff] }
 0x69a   : > { %9098 = vmatmul.mubr.msk.bf16.gmra.mrb[48].mxu1 %vm9097_vm3, %v16200_v20  ;;  %v2268_v27 = vadd.f32 %v2170_v4, %v1676_v57 }
 0x69b   : > { %vm5324_vm9 = vcmp.ge.f32.partialorder %v5226_v43, 1.0  ;;  %9612 = vset.pattern.permute.xlu1 %v16922_v19  ;;  %v3755_v46 = vpop.permute.xlu1 %3754  ;;  %v6002_v28 = vpop.f32.mrb[64].mxu0  ;;  %v5129_v43 = vmul.f32 %v12546_v3, %v14115_v10  ;;  %v1579_v10 = vmul.f32 %v12490_v16, %v17402_v49 }
 0x69c   : > { %v8719_v39 = vsel %vm5324_vm9, 1.0, %v16202_v33  ;;  %v6003_v45 = vadd.f32 %v6002_v28, %v13506_v59  ;;  %4990 = vperm.xlu1 %9612, %v9937_v23   ;;  %v6004_v2 = vpop.f32.mrb[65].mxu0  ;;  %v3945_v42 = vmul.f32 %v12534_v62, %v3755_v46  ;;  %v17400_v23 = vld [vmem:[#allocation478_spill] sm:$0xff]  ;;  %v2860_v37 = vadd.f32 %v2762_v21, %v2268_v27  ;;  %v14314_v28 = vpop.permute.xlu0 %3766 }
 0x69d   : > { %v5584_v56 = vpack.c.bf16 %v8719_v39, %v8718_v1  ;;  %v6005_v12 = vadd.f32 %v6004_v2, %v13511_v15  ;;  %v6006_v24 = vpop.f32.mrb[66].mxu0  ;;  %v3354_v34 = vmul.f32 %v12515_v41, %v17400_v23  ;;  %v988_v21 = vmul.f32 %v12479_v9, %v17404_v63 }
 0x69e   : > { %v6007_v48 = vadd.f32 %v6006_v24, %v13506_v59  ;;  %v6008_v51 = vpop.f32.mrb[67].mxu0  ;;  %vm6395_vm10 = vcmp.ge.f32.partialorder %v6003_v45, 1.0  ;;  %v4043_v25 = vadd.f32 %v3945_v42, %v3451_v11  ;;  %v14322_v45 = vld [vmem:[%s16039_s2] ss:$0 sm:$0xff]  ;;  %v9940_v42 = vld [vmem:[%s10058_s8 + $0x298] sm:$0xff] }
 0x69f   : > { %v6009_v38 = vadd.f32 %v6008_v51, %v13511_v15  ;;  %8791 = vmatmul.mubr.msk.bf16.gmra.mrb[132].mxu0 %vm5660_vm2, %v5584_v56  ;;  %vm6396_vm13 = vcmp.ge.f32.partialorder %v6005_v12, 1.0  ;;  %v3452_v46 = vadd.f32 %v3354_v34, %v2860_v37  ;;  %v1085_v2 = vadd.f32 %v14322_v45, %v987_v35  ;;  %v17406_v34 = vld [vmem:[#allocation415_spill] sm:$0xff] }
 0x6a0   : > { %vm6397_vm11 = vcmp.ge.f32.partialorder %v6007_v48, 1.0  ;;  %9613 = vset.pattern.permute.xlu1 %v16848_v60  ;;  %v4347_v8 = vpop.permute.xlu1 %4346  ;;  %6180 = vmatprep.mubr.bf16.mxu0 %v16998_v22  ;;  %v2171_v56 = vmul.f32 %v12493_v40, %v17403_v14  ;;  %v14333_v11 = vpop.permute.xlu0 %3774  ;;  %v1086_v35 = vadd.f32 %v14322_v45, %v988_v21 }
 0x6a1   : > { %vm9101_vm0 = vmpackc.low %vm6397_vm11, %vm6395_vm10  ;;  %vm6398_vm3 = vcmp.ge.f32.partialorder %v6009_v38, 1.0  ;;  %v4537_v7 = vmul.f32 %v12551_v26, %v4347_v8  ;;  %3810 = vperm.xlu1 %9613, %v9938_v55   ;;  %v4044_v1 = vadd.f32 %v3946_v18, %v3452_v46  ;;  %v1677_v51 = vadd.f32 %v1579_v10, %v1085_v2  ;;  %v17408_v46 = vld [vmem:[#allocation272_spill] sm:$0xff] }
 0x6a2   : > { %vm9099_vm4 = vmpackc.low %vm6398_vm3, %vm6396_vm13  ;;  %v17409_v2 = vld [vmem:[#allocation412_spill] sm:$0xff] }
 0x6a3   : > { %9100 = vmatprep.mubr.msk.bf16.mxu1 %vm9099_vm4, %v16200_v20  ;;  %v4635_v30 = vadd.f32 %v4537_v7, %v4043_v25  ;;  %v2269_v23 = vadd.f32 %v2171_v56, %v1677_v51  ;;  %v2763_v25 = vmul.f32 %v12513_v54, %v17406_v34  ;;  %v2764_v14 = vmul.f32 %v12513_v54, %v17409_v2 }
 0x6a4   : > { %v4351_v32 = vpop.permute.xlu1 %4350  ;;  %9102 = vmatmul.mubr.msk.bf16.gmra.mrb[52].mxu1 %vm9101_vm0, %v16200_v20  ;;  %v14353_v56 = vpop.permute.xlu0 %3782 }
 0x6a5   : > { %9614 = vset.pattern.permute.xlu1 %v16921_v31  ;;  %v4538_v61 = vmul.f32 %v12551_v26, %v4351_v32  ;;  %v5227_v39 = vadd.f32 %v5129_v43, %v4635_v30  ;;  %v17407_v43 = vld [vmem:[#allocation473_spill] sm:$0xff]  ;;  %v2861_v10 = vadd.f32 %v2763_v25, %v2269_v23  ;;  %v3948_v23 = vmul.f32 %v12534_v62, %v14314_v28 }
 0x6a6   : > { %4402 = vperm.xlu1 %9614, %v9938_v55   ;;  %v17405_v55 = vld [vmem:[#allocation212_spill] sm:$0xff]  ;;  %v3355_v18 = vmul.f32 %v12515_v41, %v17407_v43  ;;  %v17412_v28 = vld [vmem:[#allocation213_spill] sm:$0xff] }
 0x6a7   : > { %v4636_v17 = vadd.f32 %v4538_v61, %v4044_v1  ;;  %vm5325_vm6 = vcmp.ge.f32.partialorder %v5227_v39, 1.0  ;;  %v1580_v27 = vmul.f32 %v12490_v16, %v17405_v55  ;;  %v2172_v61 = vmul.f32 %v12493_v40, %v17408_v46  ;;  %v17411_v43 = vld [vmem:[#allocation120_spill] sm:$0xff] }
 0x6a8   : > { %v8720_v32 = vsel %vm5325_vm6, 1.0, %v16202_v33 }
 0x6a9   : > { %v4943_v12 = vpop.permute.xlu1 %4942  ;;  %v6012_v24 = vpop.f32.mrb[68].mxu0  ;;  %v1678_v39 = vadd.f32 %v1580_v27, %v1086_v35  ;;  %v5131_v27 = vmul.f32 %v12546_v3, %v14136_v5 }
 0x6aa   : > { %v5130_v4 = vmul.f32 %v12546_v3, %v4943_v12  ;;  %v6013_v36 = vadd.f32 %v6012_v24, %v13506_v59  ;;  %4406 = vperm.xlu1 %9614, %v9940_v42   ;;  %v6014_v48 = vpop.f32.mrb[69].mxu0  ;;  %v3453_v12 = vadd.f32 %v3355_v18, %v2861_v10  ;;  %v989_v18 = vmul.f32 %v12479_v9, %v17411_v43  ;;  %v17413_v10 = vld [vmem:[#allocation271_spill] sm:$0xff] }
 0x6ab   : > { %v6015_v57 = vadd.f32 %v6014_v48, %v13511_v15  ;;  %v6016_v38 = vpop.f32.mrb[70].mxu0  ;;  %v9941_v48 = vld [vmem:[%s10058_s8 + $0x2a0] sm:$0xff] }
 0x6ac   : > { %v5228_v50 = vadd.f32 %v5130_v4, %v4636_v17  ;;  %v6017_v8 = vadd.f32 %v6016_v38, %v13506_v59  ;;  %v6018_v7 = vpop.f32.mrb[71].mxu0  ;;  %vm6399_vm9 = vcmp.ge.f32.partialorder %v6013_v36, 1.0  ;;  %v2270_v4 = vadd.f32 %v2172_v61, %v1678_v39 }
 0x6ad   : > { %v6019_v37 = vadd.f32 %v6018_v7, %v13511_v15  ;;  %vm6400_vm11 = vcmp.ge.f32.partialorder %v6015_v57, 1.0  ;;  %v17410_v57 = vld [vmem:[#allocation480_spill] sm:$0xff] }
 0x6ae   : > { %vm5326_vm8 = vcmp.ge.f32.partialorder %v5228_v50, 1.0  ;;  %vm6401_vm10 = vcmp.ge.f32.partialorder %v6017_v8, 1.0  ;;  %9615 = vset.pattern.permute.xlu1 %v16922_v19  ;;  %v3763_v30 = vpop.permute.xlu1 %3762  ;;  %v3356_v38 = vmul.f32 %v12515_v41, %v17410_v57  ;;  %v2862_v8 = vadd.f32 %v2764_v14, %v2270_v4  ;;  %v9942_v14 = vld [vmem:[%s10058_s8 + $0x2a8] sm:$0xff] }
 0x6af   : > { %v8721_v6 = vsel %vm5326_vm8, 1.0, %v16202_v33  ;;  %vm9105_vm13 = vmpackc.low %vm6401_vm10, %vm6399_vm9  ;;  %vm6402_vm0 = vcmp.ge.f32.partialorder %v6019_v37, 1.0  ;;  %4998 = vperm.xlu1 %9615, %v9940_v42   ;;  %v3947_v1 = vmul.f32 %v12534_v62, %v3763_v30 }
 0x6b0   : > { %v5585_v49 = vpack.c.bf16 %v8721_v6, %v8720_v32  ;;  %vm9103_vm3 = vmpackc.low %vm6402_vm0, %vm6400_vm11  ;;  %v3454_v30 = vadd.f32 %v3356_v38, %v2862_v8  ;;  %v14374_v32 = vpop.permute.xlu0 %3790  ;;  %v1581_v6 = vmul.f32 %v12490_v16, %v17412_v28 }
 0x6b1   : > { %9104 = vmatprep.mubr.msk.bf16.mxu1 %vm9103_vm3, %v16200_v20  ;;  %v4045_v63 = vadd.f32 %v3947_v1, %v3453_v12  ;;  %v2173_v1 = vmul.f32 %v12493_v40, %v17413_v10  ;;  %v17414_v12 = vld [vmem:[#allocation119_spill] sm:$0xff]  ;;  %v17419_v10 = vld [vmem:[#allocation414_spill] sm:$0xff] }
 0x6b2   : > { %8792 = vmatmul.mubr.msk.bf16.gmra.mrb[136].mxu0 %vm5660_vm2, %v5585_v49  ;;  %9106 = vmatmul.mubr.msk.bf16.gmra.mrb[56].mxu1 %vm9105_vm13, %v16200_v20  ;;  %v4046_v35 = vadd.f32 %v3948_v23, %v3454_v30  ;;  %v1087_v49 = vadd.f32 %v14322_v45, %v989_v18  ;;  %v17418_v18 = vld [vmem:[#allocation274_spill] sm:$0xff] }
 0x6b3   : > { %9616 = vset.pattern.permute.xlu1 %v16848_v60  ;;  %v4355_v24 = vpop.permute.xlu1 %4354  ;;  %v6022_v17 = vpop.f32.mrb[72].mxu0  ;;  %6190 = vmatprep.mubr.bf16.mxu0 %v16998_v22  ;;  %v2174_v30 = vmul.f32 %v12493_v40, %v17418_v18 }
 0x6b4   : > { %v4539_v36 = vmul.f32 %v12551_v26, %v4355_v24  ;;  %v6023_v42 = vadd.f32 %v6022_v17, %v13506_v59  ;;  %3818 = vperm.xlu1 %9616, %v9941_v48   ;;  %v6024_v51 = vpop.f32.mrb[73].mxu0  ;;  %v990_v24 = vmul.f32 %v12479_v9, %v17414_v12  ;;  %v1679_v17 = vadd.f32 %v1581_v6, %v1087_v49  ;;  %v14388_v4 = vpop.permute.xlu0 %3798 }
 0x6b5   : > { %v6025_v21 = vadd.f32 %v6024_v51, %v13511_v15  ;;  %v6026_v50 = vpop.f32.mrb[74].mxu0  ;;  %v17416_v51 = vld [vmem:[#allocation214_spill] sm:$0xff] }
 0x6b6   : > { %v6027_v7 = vadd.f32 %v6026_v50, %v13506_v59  ;;  %v6028_v55 = vpop.f32.mrb[75].mxu0  ;;  %v4637_v34 = vadd.f32 %v4539_v36, %v4045_v63  ;;  %vm6403_vm4 = vcmp.ge.f32.partialorder %v6023_v42, 1.0  ;;  %v17415_v42 = vld [vmem:[#allocation417_spill] sm:$0xff]  ;;  %v1582_v57 = vmul.f32 %v12490_v16, %v17416_v51  ;;  %v17417_v50 = vld [vmem:[#allocation475_spill] sm:$0xff] }
 0x6b7   : > { %v6029_v25 = vadd.f32 %v6028_v55, %v13511_v15  ;;  %v4359_v37 = vpop.permute.xlu1 %4358  ;;  %vm6404_vm8 = vcmp.ge.f32.partialorder %v6025_v21, 1.0  ;;  %v2271_v38 = vadd.f32 %v2173_v1, %v1679_v17  ;;  %v3357_v8 = vmul.f32 %v12515_v41, %v17417_v50 }
 0x6b8   : > { %vm6405_vm6 = vcmp.ge.f32.partialorder %v6027_v7, 1.0  ;;  %9617 = vset.pattern.permute.xlu1 %v16921_v31  ;;  %v4540_v5 = vmul.f32 %v12551_v26, %v4359_v37  ;;  %v5229_v46 = vadd.f32 %v5131_v27, %v4637_v34  ;;  %v1088_v34 = vadd.f32 %v14322_v45, %v990_v24  ;;  %v9943_v24 = vld [vmem:[%s10058_s8 + $0x2b0] sm:$0xff] }
 0x6b9   : > { %vm9109_vm9 = vmpackc.low %vm6405_vm6, %vm6403_vm4  ;;  %vm6406_vm10 = vcmp.ge.f32.partialorder %v6029_v25, 1.0  ;;  %4410 = vperm.xlu1 %9617, %v9941_v48   ;;  %v2765_v48 = vmul.f32 %v12513_v54, %v17415_v42  ;;  %v2766_v1 = vmul.f32 %v12513_v54, %v17419_v10 }
 0x6ba   : > { %vm9107_vm11 = vmpackc.low %vm6406_vm10, %vm6404_vm8  ;;  %v4638_v39 = vadd.f32 %v4540_v5, %v4046_v35  ;;  %vm5327_vm13 = vcmp.ge.f32.partialorder %v5229_v46, 1.0  ;;  %v1680_v46 = vadd.f32 %v1582_v57, %v1088_v34 }
 0x6bb   : > { %9108 = vmatprep.mubr.msk.bf16.mxu1 %vm9107_vm11, %v16200_v20  ;;  %v8722_v7 = vsel %vm5327_vm13, 1.0, %v16202_v33  ;;  %v2863_v5 = vadd.f32 %v2765_v48, %v2271_v38  ;;  %v3950_v38 = vmul.f32 %v12534_v62, %v14333_v11  ;;  %v17423_v11 = vld [vmem:[#allocation122_spill] sm:$0xff] }
 0x6bc   : > { %v4951_v61 = vpop.permute.xlu1 %4950  ;;  %9110 = vmatmul.mubr.msk.bf16.gmra.mrb[60].mxu1 %vm9109_vm9, %v16200_v20  ;;  %v2272_v17 = vadd.f32 %v2174_v30, %v1680_v46  ;;  %v991_v34 = vmul.f32 %v12479_v9, %v17423_v11 }
 0x6bd   : > { %v5132_v2 = vmul.f32 %v12546_v3, %v4951_v61  ;;  %4414 = vperm.xlu1 %9617, %v9942_v14   ;;  %v14406_v61 = vpop.permute.xlu0 %3806 }
 0x6be   : > { %v2864_v57 = vadd.f32 %v2766_v1, %v2272_v17  ;;  %v9944_v1 = vld [vmem:[%s10058_s8 + $0x2b8] sm:$0xff] }
 0x6bf   : > { %v5230_v36 = vadd.f32 %v5132_v2, %v4638_v39  ;;  %v3455_v39 = vadd.f32 %v3357_v8, %v2863_v5 }
 0x6c1   : > { %vm5328_vm0 = vcmp.ge.f32.partialorder %v5230_v36, 1.0  ;;  %9618 = vset.pattern.permute.xlu1 %v16922_v19  ;;  %v3771_v63 = vpop.permute.xlu1 %3770  ;;  %v6032_v21 = vpop.f32.mrb[76].mxu0  ;;  %v17422_v36 = vld [vmem:[#allocation482_spill] sm:$0xff] }
 0x6c2   : > { %v8723_v55 = vsel %vm5328_vm0, 1.0, %v16202_v33  ;;  %v6033_v27 = vadd.f32 %v6032_v21, %v13506_v59  ;;  %5006 = vperm.xlu1 %9618, %v9942_v14   ;;  %v6034_v23 = vpop.f32.mrb[77].mxu0  ;;  %v3949_v28 = vmul.f32 %v12534_v62, %v3771_v63  ;;  %v3358_v42 = vmul.f32 %v12515_v41, %v17422_v36  ;;  %v4955_v51 = vpop.permute.xlu0 %4954 }
 0x6c3   : > { %v5586_v25 = vpack.c.bf16 %v8723_v55, %v8722_v7  ;;  %v6035_v37 = vadd.f32 %v6034_v23, %v13511_v15  ;;  %v6036_v43 = vpop.f32.mrb[78].mxu0  ;;  %v5133_v63 = vmul.f32 %v12546_v3, %v4955_v51  ;;  %v17428_v51 = vld [vmem:[#allocation216_spill] sm:$0xff] }
 0x6c4   : > { %v6037_v6 = vadd.f32 %v6036_v43, %v13506_v59  ;;  %v6038_v35 = vpop.f32.mrb[79].mxu0  ;;  %vm6407_vm3 = vcmp.ge.f32.partialorder %v6033_v27, 1.0  ;;  %v4047_v48 = vadd.f32 %v3949_v28, %v3455_v39  ;;  %v3456_v7 = vadd.f32 %v3358_v42, %v2864_v57  ;;  %v17424_v28 = vld [vmem:[#allocation215_spill] sm:$0xff] }
 0x6c5   : > { %v6039_v49 = vadd.f32 %v6038_v35, %v13511_v15  ;;  %8793 = vmatmul.mubr.msk.bf16.gmra.mrb[140].mxu0 %vm5660_vm2, %v5586_v25  ;;  %vm6408_vm6 = vcmp.ge.f32.partialorder %v6035_v37, 1.0  ;;  %v1089_v39 = vadd.f32 %v14322_v45, %v991_v34  ;;  %v17427_v42 = vld [vmem:[#allocation419_spill] sm:$0xff]  ;;  %v1584_v57 = vmul.f32 %v12490_v16, %v17428_v51 }
 0x6c6   : > { %vm6409_vm4 = vcmp.ge.f32.partialorder %v6037_v6, 1.0  ;;  %9619 = vset.pattern.permute.xlu1 %v16848_v60  ;;  %v4363_v2 = vpop.permute.xlu1 %4362  ;;  %6200 = vmatprep.mubr.bf16.mxu0 %v16998_v22  ;;  %v4048_v43 = vadd.f32 %v3950_v38, %v3456_v7  ;;  %v1583_v6 = vmul.f32 %v12490_v16, %v17424_v28 }
 0x6c7   : > { %vm14414_vm8 = vmpackc.low %vm6409_vm4, %vm6407_vm3  ;;  %vm6410_vm9 = vcmp.ge.f32.partialorder %v6039_v49, 1.0  ;;  %v4541_v12 = vmul.f32 %v12551_v26, %v4363_v2  ;;  %3826 = vperm.xlu1 %9619, %v9943_v24   ;;  %v17425_v2 = vld [vmem:[#allocation273_spill] sm:$0xff] }
 0x6c8   : > { %vm9111_vm10 = vmpackc.low %vm6410_vm9, %vm6408_vm6  ;;  %v2175_v14 = vmul.f32 %v12493_v40, %v17425_v2  ;;  %v1681_v36 = vadd.f32 %v1583_v6, %v1089_v39 }
 0x6c9   : > { %9112 = vmatprep.mubr.msk.bf16.mxu1 %vm9111_vm10, %v16200_v20  ;;  %v4639_v21 = vadd.f32 %v4541_v12, %v4047_v48  ;;  %v17426_v12 = vld [vmem:[#allocation121_spill] sm:$0xff]  ;;  %v2767_v48 = vmul.f32 %v12513_v54, %v17427_v42 }
 0x6ca   : > { %v4367_v50 = vpop.permute.xlu1 %4366  ;;  %9114 = vmatmul.mubr.msk.bf16.gmra.mrb[64].mxu1 %vm14414_vm8, %v16200_v20 }
 0x6cb   : > { %9620 = vset.pattern.permute.xlu1 %v16921_v31  ;;  %v6042_v8 = vpop.f32.mrb[80].mxu0  ;;  %v4542_v55 = vmul.f32 %v12551_v26, %v4367_v50  ;;  %v5231_v18 = vadd.f32 %v5133_v63, %v4639_v21  ;;  %v2273_v63 = vadd.f32 %v2175_v14, %v1681_v36  ;;  %v17429_v21 = vld [vmem:[#allocation477_spill] sm:$0xff] }
 0x6cc   : > { %v6043_v27 = vadd.f32 %v6042_v8, %v13506_v59  ;;  %4418 = vperm.xlu1 %9620, %v9943_v24   ;;  %v6044_v23 = vpop.f32.mrb[81].mxu0  ;;  %v992_v24 = vmul.f32 %v12479_v9, %v17426_v12  ;;  %v3359_v50 = vmul.f32 %v12515_v41, %v17429_v21 }
 0x6cd   : > { %v6045_v25 = vadd.f32 %v6044_v23, %v13511_v15  ;;  %v6046_v37 = vpop.f32.mrb[82].mxu0  ;;  %v4640_v49 = vadd.f32 %v4542_v55, %v4048_v43  ;;  %vm5329_vm6 = vcmp.ge.f32.partialorder %v5231_v18, 1.0  ;;  %v2865_v34 = vadd.f32 %v2767_v48, %v2273_v63  ;;  %v17431_v43 = vld [vmem:[#allocation416_spill] sm:$0xff] }
 0x6ce   : > { %v6047_v30 = vadd.f32 %v6046_v37, %v13506_v59  ;;  %v6048_v5 = vpop.f32.mrb[83].mxu0  ;;  %vm6411_vm11 = vcmp.ge.f32.partialorder %v6043_v27, 1.0  ;;  %v8724_v8 = vsel %vm5329_vm6, 1.0, %v16202_v33  ;;  %v1090_v55 = vadd.f32 %v14322_v45, %v992_v24  ;;  %v17430_v27 = vld [vmem:[#allocation276_spill] sm:$0xff] }
 0x6cf   : > { %v6049_v35 = vadd.f32 %v6048_v5, %v13511_v15  ;;  %v4959_v46 = vpop.permute.xlu1 %4958  ;;  %vm6412_vm0 = vcmp.ge.f32.partialorder %v6045_v25, 1.0  ;;  %v2176_v23 = vmul.f32 %v12493_v40, %v17430_v27  ;;  %v2768_v18 = vmul.f32 %v12513_v54, %v17431_v43 }
 0x6d0   : > { %vm6413_vm13 = vcmp.ge.f32.partialorder %v6047_v30, 1.0  ;;  %v5134_v10 = vmul.f32 %v12546_v3, %v4959_v46  ;;  %4422 = vperm.xlu1 %9620, %v9944_v1   ;;  %v1682_v37 = vadd.f32 %v1584_v57, %v1090_v55  ;;  %v3457_v30 = vadd.f32 %v3359_v50, %v2865_v34  ;;  %v17433_v50 = vld [vmem:[#allocation124_spill] sm:$0xff] }
 0x6d1   : > { %vm9117_vm3 = vmpackc.low %vm6413_vm13, %vm6411_vm11  ;;  %vm6414_vm4 = vcmp.ge.f32.partialorder %v6049_v35, 1.0  ;;  %v3952_v48 = vmul.f32 %v12534_v62, %v14353_v56 }
 0x6d2   : > { %vm9115_vm8 = vmpackc.low %vm6414_vm4, %vm6412_vm0  ;;  %v5232_v17 = vadd.f32 %v5134_v10, %v4640_v49  ;;  %v2274_v6 = vadd.f32 %v2176_v23, %v1682_v37  ;;  %v9945_v49 = vld [vmem:[%s10058_s8 + $0x2c0] sm:$0xff] }
 0x6d3   : > { %9116 = vmatprep.mubr.msk.bf16.mxu1 %vm9115_vm8, %v16200_v20 }
 0x6d4   : > { %vm5330_vm9 = vcmp.ge.f32.partialorder %v5232_v17, 1.0  ;;  %9622 = vset.pattern.permute.xlu1 %v16922_v19  ;;  %v3779_v38 = vpop.permute.xlu1 %3778  ;;  %9118 = vmatmul.mubr.msk.bf16.gmra.mrb[68].mxu1 %vm9117_vm3, %v16200_v20  ;;  %v2866_v24 = vadd.f32 %v2768_v18, %v2274_v6  ;;  %v4963_v17 = vpop.permute.xlu0 %4962 }
 0x6d5   : > { %v8725_v7 = vsel %vm5330_vm9, 1.0, %v16202_v33  ;;  %5014 = vperm.xlu1 %9622, %v9944_v1   ;;  %v3951_v25 = vmul.f32 %v12534_v62, %v3779_v38  ;;  %v17432_v1 = vld [vmem:[#allocation484_spill] sm:$0xff]  ;;  %v5135_v51 = vmul.f32 %v12546_v3, %v4963_v17  ;;  %v17437_v17 = vld [vmem:[#allocation218_spill] sm:$0xff] }
 0x6d6   : > { %v5587_v11 = vpack.c.bf16 %v8725_v7, %v8724_v8  ;;  %v3360_v39 = vmul.f32 %v12515_v41, %v17432_v1  ;;  %v993_v8 = vmul.f32 %v12479_v9, %v17433_v50 }
 0x6d7   : > { %v4049_v2 = vadd.f32 %v3951_v25, %v3457_v30  ;;  %v17435_v30 = vld [vmem:[#allocation275_spill] sm:$0xff] }
 0x6d8   : > { %8794 = vmatmul.mubr.msk.bf16.gmra.mrb[144].mxu0 %vm5660_vm2, %v5587_v11  ;;  %v3458_v55 = vadd.f32 %v3360_v39, %v2866_v24  ;;  %v17434_v11 = vld [vmem:[#allocation217_spill] sm:$0xff]  ;;  %v1091_v18 = vadd.f32 %v14322_v45, %v993_v8 }
 0x6d9   : > { %9623 = vset.pattern.permute.xlu1 %v16848_v60  ;;  %v4371_v5 = vpop.permute.xlu1 %4370  ;;  %v6052_v28 = vpop.f32.mrb[84].mxu0  ;;  %6210 = vmatprep.mubr.bf16.mxu0 %v16998_v22  ;;  %v1585_v34 = vmul.f32 %v12490_v16, %v17434_v11 }
 0x6da   : > { %v4543_v35 = vmul.f32 %v12551_v26, %v4371_v5  ;;  %v6053_v46 = vadd.f32 %v6052_v28, %v13506_v59  ;;  %3834 = vperm.xlu1 %9623, %v9945_v49   ;;  %v6054_v10 = vpop.f32.mrb[85].mxu0  ;;  %v4050_v25 = vadd.f32 %v3952_v48, %v3458_v55  ;;  %v2177_v5 = vmul.f32 %v12493_v40, %v17435_v30 }
 0x6db   : > { %v6055_v14 = vadd.f32 %v6054_v10, %v13511_v15  ;;  %v6056_v12 = vpop.f32.mrb[86].mxu0  ;;  %v1683_v1 = vadd.f32 %v1585_v34, %v1091_v18  ;;  %v17445_v18 = vld [vmem:[#allocation126_spill] sm:$0xff] }
 0x6dc   : > { %v6057_v36 = vadd.f32 %v6056_v12, %v13506_v59  ;;  %v6058_v42 = vpop.f32.mrb[87].mxu0  ;;  %v4641_v57 = vadd.f32 %v4543_v35, %v4049_v2  ;;  %vm6415_vm10 = vcmp.ge.f32.partialorder %v6053_v46, 1.0  ;;  %v9946_v35 = vld [vmem:[%s10058_s8 + $0x2c8] sm:$0xff] }
 0x6dd   : > { %v6059_v38 = vadd.f32 %v6058_v42, %v13511_v15  ;;  %v4375_v63 = vpop.permute.xlu1 %4374  ;;  %v14477_v21 = vpop.f32.mrb[0].mxu1  ;;  %vm6416_vm13 = vcmp.ge.f32.partialorder %v6055_v14, 1.0  ;;  %v17436_v12 = vld [vmem:[#allocation123_spill] sm:$0xff]  ;;  %v17438_v42 = vld [vmem:[#allocation421_spill] sm:$0xff] }
 0x6de   : > { %vm6417_vm11 = vcmp.ge.f32.partialorder %v6057_v36, 1.0  ;;  %9624 = vset.pattern.permute.xlu1 %v16921_v31  ;;  %v14482_v7 = vpop.f32.mrb[1].mxu1  ;;  %v4544_v56 = vmul.f32 %v12551_v26, %v4375_v63  ;;  %v5233_v37 = vadd.f32 %v5135_v51, %v4641_v57  ;;  %v994_v24 = vmul.f32 %v12479_v9, %v17436_v12  ;;  %v17439_v63 = vld [vmem:[#allocation479_spill] sm:$0xff]  ;;  %v9947_v12 = vld [vmem:[%s10058_s8 + $0x2d0] sm:$0xff] }
 0x6df   : > { %vm9121_vm0 = vmpackc.low %vm6417_vm11, %vm6415_vm10  ;;  %vm6418_vm3 = vcmp.ge.f32.partialorder %v6059_v38, 1.0  ;;  %4426 = vperm.xlu1 %9624, %v9945_v49   ;;  %v14485_v27 = vpop.f32.mrb[2].mxu1  ;;  %v1586_v36 = vmul.f32 %v12490_v16, %v17437_v17  ;;  %v2769_v48 = vmul.f32 %v12513_v54, %v17438_v42  ;;  %v2275_v38 = vadd.f32 %v2177_v5, %v1683_v1  ;;  %v17442_v5 = vld [vmem:[#allocation278_spill] sm:$0xff] }
 0x6e0   : > { %vm9119_vm4 = vmpackc.low %vm6418_vm3, %vm6416_vm13  ;;  %v14487_v23 = vpop.f32.mrb[3].mxu1  ;;  %v4642_v28 = vadd.f32 %v4544_v56, %v4050_v25  ;;  %vm5331_vm6 = vcmp.ge.f32.partialorder %v5233_v37, 1.0  ;;  %v3361_v50 = vmul.f32 %v12515_v41, %v17439_v63  ;;  %v1092_v37 = vadd.f32 %v14322_v45, %v994_v24  ;;  %v17444_v17 = vld [vmem:[#allocation486_spill] sm:$0xff] }
 0x6e1   : > { %9120 = vmatprep.mubr.msk.bf16.mxu1 %vm9119_vm4, %v16200_v20  ;;  %v8726_v11 = vsel %vm5331_vm6, 1.0, %v16202_v33 }
 0x6e2   : > { %v4967_v43 = vpop.permute.xlu1 %4966  ;;  %9122 = vmatmul.mubr.msk.bf16.gmra.mrb[72].mxu1 %vm9121_vm0, %v16200_v20 }
 0x6e3   : > { %v5136_v6 = vmul.f32 %v12546_v3, %v4967_v43  ;;  %4430 = vperm.xlu1 %9624, %v9946_v35   ;;  %v6062_v46 = vpop.f32.mrb[88].mxu0 }
 0x6e4   : > { %v6063_v49 = vadd.f32 %v6062_v46, %v13506_v59  ;;  %v6064_v10 = vpop.f32.mrb[89].mxu0 }
 0x6e5   : > { %v5234_v39 = vadd.f32 %v5136_v6, %v4642_v28  ;;  %v6065_v2 = vadd.f32 %v6064_v10, %v13511_v15  ;;  %v6066_v14 = vpop.f32.mrb[90].mxu0  ;;  %v2178_v28 = vmul.f32 %v12493_v40, %v17442_v5  ;;  %v2867_v6 = vadd.f32 %v2769_v48, %v2275_v38  ;;  %v17443_v10 = vld [vmem:[#allocation418_spill] sm:$0xff]  ;;  %v4971_v48 = vpop.permute.xlu0 %4970 }
 0x6e6   : > { %v6067_v51 = vadd.f32 %v6066_v14, %v13506_v59  ;;  %v6068_v57 = vpop.f32.mrb[91].mxu0  ;;  %vm6419_vm9 = vcmp.ge.f32.partialorder %v6063_v49, 1.0  ;;  %v1684_v49 = vadd.f32 %v1586_v36, %v1092_v37  ;;  %v2770_v1 = vmul.f32 %v12513_v54, %v17443_v10  ;;  %v17446_v10 = vld [vmem:[#allocation219_spill] sm:$0xff] }
 0x6e7   : > { %vm5332_vm8 = vcmp.ge.f32.partialorder %v5234_v39, 1.0  ;;  %v6069_v8 = vadd.f32 %v6068_v57, %v13511_v15  ;;  %9625 = vset.pattern.permute.xlu1 %v16922_v19  ;;  %v3787_v55 = vpop.permute.xlu1 %3786  ;;  %v14511_v56 = vpop.f32.mrb[4].mxu1  ;;  %vm6420_vm11 = vcmp.ge.f32.partialorder %v6065_v2, 1.0  ;;  %v3459_v39 = vadd.f32 %v3361_v50, %v2867_v6 }
 0x6e8   : > { %v8727_v34 = vsel %vm5332_vm8, 1.0, %v16202_v33  ;;  %vm6421_vm10 = vcmp.ge.f32.partialorder %v6067_v51, 1.0  ;;  %5022 = vperm.xlu1 %9625, %v9946_v35   ;;  %v14516_v25 = vpop.f32.mrb[5].mxu1  ;;  %v3953_v35 = vmul.f32 %v12534_v62, %v3787_v55  ;;  %v2276_v24 = vadd.f32 %v2178_v28, %v1684_v49 }
 0x6e9   : > { %v5588_v43 = vpack.c.bf16 %v8727_v34, %v8726_v11  ;;  %vm14518_vm13 = vmpackc.low %vm6421_vm10, %vm6419_vm9  ;;  %vm6422_vm0 = vcmp.ge.f32.partialorder %v6069_v8, 1.0  ;;  %v14522_v30 = vpop.f32.mrb[6].mxu1  ;;  %v3362_v36 = vmul.f32 %v12515_v41, %v17444_v17  ;;  %v3954_v57 = vmul.f32 %v12534_v62, %v14374_v32  ;;  %v9948_v17 = vld [vmem:[%s10058_s8 + $0x2d8] sm:$0xff] }
 0x6ea   : > { %vm9123_vm3 = vmpackc.low %vm6422_vm0, %vm6420_vm11  ;;  %v14528_v46 = vpop.f32.mrb[7].mxu1  ;;  %v4051_v42 = vadd.f32 %v3953_v35, %v3459_v39  ;;  %v2868_v51 = vadd.f32 %v2770_v1, %v2276_v24  ;;  %v5137_v38 = vmul.f32 %v12546_v3, %v4971_v48  ;;  %v995_v37 = vmul.f32 %v12479_v9, %v17445_v18  ;;  %v17447_v48 = vld [vmem:[#allocation277_spill] sm:$0xff] }
 0x6eb   : > { %8795 = vmatmul.mubr.msk.bf16.gmra.mrb[148].mxu0 %vm5660_vm2, %v5588_v43  ;;  %9124 = vmatprep.mubr.msk.bf16.mxu1 %vm9123_vm3, %v16200_v20  ;;  %v1587_v1 = vmul.f32 %v12490_v16, %v17446_v10 }
 0x6ec   : > { %9626 = vset.pattern.permute.xlu1 %v16848_v60  ;;  %v4379_v2 = vpop.permute.xlu1 %4378  ;;  %9126 = vmatmul.mubr.msk.bf16.gmra.mrb[76].mxu1 %vm14518_vm13, %v16200_v20  ;;  %v3460_v55 = vadd.f32 %v3362_v36, %v2868_v51  ;;  %v2179_v51 = vmul.f32 %v12493_v40, %v17447_v48 }
 0x6ed   : > { %v4545_v14 = vmul.f32 %v12551_v26, %v4379_v2  ;;  %3842 = vperm.xlu1 %9626, %v9947_v12   ;;  %6220 = vmatprep.mubr.bf16.mxu0 %v16998_v22 }
 0x6ee   : > { %v4052_v28 = vadd.f32 %v3954_v57, %v3460_v55 }
 0x6ef   : > { %v4643_v63 = vadd.f32 %v4545_v14, %v4051_v42  ;;  %v1093_v42 = vadd.f32 %v14322_v45, %v995_v37 }
 0x6f0   : > { %v4383_v50 = vpop.permute.xlu1 %4382 }
 0x6f1   : > { %9627 = vset.pattern.permute.xlu1 %v16921_v31  ;;  %v6072_v8 = vpop.f32.mrb[92].mxu0  ;;  %v4546_v11 = vmul.f32 %v12551_v26, %v4383_v50  ;;  %v5235_v6 = vadd.f32 %v5137_v38, %v4643_v63  ;;  %v17448_v38 = vld [vmem:[#allocation125_spill] sm:$0xff]  ;;  %v1685_v55 = vadd.f32 %v1587_v1, %v1093_v42  ;;  %v17452_v1 = vld [vmem:[#allocation280_spill] sm:$0xff] }
 0x6f2   : > { %v6073_v34 = vadd.f32 %v6072_v8, %v13506_v59  ;;  %4434 = vperm.xlu1 %9627, %v9947_v12   ;;  %v6074_v43 = vpop.f32.mrb[93].mxu0  ;;  %v996_v63 = vmul.f32 %v12479_v9, %v17448_v38 }
 0x6f3   : > { %v6075_v32 = vadd.f32 %v6074_v43, %v13511_v15  ;;  %v6076_v5 = vpop.f32.mrb[94].mxu0  ;;  %v4644_v12 = vadd.f32 %v4546_v11, %v4052_v28  ;;  %vm5333_vm11 = vcmp.ge.f32.partialorder %v5235_v6, 1.0  ;;  %v17449_v11 = vld [vmem:[#allocation423_spill] sm:$0xff]  ;;  %v17450_v43 = vld [vmem:[#allocation220_spill] sm:$0xff] }
 0x6f4   : > { %v6077_v35 = vadd.f32 %v6076_v5, %v13506_v59  ;;  %v6078_v49 = vpop.f32.mrb[95].mxu0  ;;  %vm6423_vm4 = vcmp.ge.f32.partialorder %v6073_v34, 1.0  ;;  %v2771_v34 = vmul.f32 %v12513_v54, %v17449_v11  ;;  %v1588_v18 = vmul.f32 %v12490_v16, %v17450_v43  ;;  %v17451_v5 = vld [vmem:[#allocation481_spill] sm:$0xff] }
 0x6f5   : > { %v6079_v39 = vadd.f32 %v6078_v49, %v13511_v15  ;;  %v4975_v2 = vpop.permute.xlu1 %4974  ;;  %v14556_v14 = vpop.f32.mrb[8].mxu1  ;;  %vm6424_vm8 = vcmp.ge.f32.partialorder %v6075_v32, 1.0  ;;  %v2277_v32 = vadd.f32 %v2179_v51, %v1685_v55  ;;  %v3363_v28 = vmul.f32 %v12515_v41, %v17451_v5 }
 0x6f6   : > { %vm6425_vm6 = vcmp.ge.f32.partialorder %v6077_v35, 1.0  ;;  %v5138_v24 = vmul.f32 %v12546_v3, %v4975_v2  ;;  %4438 = vperm.xlu1 %9627, %v9948_v17   ;;  %v14560_v36 = vpop.f32.mrb[9].mxu1  ;;  %v8728_v6 = vsel %vm5333_vm11, 1.0, %v16202_v33  ;;  %v1094_v10 = vadd.f32 %v14322_v45, %v996_v63  ;;  %v17453_v63 = vld [vmem:[#allocation420_spill] sm:$0xff] }
 0x6f7   : > { %vm9129_vm9 = vmpackc.low %vm6425_vm6, %vm6423_vm4  ;;  %vm6426_vm10 = vcmp.ge.f32.partialorder %v6079_v39, 1.0  ;;  %v14565_v57 = vpop.f32.mrb[10].mxu1  ;;  %v2180_v39 = vmul.f32 %v12493_v40, %v17452_v1  ;;  %v2869_v42 = vadd.f32 %v2771_v34, %v2277_v32  ;;  %v2772_v11 = vmul.f32 %v12513_v54, %v17453_v63  ;;  %v17458_v63 = vld [vmem:[#allocation221_spill] sm:$0xff] }
 0x6f8   : > { %vm9127_vm13 = vmpackc.low %vm6426_vm10, %vm6424_vm8  ;;  %v5236_v50 = vadd.f32 %v5138_v24, %v4644_v12  ;;  %v14569_v8 = vpop.f32.mrb[11].mxu1 }
 0x6f9   : > { %9128 = vmatprep.mubr.msk.bf16.mxu1 %vm9127_vm13, %v16200_v20  ;;  %v3461_v43 = vadd.f32 %v3363_v28, %v2869_v42 }
 0x6fa   : > { %vm5334_vm0 = vcmp.ge.f32.partialorder %v5236_v50, 1.0  ;;  %9628 = vset.pattern.permute.xlu1 %v16922_v19  ;;  %v3795_v37 = vpop.permute.xlu1 %3794  ;;  %9130 = vmatmul.mubr.msk.bf16.gmra.mrb[80].mxu1 %vm9129_vm9, %v16200_v20  ;;  %v1686_v50 = vadd.f32 %v1588_v18, %v1094_v10 }
 0x6fb   : > { %v8729_v35 = vsel %vm5334_vm0, 1.0, %v16202_v33  ;;  %5030 = vperm.xlu1 %9628, %v9948_v17   ;;  %v6082_v49 = vpop.f32.mrb[96].mxu0  ;;  %v3955_v48 = vmul.f32 %v12534_v62, %v3795_v37 }
 0x6fc   : > { %v5589_v2 = vpack.c.bf16 %v8729_v35, %v8728_v6  ;;  %v6083_v12 = vadd.f32 %v6082_v49, %v13506_v59  ;;  %v6084_v24 = vpop.f32.mrb[97].mxu0  ;;  %v2278_v32 = vadd.f32 %v2180_v39, %v1686_v50  ;;  %v9949_v6 = vld [vmem:[%s10058_s8 + $0x2e0] sm:$0xff]  ;;  %v17454_v49 = vld [vmem:[#allocation488_spill] sm:$0xff] }
 0x6fd   : > { %v6085_v51 = vadd.f32 %v6084_v24, %v13511_v15  ;;  %v6086_v38 = vpop.f32.mrb[98].mxu0  ;;  %v3364_v28 = vmul.f32 %v12515_v41, %v17454_v49  ;;  %v4053_v10 = vadd.f32 %v3955_v48, %v3461_v43  ;;  %v3956_v24 = vmul.f32 %v12534_v62, %v14388_v4  ;;  %v17457_v48 = vld [vmem:[#allocation128_spill] sm:$0xff]  ;;  %v17460_v49 = vld [vmem:[#allocation279_spill] sm:$0xff] }
 0x6fe   : > { %v6087_v17 = vadd.f32 %v6086_v38, %v13506_v59  ;;  %v6088_v55 = vpop.f32.mrb[99].mxu0  ;;  %8796 = vmatmul.mubr.msk.bf16.gmra.mrb[152].mxu0 %vm5660_vm2, %v5589_v2  ;;  %vm6427_vm3 = vcmp.ge.f32.partialorder %v6083_v12, 1.0  ;;  %v4979_v2 = vpop.permute.xlu0 %4978  ;;  %v2870_v12 = vadd.f32 %v2772_v11, %v2278_v32  ;;  %v1589_v4 = vmul.f32 %v12490_v16, %v17458_v63  ;;  %v17461_v63 = vld [vmem:[#allocation222_spill] sm:$0xff] }
 0x6ff   : > { %v6089_v5 = vadd.f32 %v6088_v55, %v13511_v15  ;;  %9629 = vset.pattern.permute.xlu1 %v16848_v60  ;;  %v4387_v34 = vpop.permute.xlu1 %4386  ;;  %v14594_v37 = vpop.f32.mrb[12].mxu1  ;;  %6230 = vmatprep.mubr.bf16.mxu0 %v16998_v22  ;;  %vm6428_vm6 = vcmp.ge.f32.partialorder %v6085_v51, 1.0  ;;  %v5139_v42 = vmul.f32 %v12546_v3, %v4979_v2  ;;  %v997_v51 = vmul.f32 %v12479_v9, %v17457_v48 }
 0x700   : > { %vm6429_vm4 = vcmp.ge.f32.partialorder %v6087_v17, 1.0  ;;  %v4547_v18 = vmul.f32 %v12551_v26, %v4387_v34  ;;  %3850 = vperm.xlu1 %9629, %v9949_v6   ;;  %v14599_v35 = vpop.f32.mrb[13].mxu1  ;;  %v3462_v17 = vadd.f32 %v3364_v28, %v2870_v12  ;;  %v9950_v12 = vld [vmem:[%s10058_s8 + $0x2e8] sm:$0xff] }
 0x701   : > { %vm9133_vm8 = vmpackc.low %vm6429_vm4, %vm6427_vm3  ;;  %vm6430_vm9 = vcmp.ge.f32.partialorder %v6089_v5, 1.0  ;;  %v14603_v1 = vpop.f32.mrb[14].mxu1  ;;  %v17459_v5 = vld [vmem:[#allocation127_spill] sm:$0xff] }
 0x702   : > { %17455 = vst [vmem:[#allocation17_spill] sm:$0xff] %v14603_v1  ;;  %vm9131_vm10 = vmpackc.low %vm6430_vm9, %vm6428_vm6  ;;  %v14605_v39 = vpop.f32.mrb[15].mxu1  ;;  %v4645_v38 = vadd.f32 %v4547_v18, %v4053_v10  ;;  %v4054_v11 = vadd.f32 %v3956_v24, %v3462_v17  ;;  %v998_v34 = vmul.f32 %v12479_v9, %v17459_v5  ;;  %v1095_v18 = vadd.f32 %v14322_v45, %v997_v51 }
 0x703   : > { %17456 = vst [vmem:[#allocation146_spill] sm:$0xff] %v14605_v39  ;;  %v4391_v50 = vpop.permute.xlu1 %4390  ;;  %9132 = vmatprep.mubr.msk.bf16.mxu1 %vm9131_vm10, %v16200_v20  ;;  %v2181_v10 = vmul.f32 %v12493_v40, %v17460_v49  ;;  %v1590_v5 = vmul.f32 %v12490_v16, %v17461_v63 }
 0x704   : > { %9631 = vset.pattern.permute.xlu1 %v16921_v31  ;;  %9134 = vmatmul.mubr.msk.bf16.gmra.mrb[84].mxu1 %vm9133_vm8, %v16200_v20  ;;  %v4548_v55 = vmul.f32 %v12551_v26, %v4391_v50  ;;  %v5237_v43 = vadd.f32 %v5139_v42, %v4645_v38  ;;  %v1687_v24 = vadd.f32 %v1589_v4, %v1095_v18 }
 0x705   : > { %4442 = vperm.xlu1 %9631, %v9949_v6   ;;  %v1096_v51 = vadd.f32 %v14322_v45, %v998_v34 }
 0x706   : > { %v4646_v2 = vadd.f32 %v4548_v55, %v4054_v11  ;;  %vm5335_vm11 = vcmp.ge.f32.partialorder %v5237_v43, 1.0  ;;  %v17462_v55 = vld [vmem:[#allocation425_spill] sm:$0xff]  ;;  %v2279_v20 = vadd.f32 %v2181_v10, %v1687_v24  ;;  %v17466_v24 = vld [vmem:[#allocation282_spill] sm:$0xff] }
 0x707   : > { %v2773_v11 = vmul.f32 %v12513_v54, %v17462_v55 }
 0x708   : > { %v4983_v32 = vpop.permute.xlu1 %4982 }
 0x709   : > { %v5140_v28 = vmul.f32 %v12546_v3, %v4983_v32  ;;  %4446 = vperm.xlu1 %9631, %v9950_v12   ;;  %v6092_v6 = vpop.f32.mrb[100].mxu0 }
 0x70a   : > { %v6093_v50 = vadd.f32 %v6092_v6, %v13506_v59  ;;  %v6094_v48 = vpop.f32.mrb[101].mxu0  ;;  %v17463_v6 = vld [vmem:[#allocation483_spill] sm:$0xff] }
 0x70b   : > { %v5238_v42 = vadd.f32 %v5140_v28, %v4646_v2  ;;  %v6095_v38 = vadd.f32 %v6094_v48, %v13511_v15  ;;  %v6096_v17 = vpop.f32.mrb[102].mxu0  ;;  %v3365_v4 = vmul.f32 %v12515_v41, %v17463_v6  ;;  %v4987_v28 = vpop.permute.xlu0 %4986  ;;  %v8730_v48 = vsel %vm5335_vm11, 1.0, %v16202_v33 }
 0x70c   : > { %v6097_v32 = vadd.f32 %v6096_v17, %v13506_v59  ;;  %v6098_v49 = vpop.f32.mrb[103].mxu0  ;;  %vm6431_vm0 = vcmp.ge.f32.partialorder %v6093_v50, 1.0  ;;  %v1688_v50 = vadd.f32 %v1590_v5, %v1096_v51  ;;  %v17471_v51 = vld [vmem:[#allocation490_spill] sm:$0xff] }
 0x70d   : > { %vm5336_vm13 = vcmp.ge.f32.partialorder %v5238_v42, 1.0  ;;  %v6099_v18 = vadd.f32 %v6098_v49, %v13511_v15  ;;  %9632 = vset.pattern.permute.xlu1 %v16922_v19  ;;  %v3803_v2 = vpop.permute.xlu1 %3802  ;;  %v14637_v34 = vpop.f32.mrb[16].mxu1  ;;  %v2182_v42 = vmul.f32 %v12493_v40, %v17466_v24  ;;  %vm6432_vm4 = vcmp.ge.f32.partialorder %v6095_v38, 1.0 }
 0x70e   : > { %17464 = vst [vmem:[#allocation316_spill] sm:$0xff] %v14637_v34  ;;  %v8731_v63 = vsel %vm5336_vm13, 1.0, %v16202_v33  ;;  %vm6433_vm3 = vcmp.ge.f32.partialorder %v6097_v32, 1.0  ;;  %5038 = vperm.xlu1 %9632, %v9950_v12   ;;  %v14642_v10 = vpop.f32.mrb[17].mxu1  ;;  %v2871_v49 = vadd.f32 %v2773_v11, %v2279_v20  ;;  %v3957_v43 = vmul.f32 %v12534_v62, %v3803_v2  ;;  %v17469_v12 = vld [vmem:[#allocation422_spill] sm:$0xff]  ;;  %v9951_v2 = vld [vmem:[%s10058_s8 + $0x2f0] sm:$0xff] }
 0x70f   : > { %17465 = vst [vmem:[#allocation12_spill] sm:$0xff] %v14642_v10  ;;  %v5590_v17 = vpack.c.bf16 %v8731_v63, %v8730_v48  ;;  %vm9137_vm6 = vmpackc.low %vm6433_vm3, %vm6431_vm0  ;;  %vm6434_vm8 = vcmp.ge.f32.partialorder %v6099_v18, 1.0  ;;  %v14646_v55 = vpop.f32.mrb[18].mxu1  ;;  %v2774_v32 = vmul.f32 %v12513_v54, %v17469_v12  ;;  %v17470_v24 = vmov 1.0|1.0   ;;  %v14662_v63 = vpop.permute.xlu0 %4994 }
 0x710   : > { %17467 = vst [vmem:[#allocation438_spill] sm:$0xff] %v14646_v55  ;;  %vm9135_vm9 = vmpackc.low %vm6434_vm8, %vm6432_vm4  ;;  %v14649_v6 = vpop.f32.mrb[19].mxu1  ;;  %v3463_v38 = vadd.f32 %v3365_v4, %v2871_v49  ;;  %v2280_v20 = vadd.f32 %v2182_v42, %v1688_v50  ;;  %v3366_v5 = vmul.f32 %v12515_v41, %v17471_v51  ;;  %v3958_v50 = vmul.f32 %v12534_v62, %v14406_v61 }
 0x711   : > { %17468 = vst [vmem:[#allocation18_spill] sm:$0xff] %v14649_v6  ;;  %8797 = vmatmul.mubr.msk.bf16.gmra.mrb[156].mxu0 %vm5660_vm2, %v5590_v17  ;;  %9136 = vmatprep.mubr.msk.bf16.mxu1 %vm9135_vm9, %v17470_v24 }
 0x712   : > { %9633 = vset.pattern.permute.xlu1 %v16848_v60  ;;  %v4395_v18 = vpop.permute.xlu1 %4394  ;;  %9138 = vmatmul.mubr.msk.bf16.gmra.mrb[88].mxu1 %vm9137_vm6, %v17470_v24  ;;  %v4055_v17 = vadd.f32 %v3957_v43, %v3463_v38  ;;  %v2872_v12 = vadd.f32 %v2774_v32, %v2280_v20 }
 0x713   : > { %v4549_v11 = vmul.f32 %v12551_v26, %v4395_v18  ;;  %3858 = vperm.xlu1 %9633, %v9951_v2   ;;  %v6102_v48 = vpop.f32.mrb[104].mxu0  ;;  %6240 = vmatprep.mubr.bf16.mxu0 %v16998_v22  ;;  %v5141_v18 = vmul.f32 %v12546_v3, %v4987_v28  ;;  %v17474_v28 = vld [vmem:[#allocation130_spill] sm:$0xff] }
 0x714   : > { %v6103_v4 = vadd.f32 %v6102_v48, %v13506_v59  ;;  %v6104_v49 = vpop.f32.mrb[105].mxu0  ;;  %v3464_v32 = vadd.f32 %v3366_v5, %v2872_v12  ;;  %v999_v20 = vmul.f32 %v12479_v9, %v17474_v28  ;;  %v9952_v12 = vld [vmem:[%s10058_s8 + $0x2f8] sm:$0xff]  ;;  %v17480_v28 = vld [vmem:[#allocation427_spill] sm:$0xff] }
 0x715   : > { %v6105_v33 = vadd.f32 %v6104_v49, %v13511_v15  ;;  %v6106_v42 = vpop.f32.mrb[106].mxu0  ;;  %v4647_v6 = vadd.f32 %v4549_v11, %v4055_v17  ;;  %v14681_v17 = vpop.permute.xlu0 %5002 }
 0x716   : > { %v6107_v55 = vadd.f32 %v6106_v42, %v13506_v59  ;;  %v4399_v10 = vpop.permute.xlu1 %4398  ;;  %v6108_v51 = vpop.f32.mrb[107].mxu0  ;;  %vm6435_vm10 = vcmp.ge.f32.partialorder %v6103_v4, 1.0  ;;  %v4056_v48 = vadd.f32 %v3958_v50, %v3464_v32  ;;  %v17478_v42 = vld [vmem:[#allocation281_spill] sm:$0xff] }
 0x717   : > { %v6109_v34 = vadd.f32 %v6108_v51, %v13511_v15  ;;  %9634 = vset.pattern.permute.xlu1 %v16921_v31  ;;  %v14672_v43 = vpop.f32.mrb[20].mxu1  ;;  %v4550_v38 = vmul.f32 %v12551_v26, %v4399_v10  ;;  %vm6436_vm13 = vcmp.ge.f32.partialorder %v6105_v33, 1.0  ;;  %v5239_v5 = vadd.f32 %v5141_v18, %v4647_v6  ;;  %v17477_v10 = vld [vmem:[#allocation223_spill] sm:$0xff]  ;;  %v17479_v50 = vld [vmem:[#allocation129_spill] sm:$0xff] }
 0x718   : > { %17472 = vst [vmem:[#allocation309_spill] sm:$0xff] %v14672_v43  ;;  %vm6437_vm11 = vcmp.ge.f32.partialorder %v6107_v55, 1.0  ;;  %4450 = vperm.xlu1 %9634, %v9951_v2   ;;  %v14675_v61 = vpop.f32.mrb[21].mxu1  ;;  %v1591_v2 = vmul.f32 %v12490_v16, %v17477_v10  ;;  %v2183_v6 = vmul.f32 %v12493_v40, %v17478_v42  ;;  %v1000_v18 = vmul.f32 %v12479_v9, %v17479_v50  ;;  %v17482_v42 = vld [vmem:[#allocation485_spill] sm:$0xff] }
 0x719   : > { %17473 = vst [vmem:[#allocation326_spill] sm:$0xff] %v14675_v61  ;;  %vm9141_vm0 = vmpackc.low %vm6437_vm11, %vm6435_vm10  ;;  %vm6438_vm3 = vcmp.ge.f32.partialorder %v6109_v34, 1.0  ;;  %v14679_v11 = vpop.f32.mrb[22].mxu1  ;;  %v4648_v49 = vadd.f32 %v4550_v38, %v4056_v48  ;;  %v1097_v34 = vadd.f32 %v14322_v45, %v999_v20  ;;  %vm5337_vm6 = vcmp.ge.f32.partialorder %v5239_v5, 1.0  ;;  %v17481_v48 = vld [vmem:[#allocation224_spill] sm:$0xff] }
 0x71a   : > { %17475 = vst [vmem:[#allocation147_spill] sm:$0xff] %v14679_v11  ;;  %vm9139_vm4 = vmpackc.low %vm6438_vm3, %vm6436_vm13  ;;  %v14683_v55 = vpop.f32.mrb[23].mxu1  ;;  %v2775_v38 = vmul.f32 %v12513_v54, %v17480_v28  ;;  %v1592_v10 = vmul.f32 %v12490_v16, %v17481_v48  ;;  %v17483_v50 = vmov 0.0  }
 0x71b   : > { %17476 = vst [vmem:[#allocation14_spill] sm:$0xff] %v14683_v55  ;;  %v4991_v4 = vpop.permute.xlu1 %4990  ;;  %9140 = vmatprep.mubr.msk.bf16.mxu1 %vm9139_vm4, %v17470_v24  ;;  %v1689_v32 = vadd.f32 %v1591_v2, %v1097_v34  ;;  %v3367_v55 = vmul.f32 %v12515_v41, %v17482_v42  ;;  %v8732_v5 = vsel %vm5337_vm6, 1.0, %v17483_v50 }
 0x71c   : > { %v5142_v33 = vmul.f32 %v12546_v3, %v4991_v4  ;;  %4454 = vperm.xlu1 %9634, %v9952_v12   ;;  %9142 = vmatmul.mubr.msk.bf16.gmra.mrb[92].mxu1 %vm9141_vm0, %v17470_v24  ;;  %v14700_v4 = vpop.permute.xlu0 %5010 }
 0x71d   : > { %v2281_v20 = vadd.f32 %v2183_v6, %v1689_v32 }
 0x71e   : > { %v5240_v51 = vadd.f32 %v5142_v33, %v4648_v49  ;;  %v14710_v33 = vld [vmem:[%s16039_s2] ss:$0 sm:$0xff] }
 0x71f   : > { %v1098_v34 = vadd.f32 %v14710_v33, %v1000_v18  ;;  %v2873_v42 = vadd.f32 %v2775_v38, %v2281_v20  ;;  %v17485_v18 = vld [vmem:[#allocation424_spill] sm:$0xff] }
 0x720   : > { %vm5338_vm8 = vcmp.ge.f32.partialorder %v5240_v51, 1.0  ;;  %9636 = vset.pattern.permute.xlu1 %v16922_v19  ;;  %v3811_v45 = vpop.permute.xlu1 %3810  ;;  %v17484_v51 = vld [vmem:[#allocation284_spill] sm:$0xff]  ;;  %v3815_v20 = vpop.permute.xlu0 %3814 }
 0x721   : > { %v8733_v2 = vsel %vm5338_vm8, 1.0, %v17483_v50  ;;  %5046 = vperm.xlu1 %9636, %v9952_v12   ;;  %v6112_v49 = vpop.f32.mrb[108].mxu0  ;;  %v2184_v28 = vmul.f32 %v12493_v40, %v17484_v51  ;;  %v3959_v11 = vmul.f32 %v12534_v62, %v3811_v45  ;;  %v1690_v43 = vadd.f32 %v1592_v10, %v1098_v34 }
 0x722   : > { %v5591_v6 = vpack.c.bf16 %v8733_v2, %v8732_v5  ;;  %v6113_v32 = vadd.f32 %v6112_v49, %v13506_v59  ;;  %v6114_v48 = vpop.f32.mrb[109].mxu0  ;;  %v2776_v51 = vmul.f32 %v12513_v54, %v17485_v18  ;;  %v3465_v5 = vadd.f32 %v3367_v55, %v2873_v42  ;;  %v9954_v49 = vld [vmem:[%s10058_s8 + $0x300] sm:$0xff]  ;;  %v17486_v55 = vld [vmem:[#allocation492_spill] sm:$0xff] }
 0x723   : > { %v6115_v12 = vadd.f32 %v6114_v48, %v13511_v15  ;;  %v6116_v61 = vpop.f32.mrb[110].mxu0  ;;  %v2282_v10 = vadd.f32 %v2184_v28, %v1690_v43 }
 0x724   : > { %v6117_v39 = vadd.f32 %v6116_v61, %v13506_v59  ;;  %v6118_v1 = vpop.f32.mrb[111].mxu0  ;;  %8798 = vmatmul.mubr.msk.bf16.gmra.mrb[160].mxu0 %vm5660_vm2, %v5591_v6  ;;  %vm6439_vm9 = vcmp.ge.f32.partialorder %v6113_v32, 1.0  ;;  %v4057_v6 = vadd.f32 %v3959_v11, %v3465_v5  ;;  %v3960_v32 = vmul.f32 %v12534_v62, %v3815_v20  ;;  %v17488_v5 = vld [vmem:[#allocation132_spill] sm:$0xff] }
 0x725   : > { %v6119_v2 = vadd.f32 %v6118_v1, %v13511_v15  ;;  %9637 = vset.pattern.permute.xlu1 %v16848_v60  ;;  %v4403_v38 = vpop.permute.xlu1 %4402  ;;  %v14724_v45 = vpop.f32.mrb[24].mxu1  ;;  %6250 = vmatprep.mubr.bf16.mxu0 %v16998_v22  ;;  %v3368_v1 = vmul.f32 %v12515_v41, %v17486_v55  ;;  %vm6440_vm11 = vcmp.ge.f32.partialorder %v6115_v12, 1.0  ;;  %v2874_v28 = vadd.f32 %v2776_v51, %v2282_v10 }
 0x726   : > { %vm6441_vm10 = vcmp.ge.f32.partialorder %v6117_v39, 1.0  ;;  %v4551_v61 = vmul.f32 %v12551_v26, %v4403_v38  ;;  %3866 = vperm.xlu1 %9637, %v9954_v49   ;;  %v14729_v34 = vpop.f32.mrb[25].mxu1  ;;  %v5143_v39 = vmul.f32 %v12546_v3, %v14662_v63  ;;  %v1001_v51 = vmul.f32 %v12479_v9, %v17488_v5 }
 0x727   : > { %vm9145_vm13 = vmpackc.low %vm6441_vm10, %vm6439_vm9  ;;  %vm6442_vm0 = vcmp.ge.f32.partialorder %v6119_v2, 1.0  ;;  %v14733_v60 = vpop.f32.mrb[26].mxu1  ;;  %v3466_v11 = vadd.f32 %v3368_v1, %v2874_v28  ;;  %v17490_v28 = vld [vmem:[#allocation131_spill] sm:$0xff] }
 0x728   : > { %vm9143_vm3 = vmpackc.low %vm6442_vm0, %vm6440_vm11  ;;  %v14735_v43 = vpop.f32.mrb[27].mxu1  ;;  %v4649_v48 = vadd.f32 %v4551_v61, %v4057_v6 }
 0x729   : > { %17487 = vst [vmem:[#allocation22_spill] sm:$0xff] %v14735_v43  ;;  %v4407_v42 = vpop.permute.xlu1 %4406  ;;  %9144 = vmatprep.mubr.msk.bf16.mxu1 %vm9143_vm3, %v17470_v24  ;;  %v4058_v38 = vadd.f32 %v3960_v32, %v3466_v11  ;;  %v9955_v32 = vld [vmem:[%s10058_s8 + $0x308] sm:$0xff] }
 0x72a   : > { %9638 = vset.pattern.permute.xlu1 %v16921_v31  ;;  %9146 = vmatmul.mubr.msk.bf16.gmra.mrb[96].mxu1 %vm9145_vm13, %v17470_v24  ;;  %v4552_v12 = vmul.f32 %v12551_v26, %v4407_v42  ;;  %v5241_v10 = vadd.f32 %v5143_v39, %v4649_v48  ;;  %v17489_v31 = vld [vmem:[#allocation225_spill] sm:$0xff]  ;;  %v1002_v42 = vmul.f32 %v12479_v9, %v17490_v28  ;;  %v17492_v11 = vld [vmem:[#allocation283_spill] sm:$0xff] }
 0x72b   : > { %4458 = vperm.xlu1 %9638, %v9954_v49   ;;  %v6122_v18 = vpop.f32.mrb[112].mxu0  ;;  %v1593_v55 = vmul.f32 %v12490_v16, %v17489_v31  ;;  %v1099_v48 = vadd.f32 %v14710_v33, %v1001_v51 }
 0x72c   : > { %v6123_v63 = vadd.f32 %v6122_v18, %v13506_v59  ;;  %v6124_v2 = vpop.f32.mrb[113].mxu0  ;;  %v4650_v43 = vadd.f32 %v4552_v12, %v4058_v38  ;;  %vm5339_vm8 = vcmp.ge.f32.partialorder %v5241_v10, 1.0 }
 0x72d   : > { %v6125_v20 = vadd.f32 %v6124_v2, %v13511_v15  ;;  %v6126_v61 = vpop.f32.mrb[114].mxu0  ;;  %v2185_v2 = vmul.f32 %v12493_v40, %v17492_v11  ;;  %v1100_v11 = vadd.f32 %v14710_v33, %v1002_v42 }
 0x72e   : > { %v6127_v1 = vadd.f32 %v6126_v61, %v13506_v59  ;;  %v4999_v6 = vpop.permute.xlu1 %4998  ;;  %v6128_v49 = vpop.f32.mrb[115].mxu0  ;;  %vm6443_vm4 = vcmp.ge.f32.partialorder %v6123_v63, 1.0  ;;  %v17499_v63 = vld [vmem:[#allocation226_spill] sm:$0xff] }
 0x72f   : > { %v5144_v5 = vmul.f32 %v12546_v3, %v4999_v6  ;;  %v6129_v18 = vadd.f32 %v6128_v49, %v13511_v15  ;;  %4462 = vperm.xlu1 %9638, %v9955_v32   ;;  %v14756_v39 = vpop.f32.mrb[28].mxu1  ;;  %vm6444_vm9 = vcmp.ge.f32.partialorder %v6125_v20, 1.0  ;;  %v1691_v6 = vadd.f32 %v1593_v55, %v1099_v48  ;;  %v17497_v49 = vld [vmem:[#allocation429_spill] sm:$0xff] }
 0x730   : > { %17491 = vst [vmem:[#allocation320_spill] sm:$0xff] %v14756_v39  ;;  %vm6445_vm6 = vcmp.ge.f32.partialorder %v6127_v1, 1.0  ;;  %v14761_v61 = vpop.f32.mrb[29].mxu1  ;;  %v2777_v51 = vmul.f32 %v12513_v54, %v17497_v49  ;;  %v1594_v1 = vmul.f32 %v12490_v16, %v17499_v63  ;;  %v8734_v55 = vsel %vm5339_vm8, 1.0, %v17483_v50 }
 0x731   : > { %17493 = vst [vmem:[#allocation148_spill] sm:$0xff] %v14761_v61  ;;  %vm14763_vm10 = vmpackc.low %vm6445_vm6, %vm6443_vm4  ;;  %v5242_v38 = vadd.f32 %v5144_v5, %v4650_v43  ;;  %vm6446_vm11 = vcmp.ge.f32.partialorder %v6129_v18, 1.0  ;;  %v14767_v31 = vpop.f32.mrb[30].mxu1  ;;  %v2283_v43 = vadd.f32 %v2185_v2, %v1691_v6  ;;  %v17500_v5 = vld [vmem:[#allocation487_spill] sm:$0xff] }
 0x732   : > { %17496 = vst [vmem:[#allocation307_spill] sm:$0xff] %v14767_v31  ;;  %vm9147_vm13 = vmpackc.low %vm6446_vm11, %vm6444_vm9  ;;  %v14771_v28 = vpop.f32.mrb[31].mxu1  ;;  %v3369_v18 = vmul.f32 %v12515_v41, %v17500_v5  ;;  %v1692_v63 = vadd.f32 %v1594_v1, %v1100_v11  ;;  %v17502_v5 = vld [vmem:[#allocation426_spill] sm:$0xff]  ;;  %v3823_v31 = vpop.permute.xlu0 %3822 }
 0x733   : > { %17498 = vst [vmem:[#allocation16_spill] sm:$0xff] %v14771_v28  ;;  %vm5340_vm0 = vcmp.ge.f32.partialorder %v5242_v38, 1.0  ;;  %9640 = vset.pattern.permute.xlu1 %v16922_v19  ;;  %v3819_v20 = vpop.permute.xlu1 %3818  ;;  %9148 = vmatprep.mubr.msk.bf16.mxu1 %vm9147_vm13, %v17470_v24  ;;  %v17501_v19 = vld [vmem:[#allocation288_spill] sm:$0xff]  ;;  %v2875_v2 = vadd.f32 %v2777_v51, %v2283_v43  ;;  %v2778_v10 = vmul.f32 %v12513_v54, %v17502_v5  ;;  %v17504_v5 = vld [vmem:[#allocation134_spill] sm:$0xff] }
 0x734   : > { %v8735_v48 = vsel %vm5340_vm0, 1.0, %v17483_v50  ;;  %5054 = vperm.xlu1 %9640, %v9955_v32   ;;  %9150 = vmatmul.mubr.msk.bf16.gmra.mrb[100].mxu1 %vm14763_vm10, %v17470_v24  ;;  %v2186_v38 = vmul.f32 %v12493_v40, %v17501_v19  ;;  %v3961_v6 = vmul.f32 %v12534_v62, %v3819_v20  ;;  %v17503_v19 = vld [vmem:[#allocation286_spill] sm:$0xff] }
 0x735   : > { %v5592_v49 = vpack.c.bf16 %v8735_v48, %v8734_v55  ;;  %v3467_v32 = vadd.f32 %v3369_v18, %v2875_v2  ;;  %v3370_v51 = vmul.f32 %v12515_v41, %v17503_v19  ;;  %v5145_v18 = vmul.f32 %v12546_v3, %v14681_v17 }
 0x736   : > { %v2284_v12 = vadd.f32 %v2186_v38, %v1692_v63  ;;  %v3962_v38 = vmul.f32 %v12534_v62, %v3823_v31 }
 0x737   : > { %8799 = vmatmul.mubr.msk.bf16.gmra.mrb[164].mxu0 %vm5660_vm2, %v5592_v49  ;;  %v4059_v43 = vadd.f32 %v3961_v6, %v3467_v32  ;;  %v1003_v6 = vmul.f32 %v12479_v9, %v17504_v5 }
 0x738   : > { %v4411_v28 = vpop.permute.xlu1 %4410  ;;  %6260 = vmatprep.mubr.bf16.mxu0 %v16998_v22  ;;  %v2876_v55 = vadd.f32 %v2778_v10, %v2284_v12 }
 0x739   : > { %v4553_v42 = vmul.f32 %v12551_v26, %v4411_v28  ;;  %v6132_v61 = vpop.f32.mrb[116].mxu0 }
 0x73a   : > { %v6133_v1 = vadd.f32 %v6132_v61, %v13506_v59  ;;  %v6134_v20 = vpop.f32.mrb[117].mxu0  ;;  %v3468_v10 = vadd.f32 %v3370_v51, %v2876_v55  ;;  %v17510_v51 = vld [vmem:[#allocation133_spill] sm:$0xff] }
 0x73b   : > { %v6135_v48 = vadd.f32 %v6134_v20, %v13511_v15  ;;  %v6136_v11 = vpop.f32.mrb[118].mxu0  ;;  %v4651_v49 = vadd.f32 %v4553_v42, %v4059_v43  ;;  %v17508_v42 = vld [vmem:[#allocation2_spill] sm:$0xff] }
 0x73c   : > { %v6137_v28 = vadd.f32 %v6136_v11, %v13506_v59  ;;  %v4415_v2 = vpop.permute.xlu1 %4414  ;;  %v6138_v63 = vpop.f32.mrb[119].mxu0  ;;  %vm6447_vm3 = vcmp.ge.f32.partialorder %v6133_v1, 1.0  ;;  %v1595_v19 = vmul.f32 %v12490_v16, %v17508_v42  ;;  %v4060_v43 = vadd.f32 %v3962_v38, %v3468_v10 }
 0x73d   : > { %v6139_v61 = vadd.f32 %v6138_v63, %v13511_v15  ;;  %v14805_v32 = vpop.f32.mrb[32].mxu1  ;;  %v4554_v12 = vmul.f32 %v12551_v26, %v4415_v2  ;;  %vm6448_vm6 = vcmp.ge.f32.partialorder %v6135_v48, 1.0  ;;  %v5243_v20 = vadd.f32 %v5145_v18, %v4651_v49 }
 0x73e   : > { %17505 = vst [vmem:[#allocation26_spill] sm:$0xff] %v14805_v32  ;;  %vm6449_vm4 = vcmp.ge.f32.partialorder %v6137_v28, 1.0  ;;  %v14808_v17 = vpop.f32.mrb[33].mxu1  ;;  %v1004_v1 = vmul.f32 %v12479_v9, %v17510_v51  ;;  %v1101_v48 = vadd.f32 %v14710_v33, %v1003_v6  ;;  %v17511_v28 = vld [vmem:[#allocation285_spill] sm:$0xff]  ;;  %v17512_v51 = vld [vmem:[#allocation431_spill] sm:$0xff] }
 0x73f   : > { %17506 = vst [vmem:[#allocation27_spill] sm:$0xff] %v14808_v17  ;;  %vm9153_vm8 = vmpackc.low %vm6449_vm4, %vm6447_vm3  ;;  %vm6450_vm9 = vcmp.ge.f32.partialorder %v6139_v61, 1.0  ;;  %v14810_v31 = vpop.f32.mrb[34].mxu1  ;;  %v2187_v2 = vmul.f32 %v12493_v40, %v17511_v28  ;;  %v4652_v63 = vadd.f32 %v4554_v12, %v4060_v43  ;;  %vm5341_vm11 = vcmp.ge.f32.partialorder %v5243_v20, 1.0  ;;  %v17513_v12 = vld [vmem:[#allocation5_spill] sm:$0xff] }
 0x740   : > { %17507 = vst [vmem:[#allocation150_spill] sm:$0xff] %v14810_v31  ;;  %vm9151_vm10 = vmpackc.low %vm6450_vm9, %vm6448_vm6  ;;  %v14814_v11 = vpop.f32.mrb[35].mxu1  ;;  %v1693_v38 = vadd.f32 %v1595_v19, %v1101_v48  ;;  %v1102_v42 = vadd.f32 %v14710_v33, %v1004_v1  ;;  %v2779_v6 = vmul.f32 %v12513_v54, %v17512_v51  ;;  %v1596_v43 = vmul.f32 %v12490_v16, %v17513_v12  ;;  %v3831_v31 = vpop.permute.xlu0 %3830  ;;  %v17516_v12 = vld [vmem:[#allocation292_spill] sm:$0xff] }
 0x741   : > { %17509 = vst [vmem:[#allocation313_spill] sm:$0xff] %v14814_v11  ;;  %v5007_v55 = vpop.permute.xlu1 %5006  ;;  %9152 = vmatprep.mubr.msk.bf16.mxu1 %vm9151_vm10, %v17470_v24  ;;  %v8736_v1 = vsel %vm5341_vm11, 1.0, %v17483_v50 }
 0x742   : > { %v5146_v5 = vmul.f32 %v12546_v3, %v5007_v55  ;;  %9154 = vmatmul.mubr.msk.bf16.gmra.mrb[104].mxu1 %vm9153_vm8, %v17470_v24  ;;  %v2285_v55 = vadd.f32 %v2187_v2, %v1693_v38  ;;  %v2188_v2 = vmul.f32 %v12493_v40, %v17516_v12  ;;  %v17520_v12 = vld [vmem:[#allocation428_spill] sm:$0xff] }
 0x743   : > { %v6142_v18 = vpop.f32.mrb[120].mxu0 }
 0x744   : > { %v5244_v49 = vadd.f32 %v5146_v5, %v4652_v63  ;;  %v6143_v61 = vadd.f32 %v6142_v18, %v13506_v59  ;;  %v6144_v10 = vpop.f32.mrb[121].mxu0  ;;  %v17514_v5 = vld [vmem:[#allocation489_spill] sm:$0xff] }
 0x745   : > { %v6145_v11 = vadd.f32 %v6144_v10, %v13511_v15  ;;  %v6146_v28 = vpop.f32.mrb[122].mxu0  ;;  %v3371_v18 = vmul.f32 %v12515_v41, %v17514_v5 }
 0x746   : > { %vm5342_vm13 = vcmp.ge.f32.partialorder %v5244_v49, 1.0  ;;  %v6147_v19 = vadd.f32 %v6146_v28, %v13506_v59  ;;  %v3827_v48 = vpop.permute.xlu1 %3826  ;;  %v6148_v63 = vpop.f32.mrb[123].mxu0  ;;  %vm6451_vm0 = vcmp.ge.f32.partialorder %v6143_v61, 1.0  ;;  %v2877_v28 = vadd.f32 %v2779_v6, %v2285_v55  ;;  %v17521_v55 = vld [vmem:[#allocation290_spill] sm:$0xff] }
 0x747   : > { %v8737_v51 = vsel %vm5342_vm13, 1.0, %v17483_v50  ;;  %v6149_v10 = vadd.f32 %v6148_v63, %v13511_v15  ;;  %v14838_v17 = vpop.f32.mrb[36].mxu1  ;;  %vm6452_vm4 = vcmp.ge.f32.partialorder %v6145_v11, 1.0  ;;  %v3963_v20 = vmul.f32 %v12534_v62, %v3827_v48 }
 0x748   : > { %17515 = vst [vmem:[#allocation311_spill] sm:$0xff] %v14838_v17  ;;  %v5593_v38 = vpack.c.bf16 %v8737_v51, %v8736_v1  ;;  %vm6453_vm3 = vcmp.ge.f32.partialorder %v6147_v19, 1.0  ;;  %v14842_v49 = vpop.f32.mrb[37].mxu1  ;;  %v1694_v17 = vadd.f32 %v1596_v43, %v1102_v42  ;;  %v2780_v61 = vmul.f32 %v12513_v54, %v17520_v12  ;;  %v14858_v51 = vpop.permute.xlu0 %3838 }
 0x749   : > { %17517 = vst [vmem:[#allocation20_spill] sm:$0xff] %v14842_v49  ;;  %vm9157_vm6 = vmpackc.low %vm6453_vm3, %vm6451_vm0  ;;  %vm6454_vm8 = vcmp.ge.f32.partialorder %v6149_v10, 1.0  ;;  %v14845_v5 = vpop.f32.mrb[38].mxu1  ;;  %v3469_v19 = vadd.f32 %v3371_v18, %v2877_v28  ;;  %v3372_v48 = vmul.f32 %v12515_v41, %v17521_v55  ;;  %v5147_v18 = vmul.f32 %v12546_v3, %v14700_v4 }
 0x74a   : > { %17518 = vst [vmem:[#allocation149_spill] sm:$0xff] %v14845_v5  ;;  %vm9155_vm9 = vmpackc.low %vm6454_vm8, %vm6452_vm4  ;;  %8800 = vmatmul.mubr.msk.bf16.gmra.mrb[168].mxu0 %vm5660_vm2, %v5593_v38  ;;  %v14848_v63 = vpop.f32.mrb[39].mxu1  ;;  %v2286_v6 = vadd.f32 %v2188_v2, %v1694_v17  ;;  %v3964_v10 = vmul.f32 %v12534_v62, %v3831_v31  ;;  %v17522_v5 = vld [vmem:[#allocation136_spill] sm:$0xff]  ;;  %v17523_v31 = vld [vmem:[#allocation3_spill] sm:$0xff] }
 0x74b   : > { %17519 = vst [vmem:[#allocation317_spill] sm:$0xff] %v14848_v63  ;;  %v4419_v1 = vpop.permute.xlu1 %4418  ;;  %9156 = vmatprep.mubr.msk.bf16.mxu1 %vm9155_vm9, %v17470_v24  ;;  %6270 = vmatprep.mubr.bf16.mxu0 %v16998_v22  ;;  %v4061_v42 = vadd.f32 %v3963_v20, %v3469_v19  ;;  %v1005_v17 = vmul.f32 %v12479_v9, %v17522_v5 }
 0x74c   : > { %v4555_v11 = vmul.f32 %v12551_v26, %v4419_v1  ;;  %9158 = vmatmul.mubr.msk.bf16.gmra.mrb[108].mxu1 %vm9157_vm6, %v17470_v24  ;;  %v2878_v43 = vadd.f32 %v2780_v61, %v2286_v6  ;;  %v14867_v20 = vpop.permute.xlu0 %3846 }
 0x74e   : > { %v4653_v38 = vadd.f32 %v4555_v11, %v4061_v42  ;;  %v3470_v12 = vadd.f32 %v3372_v48, %v2878_v43  ;;  %v1597_v11 = vmul.f32 %v12490_v16, %v17523_v31  ;;  %v17524_v43 = vld [vmem:[#allocation135_spill] sm:$0xff] }
 0x74f   : > { %v4423_v28 = vpop.permute.xlu1 %4422  ;;  %v1006_v5 = vmul.f32 %v12479_v9, %v17524_v43 }
 0x750   : > { %v4556_v1 = vmul.f32 %v12551_v26, %v4423_v28  ;;  %v4062_v49 = vadd.f32 %v3964_v10, %v3470_v12  ;;  %v5245_v61 = vadd.f32 %v5147_v18, %v4653_v38  ;;  %v1103_v18 = vadd.f32 %v14710_v33, %v1005_v17  ;;  %v17526_v38 = vld [vmem:[#allocation289_spill] sm:$0xff] }
 0x751   : > { %v6152_v63 = vpop.f32.mrb[124].mxu0 }
 0x752   : > { %v6153_v2 = vadd.f32 %v6152_v63, %v13506_v59  ;;  %v6154_v55 = vpop.f32.mrb[125].mxu0  ;;  %v4654_v28 = vadd.f32 %v4556_v1, %v4062_v49  ;;  %vm5343_vm13 = vcmp.ge.f32.partialorder %v5245_v61, 1.0 }
 0x753   : > { %v6155_v4 = vadd.f32 %v6154_v55, %v13511_v15  ;;  %v6156_v19 = vpop.f32.mrb[126].mxu0  ;;  %v2189_v55 = vmul.f32 %v12493_v40, %v17526_v38 }
 0x754   : > { %v6157_v6 = vadd.f32 %v6156_v19, %v13506_v59  ;;  %v5015_v48 = vpop.permute.xlu1 %5014  ;;  %v6158_v42 = vpop.f32.mrb[127].mxu0  ;;  %vm6455_vm10 = vcmp.ge.f32.partialorder %v6153_v2, 1.0  ;;  %v17533_v2 = vld [vmem:[#allocation7_spill] sm:$0xff] }
 0x755   : > { %v5148_v63 = vmul.f32 %v12546_v3, %v5015_v48  ;;  %v6159_v10 = vadd.f32 %v6158_v42, %v13511_v15  ;;  %v14877_v12 = vpop.f32.mrb[40].mxu1  ;;  %vm6456_vm0 = vcmp.ge.f32.partialorder %v6155_v4, 1.0  ;;  %v1695_v48 = vadd.f32 %v1597_v11, %v1103_v18  ;;  %v17531_v42 = vld [vmem:[#allocation433_spill] sm:$0xff] }
 0x756   : > { %17525 = vst [vmem:[#allocation21_spill] sm:$0xff] %v14877_v12  ;;  %vm6457_vm11 = vcmp.ge.f32.partialorder %v6157_v6, 1.0  ;;  %v14882_v19 = vpop.f32.mrb[41].mxu1  ;;  %v2781_v17 = vmul.f32 %v12513_v54, %v17531_v42  ;;  %v1598_v6 = vmul.f32 %v12490_v16, %v17533_v2  ;;  %v8738_v11 = vsel %vm5343_vm13, 1.0, %v17483_v50 }
 0x757   : > { %17527 = vst [vmem:[#allocation315_spill] sm:$0xff] %v14882_v19  ;;  %vm14884_vm3 = vmpackc.low %vm6457_vm11, %vm6455_vm10  ;;  %v5246_v49 = vadd.f32 %v5148_v63, %v4654_v28  ;;  %vm6458_vm4 = vcmp.ge.f32.partialorder %v6159_v10, 1.0  ;;  %v14888_v1 = vpop.f32.mrb[42].mxu1  ;;  %v2287_v38 = vadd.f32 %v2189_v55, %v1695_v48  ;;  %v17534_v19 = vld [vmem:[#allocation491_spill] sm:$0xff]  ;;  %v14899_v63 = vpop.permute.xlu0 %3854  ;;  %v1104_v18 = vadd.f32 %v14710_v33, %v1006_v5 }
 0x758   : > { %17530 = vst [vmem:[#allocation31_spill] sm:$0xff] %v14888_v1  ;;  %vm9159_vm6 = vmpackc.low %vm6458_vm4, %vm6456_vm0  ;;  %v14892_v43 = vpop.f32.mrb[43].mxu1  ;;  %v3373_v28 = vmul.f32 %v12515_v41, %v17534_v19 }
 0x759   : > { %17532 = vst [vmem:[#allocation324_spill] sm:$0xff] %v14892_v43  ;;  %vm5344_vm8 = vcmp.ge.f32.partialorder %v5246_v49, 1.0  ;;  %v3835_v4 = vpop.permute.xlu1 %3834  ;;  %9160 = vmatprep.mubr.msk.bf16.mxu1 %vm9159_vm6, %v17470_v24  ;;  %v17535_v49 = vld [vmem:[#allocation296_spill] sm:$0xff]  ;;  %v2879_v48 = vadd.f32 %v2781_v17, %v2287_v38  ;;  %v1696_v2 = vadd.f32 %v1598_v6, %v1104_v18  ;;  %v17536_v43 = vld [vmem:[#allocation430_spill] sm:$0xff] }
 0x75a   : > { %v8739_v10 = vsel %vm5344_vm8, 1.0, %v17483_v50  ;;  %9162 = vmatmul.mubr.msk.bf16.gmra.mrb[112].mxu1 %vm14884_vm3, %v17470_v24  ;;  %v2190_v42 = vmul.f32 %v12493_v40, %v17535_v49  ;;  %v3965_v19 = vmul.f32 %v12534_v62, %v3835_v4  ;;  %v2782_v61 = vmul.f32 %v12513_v54, %v17536_v43  ;;  %v17537_v17 = vld [vmem:[#allocation294_spill] sm:$0xff] }
 0x75b   : > { %v5594_v55 = vpack.c.bf16 %v8739_v10, %v8738_v11  ;;  %v3471_v1 = vadd.f32 %v3373_v28, %v2879_v48  ;;  %v5019_v12 = vpop.permute.xlu0 %5018  ;;  %v3374_v4 = vmul.f32 %v12515_v41, %v17537_v17 }
 0x75c   : > { %v2288_v31 = vadd.f32 %v2190_v42, %v1696_v2  ;;  %v3966_v42 = vmul.f32 %v12534_v62, %v14858_v51 }
 0x75d   : > { %8801 = vmatmul.mubr.msk.bf16.gmra.mrb[172].mxu0 %vm5660_vm2, %v5594_v55  ;;  %v4063_v6 = vadd.f32 %v3965_v19, %v3471_v1 }
 0x75e   : > { %v4427_v32 = vpop.permute.xlu1 %4426  ;;  %6280 = vmatprep.mubr.bf16.mxu0 %v16998_v22  ;;  %v2880_v28 = vadd.f32 %v2782_v61, %v2288_v31  ;;  %v17540_v31 = vld [vmem:[#allocation138_spill] sm:$0xff] }
 0x75f   : > { %v4557_v5 = vmul.f32 %v12551_v26, %v4427_v32  ;;  %v6162_v39 = vpop.f32.mrb[128].mxu0  ;;  %v14916_v49 = vpop.f32.mrb[44].mxu1  ;;  %v5149_v32 = vmul.f32 %v12546_v3, %v5019_v12 }
 0x760   : > { %v6163_v38 = vadd.f32 %v6162_v39, %v13506_v59  ;;  %v6164_v43 = vpop.f32.mrb[129].mxu0  ;;  %v14921_v11 = vpop.f32.mrb[45].mxu1  ;;  %v3472_v19 = vadd.f32 %v3374_v4, %v2880_v28 }
 0x761   : > { %v6166_v10 = vpop.f32.mrb[130].mxu0  ;;  %v14923_v18 = vpop.f32.mrb[46].mxu1  ;;  %v4655_v55 = vadd.f32 %v4557_v5, %v4063_v6  ;;  %v6165_v1 = vadd.f32 %v6164_v43, %v13511_v15 }
 0x762   : > { %17538 = vst [vmem:[#allocation439_spill] sm:$0xff] %v14923_v18  ;;  %v6167_v48 = vadd.f32 %v6166_v10, %v13506_v59  ;;  %v4431_v2 = vpop.permute.xlu1 %4430  ;;  %v6168_v17 = vpop.f32.mrb[131].mxu0  ;;  %vm6459_vm9 = vcmp.ge.f32.partialorder %v6163_v38, 1.0  ;;  %v1007_v18 = vmul.f32 %v12479_v9, %v17540_v31  ;;  %v4064_v5 = vadd.f32 %v3966_v42, %v3472_v19  ;;  %v17543_v10 = vld [vmem:[#allocation4_spill] sm:$0xff] }
 0x763   : > { %v14930_v39 = vpop.f32.mrb[47].mxu1  ;;  %v4558_v61 = vmul.f32 %v12551_v26, %v4431_v2  ;;  %v6169_v12 = vadd.f32 %v6168_v17, %v13511_v15  ;;  %v5247_v6 = vadd.f32 %v5149_v32, %v4655_v55  ;;  %v1599_v43 = vmul.f32 %v12490_v16, %v17543_v10  ;;  %v17544_v2 = vld [vmem:[#allocation293_spill] sm:$0xff] }
 0x764   : > { %17539 = vst [vmem:[#allocation151_spill] sm:$0xff] %v14930_v39  ;;  %vm6461_vm10 = vcmp.ge.f32.partialorder %v6167_v48, 1.0  ;;  %vm6460_vm13 = vcmp.ge.f32.partialorder %v6165_v1, 1.0  ;;  %v1105_v48 = vadd.f32 %v14710_v33, %v1007_v18  ;;  %v2191_v31 = vmul.f32 %v12493_v40, %v17544_v2  ;;  %v17545_v17 = vld [vmem:[#allocation137_spill] sm:$0xff]  ;;  %v17546_v1 = vld [vmem:[#allocation287_spill] sm:$0xff] }
 0x765   : > { %vm14935_vm11 = vmpackc.low %vm6461_vm10, %vm6459_vm9  ;;  %vm6462_vm0 = vcmp.ge.f32.partialorder %v6169_v12, 1.0  ;;  %v4656_v38 = vadd.f32 %v4558_v61, %v4064_v5  ;;  %v1008_v42 = vmul.f32 %v12479_v9, %v17545_v17  ;;  %vm5345_vm4 = vcmp.ge.f32.partialorder %v5247_v6, 1.0  ;;  %v17547_v61 = vld [vmem:[#allocation9_spill] sm:$0xff] }
 0x766   : > { %vm9163_vm3 = vmpackc.low %vm6462_vm0, %vm6460_vm13  ;;  %v1697_v55 = vadd.f32 %v1599_v43, %v1105_v48  ;;  %v2783_v19 = vmul.f32 %v12513_v54, %v17546_v1  ;;  %v1600_v18 = vmul.f32 %v12490_v16, %v17547_v61  ;;  %v17548_v10 = vld [vmem:[#allocation493_spill] sm:$0xff]  ;;  %v8740_v6 = vsel %vm5345_vm4, 1.0, %v17483_v50  ;;  %v17550_v43 = vld [vmem:[#allocation300_spill] sm:$0xff] }
 0x767   : > { %v5023_v4 = vpop.permute.xlu1 %5022  ;;  %9164 = vmatprep.mubr.msk.bf16.mxu1 %vm9163_vm3, %v17470_v24  ;;  %v1106_v51 = vadd.f32 %v14710_v33, %v1008_v42  ;;  %v2192_v48 = vmul.f32 %v12493_v40, %v17550_v43  ;;  %v17553_v61 = vld [vmem:[#allocation432_spill] sm:$0xff] }
 0x768   : > { %v5150_v28 = vmul.f32 %v12546_v3, %v5023_v4  ;;  %9166 = vmatmul.mubr.msk.bf16.gmra.mrb[116].mxu1 %vm14935_vm11, %v17470_v24  ;;  %v2289_v5 = vadd.f32 %v2191_v31, %v1697_v55  ;;  %v3375_v4 = vmul.f32 %v12515_v41, %v17548_v10  ;;  %v2784_v10 = vmul.f32 %v12513_v54, %v17553_v61 }
 0x769   : > { %v1698_v1 = vadd.f32 %v1600_v18, %v1106_v51 }
 0x76a   : > { %v5248_v32 = vadd.f32 %v5150_v28, %v4656_v38 }
 0x76c   : > { %vm5346_vm6 = vcmp.ge.f32.partialorder %v5248_v32, 1.0  ;;  %v3843_v12 = vpop.permute.xlu1 %3842  ;;  %v2881_v32 = vadd.f32 %v2783_v19, %v2289_v5  ;;  %v17555_v5 = vld [vmem:[#allocation298_spill] sm:$0xff] }
 0x76d   : > { %v8741_v38 = vsel %vm5346_vm6, 1.0, %v17483_v50  ;;  %v14960_v28 = vpop.f32.mrb[48].mxu1  ;;  %v3967_v31 = vmul.f32 %v12534_v62, %v3843_v12  ;;  %v3376_v12 = vmul.f32 %v12515_v41, %v17555_v5 }
 0x76e   : > { %17549 = vst [vmem:[#allocation25_spill] sm:$0xff] %v14960_v28  ;;  %v5595_v2 = vpack.c.bf16 %v8741_v38, %v8740_v6  ;;  %v14965_v17 = vpop.f32.mrb[49].mxu1  ;;  %v3473_v42 = vadd.f32 %v3375_v4, %v2881_v32  ;;  %v2290_v6 = vadd.f32 %v2192_v48, %v1698_v1  ;;  %v3968_v4 = vmul.f32 %v12534_v62, %v14867_v20 }
 0x76f   : > { %17551 = vst [vmem:[#allocation30_spill] sm:$0xff] %v14965_v17  ;;  %v14968_v55 = vpop.f32.mrb[50].mxu1 }
 0x770   : > { %17552 = vst [vmem:[#allocation328_spill] sm:$0xff] %v14968_v55  ;;  %8802 = vmatmul.mubr.msk.bf16.gmra.mrb[176].mxu0 %vm5660_vm2, %v5595_v2  ;;  %v14973_v28 = vpop.f32.mrb[51].mxu1  ;;  %v4065_v43 = vadd.f32 %v3967_v31, %v3473_v42  ;;  %v2882_v61 = vadd.f32 %v2784_v10, %v2290_v6  ;;  %v5027_v55 = vpop.permute.xlu0 %5026 }
 0x771   : > { %17554 = vst [vmem:[#allocation152_spill] sm:$0xff] %v14973_v28  ;;  %v4435_v39 = vpop.permute.xlu1 %4434  ;;  %6290 = vmatprep.mubr.bf16.mxu0 %v16998_v22  ;;  %v5151_v48 = vmul.f32 %v12546_v3, %v5027_v55 }
 0x772   : > { %v4559_v38 = vmul.f32 %v12551_v26, %v4435_v39  ;;  %v6172_v19 = vpop.f32.mrb[132].mxu0  ;;  %v3474_v42 = vadd.f32 %v3376_v12, %v2882_v61 }
 0x773   : > { %v6173_v18 = vadd.f32 %v6172_v19, %v13506_v59  ;;  %v6174_v51 = vpop.f32.mrb[133].mxu0  ;;  %v17557_v19 = vld [vmem:[#allocation140_spill] sm:$0xff] }
 0x774   : > { %v6175_v2 = vadd.f32 %v6174_v51, %v13511_v15  ;;  %v6176_v28 = vpop.f32.mrb[134].mxu0  ;;  %v4657_v32 = vadd.f32 %v4559_v38, %v4065_v43  ;;  %v1009_v5 = vmul.f32 %v12479_v9, %v17557_v19 }
 0x775   : > { %v6177_v39 = vadd.f32 %v6176_v28, %v13506_v59  ;;  %v4439_v1 = vpop.permute.xlu1 %4438  ;;  %v6178_v17 = vpop.f32.mrb[135].mxu0  ;;  %vm6463_vm8 = vcmp.ge.f32.partialorder %v6173_v18, 1.0  ;;  %v4066_v28 = vadd.f32 %v3968_v4, %v3474_v42  ;;  %v17562_v4 = vld [vmem:[#allocation297_spill] sm:$0xff]  ;;  %v17564_v42 = vld [vmem:[#allocation291_spill] sm:$0xff] }
 0x776   : > { %v6179_v31 = vadd.f32 %v6178_v17, %v13511_v15  ;;  %v4560_v10 = vmul.f32 %v12551_v26, %v4439_v1  ;;  %vm6464_vm10 = vcmp.ge.f32.partialorder %v6175_v2, 1.0  ;;  %v5249_v55 = vadd.f32 %v5151_v48, %v4657_v32  ;;  %v17560_v17 = vld [vmem:[#allocation6_spill] sm:$0xff]  ;;  %v17563_v32 = vld [vmem:[#allocation139_spill] sm:$0xff] }
 0x777   : > { %vm6465_vm9 = vcmp.ge.f32.partialorder %v6177_v39, 1.0  ;;  %v14987_v6 = vpop.f32.mrb[52].mxu1  ;;  %v1601_v12 = vmul.f32 %v12490_v16, %v17560_v17  ;;  %v1107_v2 = vadd.f32 %v14710_v33, %v1009_v5  ;;  %v2193_v48 = vmul.f32 %v12493_v40, %v17562_v4  ;;  %v17565_v17 = vld [vmem:[#allocation11_spill] sm:$0xff] }
 0x778   : > { %17556 = vst [vmem:[#allocation440_spill] sm:$0xff] %v14987_v6  ;;  %vm9169_vm11 = vmpackc.low %vm6465_vm9, %vm6463_vm8  ;;  %vm6466_vm13 = vcmp.ge.f32.partialorder %v6179_v31, 1.0  ;;  %v14991_v20 = vpop.f32.mrb[53].mxu1  ;;  %v4658_v51 = vadd.f32 %v4560_v10, %v4066_v28  ;;  %v1010_v39 = vmul.f32 %v12479_v9, %v17563_v32  ;;  %vm5347_vm3 = vcmp.ge.f32.partialorder %v5249_v55, 1.0 }
 0x779   : > { %17558 = vst [vmem:[#allocation24_spill] sm:$0xff] %v14991_v20  ;;  %vm9167_vm0 = vmpackc.low %vm6466_vm13, %vm6464_vm10  ;;  %v14993_v38 = vpop.f32.mrb[54].mxu1  ;;  %v1699_v31 = vadd.f32 %v1601_v12, %v1107_v2  ;;  %v2785_v19 = vmul.f32 %v12513_v54, %v17564_v42  ;;  %v1602_v10 = vmul.f32 %v12490_v16, %v17565_v17  ;;  %v8742_v4 = vsel %vm5347_vm3, 1.0, %v17483_v50 }
 0x77a   : > { %17559 = vst [vmem:[#allocation34_spill] sm:$0xff] %v14993_v38  ;;  %v5031_v43 = vpop.permute.xlu1 %5030  ;;  %v14997_v18 = vpop.f32.mrb[55].mxu1  ;;  %9168 = vmatprep.mubr.msk.bf16.mxu1 %vm9167_vm0, %v17470_v24  ;;  %v1108_v55 = vadd.f32 %v14710_v33, %v1010_v39 }
 0x77b   : > { %17561 = vst [vmem:[#allocation35_spill] sm:$0xff] %v14997_v18  ;;  %v5152_v61 = vmul.f32 %v12546_v3, %v5031_v43  ;;  %9170 = vmatmul.mubr.msk.bf16.gmra.mrb[120].mxu1 %vm9169_vm11, %v17470_v24  ;;  %v2291_v43 = vadd.f32 %v2193_v48, %v1699_v31  ;;  %v17566_v18 = vld [vmem:[#allocation295_spill] sm:$0xff]  ;;  %v5035_v31 = vpop.permute.xlu0 %5034 }
 0x77c   : > { %v3377_v5 = vmul.f32 %v12515_v41, %v17566_v18  ;;  %v1700_v42 = vadd.f32 %v1602_v10, %v1108_v55 }
 0x77d   : > { %v5250_v1 = vadd.f32 %v5152_v61, %v4658_v51  ;;  %v17567_v51 = vld [vmem:[#allocation304_spill] sm:$0xff]  ;;  %v2883_v2 = vadd.f32 %v2785_v19, %v2291_v43 }
 0x77e   : > { %v2194_v12 = vmul.f32 %v12493_v40, %v17567_v51 }
 0x77f   : > { %vm5348_vm4 = vcmp.ge.f32.partialorder %v5250_v1, 1.0  ;;  %v3851_v28 = vpop.permute.xlu1 %3850  ;;  %v17568_v1 = vld [vmem:[#allocation434_spill] sm:$0xff]  ;;  %v3475_v18 = vadd.f32 %v3377_v5, %v2883_v2  ;;  %v5153_v2 = vmul.f32 %v12546_v3, %v5035_v31 }
 0x780   : > { %v8743_v38 = vsel %vm5348_vm4, 1.0, %v17483_v50  ;;  %v3969_v32 = vmul.f32 %v12534_v62, %v3851_v28  ;;  %v2786_v48 = vmul.f32 %v12513_v54, %v17568_v1  ;;  %v2292_v20 = vadd.f32 %v2194_v12, %v1700_v42 }
 0x781   : > { %v5596_v61 = vpack.c.bf16 %v8743_v38, %v8742_v4  ;;  %v17570_v38 = vld [vmem:[#allocation302_spill] sm:$0xff]  ;;  %v3970_v12 = vmul.f32 %v12534_v62, %v14899_v63 }
 0x782   : > { %v3378_v19 = vmul.f32 %v12515_v41, %v17570_v38  ;;  %v4067_v10 = vadd.f32 %v3969_v32, %v3475_v18  ;;  %v2884_v5 = vadd.f32 %v2786_v48, %v2292_v20  ;;  %v17574_v48 = vld [vmem:[#allocation142_spill] sm:$0xff] }
 0x783   : > { %8803 = vmatmul.mubr.msk.bf16.gmra.mrb[180].mxu0 %vm5660_vm2, %v5596_v61 }
 0x784   : > { %v4443_v17 = vpop.permute.xlu1 %4442  ;;  %6300 = vmatprep.mubr.bf16.mxu0 %v16998_v22  ;;  %v3476_v18 = vadd.f32 %v3378_v19, %v2884_v5 }
 0x785   : > { %v4561_v39 = vmul.f32 %v12551_v26, %v4443_v17  ;;  %v6182_v6 = vpop.f32.mrb[136].mxu0  ;;  %v15024_v51 = vpop.f32.mrb[56].mxu1 }
 0x786   : > { %17569 = vst [vmem:[#allocation154_spill] sm:$0xff] %v15024_v51  ;;  %v6183_v28 = vadd.f32 %v6182_v6, %v13506_v59  ;;  %v6184_v43 = vpop.f32.mrb[137].mxu0  ;;  %v15029_v4 = vpop.f32.mrb[57].mxu1 }
 0x787   : > { %17571 = vst [vmem:[#allocation321_spill] sm:$0xff] %v15029_v4  ;;  %v6186_v55 = vpop.f32.mrb[138].mxu0  ;;  %v15031_v61 = vpop.f32.mrb[58].mxu1  ;;  %v4659_v42 = vadd.f32 %v4561_v39, %v4067_v10  ;;  %v6185_v32 = vadd.f32 %v6184_v43, %v13511_v15  ;;  %v4068_v39 = vadd.f32 %v3970_v12, %v3476_v18  ;;  %v17580_v12 = vld [vmem:[#allocation141_spill] sm:$0xff]  ;;  %v17589_v4 = vld [vmem:[#allocation306_spill] sm:$0xff] }
 0x788   : > { %17572 = vst [vmem:[#allocation319_spill] sm:$0xff] %v15031_v61  ;;  %v6187_v1 = vadd.f32 %v6186_v55, %v13506_v59  ;;  %v4447_v17 = vpop.permute.xlu1 %4446  ;;  %v6188_v38 = vpop.f32.mrb[139].mxu0  ;;  %vm6467_vm6 = vcmp.ge.f32.partialorder %v6183_v28, 1.0  ;;  %v1011_v61 = vmul.f32 %v12479_v9, %v17574_v48  ;;  %v17577_v55 = vld [vmem:[#allocation8_spill] sm:$0xff] }
 0x789   : > { %v15038_v6 = vpop.f32.mrb[59].mxu1  ;;  %v4562_v20 = vmul.f32 %v12551_v26, %v4447_v17  ;;  %v6189_v31 = vadd.f32 %v6188_v38, %v13511_v15  ;;  %v5251_v10 = vadd.f32 %v5153_v2, %v4659_v42  ;;  %v1603_v43 = vmul.f32 %v12490_v16, %v17577_v55  ;;  %v17578_v17 = vld [vmem:[#allocation301_spill] sm:$0xff] }
 0x78a   : > { %17573 = vst [vmem:[#allocation28_spill] sm:$0xff] %v15038_v6  ;;  %vm6469_vm8 = vcmp.ge.f32.partialorder %v6187_v1, 1.0  ;;  %vm6468_vm10 = vcmp.ge.f32.partialorder %v6185_v32, 1.0  ;;  %v1109_v1 = vadd.f32 %v14710_v33, %v1011_v61  ;;  %v2195_v48 = vmul.f32 %v12493_v40, %v17578_v17  ;;  %v17582_v61 = vld [vmem:[#allocation437_spill] sm:$0xff]  ;;  %v17588_v6 = vld [vmem:[#allocation435_spill] sm:$0xff] }
 0x78b   : > { %vm15043_vm9 = vmpackc.low %vm6469_vm8, %vm6467_vm6  ;;  %vm6470_vm11 = vcmp.ge.f32.partialorder %v6189_v31, 1.0  ;;  %v4660_v28 = vadd.f32 %v4562_v20, %v4068_v39  ;;  %v1012_v2 = vmul.f32 %v12479_v9, %v17580_v12  ;;  %vm5349_vm0 = vcmp.ge.f32.partialorder %v5251_v10, 1.0  ;;  %v5043_v31 = vpop.permute.xlu0 %5042  ;;  %v17584_v55 = vld [vmem:[#allocation13_spill] sm:$0xff] }
 0x78c   : > { %vm9171_vm13 = vmpackc.low %vm6470_vm11, %vm6468_vm10  ;;  %v1701_v18 = vadd.f32 %v1603_v43, %v1109_v1  ;;  %v2787_v20 = vmul.f32 %v12513_v54, %v17582_v61  ;;  %v8744_v12 = vsel %vm5349_vm0, 1.0, %v17483_v50  ;;  %v17587_v61 = vld [vmem:[#allocation308_spill] sm:$0xff] }
 0x78d   : > { %v5039_v19 = vpop.permute.xlu1 %5038  ;;  %9172 = vmatprep.mubr.msk.bf16.mxu1 %vm9171_vm13, %v17470_v24  ;;  %v1110_v1 = vadd.f32 %v14710_v33, %v1012_v2  ;;  %v3380_v2 = vmul.f32 %v12515_v41, %v17589_v4 }
 0x78e   : > { %v5154_v5 = vmul.f32 %v12546_v3, %v5039_v19  ;;  %9174 = vmatmul.mubr.msk.bf16.gmra.mrb[124].mxu1 %vm15043_vm9, %v17470_v24  ;;  %v1604_v19 = vmul.f32 %v12490_v16, %v17584_v55 }
 0x78f   : > { %v15055_v38 = vpop.f32.mrb[60].mxu1  ;;  %v3863_v51 = vpop.permute.xlu0 %3862 }
 0x790   : > { %17579 = vst [vmem:[#allocation153_spill] sm:$0xff] %v15055_v38  ;;  %v5252_v42 = vadd.f32 %v5154_v5, %v4660_v28  ;;  %v15062_v32 = vpop.f32.mrb[61].mxu1  ;;  %v2293_v28 = vadd.f32 %v2195_v48, %v1701_v18  ;;  %v17586_v5 = vld [vmem:[#allocation299_spill] sm:$0xff]  ;;  %v1702_v55 = vadd.f32 %v1604_v19, %v1110_v1  ;;  %v2788_v48 = vmul.f32 %v12513_v54, %v17588_v6 }
 0x791   : > { %17581 = vst [vmem:[#allocation325_spill] sm:$0xff] %v15062_v32  ;;  %v15066_v39 = vpop.f32.mrb[62].mxu1  ;;  %v3379_v63 = vmul.f32 %v12515_v41, %v17586_v5 }
 0x792   : > { %17583 = vst [vmem:[#allocation29_spill] sm:$0xff] %v15066_v39  ;;  %vm5350_vm3 = vcmp.ge.f32.partialorder %v5252_v42, 1.0  ;;  %v3859_v17 = vpop.permute.xlu1 %3858  ;;  %v15070_v10 = vpop.f32.mrb[63].mxu1  ;;  %v2196_v39 = vmul.f32 %v12493_v40, %v17587_v61  ;;  %v2885_v38 = vadd.f32 %v2787_v20, %v2293_v28 }
 0x793   : > { %17585 = vst [vmem:[#allocation323_spill] sm:$0xff] %v15070_v10  ;;  %v8745_v43 = vsel %vm5350_vm3, 1.0, %v17483_v50  ;;  %v3971_v42 = vmul.f32 %v12534_v62, %v3859_v17 }
 0x794   : > { %v5597_v32 = vpack.c.bf16 %v8745_v43, %v8744_v12  ;;  %v3477_v18 = vadd.f32 %v3379_v63, %v2885_v38  ;;  %v2294_v10 = vadd.f32 %v2196_v39, %v1702_v55  ;;  %v3972_v38 = vmul.f32 %v12534_v62, %v3863_v51 }
 0x796   : > { %8804 = vmatmul.mubr.msk.bf16.gmra.mrb[184].mxu0 %vm5660_vm2, %v5597_v32  ;;  %v4069_v28 = vadd.f32 %v3971_v42, %v3477_v18  ;;  %v2886_v43 = vadd.f32 %v2788_v48, %v2294_v10  ;;  %v17590_v48 = vld [vmem:[#allocation144_spill] sm:$0xff] }
 0x797   : > { %v4451_v5 = vpop.permute.xlu1 %4450  ;;  %6310 = vmatprep.mubr.bf16.mxu0 %v16998_v22  ;;  %v1013_v18 = vmul.f32 %v12479_v9, %v17590_v48  ;;  %v17596_v48 = vld [vmem:[#allocation15_spill] sm:$0xff] }
 0x798   : > { %v4563_v12 = vmul.f32 %v12551_v26, %v4451_v5  ;;  %v6192_v20 = vpop.f32.mrb[140].mxu0  ;;  %v3478_v4 = vadd.f32 %v3380_v2, %v2886_v43  ;;  %v5155_v5 = vmul.f32 %v12546_v3, %v5043_v31  ;;  %v17591_v31 = vld [vmem:[#allocation10_spill] sm:$0xff] }
 0x799   : > { %v6193_v19 = vadd.f32 %v6192_v20, %v13506_v59  ;;  %v6194_v17 = vpop.f32.mrb[141].mxu0 }
 0x79a   : > { %v6195_v6 = vadd.f32 %v6194_v17, %v13511_v15  ;;  %v6196_v32 = vpop.f32.mrb[142].mxu0  ;;  %v4661_v63 = vadd.f32 %v4563_v12, %v4069_v28  ;;  %v4070_v12 = vadd.f32 %v3972_v38, %v3478_v4  ;;  %v1605_v28 = vmul.f32 %v12490_v16, %v17591_v31  ;;  %v17593_v38 = vld [vmem:[#allocation305_spill] sm:$0xff] }
 0x79b   : > { %v6197_v39 = vadd.f32 %v6196_v32, %v13506_v59  ;;  %v4455_v1 = vpop.permute.xlu1 %4454  ;;  %v6198_v61 = vpop.f32.mrb[143].mxu0  ;;  %vm6471_vm4 = vcmp.ge.f32.partialorder %v6193_v19, 1.0  ;;  %v1111_v32 = vadd.f32 %v14710_v33, %v1013_v18 }
 0x79c   : > { %v6199_v55 = vadd.f32 %v6198_v61, %v13511_v15  ;;  %v4564_v42 = vmul.f32 %v12551_v26, %v4455_v1  ;;  %vm6472_vm8 = vcmp.ge.f32.partialorder %v6195_v6, 1.0  ;;  %v5253_v2 = vadd.f32 %v5155_v5, %v4661_v63 }
 0x79d   : > { %vm6473_vm6 = vcmp.ge.f32.partialorder %v6197_v39, 1.0  ;;  %v15094_v10 = vpop.f32.mrb[64].mxu1  ;;  %v2197_v63 = vmul.f32 %v12493_v40, %v17593_v38  ;;  %v17594_v39 = vld [vmem:[#allocation143_spill] sm:$0xff]  ;;  %v1703_v4 = vadd.f32 %v1605_v28, %v1111_v32 }
 0x79e   : > { %vm9177_vm9 = vmpackc.low %vm6473_vm6, %vm6471_vm4  ;;  %vm6474_vm10 = vcmp.ge.f32.partialorder %v6199_v55, 1.0  ;;  %v15098_v51 = vpop.f32.mrb[65].mxu1  ;;  %v4662_v43 = vadd.f32 %v4564_v42, %v4070_v12  ;;  %v1014_v1 = vmul.f32 %v12479_v9, %v17594_v39  ;;  %vm5351_vm13 = vcmp.ge.f32.partialorder %v5253_v2, 1.0  ;;  %v17595_v55 = vld [vmem:[#allocation322_spill] sm:$0xff]  ;;  %v17598_v2 = vld [vmem:[#allocation312_spill] sm:$0xff] }
 0x79f   : > { %vm9175_vm11 = vmpackc.low %vm6474_vm10, %vm6472_vm8  ;;  %v15100_v20 = vpop.f32.mrb[66].mxu1  ;;  %v2789_v5 = vmul.f32 %v12513_v54, %v17595_v55  ;;  %v1606_v42 = vmul.f32 %v12490_v16, %v17596_v48  ;;  %v2295_v31 = vadd.f32 %v2197_v63, %v1703_v4  ;;  %v8746_v38 = vsel %vm5351_vm13, 1.0, %v17483_v50  ;;  %v17599_v4 = vld [vmem:[#allocation436_spill] sm:$0xff] }
 0x7a0   : > { %v5047_v19 = vpop.permute.xlu1 %5046  ;;  %v15104_v17 = vpop.f32.mrb[67].mxu1  ;;  %9176 = vmatprep.mubr.msk.bf16.mxu1 %vm9175_vm11, %v17470_v24  ;;  %v1112_v9 = vadd.f32 %v14710_v33, %v1014_v1  ;;  %v2198_v28 = vmul.f32 %v12493_v40, %v17598_v2  ;;  %v2790_v55 = vmul.f32 %v12513_v54, %v17599_v4 }
 0x7a1   : > { %17592 = vst [vmem:[#allocation39_spill] sm:$0xff] %v15104_v17  ;;  %v5156_v6 = vmul.f32 %v12546_v3, %v5047_v19  ;;  %9178 = vmatmul.mubr.msk.bf16.gmra.mrb[128].mxu1 %vm9177_vm9, %v17470_v24  ;;  %v17597_v19 = vld [vmem:[#allocation303_spill] sm:$0xff]  ;;  %v2887_v16 = vadd.f32 %v2789_v5, %v2295_v31 }
 0x7a2   : > { %v3381_v18 = vmul.f32 %v12515_v41, %v17597_v19  ;;  %v17601_v19 = vld [vmem:[#allocation310_spill] sm:$0xff] }
 0x7a3   : > { %v5254_v61 = vadd.f32 %v5156_v6, %v4662_v43  ;;  %v3871_v43 = vpop.permute.xlu0 %3870 }
 0x7a4   : > { %v3479_v33 = vadd.f32 %v3381_v18, %v2887_v16  ;;  %v3974_v16 = vmul.f32 %v12534_v62, %v3871_v43 }
 0x7a5   : > { %vm5352_vm0 = vcmp.ge.f32.partialorder %v5254_v61, 1.0  ;;  %v3867_v12 = vpop.permute.xlu1 %3866  ;;  %v1704_v61 = vadd.f32 %v1606_v42, %v1112_v9  ;;  %v3382_v42 = vmul.f32 %v12515_v41, %v17601_v19 }
 0x7a6   : > { %v8747_v17 = vsel %vm5352_vm0, 1.0, %v17483_v50  ;;  %v3973_v39 = vmul.f32 %v12534_v62, %v3867_v12 }
 0x7a7   : > { %v5598_v6 = vpack.c.bf16 %v8747_v17, %v8746_v38  ;;  %v15125_v32 = vpop.f32.mrb[68].mxu1  ;;  %v2296_v17 = vadd.f32 %v2198_v28, %v1704_v61  ;;  %v5051_v31 = vpop.permute.xlu0 %5050 }
 0x7a8   : > { %v15128_v63 = vpop.f32.mrb[69].mxu1  ;;  %v4071_v38 = vadd.f32 %v3973_v39, %v3479_v33 }
 0x7a9   : > { %8805 = vmatmul.mubr.msk.bf16.gmra.mrb[188].mxu0 %vm5660_vm2, %v5598_v6  ;;  %v15133_v48 = vpop.f32.mrb[70].mxu1  ;;  %v2888_v2 = vadd.f32 %v2790_v55, %v2296_v17 }
 0x7aa   : > { %v4459_v1 = vpop.permute.xlu1 %4458  ;;  %v15135_v40 = vpop.f32.mrb[71].mxu1  ;;  %6320 = vmatprep.mubr.bf16.mxu0 %v16998_v22  ;;  %v5157_v22 = vmul.f32 %v12546_v3, %v5051_v31 }
 0x7ab   : > { %17600 = vst [vmem:[#allocation332_spill] sm:$0xff] %v15135_v40  ;;  %v4565_v5 = vmul.f32 %v12551_v26, %v4459_v1  ;;  %v6202_v12 = vpop.f32.mrb[144].mxu0  ;;  %v3480_v41 = vadd.f32 %v3382_v42, %v2888_v2 }
 0x7ac   : > { %v6203_v54 = vadd.f32 %v6202_v12, %v13506_v59  ;;  %v6204_v9 = vpop.f32.mrb[145].mxu0 }
 0x7ad   : > { %v6205_v18 = vadd.f32 %v6204_v9, %v13511_v15  ;;  %v6206_v6 = vpop.f32.mrb[146].mxu0  ;;  %v4663_v4 = vadd.f32 %v4565_v5, %v4071_v38  ;;  %v4072_v55 = vadd.f32 %v3974_v16, %v3480_v41 }
 0x7ae   : > { %v6207_v28 = vadd.f32 %v6206_v6, %v13506_v59  ;;  %v4463_v61 = vpop.permute.xlu1 %4462  ;;  %v6208_v1 = vpop.f32.mrb[147].mxu0  ;;  %vm6475_vm3 = vcmp.ge.f32.partialorder %v6203_v54, 1.0 }
 0x7af   : > { %v6209_v40 = vadd.f32 %v6208_v1, %v13511_v15  ;;  %v4566_v39 = vmul.f32 %v12551_v26, %v4463_v61  ;;  %vm6476_vm6 = vcmp.ge.f32.partialorder %v6205_v18, 1.0  ;;  %v5255_v33 = vadd.f32 %v5157_v22, %v4663_v4 }
 0x7b0   : > { %vm6477_vm4 = vcmp.ge.f32.partialorder %v6207_v28, 1.0 }
 0x7b1   : > { %vm9181_vm8 = vmpackc.low %vm6477_vm4, %vm6475_vm3  ;;  %vm6478_vm9 = vcmp.ge.f32.partialorder %v6209_v40, 1.0  ;;  %v4664_v43 = vadd.f32 %v4566_v39, %v4072_v55  ;;  %vm5353_vm11 = vcmp.ge.f32.partialorder %v5255_v33, 1.0 }
 0x7b2   : > { %vm9179_vm10 = vmpackc.low %vm6478_vm9, %vm6476_vm6  ;;  %v8748_v19 = vsel %vm5353_vm11, 1.0, %v17483_v50 }
 0x7b3   : > { %v5055_v62 = vpop.permute.xlu1 %5054  ;;  %9180 = vmatprep.mubr.msk.bf16.mxu1 %vm9179_vm10, %v17470_v24 }
 0x7b4   : > { %v5158_v17 = vmul.f32 %v12546_v3, %v5055_v62  ;;  %9182 = vmatmul.mubr.msk.bf16.gmra.mrb[132].mxu1 %vm9181_vm8, %v17470_v24 }
 0x7b5   : > { %v15151_v5 = vpop.f32.mrb[72].mxu1 }
 0x7b6   : > { %v5256_v12 = vadd.f32 %v5158_v17, %v4664_v43  ;;  %v15153_v31 = vpop.f32.mrb[73].mxu1 }
 0x7b7   : > { %v15155_v26 = vpop.f32.mrb[74].mxu1 }
 0x7b8   : > { %vm5354_vm13 = vcmp.ge.f32.partialorder %v5256_v12, 1.0  ;;  %v15157_v40 = vpop.f32.mrb[75].mxu1 }
 0x7b9   : > { %v8749_v42 = vsel %vm5354_vm13, 1.0, %v17483_v50 }
 0x7ba   : > { %v5599_v38 = vpack.c.bf16 %v8749_v42, %v8748_v19 }
 0x7bc   : > { %8806 = vmatmul.mubr.msk.bf16.gmra.mrb[192].mxu0 %vm5660_vm2, %v5599_v38 }
 0x7bd   : > { %9036 = vmatprep.mubr.msk.bf16.mxu0 %vm13548_vm14, %v17470_v24 }
 0x7be   : > { %v6212_v3 = vpop.f32.mrb[148].mxu0 }
 0x7bf   : > { %v6213_v54 = vadd.f32 %v6212_v3, %v13506_v59  ;;  %v6214_v9 = vpop.f32.mrb[149].mxu0  ;;  %v15166_v2 = vpop.f32.mrb[76].mxu1 }
 0x7c0   : > { %v6215_v18 = vadd.f32 %v6214_v9, %v13511_v15  ;;  %v6216_v6 = vpop.f32.mrb[150].mxu0  ;;  %v15169_v16 = vpop.f32.mrb[77].mxu1 }
 0x7c1   : > { %v6217_v4 = vadd.f32 %v6216_v6, %v13506_v59  ;;  %v6218_v22 = vpop.f32.mrb[151].mxu0  ;;  %v15172_v28 = vpop.f32.mrb[78].mxu1  ;;  %vm6479_vm2 = vcmp.ge.f32.partialorder %v6213_v54, 1.0 }
 0x7c2   : > { %v6219_v61 = vadd.f32 %v6218_v22, %v13511_v15  ;;  %v15175_v13 = vpop.f32.mrb[79].mxu1  ;;  %vm6480_vm0 = vcmp.ge.f32.partialorder %v6215_v18, 1.0 }
 0x7c3   : > { %vm6481_vm14 = vcmp.ge.f32.partialorder %v6217_v4, 1.0 }
 0x7c4   : > { %vm9185_vm3 = vmpackc.low %vm6481_vm14, %vm6479_vm2  ;;  %vm6482_vm4 = vcmp.ge.f32.partialorder %v6219_v61, 1.0  ;;  %9038 = vmatmul.mubr.msk.bf16.vlgmr.msra.gmra.mrb[196].mxu0 %vm13541_vm12, %v17470_v24 }
 0x7c5   : > { %vm9183_vm6 = vmpackc.low %vm6482_vm4, %vm6480_vm0  ;;  %9040 = vmatprep.mubr.msk.bf16.mxu0 %vm13609_vm7, %v17470_v24 }
 0x7c6   : > { %9184 = vmatprep.mubr.msk.bf16.mxu1 %vm9183_vm6, %v17470_v24 }
 0x7c7   : > { %9186 = vmatmul.mubr.msk.bf16.gmra.mrb[136].mxu1 %vm9185_vm3, %v17470_v24 }
 0x7cc   : > { %9042 = vmatmul.mubr.msk.bf16.gmra.mrb[200].mxu0 %vm13600_vm5, %v17470_v24 }
 0x7cd   : > { %9044 = vmatprep.mubr.msk.bf16.mxu0 %vm13655_vm1, %v17470_v24  ;;  %v15191_v1 = vpop.f32.mrb[80].mxu1 }
 0x7ce   : > { %v15193_v53 = vpop.f32.mrb[81].mxu1 }
 0x7cf   : > { %v15195_v41 = vpop.f32.mrb[82].mxu1 }
 0x7d0   : > { %v15197_v44 = vpop.f32.mrb[83].mxu1 }
 0x7d1   : > { %v6222_v39 = vpop.f32.mrb[152].mxu0 }
 0x7d2   : > { %v6223_v55 = vadd.f32 %v6222_v39, %v13506_v59  ;;  %v6224_v33 = vpop.f32.mrb[153].mxu0 }
 0x7d3   : > { %v6225_v62 = vadd.f32 %v6224_v33, %v13511_v15  ;;  %v6226_v47 = vpop.f32.mrb[154].mxu0 }
 0x7d4   : > { %v6227_v43 = vadd.f32 %v6226_v47, %v13506_v59  ;;  %v6228_v17 = vpop.f32.mrb[155].mxu0  ;;  %9046 = vmatmul.mubr.msk.bf16.gmra.mrb[204].mxu0 %vm13646_vm15, %v17470_v24  ;;  %vm6483_vm12 = vcmp.ge.f32.partialorder %v6223_v55, 1.0 }
 0x7d5   : > { %v6229_v52 = vadd.f32 %v6228_v17, %v13511_v15  ;;  %vm6484_vm7 = vcmp.ge.f32.partialorder %v6225_v62, 1.0 }
 0x7d6   : > { %vm6485_vm5 = vcmp.ge.f32.partialorder %v6227_v43, 1.0 }
 0x7d7   : > { %vm9189_vm1 = vmpackc.low %vm6485_vm5, %vm6483_vm12  ;;  %vm6486_vm8 = vcmp.ge.f32.partialorder %v6229_v52, 1.0  ;;  %v15206_v12 = vpop.f32.mrb[84].mxu1 }
 0x7d8   : > { %vm9187_vm9 = vmpackc.low %vm6486_vm8, %vm6484_vm7  ;;  %v15208_v19 = vpop.f32.mrb[85].mxu1 }
 0x7d9   : > { %v15210_v42 = vpop.f32.mrb[86].mxu1  ;;  %9188 = vmatprep.mubr.msk.bf16.mxu1 %vm9187_vm9, %v17470_v24 }
 0x7da   : > { %v15213_v38 = vpop.f32.mrb[87].mxu1  ;;  %9190 = vmatmul.mubr.msk.bf16.gmra.mrb[140].mxu1 %vm9189_vm1, %v17470_v24 }
 0x7e4   : > { %v6232_v58 = vpop.f32.mrb[156].mxu0 }
 0x7e5   : > { %v6233_v3 = vadd.f32 %v6232_v58, %v13506_v59  ;;  %v6234_v54 = vpop.f32.mrb[157].mxu0  ;;  %v15217_v9 = vpop.f32.mrb[88].mxu1 }
 0x7e6   : > { %v6235_v18 = vadd.f32 %v6234_v54, %v13511_v15  ;;  %v6236_v6 = vpop.f32.mrb[158].mxu0  ;;  %v15220_v4 = vpop.f32.mrb[89].mxu1 }
 0x7e7   : > { %v6237_v22 = vadd.f32 %v6236_v6, %v13506_v59  ;;  %v6238_v61 = vpop.f32.mrb[159].mxu0  ;;  %v15223_v39 = vpop.f32.mrb[90].mxu1  ;;  %vm6487_vm15 = vcmp.ge.f32.partialorder %v6233_v3, 1.0 }
 0x7e8   : > { %v6239_v55 = vadd.f32 %v6238_v61, %v13511_v15  ;;  %v15226_v33 = vpop.f32.mrb[91].mxu1  ;;  %vm6488_vm11 = vcmp.ge.f32.partialorder %v6235_v18, 1.0 }
 0x7e9   : > { %vm6489_vm10 = vcmp.ge.f32.partialorder %v6237_v22, 1.0 }
 0x7ea   : > { %vm9193_vm13 = vmpackc.low %vm6489_vm10, %vm6487_vm15  ;;  %vm6490_vm2 = vcmp.ge.f32.partialorder %v6239_v55, 1.0 }
 0x7eb   : > { %vm9191_vm14 = vmpackc.low %vm6490_vm2, %vm6488_vm11 }
 0x7ec   : > { %9192 = vmatprep.mubr.msk.bf16.mxu1 %vm9191_vm14, %v17470_v24 }
 0x7ed   : > { %9194 = vmatmul.mubr.msk.bf16.gmra.mrb[144].mxu1 %vm9193_vm13, %v17470_v24 }
 0x7ef   : > { %v15230_v62 = vpop.f32.mrb[92].mxu1 }
 0x7f0   : > { %17602 = vst [vmem:[#allocation330_spill] sm:$0xff] %v15230_v62  ;;  %v15232_v47 = vpop.f32.mrb[93].mxu1 }
 0x7f1   : > { %17603 = vst [vmem:[#allocation155_spill] sm:$0xff] %v15232_v47  ;;  %v15234_v43 = vpop.f32.mrb[94].mxu1 }
 0x7f2   : > { %17604 = vst [vmem:[#allocation33_spill] sm:$0xff] %v15234_v43  ;;  %v15236_v17 = vpop.f32.mrb[95].mxu1 }
 0x7f3   : > { %17605 = vst [vmem:[#allocation38_spill] sm:$0xff] %v15236_v17 }
 0x7f7   : > { %v6242_v52 = vpop.f32.mrb[160].mxu0 }
 0x7f8   : > { %v6243_v58 = vadd.f32 %v6242_v52, %v13506_v59  ;;  %v6244_v3 = vpop.f32.mrb[161].mxu0 }
 0x7f9   : > { %v6245_v54 = vadd.f32 %v6244_v3, %v13511_v15  ;;  %v6246_v18 = vpop.f32.mrb[162].mxu0 }
 0x7fa   : > { %v6247_v6 = vadd.f32 %v6246_v18, %v13506_v59  ;;  %v6248_v22 = vpop.f32.mrb[163].mxu0  ;;  %vm6491_vm0 = vcmp.ge.f32.partialorder %v6243_v58, 1.0 }
 0x7fb   : > { %v6249_v61 = vadd.f32 %v6248_v22, %v13511_v15  ;;  %vm6492_vm4 = vcmp.ge.f32.partialorder %v6245_v54, 1.0 }
 0x7fc   : > { %vm6493_vm3 = vcmp.ge.f32.partialorder %v6247_v6, 1.0 }
 0x7fd   : > { %vm9197_vm6 = vmpackc.low %vm6493_vm3, %vm6491_vm0  ;;  %vm6494_vm12 = vcmp.ge.f32.partialorder %v6249_v61, 1.0  ;;  %v15242_v55 = vpop.f32.mrb[96].mxu1 }
 0x7fe   : > { %17606 = vst [vmem:[#allocation336_spill] sm:$0xff] %v15242_v55  ;;  %vm9195_vm5 = vmpackc.low %vm6494_vm12, %vm6492_vm4  ;;  %v15244_v17 = vpop.f32.mrb[97].mxu1 }
 0x7ff   : > { %17607 = vst [vmem:[#allocation156_spill] sm:$0xff] %v15244_v17  ;;  %v15246_v52 = vpop.f32.mrb[98].mxu1  ;;  %9196 = vmatprep.mubr.msk.bf16.mxu1 %vm9195_vm5, %v17470_v24 }
 0x800   : > { %17608 = vst [vmem:[#allocation334_spill] sm:$0xff] %v15246_v52  ;;  %v15249_v3 = vpop.f32.mrb[99].mxu1  ;;  %9198 = vmatmul.mubr.msk.bf16.gmra.mrb[148].mxu1 %vm9197_vm6, %v17470_v24 }
 0x801   : > { %17609 = vst [vmem:[#allocation32_spill] sm:$0xff] %v15249_v3 }
 0x807   : > { %v15252_v18 = vpop.f32.mrb[100].mxu1 }
 0x808   : > { %17610 = vst [vmem:[#allocation42_spill] sm:$0xff] %v15252_v18  ;;  %v15254_v58 = vpop.f32.mrb[101].mxu1 }
 0x809   : > { %17611 = vst [vmem:[#allocation43_spill] sm:$0xff] %v15254_v58  ;;  %v15256_v54 = vpop.f32.mrb[102].mxu1 }
 0x80a   : > { %17612 = vst [vmem:[#allocation158_spill] sm:$0xff] %v15256_v54  ;;  %v6252_v6 = vpop.f32.mrb[164].mxu0  ;;  %v15258_v22 = vpop.f32.mrb[103].mxu1 }
 0x80b   : > { %17613 = vst [vmem:[#allocation329_spill] sm:$0xff] %v15258_v22  ;;  %v6253_v61 = vadd.f32 %v6252_v6, %v13506_v59  ;;  %v6254_v17 = vpop.f32.mrb[165].mxu0 }
 0x80c   : > { %v6255_v52 = vadd.f32 %v6254_v17, %v13511_v15  ;;  %v6256_v55 = vpop.f32.mrb[166].mxu0 }
 0x80d   : > { %v6257_v43 = vadd.f32 %v6256_v55, %v13506_v59  ;;  %v6258_v3 = vpop.f32.mrb[167].mxu0  ;;  %vm6495_vm7 = vcmp.ge.f32.partialorder %v6253_v61, 1.0 }
 0x80e   : > { %v6259_v47 = vadd.f32 %v6258_v3, %v13511_v15  ;;  %vm6496_vm8 = vcmp.ge.f32.partialorder %v6255_v52, 1.0 }
 0x80f   : > { %vm6497_vm1 = vcmp.ge.f32.partialorder %v6257_v43, 1.0 }
 0x810   : > { %vm9201_vm9 = vmpackc.low %vm6497_vm1, %vm6495_vm7  ;;  %vm6498_vm15 = vcmp.ge.f32.partialorder %v6259_v47, 1.0 }
 0x811   : > { %vm9199_vm10 = vmpackc.low %vm6498_vm15, %vm6496_vm8 }
 0x812   : > { %9200 = vmatprep.mubr.msk.bf16.mxu1 %vm9199_vm10, %v17470_v24 }
 0x813   : > { %9202 = vmatmul.mubr.msk.bf16.gmra.mrb[152].mxu1 %vm9201_vm9, %v17470_v24 }
 0x815   : > { %v15266_v6 = vpop.f32.mrb[104].mxu1 }
 0x816   : > { %17614 = vst [vmem:[#allocation327_spill] sm:$0xff] %v15266_v6  ;;  %v15268_v22 = vpop.f32.mrb[105].mxu1 }
 0x817   : > { %17615 = vst [vmem:[#allocation36_spill] sm:$0xff] %v15268_v22  ;;  %v15270_v17 = vpop.f32.mrb[106].mxu1 }
 0x818   : > { %17616 = vst [vmem:[#allocation157_spill] sm:$0xff] %v15270_v17  ;;  %v15272_v55 = vpop.f32.mrb[107].mxu1 }
 0x819   : > { %17617 = vst [vmem:[#allocation333_spill] sm:$0xff] %v15272_v55 }
 0x81d   : > { %v6262_v54 = vpop.f32.mrb[168].mxu0 }
 0x81e   : > { %v6263_v3 = vadd.f32 %v6262_v54, %v13506_v59  ;;  %v6264_v43 = vpop.f32.mrb[169].mxu0 }
 0x81f   : > { %v6265_v52 = vadd.f32 %v6264_v43, %v13511_v15  ;;  %v6266_v47 = vpop.f32.mrb[170].mxu0  ;;  %v15276_v61 = vpop.f32.mrb[108].mxu1 }
 0x820   : > { %17618 = vst [vmem:[#allocation37_spill] sm:$0xff] %v15276_v61  ;;  %v6267_v58 = vadd.f32 %v6266_v47, %v13506_v59  ;;  %v6268_v18 = vpop.f32.mrb[171].mxu0  ;;  %v15279_v62 = vpop.f32.mrb[109].mxu1  ;;  %vm6499_vm11 = vcmp.ge.f32.partialorder %v6263_v3, 1.0 }
 0x821   : > { %17619 = vst [vmem:[#allocation331_spill] sm:$0xff] %v15279_v62  ;;  %v6269_v22 = vadd.f32 %v6268_v18, %v13511_v15  ;;  %v15282_v6 = vpop.f32.mrb[110].mxu1  ;;  %vm6500_vm2 = vcmp.ge.f32.partialorder %v6265_v52, 1.0 }
 0x822   : > { %17620 = vst [vmem:[#allocation47_spill] sm:$0xff] %v15282_v6  ;;  %vm6501_vm13 = vcmp.ge.f32.partialorder %v6267_v58, 1.0  ;;  %v15284_v55 = vpop.f32.mrb[111].mxu1 }
 0x823   : > { %17621 = vst [vmem:[#allocation340_spill] sm:$0xff] %v15284_v55  ;;  %vm9205_vm14 = vmpackc.low %vm6501_vm13, %vm6499_vm11  ;;  %vm6502_vm0 = vcmp.ge.f32.partialorder %v6269_v22, 1.0 }
 0x824   : > { %vm9203_vm3 = vmpackc.low %vm6502_vm0, %vm6500_vm2 }
 0x825   : > { %9204 = vmatprep.mubr.msk.bf16.mxu1 %vm9203_vm3, %v17470_v24 }
 0x826   : > { %9206 = vmatmul.mubr.msk.bf16.gmra.mrb[156].mxu1 %vm9205_vm14, %v17470_v24 }
 0x82d   : > { %v15288_v54 = vpop.f32.mrb[112].mxu1 }
 0x82e   : > { %17622 = vst [vmem:[#allocation338_spill] sm:$0xff] %v15288_v54  ;;  %v15290_v43 = vpop.f32.mrb[113].mxu1 }
 0x82f   : > { %17623 = vst [vmem:[#allocation159_spill] sm:$0xff] %v15290_v43  ;;  %v15292_v47 = vpop.f32.mrb[114].mxu1 }
 0x830   : > { %17624 = vst [vmem:[#allocation41_spill] sm:$0xff] %v15292_v47  ;;  %v6272_v18 = vpop.f32.mrb[172].mxu0  ;;  %v15294_v6 = vpop.f32.mrb[115].mxu1 }
 0x831   : > { %17625 = vst [vmem:[#allocation46_spill] sm:$0xff] %v15294_v6  ;;  %v6273_v58 = vadd.f32 %v6272_v18, %v13506_v59  ;;  %v6274_v3 = vpop.f32.mrb[173].mxu0 }
 0x832   : > { %v6275_v52 = vadd.f32 %v6274_v3, %v13511_v15  ;;  %v6276_v22 = vpop.f32.mrb[174].mxu0 }
 0x833   : > { %v6277_v55 = vadd.f32 %v6276_v22, %v13506_v59  ;;  %v6278_v62 = vpop.f32.mrb[175].mxu0  ;;  %vm6503_vm4 = vcmp.ge.f32.partialorder %v6273_v58, 1.0 }
 0x834   : > { %v6279_v61 = vadd.f32 %v6278_v62, %v13511_v15  ;;  %vm6504_vm12 = vcmp.ge.f32.partialorder %v6275_v52, 1.0 }
 0x835   : > { %vm6505_vm6 = vcmp.ge.f32.partialorder %v6277_v55, 1.0 }
 0x836   : > { %vm9209_vm5 = vmpackc.low %vm6505_vm6, %vm6503_vm4  ;;  %vm6506_vm7 = vcmp.ge.f32.partialorder %v6279_v61, 1.0 }
 0x837   : > { %vm9207_vm1 = vmpackc.low %vm6506_vm7, %vm6504_vm12 }
 0x838   : > { %9208 = vmatprep.mubr.msk.bf16.mxu1 %vm9207_vm1, %v17470_v24 }
 0x839   : > { %9210 = vmatmul.mubr.msk.bf16.gmra.mrb[160].mxu1 %vm9209_vm5, %v17470_v24 }
 0x83b   : > { %v15302_v18 = vpop.f32.mrb[116].mxu1 }
 0x83c   : > { %17626 = vst [vmem:[#allocation344_spill] sm:$0xff] %v15302_v18  ;;  %v15304_v6 = vpop.f32.mrb[117].mxu1 }
 0x83d   : > { %17627 = vst [vmem:[#allocation50_spill] sm:$0xff] %v15304_v6  ;;  %v15306_v3 = vpop.f32.mrb[118].mxu1 }
 0x83e   : > { %17628 = vst [vmem:[#allocation160_spill] sm:$0xff] %v15306_v3  ;;  %v15308_v22 = vpop.f32.mrb[119].mxu1 }
 0x83f   : > { %17629 = vst [vmem:[#allocation342_spill] sm:$0xff] %v15308_v22 }
 0x843   : > { %v6282_v47 = vpop.f32.mrb[176].mxu0 }
 0x844   : > { %v6283_v62 = vadd.f32 %v6282_v47, %v13506_v59  ;;  %v6284_v55 = vpop.f32.mrb[177].mxu0 }
 0x845   : > { %v6285_v58 = vadd.f32 %v6284_v55, %v13511_v15  ;;  %v6286_v61 = vpop.f32.mrb[178].mxu0 }
 0x846   : > { %v6287_v52 = vadd.f32 %v6286_v61, %v13506_v59  ;;  %v6288_v43 = vpop.f32.mrb[179].mxu0  ;;  %vm6507_vm8 = vcmp.ge.f32.partialorder %v6283_v62, 1.0 }
 0x847   : > { %v6289_v54 = vadd.f32 %v6288_v43, %v13511_v15  ;;  %vm6508_vm15 = vcmp.ge.f32.partialorder %v6285_v58, 1.0 }
 0x848   : > { %vm6509_vm9 = vcmp.ge.f32.partialorder %v6287_v52, 1.0 }
 0x849   : > { %vm9213_vm10 = vmpackc.low %vm6509_vm9, %vm6507_vm8  ;;  %vm6510_vm11 = vcmp.ge.f32.partialorder %v6289_v54, 1.0 }
 0x84a   : > { %vm9211_vm13 = vmpackc.low %vm6510_vm11, %vm6508_vm15 }
 0x84b   : > { %9212 = vmatprep.mubr.msk.bf16.mxu1 %vm9211_vm13, %v17470_v24 }
 0x84c   : > { %9214 = vmatmul.mubr.msk.bf16.gmra.mrb[164].mxu1 %vm9213_vm10, %v17470_v24 }
 0x84e   : > { %v15316_v47 = vpop.f32.mrb[120].mxu1 }
 0x84f   : > { %17630 = vst [vmem:[#allocation40_spill] sm:$0xff] %v15316_v47  ;;  %v15318_v22 = vpop.f32.mrb[121].mxu1 }
 0x850   : > { %17631 = vst [vmem:[#allocation51_spill] sm:$0xff] %v15318_v22  ;;  %v15320_v55 = vpop.f32.mrb[122].mxu1 }
 0x851   : > { %17632 = vst [vmem:[#allocation337_spill] sm:$0xff] %v15320_v55  ;;  %v15322_v61 = vpop.f32.mrb[123].mxu1 }
 0x852   : > { %17633 = vst [vmem:[#allocation162_spill] sm:$0xff] %v15322_v61 }
 0x856   : > { %v6292_v3 = vpop.f32.mrb[180].mxu0 }
 0x857   : > { %v6293_v43 = vadd.f32 %v6292_v3, %v13506_v59  ;;  %v6294_v62 = vpop.f32.mrb[181].mxu0 }
 0x858   : > { %v6295_v58 = vadd.f32 %v6294_v62, %v13511_v15  ;;  %v6296_v54 = vpop.f32.mrb[182].mxu0 }
 0x859   : > { %v6297_v52 = vadd.f32 %v6296_v54, %v13506_v59  ;;  %v6298_v6 = vpop.f32.mrb[183].mxu0  ;;  %vm6511_vm2 = vcmp.ge.f32.partialorder %v6293_v43, 1.0 }
 0x85a   : > { %v6299_v18 = vadd.f32 %v6298_v6, %v13511_v15  ;;  %vm6512_vm0 = vcmp.ge.f32.partialorder %v6295_v58, 1.0 }
 0x85b   : > { %vm6513_vm14 = vcmp.ge.f32.partialorder %v6297_v52, 1.0 }
 0x85c   : > { %vm9217_vm3 = vmpackc.low %vm6513_vm14, %vm6511_vm2  ;;  %vm6514_vm4 = vcmp.ge.f32.partialorder %v6299_v18, 1.0 }
 0x85d   : > { %vm9215_vm6 = vmpackc.low %vm6514_vm4, %vm6512_vm0 }
 0x85e   : > { %9216 = vmatprep.mubr.msk.bf16.mxu1 %vm9215_vm6, %v17470_v24 }
 0x85f   : > { %9218 = vmatmul.mubr.msk.bf16.gmra.mrb[168].mxu1 %vm9217_vm3, %v17470_v24 }
 0x861   : > { %v15330_v3 = vpop.f32.mrb[124].mxu1 }
 0x862   : > { %17634 = vst [vmem:[#allocation335_spill] sm:$0xff] %v15330_v3  ;;  %v15332_v61 = vpop.f32.mrb[125].mxu1 }
 0x863   : > { %17635 = vst [vmem:[#allocation44_spill] sm:$0xff] %v15332_v61  ;;  %v15334_v62 = vpop.f32.mrb[126].mxu1 }
 0x864   : > { %17636 = vst [vmem:[#allocation161_spill] sm:$0xff] %v15334_v62  ;;  %v15336_v54 = vpop.f32.mrb[127].mxu1 }
 0x865   : > { %17637 = vst [vmem:[#allocation341_spill] sm:$0xff] %v15336_v54 }
 0x869   : > { %v6302_v55 = vpop.f32.mrb[184].mxu0 }
 0x86a   : > { %v6303_v6 = vadd.f32 %v6302_v55, %v13506_v59  ;;  %v6304_v43 = vpop.f32.mrb[185].mxu0 }
 0x86b   : > { %v6305_v58 = vadd.f32 %v6304_v43, %v13511_v15  ;;  %v6306_v18 = vpop.f32.mrb[186].mxu0 }
 0x86c   : > { %v6307_v52 = vadd.f32 %v6306_v18, %v13506_v59  ;;  %v6308_v22 = vpop.f32.mrb[187].mxu0  ;;  %vm6515_vm12 = vcmp.ge.f32.partialorder %v6303_v6, 1.0 }
 0x86d   : > { %v6309_v47 = vadd.f32 %v6308_v22, %v13511_v15  ;;  %vm6516_vm7 = vcmp.ge.f32.partialorder %v6305_v58, 1.0 }
 0x86e   : > { %vm6517_vm5 = vcmp.ge.f32.partialorder %v6307_v52, 1.0 }
 0x86f   : > { %vm9221_vm1 = vmpackc.low %vm6517_vm5, %vm6515_vm12  ;;  %vm6518_vm8 = vcmp.ge.f32.partialorder %v6309_v47, 1.0 }
 0x870   : > { %vm9219_vm9 = vmpackc.low %vm6518_vm8, %vm6516_vm7 }
 0x871   : > { %9220 = vmatprep.mubr.msk.bf16.mxu1 %vm9219_vm9, %v17470_v24 }
 0x872   : > { %9222 = vmatmul.mubr.msk.bf16.gmra.mrb[172].mxu1 %vm9221_vm1, %v17470_v24 }
 0x874   : > { %v15344_v55 = vpop.f32.mrb[128].mxu1 }
 0x875   : > { %17638 = vst [vmem:[#allocation45_spill] sm:$0xff] %v15344_v55  ;;  %v15346_v54 = vpop.f32.mrb[129].mxu1 }
 0x876   : > { %17639 = vst [vmem:[#allocation339_spill] sm:$0xff] %v15346_v54  ;;  %v15348_v43 = vpop.f32.mrb[130].mxu1 }
 0x877   : > { %17640 = vst [vmem:[#allocation55_spill] sm:$0xff] %v15348_v43  ;;  %v15350_v18 = vpop.f32.mrb[131].mxu1 }
 0x878   : > { %17641 = vst [vmem:[#allocation348_spill] sm:$0xff] %v15350_v18 }
 0x87c   : > { %v6312_v62 = vpop.f32.mrb[188].mxu0 }
 0x87d   : > { %v6313_v22 = vadd.f32 %v6312_v62, %v13506_v59  ;;  %v6314_v6 = vpop.f32.mrb[189].mxu0 }
 0x87e   : > { %v6315_v58 = vadd.f32 %v6314_v6, %v13511_v15  ;;  %v6316_v47 = vpop.f32.mrb[190].mxu0 }
 0x87f   : > { %v6317_v52 = vadd.f32 %v6316_v47, %v13506_v59  ;;  %v6318_v61 = vpop.f32.mrb[191].mxu0  ;;  %vm6519_vm15 = vcmp.ge.f32.partialorder %v6313_v22, 1.0 }
 0x880   : > { %v6319_v3 = vadd.f32 %v6318_v61, %v13511_v15  ;;  %vm6520_vm11 = vcmp.ge.f32.partialorder %v6315_v58, 1.0 }
 0x881   : > { %vm6521_vm10 = vcmp.ge.f32.partialorder %v6317_v52, 1.0 }
 0x882   : > { %vm9225_vm13 = vmpackc.low %vm6521_vm10, %vm6519_vm15  ;;  %vm6522_vm2 = vcmp.ge.f32.partialorder %v6319_v3, 1.0 }
 0x883   : > { %vm9223_vm14 = vmpackc.low %vm6522_vm2, %vm6520_vm11 }
 0x884   : > { %9224 = vmatprep.mubr.msk.bf16.mxu1 %vm9223_vm14, %v17470_v24 }
 0x885   : > { %9226 = vmatmul.mubr.msk.bf16.gmra.mrb[176].mxu1 %vm9225_vm13, %v17470_v24 }
 0x887   : > { %v15358_v62 = vpop.f32.mrb[132].mxu1 }
 0x888   : > { %17642 = vst [vmem:[#allocation346_spill] sm:$0xff] %v15358_v62  ;;  %v15360_v18 = vpop.f32.mrb[133].mxu1  ;;  %v7049_v62 = vld [vmem:[%s16043_s6] sm:$0x3] }
 0x889   : > { %17643 = vst [vmem:[#allocation163_spill] sm:$0xff] %v15360_v18  ;;  %v15362_v6 = vpop.f32.mrb[134].mxu1 }
 0x88a   : > { %17644 = vst [vmem:[#allocation49_spill] sm:$0xff] %v15362_v6  ;;  %v15364_v47 = vpop.f32.mrb[135].mxu1 }
 0x88b   : > { %17645 = vst [vmem:[#allocation54_spill] sm:$0xff] %v15364_v47 }
 0x88f   : > { %v6322_v43 = vpop.f32.mrb[192].mxu0 }
 0x890   : > { %v6323_v61 = vadd.f32 %v6322_v43, %v13506_v59  ;;  %v6324_v22 = vpop.f32.mrb[193].mxu0  ;;  %v15374_v43 = vrot.slane %v7049_v62, %v17193_v29 }
 0x891   : > { %v6325_v58 = vadd.f32 %v6324_v22, %v13511_v15  ;;  %v6326_v3 = vpop.f32.mrb[194].mxu0  ;;  %v15377_v22 = vrot.slane %v7049_v62, %v17194_v0 }
 0x892   : > { %v6327_v52 = vadd.f32 %v6326_v3, %v13506_v59  ;;  %v6328_v54 = vpop.f32.mrb[195].mxu0  ;;  %vm6523_vm0 = vcmp.ge.f32.partialorder %v6323_v61, 1.0 }
 0x893   : > { %v6329_v18 = vadd.f32 %v6328_v54, %v13511_v15  ;;  %vm6524_vm4 = vcmp.ge.f32.partialorder %v6325_v58, 1.0 }
 0x894   : > { %vm6525_vm3 = vcmp.ge.f32.partialorder %v6327_v52, 1.0 }
 0x895   : > { %vm9229_vm6 = vmpackc.low %vm6525_vm3, %vm6523_vm0  ;;  %vm6526_vm12 = vcmp.ge.f32.partialorder %v6329_v18, 1.0 }
 0x896   : > { %vm9227_vm5 = vmpackc.low %vm6526_vm12, %vm6524_vm4 }
 0x897   : > { %v7255_v59 = vpop.f32.mrb[196].mxu0  ;;  %9228 = vmatprep.mubr.msk.bf16.mxu1 %vm9227_vm5, %v17470_v24 }
 0x898   : > { %v7256_v3 = vadd.f32 %v7255_v59, %v15374_v43  ;;  %v7257_v47 = vpop.f32.mrb[197].mxu0  ;;  %9230 = vmatmul.mubr.msk.bf16.gmra.mrb[180].mxu1 %vm9229_vm6, %v17470_v24 }
 0x899   : > { %v7258_v15 = vadd.f32 %v7257_v47, %v15377_v22  ;;  %v7259_v54 = vpop.f32.mrb[198].mxu0 }
 0x89a   : > { %vm7744_vm7 = vcmp.ge.f32.partialorder %v7256_v3, 1.0  ;;  %v7260_v18 = vadd.f32 %v7259_v54, %v15374_v43  ;;  %v7261_v29 = vpop.f32.mrb[199].mxu0  ;;  %v15384_v61 = vpop.f32.mrb[136].mxu1 }
 0x89b   : > { %17646 = vst [vmem:[#allocation58_spill] sm:$0xff] %v15384_v61  ;;  %vm7745_vm1 = vcmp.ge.f32.partialorder %v7258_v15, 1.0  ;;  %v7262_v0 = vadd.f32 %v7261_v29, %v15377_v22  ;;  %v15387_v62 = vpop.f32.mrb[137].mxu1  ;;  %v9231_v52 = vsel %vm7744_vm7, 1.0, %v17483_v50 }
 0x89c   : > { %17647 = vst [vmem:[#allocation352_spill] sm:$0xff] %v15387_v62  ;;  %vm7746_vm8 = vcmp.ge.f32.partialorder %v7260_v18, 1.0  ;;  %v15389_v58 = vpop.f32.mrb[138].mxu1  ;;  %v9232_v59 = vsel %vm7745_vm1, 1.0, %v17483_v50 }
 0x89d   : > { %17648 = vst [vmem:[#allocation164_spill] sm:$0xff] %v15389_v58  ;;  %v9233_v24 = vsel %vm7746_vm8, 1.0, %v17483_v50  ;;  %vm7747_vm9 = vcmp.ge.f32.partialorder %v7262_v0, 1.0  ;;  %v15393_v47 = vpop.f32.mrb[139].mxu1 }
 0x89e   : > { %17649 = vst [vmem:[#allocation350_spill] sm:$0xff] %v15393_v47  ;;  %v8332_v3 = vadd.f32 %v9233_v24, %v9231_v52  ;;  %v9234_v54 = vsel %vm7747_vm9, 1.0, %v17483_v50 }
 0x89f   : > { %v8435_v15 = vadd.f32 %v9234_v54, %v9232_v59  ;;  %v7265_v61 = vpop.f32.mrb[200].mxu0 }
 0x8a0   : > { %v7266_v29 = vadd.f32 %v7265_v61, %v15374_v43  ;;  %v7267_v62 = vpop.f32.mrb[201].mxu0  ;;  %v7286_v61 = vadd.f32 %v14477_v21, %v15374_v43  ;;  %v7290_v21 = vadd.f32 %v14485_v27, %v15374_v43  ;;  %v7298_v27 = vadd.f32 %v14516_v25, %v15377_v22 }
 0x8a1   : > { %v7268_v18 = vadd.f32 %v7267_v62, %v15377_v22  ;;  %v7269_v58 = vpop.f32.mrb[202].mxu0  ;;  %v7302_v25 = vadd.f32 %v14528_v46, %v15377_v22 }
 0x8a2   : > { %vm7748_vm15 = vcmp.ge.f32.partialorder %v7266_v29, 1.0  ;;  %v7270_v6 = vadd.f32 %v7269_v58, %v15374_v43  ;;  %v7271_v55 = vpop.f32.mrb[203].mxu0  ;;  %v7288_v58 = vadd.f32 %v14482_v7, %v15377_v22  ;;  %vm7756_vm2 = vcmp.ge.f32.partialorder %v7286_v61, 1.0 }
 0x8a3   : > { %v9235_v0 = vsel %vm7748_vm15, 1.0, %v17483_v50  ;;  %vm7749_vm10 = vcmp.ge.f32.partialorder %v7268_v18, 1.0  ;;  %v7272_v47 = vadd.f32 %v7271_v55, %v15377_v22  ;;  %vm7758_vm12 = vcmp.ge.f32.partialorder %v7290_v21, 1.0 }
 0x8a4   : > { %v8333_v52 = vadd.f32 %v9235_v0, %v8332_v3  ;;  %v9236_v24 = vsel %vm7749_vm10, 1.0, %v17483_v50  ;;  %vm7750_vm11 = vcmp.ge.f32.partialorder %v7270_v6, 1.0  ;;  %vm7757_vm14 = vcmp.ge.f32.partialorder %v7288_v58, 1.0 }
 0x8a5   : > { %v8436_v59 = vadd.f32 %v9236_v24, %v8435_v15  ;;  %v9237_v62 = vsel %vm7750_vm11, 1.0, %v17483_v50  ;;  %vm7751_vm13 = vcmp.ge.f32.partialorder %v7272_v47, 1.0  ;;  %v7292_v15 = vadd.f32 %v14487_v23, %v15377_v22 }
 0x8a6   : > { %v8334_v54 = vadd.f32 %v9237_v62, %v8333_v52  ;;  %v9238_v29 = vsel %vm7751_vm13, 1.0, %v17483_v50  ;;  %v7296_v24 = vadd.f32 %v14511_v56, %v15374_v43  ;;  %v9244_v21 = vsel %vm7757_vm14, 1.0, %v17483_v50 }
 0x8a7   : > { %v8437_v18 = vadd.f32 %v9238_v29, %v8436_v59  ;;  %v7275_v17 = vpop.f32.mrb[204].mxu0  ;;  %vm7759_vm5 = vcmp.ge.f32.partialorder %v7292_v15, 1.0  ;;  %v9245_v61 = vsel %vm7758_vm12, 1.0, %v17483_v50  ;;  %vm7761_vm1 = vcmp.ge.f32.partialorder %v7298_v27, 1.0 }
 0x8a8   : > { %v7276_v55 = vadd.f32 %v7275_v17, %v15374_v43  ;;  %v7277_v3 = vpop.f32.mrb[205].mxu0  ;;  %vm7760_vm7 = vcmp.ge.f32.partialorder %v7296_v24, 1.0  ;;  %v7308_v15 = vadd.f32 %v14560_v36, %v15377_v22  ;;  %v7310_v58 = vadd.f32 %v14565_v57, %v15374_v43 }
 0x8a9   : > { %v7278_v6 = vadd.f32 %v7277_v3, %v15377_v22  ;;  %v7279_v0 = vpop.f32.mrb[206].mxu0  ;;  %v7300_v3 = vadd.f32 %v14522_v30, %v15374_v43  ;;  %v7306_v30 = vadd.f32 %v14556_v14, %v15374_v43  ;;  %vm7763_vm9 = vcmp.ge.f32.partialorder %v7302_v25, 1.0 }
 0x8aa   : > { %vm7752_vm0 = vcmp.ge.f32.partialorder %v7276_v55, 1.0  ;;  %v7280_v47 = vadd.f32 %v7279_v0, %v15374_v43  ;;  %v7281_v7 = vpop.f32.mrb[207].mxu0  ;;  %v9243_v0 = vsel %vm7756_vm2, 1.0, %v17483_v50  ;;  %v7312_v14 = vadd.f32 %v14569_v8, %v15377_v22  ;;  %v17650_v8 = vld [vmem:[#allocation17_spill] sm:$0xff] }
 0x8ab   : > { %v9239_v52 = vsel %vm7752_vm0, 1.0, %v17483_v50  ;;  %vm7753_vm3 = vcmp.ge.f32.partialorder %v7278_v6, 1.0  ;;  %v7282_v17 = vadd.f32 %v7281_v7, %v15377_v22  ;;  %vm7762_vm8 = vcmp.ge.f32.partialorder %v7300_v3, 1.0 }
 0x8ac   : > { %v8335_v59 = vadd.f32 %v9239_v52, %v8334_v54  ;;  %v9240_v62 = vsel %vm7753_vm3, 1.0, %v17483_v50  ;;  %vm7754_vm4 = vcmp.ge.f32.partialorder %v7280_v47, 1.0  ;;  %v9248_v27 = vsel %vm7761_vm1, 1.0, %v17483_v50 }
 0x8ad   : > { %v8438_v29 = vadd.f32 %v9240_v62, %v8437_v18  ;;  %v9241_v55 = vsel %vm7754_vm4, 1.0, %v17483_v50  ;;  %vm7755_vm6 = vcmp.ge.f32.partialorder %v7282_v17, 1.0  ;;  %v15424_v23 = vpop.f32.mrb[140].mxu1  ;;  %v9246_v17 = vsel %vm7759_vm5, 1.0, %v17483_v50 }
 0x8ae   : > { %v8336_v6 = vadd.f32 %v9241_v55, %v8335_v59  ;;  %v9242_v56 = vsel %vm7755_vm6, 1.0, %v17483_v50  ;;  %v15429_v54 = vpop.f32.mrb[141].mxu1  ;;  %v9247_v59 = vsel %vm7760_vm7, 1.0, %v17483_v50  ;;  %vm7764_vm15 = vcmp.ge.f32.partialorder %v7306_v30, 1.0 }
 0x8af   : > { %v8439_v18 = vadd.f32 %v9242_v56, %v8438_v29  ;;  %v15435_v47 = vpop.f32.mrb[142].mxu1  ;;  %v7316_v36 = vadd.f32 %v14594_v37, %v15374_v43  ;;  %v9249_v55 = vsel %vm7762_vm8, 1.0, %v17483_v50  ;;  %vm7765_vm10 = vcmp.ge.f32.partialorder %v7308_v15, 1.0  ;;  %v17651_v37 = vld [vmem:[#allocation146_spill] sm:$0xff] }
 0x8b0   : > { %v8337_v7 = vadd.f32 %v9243_v0, %v8336_v6  ;;  %v15441_v52 = vpop.f32.mrb[143].mxu1  ;;  %v7318_v57 = vadd.f32 %v14599_v35, %v15377_v22  ;;  %v9250_v6 = vsel %vm7763_vm9, 1.0, %v17483_v50  ;;  %vm7766_vm11 = vcmp.ge.f32.partialorder %v7310_v58, 1.0  ;;  %v17652_v35 = vld [vmem:[#allocation316_spill] sm:$0xff] }
 0x8b1   : > { %v8440_v46 = vadd.f32 %v9244_v21, %v8439_v18  ;;  %v7320_v56 = vadd.f32 %v17650_v8, %v15374_v43  ;;  %v9251_v25 = vsel %vm7764_vm15, 1.0, %v17483_v50  ;;  %vm7767_vm13 = vcmp.ge.f32.partialorder %v7312_v14, 1.0 }
 0x8b2   : > { %v8338_v24 = vadd.f32 %v9245_v61, %v8337_v7  ;;  %v7322_v18 = vadd.f32 %v17651_v37, %v15377_v22  ;;  %v9252_v30 = vsel %vm7765_vm10, 1.0, %v17483_v50  ;;  %vm7768_vm2 = vcmp.ge.f32.partialorder %v7316_v36, 1.0  ;;  %v17655_v36 = vld [vmem:[#allocation18_spill] sm:$0xff] }
 0x8b3   : > { %v8441_v62 = vadd.f32 %v9246_v17, %v8440_v46  ;;  %v7326_v7 = vadd.f32 %v17652_v35, %v15374_v43  ;;  %v9253_v15 = vsel %vm7766_vm11, 1.0, %v17483_v50  ;;  %vm7769_vm14 = vcmp.ge.f32.partialorder %v7318_v57, 1.0  ;;  %v17653_v46 = vld [vmem:[#allocation12_spill] sm:$0xff] }
 0x8b4   : > { %v8339_v29 = vadd.f32 %v9247_v59, %v8338_v24  ;;  %v7328_v17 = vadd.f32 %v17653_v46, %v15377_v22  ;;  %v9254_v24 = vsel %vm7767_vm13, 1.0, %v17483_v50  ;;  %vm7770_vm0 = vcmp.ge.f32.partialorder %v7320_v56, 1.0  ;;  %v17654_v59 = vld [vmem:[#allocation438_spill] sm:$0xff] }
 0x8b5   : > { %v8442_v3 = vadd.f32 %v9248_v27, %v8441_v62  ;;  %v7330_v14 = vadd.f32 %v17654_v59, %v15374_v43  ;;  %v9255_v27 = vsel %vm7768_vm2, 1.0, %v17483_v50  ;;  %vm7771_vm3 = vcmp.ge.f32.partialorder %v7322_v18, 1.0 }
 0x8b6   : > { %v8340_v0 = vadd.f32 %v9249_v55, %v8339_v29  ;;  %v7332_v29 = vadd.f32 %v17655_v36, %v15377_v22  ;;  %v9256_v57 = vsel %vm7769_vm14, 1.0, %v17483_v50  ;;  %vm7772_vm4 = vcmp.ge.f32.partialorder %v7326_v7, 1.0 }
 0x8b7   : > { %v8443_v21 = vadd.f32 %v9250_v6, %v8442_v3  ;;  %v17656_v3 = vld [vmem:[#allocation309_spill] sm:$0xff]  ;;  %v9257_v56 = vsel %vm7770_vm0, 1.0, %v17483_v50  ;;  %vm7773_vm6 = vcmp.ge.f32.partialorder %v7328_v17, 1.0  ;;  %v9258_v18 = vsel %vm7771_vm3, 1.0, %v17483_v50 }
 0x8b8   : > { %v8341_v61 = vadd.f32 %v9251_v25, %v8340_v0  ;;  %v7336_v6 = vadd.f32 %v17656_v3, %v15374_v43  ;;  %v17657_v0 = vld [vmem:[#allocation326_spill] sm:$0xff]  ;;  %vm7774_vm12 = vcmp.ge.f32.partialorder %v7330_v14, 1.0  ;;  %v9259_v7 = vsel %vm7772_vm4, 1.0, %v17483_v50 }
 0x8b9   : > { %v8444_v58 = vadd.f32 %v9252_v30, %v8443_v21  ;;  %v7338_v25 = vadd.f32 %v17657_v0, %v15377_v22  ;;  %v17658_v21 = vld [vmem:[#allocation147_spill] sm:$0xff]  ;;  %vm7775_vm5 = vcmp.ge.f32.partialorder %v7332_v29, 1.0  ;;  %v9260_v17 = vsel %vm7773_vm6, 1.0, %v17483_v50 }
 0x8ba   : > { %v8342_v62 = vadd.f32 %v9253_v15, %v8341_v61  ;;  %v7340_v30 = vadd.f32 %v17658_v21, %v15374_v43  ;;  %v17659_v61 = vld [vmem:[#allocation14_spill] sm:$0xff]  ;;  %vm7776_vm7 = vcmp.ge.f32.partialorder %v7336_v6, 1.0  ;;  %v9261_v14 = vsel %vm7774_vm12, 1.0, %v17483_v50  ;;  %v17662_v21 = vld [vmem:[#allocation148_spill] sm:$0xff] }
 0x8bb   : > { %v8445_v55 = vadd.f32 %v9254_v24, %v8444_v58  ;;  %v7342_v15 = vadd.f32 %v17659_v61, %v15377_v22  ;;  %v7346_v58 = vadd.f32 %v14724_v45, %v15374_v43  ;;  %vm7777_vm1 = vcmp.ge.f32.partialorder %v7338_v25, 1.0  ;;  %v17660_v6 = vld [vmem:[#allocation22_spill] sm:$0xff]  ;;  %v17661_v25 = vld [vmem:[#allocation320_spill] sm:$0xff]  ;;  %v17663_v61 = vld [vmem:[#allocation307_spill] sm:$0xff] }
 0x8bc   : > { %v8343_v8 = vadd.f32 %v9255_v27, %v8342_v62  ;;  %v7348_v62 = vadd.f32 %v14729_v34, %v15377_v22  ;;  %v9262_v29 = vsel %vm7775_vm5, 1.0, %v17483_v50  ;;  %vm7778_vm8 = vcmp.ge.f32.partialorder %v7340_v30, 1.0 }
 0x8bd   : > { %v8446_v37 = vadd.f32 %v9256_v57, %v8445_v55  ;;  %v7350_v55 = vadd.f32 %v14733_v60, %v15374_v43  ;;  %v9263_v3 = vsel %vm7776_vm7, 1.0, %v17483_v50  ;;  %vm7779_vm9 = vcmp.ge.f32.partialorder %v7342_v15, 1.0 }
 0x8be   : > { %v8344_v35 = vadd.f32 %v9257_v56, %v8343_v8  ;;  %v7352_v8 = vadd.f32 %v17660_v6, %v15377_v22  ;;  %v9264_v0 = vsel %vm7777_vm1, 1.0, %v17483_v50  ;;  %vm7780_vm15 = vcmp.ge.f32.partialorder %v7346_v58, 1.0  ;;  %v17664_v58 = vld [vmem:[#allocation16_spill] sm:$0xff] }
 0x8bf   : > { %v8447_v46 = vadd.f32 %v9258_v18, %v8446_v37  ;;  %v7356_v37 = vadd.f32 %v17661_v25, %v15374_v43  ;;  %v9265_v60 = vsel %vm7778_vm8, 1.0, %v17483_v50  ;;  %vm7781_vm10 = vcmp.ge.f32.partialorder %v7348_v62, 1.0 }
 0x8c0   : > { %v8345_v24 = vadd.f32 %v9259_v7, %v8344_v35  ;;  %v15491_v59 = vpop.f32.mrb[144].mxu1  ;;  %v7358_v30 = vadd.f32 %v17662_v21, %v15377_v22  ;;  %v9266_v7 = vsel %vm7779_vm9, 1.0, %v17483_v50  ;;  %vm7782_vm11 = vcmp.ge.f32.partialorder %v7350_v55, 1.0 }
 0x8c1   : > { %v8448_v27 = vadd.f32 %v9260_v17, %v8447_v46  ;;  %v15496_v36 = vpop.f32.mrb[145].mxu1  ;;  %v7360_v15 = vadd.f32 %v17663_v61, %v15374_v43  ;;  %v9267_v17 = vsel %vm7780_vm15, 1.0, %v17483_v50  ;;  %vm7783_vm13 = vcmp.ge.f32.partialorder %v7352_v8, 1.0 }
 0x8c2   : > { %v8346_v57 = vadd.f32 %v9261_v14, %v8345_v24  ;;  %v15501_v45 = vpop.f32.mrb[146].mxu1  ;;  %v7362_v24 = vadd.f32 %v17664_v58, %v15377_v22  ;;  %v9268_v62 = vsel %vm7781_vm10, 1.0, %v17483_v50  ;;  %vm7784_vm2 = vcmp.ge.f32.partialorder %v7356_v37, 1.0 }
 0x8c3   : > { %v8449_v56 = vadd.f32 %v9262_v29, %v8448_v27  ;;  %v15506_v34 = vpop.f32.mrb[147].mxu1  ;;  %v17665_v27 = vld [vmem:[#allocation26_spill] sm:$0xff]  ;;  %v9269_v55 = vsel %vm7782_vm11, 1.0, %v17483_v50  ;;  %vm7785_vm14 = vcmp.ge.f32.partialorder %v7358_v30, 1.0  ;;  %v9270_v8 = vsel %vm7783_vm13, 1.0, %v17483_v50 }
 0x8c4   : > { %v8347_v18 = vadd.f32 %v9263_v3, %v8346_v57  ;;  %v7366_v29 = vadd.f32 %v17665_v27, %v15374_v43  ;;  %v17666_v3 = vld [vmem:[#allocation27_spill] sm:$0xff]  ;;  %vm7786_vm0 = vcmp.ge.f32.partialorder %v7360_v15, 1.0  ;;  %v9271_v37 = vsel %vm7784_vm2, 1.0, %v17483_v50 }
 0x8c5   : > { %v8450_v35 = vadd.f32 %v9264_v0, %v8449_v56  ;;  %v7368_v6 = vadd.f32 %v17666_v3, %v15377_v22  ;;  %v17667_v0 = vld [vmem:[#allocation150_spill] sm:$0xff]  ;;  %vm7787_vm3 = vcmp.ge.f32.partialorder %v7362_v24, 1.0  ;;  %v9272_v30 = vsel %vm7785_vm14, 1.0, %v17483_v50 }
 0x8c6   : > { %v8348_v46 = vadd.f32 %v9265_v60, %v8347_v18  ;;  %v7370_v25 = vadd.f32 %v17667_v0, %v15374_v43  ;;  %v17668_v60 = vld [vmem:[#allocation313_spill] sm:$0xff]  ;;  %vm7788_vm4 = vcmp.ge.f32.partialorder %v7366_v29, 1.0  ;;  %v9273_v15 = vsel %vm7786_vm0, 1.0, %v17483_v50 }
 0x8c7   : > { %v8451_v14 = vadd.f32 %v9266_v7, %v8450_v35  ;;  %v7372_v21 = vadd.f32 %v17668_v60, %v15377_v22  ;;  %v17669_v7 = vld [vmem:[#allocation311_spill] sm:$0xff]  ;;  %vm7789_vm6 = vcmp.ge.f32.partialorder %v7368_v6, 1.0  ;;  %v9274_v24 = vsel %vm7787_vm3, 1.0, %v17483_v50 }
 0x8c8   : > { %v8349_v57 = vadd.f32 %v9267_v17, %v8348_v46  ;;  %v7376_v61 = vadd.f32 %v17669_v7, %v15374_v43  ;;  %v17670_v17 = vld [vmem:[#allocation20_spill] sm:$0xff]  ;;  %vm7790_vm12 = vcmp.ge.f32.partialorder %v7370_v25, 1.0  ;;  %v9275_v29 = vsel %vm7788_vm4, 1.0, %v17483_v50 }
 0x8c9   : > { %v8452_v56 = vadd.f32 %v9268_v62, %v8451_v14  ;;  %v7378_v58 = vadd.f32 %v17670_v17, %v15377_v22  ;;  %v17671_v62 = vld [vmem:[#allocation149_spill] sm:$0xff]  ;;  %vm7791_vm5 = vcmp.ge.f32.partialorder %v7372_v21, 1.0  ;;  %v9276_v6 = vsel %vm7789_vm6, 1.0, %v17483_v50 }
 0x8ca   : > { %v8350_v18 = vadd.f32 %v9269_v55, %v8349_v57  ;;  %v7380_v27 = vadd.f32 %v17671_v62, %v15374_v43  ;;  %v17672_v55 = vld [vmem:[#allocation317_spill] sm:$0xff]  ;;  %vm7792_vm7 = vcmp.ge.f32.partialorder %v7376_v61, 1.0  ;;  %v9277_v25 = vsel %vm7790_vm12, 1.0, %v17483_v50 }
 0x8cb   : > { %v8453_v35 = vadd.f32 %v9270_v8, %v8452_v56  ;;  %v7382_v3 = vadd.f32 %v17672_v55, %v15377_v22  ;;  %v17673_v8 = vld [vmem:[#allocation21_spill] sm:$0xff]  ;;  %vm7793_vm1 = vcmp.ge.f32.partialorder %v7378_v58, 1.0  ;;  %v9278_v21 = vsel %vm7791_vm5, 1.0, %v17483_v50 }
 0x8cc   : > { %v8351_v46 = vadd.f32 %v9271_v37, %v8350_v18  ;;  %v7386_v0 = vadd.f32 %v17673_v8, %v15374_v43  ;;  %v17674_v37 = vld [vmem:[#allocation315_spill] sm:$0xff]  ;;  %vm7794_vm8 = vcmp.ge.f32.partialorder %v7380_v27, 1.0  ;;  %v9279_v61 = vsel %vm7792_vm7, 1.0, %v17483_v50 }
 0x8cd   : > { %v8454_v14 = vadd.f32 %v9272_v30, %v8453_v35  ;;  %v7388_v60 = vadd.f32 %v17674_v37, %v15377_v22  ;;  %v17675_v30 = vld [vmem:[#allocation31_spill] sm:$0xff]  ;;  %vm7795_vm9 = vcmp.ge.f32.partialorder %v7382_v3, 1.0  ;;  %v9280_v58 = vsel %vm7793_vm1, 1.0, %v17483_v50 }
 0x8ce   : > { %v8352_v57 = vadd.f32 %v9273_v15, %v8351_v46  ;;  %v7390_v7 = vadd.f32 %v17675_v30, %v15374_v43  ;;  %v17676_v15 = vld [vmem:[#allocation324_spill] sm:$0xff]  ;;  %vm7796_vm15 = vcmp.ge.f32.partialorder %v7386_v0, 1.0  ;;  %v7396_v62 = vadd.f32 %v14916_v49, %v15374_v43  ;;  %v17677_v8 = vld [vmem:[#allocation439_spill] sm:$0xff] }
 0x8cf   : > { %v8455_v56 = vadd.f32 %v9274_v24, %v8454_v14  ;;  %v7392_v17 = vadd.f32 %v17676_v15, %v15377_v22  ;;  %vm7797_vm10 = vcmp.ge.f32.partialorder %v7388_v60, 1.0  ;;  %v7398_v55 = vadd.f32 %v14921_v11, %v15377_v22  ;;  %v17678_v37 = vld [vmem:[#allocation151_spill] sm:$0xff] }
 0x8d0   : > { %v8353_v18 = vadd.f32 %v9275_v29, %v8352_v57  ;;  %v9281_v29 = vsel %vm7794_vm8, 1.0, %v17483_v50  ;;  %vm7798_vm11 = vcmp.ge.f32.partialorder %v7390_v7, 1.0  ;;  %v7400_v0 = vadd.f32 %v17677_v8, %v15374_v43 }
 0x8d1   : > { %v8456_v35 = vadd.f32 %v9276_v6, %v8455_v56  ;;  %v9282_v6 = vsel %vm7795_vm9, 1.0, %v17483_v50  ;;  %vm7799_vm13 = vcmp.ge.f32.partialorder %v7392_v17, 1.0  ;;  %v7402_v60 = vadd.f32 %v17678_v37, %v15377_v22 }
 0x8d2   : > { %v8354_v46 = vadd.f32 %v9277_v25, %v8353_v18  ;;  %v9283_v25 = vsel %vm7796_vm15, 1.0, %v17483_v50  ;;  %v9284_v11 = vsel %vm7797_vm10, 1.0, %v17483_v50  ;;  %vm7800_vm2 = vcmp.ge.f32.partialorder %v7396_v62, 1.0 }
 0x8d3   : > { %v8457_v14 = vadd.f32 %v9278_v21, %v8456_v35  ;;  %v15556_v24 = vpop.f32.mrb[148].mxu1  ;;  %v17679_v21 = vld [vmem:[#allocation25_spill] sm:$0xff]  ;;  %vm7801_vm14 = vcmp.ge.f32.partialorder %v7398_v55, 1.0  ;;  %v9286_v17 = vsel %vm7799_vm13, 1.0, %v17483_v50  ;;  %vm7802_vm0 = vcmp.ge.f32.partialorder %v7400_v0, 1.0 }
 0x8d4   : > { %v8355_v27 = vadd.f32 %v9279_v61, %v8354_v46  ;;  %v15561_v57 = vpop.f32.mrb[149].mxu1  ;;  %v7406_v30 = vadd.f32 %v17679_v21, %v15374_v43  ;;  %v9285_v46 = vsel %vm7798_vm11, 1.0, %v17483_v50  ;;  %v17680_v61 = vld [vmem:[#allocation30_spill] sm:$0xff]  ;;  %v9287_v62 = vsel %vm7800_vm2, 1.0, %v17483_v50 }
 0x8d5   : > { %v8458_v3 = vadd.f32 %v9280_v58, %v8457_v14  ;;  %v15566_v56 = vpop.f32.mrb[150].mxu1  ;;  %v7408_v15 = vadd.f32 %v17680_v61, %v15377_v22  ;;  %v17681_v58 = vld [vmem:[#allocation328_spill] sm:$0xff]  ;;  %vm7803_vm3 = vcmp.ge.f32.partialorder %v7402_v60, 1.0  ;;  %v9288_v55 = vsel %vm7801_vm14, 1.0, %v17483_v50 }
 0x8d6   : > { %v8356_v18 = vadd.f32 %v9281_v29, %v8355_v27  ;;  %v15571_v49 = vpop.f32.mrb[151].mxu1  ;;  %v7410_v27 = vadd.f32 %v17681_v58, %v15374_v43  ;;  %vm7804_vm4 = vcmp.ge.f32.partialorder %v7406_v30, 1.0  ;;  %v9289_v0 = vsel %vm7802_vm0, 1.0, %v17483_v50 }
 0x8d7   : > { %v8459_v35 = vadd.f32 %v9282_v6, %v8458_v3  ;;  %v17682_v3 = vld [vmem:[#allocation152_spill] sm:$0xff]  ;;  %vm7805_vm6 = vcmp.ge.f32.partialorder %v7408_v15, 1.0  ;;  %v9290_v60 = vsel %vm7803_vm3, 1.0, %v17483_v50  ;;  %v9291_v30 = vsel %vm7804_vm4, 1.0, %v17483_v50 }
 0x8d8   : > { %v8357_v7 = vadd.f32 %v9283_v25, %v8356_v18  ;;  %v7412_v6 = vadd.f32 %v17682_v3, %v15377_v22  ;;  %v17683_v18 = vld [vmem:[#allocation440_spill] sm:$0xff]  ;;  %vm7806_vm12 = vcmp.ge.f32.partialorder %v7410_v27, 1.0  ;;  %v9292_v15 = vsel %vm7805_vm6, 1.0, %v17483_v50 }
 0x8d9   : > { %v8460_v14 = vadd.f32 %v9284_v11, %v8459_v35  ;;  %v7416_v25 = vadd.f32 %v17683_v18, %v15374_v43  ;;  %v17684_v35 = vld [vmem:[#allocation24_spill] sm:$0xff]  ;;  %v9293_v27 = vsel %vm7806_vm12, 1.0, %v17483_v50 }
 0x8da   : > { %v8358_v29 = vadd.f32 %v9285_v46, %v8357_v7  ;;  %v7418_v11 = vadd.f32 %v17684_v35, %v15377_v22  ;;  %v17685_v7 = vld [vmem:[#allocation34_spill] sm:$0xff]  ;;  %vm7807_vm5 = vcmp.ge.f32.partialorder %v7412_v6, 1.0 }
 0x8db   : > { %v8461_v8 = vadd.f32 %v9286_v17, %v8460_v14  ;;  %v7420_v46 = vadd.f32 %v17685_v7, %v15374_v43  ;;  %v17686_v14 = vld [vmem:[#allocation35_spill] sm:$0xff]  ;;  %vm7808_vm7 = vcmp.ge.f32.partialorder %v7416_v25, 1.0  ;;  %v9294_v6 = vsel %vm7807_vm5, 1.0, %v17483_v50 }
 0x8dc   : > { %v8359_v37 = vadd.f32 %v9287_v62, %v8358_v29  ;;  %v7422_v17 = vadd.f32 %v17686_v14, %v15377_v22  ;;  %v17687_v29 = vld [vmem:[#allocation154_spill] sm:$0xff]  ;;  %vm7809_vm1 = vcmp.ge.f32.partialorder %v7418_v11, 1.0  ;;  %v9295_v25 = vsel %vm7808_vm7, 1.0, %v17483_v50 }
 0x8dd   : > { %v8462_v21 = vadd.f32 %v9288_v55, %v8461_v8  ;;  %v7426_v62 = vadd.f32 %v17687_v29, %v15374_v43  ;;  %v17688_v8 = vld [vmem:[#allocation321_spill] sm:$0xff]  ;;  %vm7810_vm8 = vcmp.ge.f32.partialorder %v7420_v46, 1.0  ;;  %v9296_v11 = vsel %vm7809_vm1, 1.0, %v17483_v50 }
 0x8de   : > { %v8360_v61 = vadd.f32 %v9289_v0, %v8359_v37  ;;  %v7428_v55 = vadd.f32 %v17688_v8, %v15377_v22  ;;  %v17689_v37 = vld [vmem:[#allocation319_spill] sm:$0xff]  ;;  %vm7811_vm9 = vcmp.ge.f32.partialorder %v7422_v17, 1.0  ;;  %v9297_v46 = vsel %vm7810_vm8, 1.0, %v17483_v50 }
 0x8df   : > { %v8463_v58 = vadd.f32 %v9290_v60, %v8462_v21  ;;  %v7430_v0 = vadd.f32 %v17689_v37, %v15374_v43  ;;  %v17690_v21 = vld [vmem:[#allocation28_spill] sm:$0xff]  ;;  %vm7812_vm15 = vcmp.ge.f32.partialorder %v7426_v62, 1.0  ;;  %v9298_v17 = vsel %vm7811_vm9, 1.0, %v17483_v50 }
 0x8e0   : > { %v8361_v3 = vadd.f32 %v9291_v30, %v8360_v61  ;;  %v7432_v60 = vadd.f32 %v17690_v21, %v15377_v22  ;;  %v17691_v61 = vld [vmem:[#allocation153_spill] sm:$0xff]  ;;  %vm7813_vm10 = vcmp.ge.f32.partialorder %v7428_v55, 1.0  ;;  %v9299_v62 = vsel %vm7812_vm15, 1.0, %v17483_v50 }
 0x8e1   : > { %v8464_v18 = vadd.f32 %v9292_v15, %v8463_v58  ;;  %v7436_v30 = vadd.f32 %v17691_v61, %v15374_v43  ;;  %v17692_v58 = vld [vmem:[#allocation325_spill] sm:$0xff]  ;;  %vm7814_vm11 = vcmp.ge.f32.partialorder %v7430_v0, 1.0  ;;  %v7446_v0 = vadd.f32 %v15094_v10, %v15374_v43 }
 0x8e2   : > { %v8362_v35 = vadd.f32 %v9293_v27, %v8361_v3  ;;  %v7438_v15 = vadd.f32 %v17692_v58, %v15377_v22  ;;  %v17693_v3 = vld [vmem:[#allocation29_spill] sm:$0xff]  ;;  %vm7815_vm13 = vcmp.ge.f32.partialorder %v7432_v60, 1.0  ;;  %v7448_v60 = vadd.f32 %v15098_v51, %v15377_v22 }
 0x8e3   : > { %v8465_v7 = vadd.f32 %v9294_v6, %v8464_v18  ;;  %v7440_v27 = vadd.f32 %v17693_v3, %v15374_v43  ;;  %v17694_v6 = vld [vmem:[#allocation323_spill] sm:$0xff]  ;;  %vm7816_vm2 = vcmp.ge.f32.partialorder %v7436_v30, 1.0  ;;  %v7450_v30 = vadd.f32 %v15100_v20, %v15374_v43 }
 0x8e4   : > { %v8363_v14 = vadd.f32 %v9295_v25, %v8362_v35  ;;  %v7442_v37 = vadd.f32 %v17694_v6, %v15377_v22  ;;  %v9300_v25 = vsel %vm7813_vm10, 1.0, %v17483_v50  ;;  %vm7817_vm14 = vcmp.ge.f32.partialorder %v7438_v15, 1.0 }
 0x8e5   : > { %v8466_v29 = vadd.f32 %v9296_v11, %v8465_v7  ;;  %v9301_v11 = vsel %vm7814_vm11, 1.0, %v17483_v50  ;;  %vm7818_vm0 = vcmp.ge.f32.partialorder %v7440_v27, 1.0  ;;  %v9303_v10 = vsel %vm7816_vm2, 1.0, %v17483_v50 }
 0x8e6   : > { %v8364_v8 = vadd.f32 %v9297_v46, %v8363_v14  ;;  %v15621_v18 = vpop.f32.mrb[152].mxu1  ;;  %v9302_v46 = vsel %vm7815_vm13, 1.0, %v17483_v50  ;;  %vm7819_vm3 = vcmp.ge.f32.partialorder %v7442_v37, 1.0  ;;  %v9304_v3 = vsel %vm7817_vm14, 1.0, %v17483_v50 }
 0x8e7   : > { %v8467_v55 = vadd.f32 %v9298_v17, %v8466_v29  ;;  %v15626_v35 = vpop.f32.mrb[153].mxu1  ;;  %v17695_v29 = vld [vmem:[#allocation39_spill] sm:$0xff]  ;;  %vm7820_vm4 = vcmp.ge.f32.partialorder %v7446_v0, 1.0  ;;  %v7456_v51 = vadd.f32 %v15125_v32, %v15374_v43  ;;  %v9305_v27 = vsel %vm7818_vm0, 1.0, %v17483_v50  ;;  %v17696_v32 = vld [vmem:[#allocation332_spill] sm:$0xff] }
 0x8e8   : > { %v8365_v21 = vadd.f32 %v9299_v62, %v8364_v8  ;;  %v15631_v7 = vpop.f32.mrb[154].mxu1  ;;  %v7452_v17 = vadd.f32 %v17695_v29, %v15377_v22  ;;  %vm7821_vm6 = vcmp.ge.f32.partialorder %v7448_v60, 1.0  ;;  %v7458_v20 = vadd.f32 %v15128_v63, %v15377_v22 }
 0x8e9   : > { %v8468_v61 = vadd.f32 %v9300_v25, %v8467_v55  ;;  %v15636_v14 = vpop.f32.mrb[155].mxu1  ;;  %v9306_v6 = vsel %vm7819_vm3, 1.0, %v17483_v50  ;;  %vm7822_vm12 = vcmp.ge.f32.partialorder %v7450_v30, 1.0  ;;  %v7460_v37 = vadd.f32 %v15133_v48, %v15374_v43 }
 0x8ea   : > { %v8366_v58 = vadd.f32 %v9301_v11, %v8365_v21  ;;  %v9307_v25 = vsel %vm7820_vm4, 1.0, %v17483_v50  ;;  %vm7823_vm5 = vcmp.ge.f32.partialorder %v7452_v17, 1.0  ;;  %v7462_v0 = vadd.f32 %v17696_v32, %v15377_v22 }
 0x8eb   : > { %v8469_v15 = vadd.f32 %v9302_v46, %v8468_v61  ;;  %v9308_v11 = vsel %vm7821_vm6, 1.0, %v17483_v50  ;;  %vm7824_vm7 = vcmp.ge.f32.partialorder %v7456_v51, 1.0  ;;  %v7466_v63 = vadd.f32 %v15151_v5, %v15374_v43 }
 0x8ec   : > { %v8367_v8 = vadd.f32 %v9303_v10, %v8366_v58  ;;  %v9309_v61 = vsel %vm7822_vm12, 1.0, %v17483_v50  ;;  %vm7825_vm1 = vcmp.ge.f32.partialorder %v7458_v20, 1.0  ;;  %v7468_v48 = vadd.f32 %v15153_v31, %v15377_v22 }
 0x8ed   : > { %v8470_v62 = vadd.f32 %v9304_v3, %v8469_v15  ;;  %v9310_v30 = vsel %vm7823_vm5, 1.0, %v17483_v50  ;;  %vm7826_vm8 = vcmp.ge.f32.partialorder %v7460_v37, 1.0  ;;  %v7470_v58 = vadd.f32 %v15155_v26, %v15374_v43 }
 0x8ee   : > { %v8368_v55 = vadd.f32 %v9305_v27, %v8367_v8  ;;  %v9311_v29 = vsel %vm7824_vm7, 1.0, %v17483_v50  ;;  %vm7827_vm9 = vcmp.ge.f32.partialorder %v7462_v0, 1.0  ;;  %v7472_v5 = vadd.f32 %v15157_v40, %v15377_v22 }
 0x8ef   : > { %v8471_v21 = vadd.f32 %v9306_v6, %v8470_v62  ;;  %v9312_v15 = vsel %vm7825_vm1, 1.0, %v17483_v50  ;;  %vm7828_vm15 = vcmp.ge.f32.partialorder %v7466_v63, 1.0  ;;  %v7476_v31 = vadd.f32 %v15166_v2, %v15374_v43 }
 0x8f0   : > { %v8369_v60 = vadd.f32 %v9307_v25, %v8368_v55  ;;  %v9313_v51 = vsel %vm7826_vm8, 1.0, %v17483_v50  ;;  %vm7829_vm10 = vcmp.ge.f32.partialorder %v7468_v48, 1.0  ;;  %v7478_v26 = vadd.f32 %v15169_v16, %v15377_v22 }
 0x8f1   : > { %v8472_v46 = vadd.f32 %v9308_v11, %v8471_v21  ;;  %v9314_v27 = vsel %vm7827_vm9, 1.0, %v17483_v50  ;;  %vm7830_vm11 = vcmp.ge.f32.partialorder %v7470_v58, 1.0  ;;  %v7480_v40 = vadd.f32 %v15172_v28, %v15374_v43 }
 0x8f2   : > { %v8370_v10 = vadd.f32 %v9309_v61, %v8369_v60  ;;  %v9315_v62 = vsel %vm7828_vm15, 1.0, %v17483_v50  ;;  %vm7831_vm13 = vcmp.ge.f32.partialorder %v7472_v5, 1.0  ;;  %v7482_v2 = vadd.f32 %v15175_v13, %v15377_v22 }
 0x8f3   : > { %v8473_v17 = vadd.f32 %v9310_v30, %v8472_v46  ;;  %v9316_v37 = vsel %vm7829_vm10, 1.0, %v17483_v50  ;;  %vm7832_vm2 = vcmp.ge.f32.partialorder %v7476_v31, 1.0  ;;  %v7486_v16 = vadd.f32 %v15191_v1, %v15374_v43 }
 0x8f4   : > { %v8371_v3 = vadd.f32 %v9311_v29, %v8370_v10  ;;  %v9317_v25 = vsel %vm7830_vm11, 1.0, %v17483_v50  ;;  %vm7833_vm14 = vcmp.ge.f32.partialorder %v7478_v26, 1.0  ;;  %v7488_v28 = vadd.f32 %v15193_v53, %v15377_v22 }
 0x8f5   : > { %v8474_v8 = vadd.f32 %v9312_v15, %v8473_v17  ;;  %v9318_v21 = vsel %vm7831_vm13, 1.0, %v17483_v50  ;;  %vm7834_vm0 = vcmp.ge.f32.partialorder %v7480_v40, 1.0  ;;  %v7490_v13 = vadd.f32 %v15195_v41, %v15374_v43 }
 0x8f6   : > { %v8372_v20 = vadd.f32 %v9313_v51, %v8371_v3  ;;  %v9319_v1 = vsel %vm7832_vm2, 1.0, %v17483_v50  ;;  %vm7835_vm3 = vcmp.ge.f32.partialorder %v7482_v2, 1.0  ;;  %v7492_v60 = vadd.f32 %v15197_v44, %v15377_v22 }
 0x8f7   : > { %v8475_v6 = vadd.f32 %v9314_v27, %v8474_v8  ;;  %v9320_v48 = vsel %vm7833_vm14, 1.0, %v17483_v50  ;;  %vm7836_vm4 = vcmp.ge.f32.partialorder %v7486_v16, 1.0  ;;  %v7496_v46 = vadd.f32 %v15206_v12, %v15374_v43 }
 0x8f8   : > { %v8373_v55 = vadd.f32 %v9315_v62, %v8372_v20  ;;  %v9321_v58 = vsel %vm7834_vm0, 1.0, %v17483_v50  ;;  %vm7837_vm6 = vcmp.ge.f32.partialorder %v7488_v28, 1.0  ;;  %v7498_v10 = vadd.f32 %v15208_v19, %v15377_v22 }
 0x8f9   : > { %v8476_v32 = vadd.f32 %v9316_v37, %v8475_v6  ;;  %v15686_v0 = vpop.f32.mrb[156].mxu1  ;;  %v9322_v44 = vsel %vm7835_vm3, 1.0, %v17483_v50  ;;  %vm7838_vm12 = vcmp.ge.f32.partialorder %v7490_v13, 1.0  ;;  %v7500_v5 = vadd.f32 %v15210_v42, %v15374_v43 }
 0x8fa   : > { %v8374_v11 = vadd.f32 %v9317_v25, %v8373_v55  ;;  %v15691_v63 = vpop.f32.mrb[157].mxu1  ;;  %v9323_v15 = vsel %vm7836_vm4, 1.0, %v17483_v50  ;;  %vm7839_vm5 = vcmp.ge.f32.partialorder %v7492_v60, 1.0  ;;  %v7502_v12 = vadd.f32 %v15213_v38, %v15377_v22 }
 0x8fb   : > { %v8477_v61 = vadd.f32 %v9318_v21, %v8476_v32  ;;  %v15696_v53 = vpop.f32.mrb[158].mxu1  ;;  %v9324_v3 = vsel %vm7837_vm6, 1.0, %v17483_v50  ;;  %vm7840_vm7 = vcmp.ge.f32.partialorder %v7496_v46, 1.0  ;;  %v7506_v19 = vadd.f32 %v15217_v9, %v15374_v43 }
 0x8fc   : > { %v8375_v30 = vadd.f32 %v9319_v1, %v8374_v11  ;;  %v15701_v41 = vpop.f32.mrb[159].mxu1  ;;  %v9325_v26 = vsel %vm7838_vm12, 1.0, %v17483_v50  ;;  %vm7841_vm1 = vcmp.ge.f32.partialorder %v7498_v10, 1.0  ;;  %v7508_v42 = vadd.f32 %v15220_v4, %v15377_v22  ;;  %v17697_v4 = vld [vmem:[#allocation330_spill] sm:$0xff]  ;;  %v17702_v10 = vld [vmem:[#allocation156_spill] sm:$0xff] }
 0x8fd   : > { %v8478_v29 = vadd.f32 %v9320_v48, %v8477_v61  ;;  %v9326_v27 = vsel %vm7839_vm5, 1.0, %v17483_v50  ;;  %vm7842_vm8 = vcmp.ge.f32.partialorder %v7500_v5, 1.0  ;;  %v7510_v38 = vadd.f32 %v15223_v39, %v15374_v43  ;;  %v17698_v39 = vld [vmem:[#allocation155_spill] sm:$0xff]  ;;  %v17700_v11 = vld [vmem:[#allocation38_spill] sm:$0xff]  ;;  %v17701_v48 = vld [vmem:[#allocation336_spill] sm:$0xff] }
 0x8fe   : > { %v8376_v17 = vadd.f32 %v9321_v58, %v8375_v30  ;;  %v9327_v20 = vsel %vm7840_vm7, 1.0, %v17483_v50  ;;  %vm7843_vm9 = vcmp.ge.f32.partialorder %v7502_v12, 1.0  ;;  %v7512_v9 = vadd.f32 %v15226_v33, %v15377_v22  ;;  %v17699_v33 = vld [vmem:[#allocation33_spill] sm:$0xff] }
 0x8ff   : > { %v8479_v31 = vadd.f32 %v9322_v44, %v8478_v29  ;;  %v9328_v2 = vsel %vm7841_vm1, 1.0, %v17483_v50  ;;  %vm7844_vm15 = vcmp.ge.f32.partialorder %v7506_v19, 1.0  ;;  %v7516_v6 = vadd.f32 %v17697_v4, %v15374_v43 }
 0x900   : > { %v8377_v51 = vadd.f32 %v9323_v15, %v8376_v17  ;;  %v9329_v16 = vsel %vm7842_vm8, 1.0, %v17483_v50  ;;  %vm7845_vm10 = vcmp.ge.f32.partialorder %v7508_v42, 1.0  ;;  %v7518_v55 = vadd.f32 %v17698_v39, %v15377_v22  ;;  %v17703_v17 = vld [vmem:[#allocation334_spill] sm:$0xff] }
 0x901   : > { %v8480_v8 = vadd.f32 %v9324_v3, %v8479_v31  ;;  %v9330_v28 = vsel %vm7843_vm9, 1.0, %v17483_v50  ;;  %vm7846_vm11 = vcmp.ge.f32.partialorder %v7510_v38, 1.0  ;;  %v7520_v32 = vadd.f32 %v17699_v33, %v15374_v43  ;;  %v17704_v3 = vld [vmem:[#allocation32_spill] sm:$0xff]  ;;  %v17705_v42 = vld [vmem:[#allocation42_spill] sm:$0xff] }
 0x902   : > { %v8378_v40 = vadd.f32 %v9325_v26, %v8377_v51  ;;  %v9331_v13 = vsel %vm7844_vm15, 1.0, %v17483_v50  ;;  %vm7847_vm13 = vcmp.ge.f32.partialorder %v7512_v9, 1.0  ;;  %v7522_v1 = vadd.f32 %v17700_v11, %v15377_v22 }
 0x903   : > { %v8481_v62 = vadd.f32 %v9326_v27, %v8480_v8  ;;  %v9332_v61 = vsel %vm7845_vm10, 1.0, %v17483_v50  ;;  %vm7848_vm2 = vcmp.ge.f32.partialorder %v7516_v6, 1.0  ;;  %v7526_v46 = vadd.f32 %v17701_v48, %v15374_v43  ;;  %v17707_v6 = vld [vmem:[#allocation158_spill] sm:$0xff] }
 0x904   : > { %v8379_v37 = vadd.f32 %v9327_v20, %v8378_v40  ;;  %v9333_v58 = vsel %vm7846_vm11, 1.0, %v17483_v50  ;;  %vm7849_vm14 = vcmp.ge.f32.partialorder %v7518_v55, 1.0  ;;  %v7528_v29 = vadd.f32 %v17702_v10, %v15377_v22  ;;  %v17706_v20 = vld [vmem:[#allocation43_spill] sm:$0xff] }
 0x905   : > { %v8482_v25 = vadd.f32 %v9328_v2, %v8481_v62  ;;  %v9334_v5 = vsel %vm7847_vm13, 1.0, %v17483_v50  ;;  %vm7850_vm0 = vcmp.ge.f32.partialorder %v7520_v32, 1.0  ;;  %v7530_v15 = vadd.f32 %v17703_v17, %v15374_v43 }
 0x906   : > { %v8380_v21 = vadd.f32 %v9329_v16, %v8379_v37  ;;  %v9335_v31 = vsel %vm7848_vm2, 1.0, %v17483_v50  ;;  %vm7851_vm3 = vcmp.ge.f32.partialorder %v7522_v1, 1.0  ;;  %v7532_v19 = vadd.f32 %v17704_v3, %v15377_v22 }
 0x907   : > { %v8483_v60 = vadd.f32 %v9330_v28, %v8482_v25  ;;  %v9336_v26 = vsel %vm7849_vm14, 1.0, %v17483_v50  ;;  %vm7852_vm4 = vcmp.ge.f32.partialorder %v7526_v46, 1.0  ;;  %v7536_v8 = vadd.f32 %v17705_v42, %v15374_v43  ;;  %v17708_v25 = vld [vmem:[#allocation329_spill] sm:$0xff] }
 0x908   : > { %v8381_v30 = vadd.f32 %v9331_v13, %v8380_v21  ;;  %v9337_v40 = vsel %vm7850_vm0, 1.0, %v17483_v50  ;;  %vm7853_vm6 = vcmp.ge.f32.partialorder %v7528_v29, 1.0  ;;  %v7538_v9 = vadd.f32 %v17706_v20, %v15377_v22  ;;  %v17709_v13 = vld [vmem:[#allocation327_spill] sm:$0xff] }
 0x909   : > { %v8484_v44 = vadd.f32 %v9332_v61, %v8483_v60  ;;  %v9338_v4 = vsel %vm7851_vm3, 1.0, %v17483_v50  ;;  %vm7854_vm12 = vcmp.ge.f32.partialorder %v7530_v15, 1.0  ;;  %v7540_v37 = vadd.f32 %v17707_v6, %v15374_v43  ;;  %v17710_v61 = vld [vmem:[#allocation36_spill] sm:$0xff] }
 0x90a   : > { %v8382_v12 = vadd.f32 %v9333_v58, %v8381_v30  ;;  %v9339_v55 = vsel %vm7852_vm4, 1.0, %v17483_v50  ;;  %vm7855_vm5 = vcmp.ge.f32.partialorder %v7532_v19, 1.0  ;;  %v7542_v28 = vadd.f32 %v17708_v25, %v15377_v22  ;;  %v17711_v58 = vld [vmem:[#allocation157_spill] sm:$0xff] }
 0x90b   : > { %v8485_v51 = vadd.f32 %v9334_v5, %v8484_v44  ;;  %v9340_v21 = vsel %vm7853_vm6, 1.0, %v17483_v50  ;;  %vm7856_vm7 = vcmp.ge.f32.partialorder %v7536_v8, 1.0  ;;  %v7546_v11 = vadd.f32 %v17709_v13, %v15374_v43  ;;  %v17712_v5 = vld [vmem:[#allocation333_spill] sm:$0xff] }
 0x90c   : > { %v8383_v27 = vadd.f32 %v9335_v31, %v8382_v12  ;;  %v15751_v38 = vpop.f32.mrb[160].mxu1  ;;  %v9341_v60 = vsel %vm7854_vm12, 1.0, %v17483_v50  ;;  %vm7857_vm1 = vcmp.ge.f32.partialorder %v7538_v9, 1.0  ;;  %v7548_v48 = vadd.f32 %v17710_v61, %v15377_v22  ;;  %v17713_v31 = vld [vmem:[#allocation37_spill] sm:$0xff] }
 0x90d   : > { %v8486_v62 = vadd.f32 %v9336_v26, %v8485_v51  ;;  %v15756_v2 = vpop.f32.mrb[161].mxu1  ;;  %v9342_v30 = vsel %vm7855_vm5, 1.0, %v17483_v50  ;;  %vm7858_vm8 = vcmp.ge.f32.partialorder %v7540_v37, 1.0  ;;  %v7550_v10 = vadd.f32 %v17711_v58, %v15374_v43  ;;  %v17714_v26 = vld [vmem:[#allocation331_spill] sm:$0xff] }
 0x90e   : > { %v8384_v16 = vadd.f32 %v9337_v40, %v8383_v27  ;;  %v15761_v39 = vpop.f32.mrb[162].mxu1  ;;  %v9343_v44 = vsel %vm7856_vm7, 1.0, %v17483_v50  ;;  %vm7859_vm9 = vcmp.ge.f32.partialorder %v7542_v28, 1.0  ;;  %v7552_v17 = vadd.f32 %v17712_v5, %v15377_v22  ;;  %v17715_v40 = vld [vmem:[#allocation47_spill] sm:$0xff] }
 0x90f   : > { %v8487_v33 = vadd.f32 %v9338_v4, %v8486_v62  ;;  %v15766_v32 = vpop.f32.mrb[163].mxu1  ;;  %v9344_v12 = vsel %vm7857_vm1, 1.0, %v17483_v50  ;;  %vm7860_vm15 = vcmp.ge.f32.partialorder %v7546_v11, 1.0  ;;  %v7556_v3 = vadd.f32 %v17713_v31, %v15374_v43  ;;  %v17716_v4 = vld [vmem:[#allocation340_spill] sm:$0xff] }
 0x910   : > { %v8385_v1 = vadd.f32 %v9339_v55, %v8384_v16  ;;  %v9345_v51 = vsel %vm7858_vm8, 1.0, %v17483_v50  ;;  %vm7861_vm10 = vcmp.ge.f32.partialorder %v7548_v48, 1.0  ;;  %v7558_v42 = vadd.f32 %v17714_v26, %v15377_v22  ;;  %v17717_v55 = vld [vmem:[#allocation338_spill] sm:$0xff] }
 0x911   : > { %v8488_v46 = vadd.f32 %v9340_v21, %v8487_v33  ;;  %v9346_v27 = vsel %vm7859_vm9, 1.0, %v17483_v50  ;;  %vm7862_vm11 = vcmp.ge.f32.partialorder %v7550_v10, 1.0  ;;  %v7560_v20 = vadd.f32 %v17715_v40, %v15374_v43  ;;  %v17718_v21 = vld [vmem:[#allocation159_spill] sm:$0xff] }
 0x912   : > { %v8386_v29 = vadd.f32 %v9341_v60, %v8385_v1  ;;  %v9347_v62 = vsel %vm7860_vm15, 1.0, %v17483_v50  ;;  %vm7863_vm13 = vcmp.ge.f32.partialorder %v7552_v17, 1.0  ;;  %v7562_v6 = vadd.f32 %v17716_v4, %v15377_v22  ;;  %v17719_v60 = vld [vmem:[#allocation41_spill] sm:$0xff]  ;;  %v17725_v4 = vld [vmem:[#allocation40_spill] sm:$0xff] }
 0x913   : > { %v8489_v15 = vadd.f32 %v9342_v30, %v8488_v46  ;;  %v9348_v16 = vsel %vm7861_vm10, 1.0, %v17483_v50  ;;  %vm7864_vm2 = vcmp.ge.f32.partialorder %v7556_v3, 1.0  ;;  %v7566_v25 = vadd.f32 %v17717_v55, %v15374_v43  ;;  %v17720_v30 = vld [vmem:[#allocation46_spill] sm:$0xff] }
 0x914   : > { %v8387_v19 = vadd.f32 %v9343_v44, %v8386_v29  ;;  %v9349_v33 = vsel %vm7862_vm11, 1.0, %v17483_v50  ;;  %vm7865_vm14 = vcmp.ge.f32.partialorder %v7558_v42, 1.0  ;;  %v7568_v13 = vadd.f32 %v17718_v21, %v15377_v22  ;;  %v17721_v44 = vld [vmem:[#allocation344_spill] sm:$0xff] }
 0x915   : > { %v8490_v8 = vadd.f32 %v9344_v12, %v8489_v15  ;;  %v9350_v1 = vsel %vm7863_vm13, 1.0, %v17483_v50  ;;  %vm7866_vm0 = vcmp.ge.f32.partialorder %v7560_v20, 1.0  ;;  %v7570_v61 = vadd.f32 %v17719_v60, %v15374_v43  ;;  %v17722_v12 = vld [vmem:[#allocation50_spill] sm:$0xff] }
 0x916   : > { %v8388_v9 = vadd.f32 %v9345_v51, %v8387_v19  ;;  %v9351_v46 = vsel %vm7864_vm2, 1.0, %v17483_v50  ;;  %vm7867_vm3 = vcmp.ge.f32.partialorder %v7562_v6, 1.0  ;;  %v7572_v58 = vadd.f32 %v17720_v30, %v15377_v22  ;;  %v17723_v51 = vld [vmem:[#allocation160_spill] sm:$0xff] }
 0x917   : > { %v8491_v37 = vadd.f32 %v9346_v27, %v8490_v8  ;;  %v9352_v29 = vsel %vm7865_vm14, 1.0, %v17483_v50  ;;  %vm7868_vm4 = vcmp.ge.f32.partialorder %v7566_v25, 1.0  ;;  %v7576_v5 = vadd.f32 %v17721_v44, %v15374_v43  ;;  %v17724_v27 = vld [vmem:[#allocation342_spill] sm:$0xff]  ;;  %v17726_v25 = vld [vmem:[#allocation51_spill] sm:$0xff] }
 0x918   : > { %v8389_v28 = vadd.f32 %v9347_v62, %v8388_v9  ;;  %v9353_v15 = vsel %vm7866_vm0, 1.0, %v17483_v50  ;;  %vm7869_vm6 = vcmp.ge.f32.partialorder %v7568_v13, 1.0  ;;  %v7578_v31 = vadd.f32 %v17722_v12, %v15377_v22 }
 0x919   : > { %v8492_v11 = vadd.f32 %v9348_v16, %v8491_v37  ;;  %v9354_v19 = vsel %vm7867_vm3, 1.0, %v17483_v50  ;;  %vm7870_vm12 = vcmp.ge.f32.partialorder %v7570_v61, 1.0  ;;  %v7580_v26 = vadd.f32 %v17723_v51, %v15374_v43 }
 0x91a   : > { %v8390_v48 = vadd.f32 %v9349_v33, %v8389_v28  ;;  %v9355_v8 = vsel %vm7868_vm4, 1.0, %v17483_v50  ;;  %vm7871_vm5 = vcmp.ge.f32.partialorder %v7572_v58, 1.0  ;;  %v7582_v40 = vadd.f32 %v17724_v27, %v15377_v22 }
 0x91b   : > { %v8493_v10 = vadd.f32 %v9350_v1, %v8492_v11  ;;  %v9356_v62 = vsel %vm7869_vm6, 1.0, %v17483_v50  ;;  %vm7872_vm7 = vcmp.ge.f32.partialorder %v7576_v5, 1.0  ;;  %v7586_v6 = vadd.f32 %v17725_v4, %v15374_v43  ;;  %v17727_v11 = vld [vmem:[#allocation337_spill] sm:$0xff] }
 0x91c   : > { %v8391_v17 = vadd.f32 %v9351_v46, %v8390_v48  ;;  %v9357_v55 = vsel %vm7870_vm12, 1.0, %v17483_v50  ;;  %vm7873_vm1 = vcmp.ge.f32.partialorder %v7578_v31, 1.0  ;;  %v7588_v28 = vadd.f32 %v17726_v25, %v15377_v22  ;;  %v17728_v46 = vld [vmem:[#allocation162_spill] sm:$0xff] }
 0x91d   : > { %v8494_v3 = vadd.f32 %v9352_v29, %v8493_v10  ;;  %v9358_v13 = vsel %vm7871_vm5, 1.0, %v17483_v50  ;;  %vm7874_vm8 = vcmp.ge.f32.partialorder %v7580_v26, 1.0  ;;  %v7590_v1 = vadd.f32 %v17727_v11, %v15374_v43  ;;  %v17729_v29 = vld [vmem:[#allocation335_spill] sm:$0xff] }
 0x91e   : > { %v8392_v42 = vadd.f32 %v9353_v15, %v8391_v17  ;;  %v9359_v48 = vsel %vm7872_vm7, 1.0, %v17483_v50  ;;  %vm7875_vm9 = vcmp.ge.f32.partialorder %v7582_v40, 1.0  ;;  %v7592_v30 = vadd.f32 %v17728_v46, %v15377_v22  ;;  %v17730_v15 = vld [vmem:[#allocation44_spill] sm:$0xff] }
 0x91f   : > { %v8495_v20 = vadd.f32 %v9354_v19, %v8494_v3  ;;  %v15816_v9 = vpop.f32.mrb[164].mxu1  ;;  %v9360_v10 = vsel %vm7873_vm1, 1.0, %v17483_v50  ;;  %vm7876_vm15 = vcmp.ge.f32.partialorder %v7586_v6, 1.0  ;;  %v7596_v44 = vadd.f32 %v17729_v29, %v15374_v43  ;;  %v17731_v19 = vld [vmem:[#allocation161_spill] sm:$0xff] }
 0x920   : > { %v8393_v37 = vadd.f32 %v9355_v8, %v8392_v42  ;;  %v15821_v16 = vpop.f32.mrb[165].mxu1  ;;  %v9361_v17 = vsel %vm7874_vm8, 1.0, %v17483_v50  ;;  %vm7877_vm10 = vcmp.ge.f32.partialorder %v7588_v28, 1.0  ;;  %v7598_v12 = vadd.f32 %v17730_v15, %v15377_v22  ;;  %v17732_v8 = vld [vmem:[#allocation341_spill] sm:$0xff] }
 0x921   : > { %v8496_v33 = vadd.f32 %v9356_v62, %v8495_v20  ;;  %v15826_v21 = vpop.f32.mrb[166].mxu1  ;;  %v9362_v3 = vsel %vm7875_vm9, 1.0, %v17483_v50  ;;  %vm7878_vm11 = vcmp.ge.f32.partialorder %v7590_v1, 1.0  ;;  %v7600_v51 = vadd.f32 %v17731_v19, %v15374_v43  ;;  %v17733_v62 = vld [vmem:[#allocation45_spill] sm:$0xff] }
 0x922   : > { %v8394_v60 = vadd.f32 %v9357_v55, %v8393_v37  ;;  %v15831_v61 = vpop.f32.mrb[167].mxu1  ;;  %v9363_v42 = vsel %vm7876_vm15, 1.0, %v17483_v50  ;;  %vm7879_vm13 = vcmp.ge.f32.partialorder %v7592_v30, 1.0  ;;  %v7602_v27 = vadd.f32 %v17732_v8, %v15377_v22  ;;  %v17734_v55 = vld [vmem:[#allocation339_spill] sm:$0xff] }
 0x923   : > { %v8497_v58 = vadd.f32 %v9358_v13, %v8496_v33  ;;  %v9364_v20 = vsel %vm7877_vm10, 1.0, %v17483_v50  ;;  %vm7880_vm2 = vcmp.ge.f32.partialorder %v7596_v44, 1.0  ;;  %v7606_v4 = vadd.f32 %v17733_v62, %v15374_v43  ;;  %v17735_v13 = vld [vmem:[#allocation55_spill] sm:$0xff] }
 0x924   : > { %v8395_v5 = vadd.f32 %v9359_v48, %v8394_v60  ;;  %v9365_v37 = vsel %vm7878_vm11, 1.0, %v17483_v50  ;;  %vm7881_vm14 = vcmp.ge.f32.partialorder %v7598_v12, 1.0  ;;  %v7608_v25 = vadd.f32 %v17734_v55, %v15377_v22  ;;  %v17736_v48 = vld [vmem:[#allocation348_spill] sm:$0xff] }
 0x925   : > { %v8498_v31 = vadd.f32 %v9360_v10, %v8497_v58  ;;  %v9366_v33 = vsel %vm7879_vm13, 1.0, %v17483_v50  ;;  %vm7882_vm0 = vcmp.ge.f32.partialorder %v7600_v51, 1.0  ;;  %v7610_v11 = vadd.f32 %v17735_v13, %v15374_v43  ;;  %v17737_v10 = vld [vmem:[#allocation346_spill] sm:$0xff] }
 0x926   : > { %v8396_v26 = vadd.f32 %v9361_v17, %v8395_v5  ;;  %v9367_v60 = vsel %vm7880_vm2, 1.0, %v17483_v50  ;;  %vm7883_vm3 = vcmp.ge.f32.partialorder %v7602_v27, 1.0  ;;  %v7612_v46 = vadd.f32 %v17736_v48, %v15377_v22  ;;  %v17738_v17 = vld [vmem:[#allocation163_spill] sm:$0xff]  ;;  %v17744_v48 = vld [vmem:[#allocation350_spill] sm:$0xff] }
 0x927   : > { %v8499_v40 = vadd.f32 %v9362_v3, %v8498_v31  ;;  %v9368_v58 = vsel %vm7881_vm14, 1.0, %v17483_v50  ;;  %vm7884_vm4 = vcmp.ge.f32.partialorder %v7606_v4, 1.0  ;;  %v7616_v29 = vadd.f32 %v17737_v10, %v15374_v43  ;;  %v17739_v3 = vld [vmem:[#allocation49_spill] sm:$0xff] }
 0x928   : > { %v8397_v6 = vadd.f32 %v9363_v42, %v8396_v26  ;;  %v9369_v5 = vsel %vm7882_vm0, 1.0, %v17483_v50  ;;  %vm7885_vm6 = vcmp.ge.f32.partialorder %v7608_v25, 1.0  ;;  %v7618_v15 = vadd.f32 %v17738_v17, %v15377_v22  ;;  %v17740_v42 = vld [vmem:[#allocation54_spill] sm:$0xff] }
 0x929   : > { %v8500_v28 = vadd.f32 %v9364_v20, %v8499_v40  ;;  %v9370_v31 = vsel %vm7883_vm3, 1.0, %v17483_v50  ;;  %vm7886_vm12 = vcmp.ge.f32.partialorder %v7610_v11, 1.0  ;;  %v7620_v19 = vadd.f32 %v17739_v3, %v15374_v43  ;;  %v17741_v20 = vld [vmem:[#allocation58_spill] sm:$0xff] }
 0x92a   : > { %v8398_v1 = vadd.f32 %v9365_v37, %v8397_v6  ;;  %v9371_v26 = vsel %vm7884_vm4, 1.0, %v17483_v50  ;;  %vm7887_vm5 = vcmp.ge.f32.partialorder %v7612_v46, 1.0  ;;  %v7622_v8 = vadd.f32 %v17740_v42, %v15377_v22  ;;  %v17742_v37 = vld [vmem:[#allocation352_spill] sm:$0xff] }
 0x92b   : > { %v8501_v30 = vadd.f32 %v9366_v33, %v8500_v28  ;;  %v9372_v40 = vsel %vm7885_vm6, 1.0, %v17483_v50  ;;  %vm7888_vm7 = vcmp.ge.f32.partialorder %v7616_v29, 1.0  ;;  %v7626_v62 = vadd.f32 %v17741_v20, %v15374_v43  ;;  %v17743_v33 = vld [vmem:[#allocation164_spill] sm:$0xff] }
 0x92c   : > { %v8399_v44 = vadd.f32 %v9367_v60, %v8398_v1  ;;  %v9373_v6 = vsel %vm7886_vm12, 1.0, %v17483_v50  ;;  %vm7889_vm1 = vcmp.ge.f32.partialorder %v7618_v15, 1.0  ;;  %v7628_v55 = vadd.f32 %v17742_v37, %v15377_v22 }
 0x92d   : > { %v8502_v12 = vadd.f32 %v9368_v58, %v8501_v30  ;;  %v9374_v28 = vsel %vm7887_vm5, 1.0, %v17483_v50  ;;  %vm7890_vm8 = vcmp.ge.f32.partialorder %v7620_v19, 1.0  ;;  %v7630_v13 = vadd.f32 %v17743_v33, %v15374_v43 }
 0x92e   : > { %v8400_v51 = vadd.f32 %v9369_v5, %v8399_v44  ;;  %v9375_v60 = vsel %vm7888_vm7, 1.0, %v17483_v50  ;;  %vm7891_vm9 = vcmp.ge.f32.partialorder %v7622_v8, 1.0  ;;  %v7632_v46 = vadd.f32 %v17744_v48, %v15377_v22 }
 0x92f   : > { %v8503_v27 = vadd.f32 %v9370_v31, %v8502_v12  ;;  %v9376_v10 = vsel %vm7889_vm1, 1.0, %v17483_v50  ;;  %vm7892_vm15 = vcmp.ge.f32.partialorder %v7626_v62, 1.0  ;;  %v7636_v29 = vadd.f32 %v15424_v23, %v15374_v43 }
 0x930   : > { %v8401_v4 = vadd.f32 %v9371_v26, %v8400_v51  ;;  %v9377_v17 = vsel %vm7890_vm8, 1.0, %v17483_v50  ;;  %vm7893_vm10 = vcmp.ge.f32.partialorder %v7628_v55, 1.0  ;;  %v7638_v15 = vadd.f32 %v15429_v54, %v15377_v22 }
 0x931   : > { %v8504_v25 = vadd.f32 %v9372_v40, %v8503_v27  ;;  %v9378_v3 = vsel %vm7891_vm9, 1.0, %v17483_v50  ;;  %vm7894_vm11 = vcmp.ge.f32.partialorder %v7630_v13, 1.0  ;;  %v7640_v51 = vadd.f32 %v15435_v47, %v15374_v43 }
 0x932   : > { %v8402_v11 = vadd.f32 %v9373_v6, %v8401_v4  ;;  %v15881_v1 = vpop.f32.mrb[168].mxu1  ;;  %v9379_v23 = vsel %vm7892_vm15, 1.0, %v17483_v50  ;;  %vm7895_vm13 = vcmp.ge.f32.partialorder %v7632_v46, 1.0  ;;  %v7642_v42 = vadd.f32 %v15441_v52, %v15377_v22 }
 0x933   : > { %v8505_v30 = vadd.f32 %v9374_v28, %v8504_v25  ;;  %v15886_v58 = vpop.f32.mrb[169].mxu1  ;;  %v9380_v8 = vsel %vm7893_vm10, 1.0, %v17483_v50  ;;  %vm7896_vm2 = vcmp.ge.f32.partialorder %v7636_v29, 1.0  ;;  %v7646_v27 = vadd.f32 %v15491_v59, %v15374_v43 }
 0x934   : > { %v8403_v44 = vadd.f32 %v9375_v60, %v8402_v11  ;;  %v15891_v5 = vpop.f32.mrb[170].mxu1  ;;  %v9381_v40 = vsel %vm7894_vm11, 1.0, %v17483_v50  ;;  %vm7897_vm14 = vcmp.ge.f32.partialorder %v7638_v15, 1.0  ;;  %v7648_v47 = vadd.f32 %v15496_v36, %v15377_v22 }
 0x935   : > { %v8506_v12 = vadd.f32 %v9376_v10, %v8505_v30  ;;  %v15896_v31 = vpop.f32.mrb[171].mxu1  ;;  %v9382_v62 = vsel %vm7895_vm13, 1.0, %v17483_v50  ;;  %vm7898_vm0 = vcmp.ge.f32.partialorder %v7640_v51, 1.0  ;;  %v7650_v52 = vadd.f32 %v15501_v45, %v15374_v43 }
 0x936   : > { %v8404_v19 = vadd.f32 %v9377_v17, %v8403_v44  ;;  %v9383_v6 = vsel %vm7896_vm2, 1.0, %v17483_v50  ;;  %vm7899_vm3 = vcmp.ge.f32.partialorder %v7642_v42, 1.0  ;;  %v7652_v59 = vadd.f32 %v15506_v34, %v15377_v22 }
 0x937   : > { %v8507_v26 = vadd.f32 %v9378_v3, %v8506_v12  ;;  %v9384_v25 = vsel %vm7897_vm14, 1.0, %v17483_v50  ;;  %vm7900_vm4 = vcmp.ge.f32.partialorder %v7646_v27, 1.0  ;;  %v7656_v36 = vadd.f32 %v15556_v24, %v15374_v43 }
 0x938   : > { %v8405_v54 = vadd.f32 %v9379_v23, %v8404_v19  ;;  %v9385_v33 = vsel %vm7898_vm0, 1.0, %v17483_v50  ;;  %vm7901_vm6 = vcmp.ge.f32.partialorder %v7648_v47, 1.0  ;;  %v7658_v45 = vadd.f32 %v15561_v57, %v15377_v22 }
 0x939   : > { %v8508_v20 = vadd.f32 %v9380_v8, %v8507_v26  ;;  %v9386_v11 = vsel %vm7899_vm3, 1.0, %v17483_v50  ;;  %vm7902_vm12 = vcmp.ge.f32.partialorder %v7650_v52, 1.0  ;;  %v7660_v34 = vadd.f32 %v15566_v56, %v15374_v43 }
 0x93a   : > { %v8406_v4 = vadd.f32 %v9381_v40, %v8405_v54  ;;  %v9387_v48 = vsel %vm7900_vm4, 1.0, %v17483_v50  ;;  %vm7903_vm5 = vcmp.ge.f32.partialorder %v7652_v59, 1.0  ;;  %v7662_v24 = vadd.f32 %v15571_v49, %v15377_v22 }
 0x93b   : > { %v8509_v37 = vadd.f32 %v9382_v62, %v8508_v20  ;;  %v9388_v30 = vsel %vm7901_vm6, 1.0, %v17483_v50  ;;  %vm7904_vm7 = vcmp.ge.f32.partialorder %v7656_v36, 1.0  ;;  %v7666_v57 = vadd.f32 %v15621_v18, %v15374_v43 }
 0x93c   : > { %v8407_v55 = vadd.f32 %v9383_v6, %v8406_v4  ;;  %v9389_v29 = vsel %vm7902_vm12, 1.0, %v17483_v50  ;;  %vm7905_vm1 = vcmp.ge.f32.partialorder %v7658_v45, 1.0  ;;  %v7668_v56 = vadd.f32 %v15626_v35, %v15377_v22 }
 0x93d   : > { %v8510_v28 = vadd.f32 %v9384_v25, %v8509_v37  ;;  %v9390_v17 = vsel %vm7903_vm5, 1.0, %v17483_v50  ;;  %vm7906_vm8 = vcmp.ge.f32.partialorder %v7660_v34, 1.0  ;;  %v7670_v49 = vadd.f32 %v15631_v7, %v15374_v43 }
 0x93e   : > { %v8408_v13 = vadd.f32 %v9385_v33, %v8407_v55  ;;  %v9391_v12 = vsel %vm7904_vm7, 1.0, %v17483_v50  ;;  %vm7907_vm9 = vcmp.ge.f32.partialorder %v7662_v24, 1.0  ;;  %v7672_v18 = vadd.f32 %v15636_v14, %v15377_v22 }
 0x93f   : > { %v8511_v60 = vadd.f32 %v9386_v11, %v8510_v28  ;;  %v9392_v19 = vsel %vm7905_vm1, 1.0, %v17483_v50  ;;  %vm7908_vm15 = vcmp.ge.f32.partialorder %v7666_v57, 1.0  ;;  %v7676_v35 = vadd.f32 %v15686_v0, %v15374_v43 }
 0x940   : > { %v8409_v46 = vadd.f32 %v9387_v48, %v8408_v13  ;;  %v9393_v23 = vsel %vm7906_vm8, 1.0, %v17483_v50  ;;  %vm7909_vm10 = vcmp.ge.f32.partialorder %v7668_v56, 1.0  ;;  %v7678_v7 = vadd.f32 %v15691_v63, %v15377_v22 }
 0x941   : > { %v8512_v10 = vadd.f32 %v9388_v30, %v8511_v60  ;;  %v9394_v8 = vsel %vm7907_vm9, 1.0, %v17483_v50  ;;  %vm7910_vm11 = vcmp.ge.f32.partialorder %v7670_v49, 1.0  ;;  %v7680_v14 = vadd.f32 %v15696_v53, %v15374_v43 }
 0x942   : > { %v8410_v44 = vadd.f32 %v9389_v29, %v8409_v46  ;;  %v9395_v0 = vsel %vm7908_vm15, 1.0, %v17483_v50  ;;  %vm7911_vm13 = vcmp.ge.f32.partialorder %v7672_v18, 1.0  ;;  %v7682_v40 = vadd.f32 %v15701_v41, %v15377_v22 }
 0x943   : > { %v8513_v15 = vadd.f32 %v9390_v17, %v8512_v10  ;;  %v9396_v63 = vsel %vm7909_vm10, 1.0, %v17483_v50  ;;  %vm7912_vm2 = vcmp.ge.f32.partialorder %v7676_v35, 1.0  ;;  %v7686_v62 = vadd.f32 %v15751_v38, %v15374_v43 }
 0x944   : > { %v8411_v3 = vadd.f32 %v9391_v12, %v8410_v44  ;;  %v9397_v53 = vsel %vm7910_vm11, 1.0, %v17483_v50  ;;  %vm7913_vm14 = vcmp.ge.f32.partialorder %v7678_v7, 1.0  ;;  %v7688_v6 = vadd.f32 %v15756_v2, %v15377_v22 }
 0x945   : > { %v8514_v51 = vadd.f32 %v9392_v19, %v8513_v15  ;;  %v15946_v26 = vpop.f32.mrb[172].mxu1  ;;  %v9398_v59 = vsel %vm7911_vm13, 1.0, %v17483_v50  ;;  %vm7914_vm0 = vcmp.ge.f32.partialorder %v7680_v14, 1.0  ;;  %v7690_v41 = vadd.f32 %v15761_v39, %v15374_v43 }
 0x946   : > { %v8412_v42 = vadd.f32 %v9393_v23, %v8411_v3  ;;  %v7717_v54 = vpop.f32.mrb[173].mxu1  ;;  %v9399_v25 = vsel %vm7912_vm2, 1.0, %v17483_v50  ;;  %vm7915_vm3 = vcmp.ge.f32.partialorder %v7682_v40, 1.0  ;;  %v7692_v38 = vadd.f32 %v15766_v32, %v15377_v22 }
 0x947   : > { %v8515_v27 = vadd.f32 %v9394_v8, %v8514_v51  ;;  %v7719_v20 = vpop.f32.mrb[174].mxu1  ;;  %v9400_v28 = vsel %vm7913_vm14, 1.0, %v17483_v50  ;;  %vm7916_vm4 = vcmp.ge.f32.partialorder %v7686_v62, 1.0  ;;  %v7696_v2 = vadd.f32 %v15816_v9, %v15374_v43 }
 0x948   : > { %v8413_v47 = vadd.f32 %v9395_v0, %v8412_v42  ;;  %v7721_v4 = vpop.f32.mrb[175].mxu1  ;;  %v9401_v45 = vsel %vm7914_vm0, 1.0, %v17483_v50  ;;  %vm7917_vm6 = vcmp.ge.f32.partialorder %v7688_v6, 1.0  ;;  %v7698_v39 = vadd.f32 %v15821_v16, %v15377_v22 }
 0x949   : > { %v8516_v52 = vadd.f32 %v9396_v63, %v8515_v27  ;;  %v9402_v11 = vsel %vm7915_vm3, 1.0, %v17483_v50  ;;  %vm7918_vm12 = vcmp.ge.f32.partialorder %v7690_v41, 1.0  ;;  %v7700_v32 = vadd.f32 %v15826_v21, %v15374_v43 }
 0x94a   : > { %v8414_v37 = vadd.f32 %v9397_v53, %v8413_v47  ;;  %v9403_v60 = vsel %vm7916_vm4, 1.0, %v17483_v50  ;;  %vm7919_vm5 = vcmp.ge.f32.partialorder %v7692_v38, 1.0  ;;  %v7702_v9 = vadd.f32 %v15831_v61, %v15377_v22 }
 0x94b   : > { %v8517_v55 = vadd.f32 %v9398_v59, %v8516_v52  ;;  %v9404_v24 = vsel %vm7917_vm6, 1.0, %v17483_v50  ;;  %vm7920_vm7 = vcmp.ge.f32.partialorder %v7696_v2, 1.0  ;;  %v7706_v16 = vadd.f32 %v15881_v1, %v15374_v43 }
 0x94c   : > { %v8415_v36 = vadd.f32 %v9399_v25, %v8414_v37  ;;  %v9405_v30 = vsel %vm7918_vm12, 1.0, %v17483_v50  ;;  %vm7921_vm1 = vcmp.ge.f32.partialorder %v7698_v39, 1.0  ;;  %v7708_v21 = vadd.f32 %v15886_v58, %v15377_v22 }
 0x94d   : > { %v8518_v33 = vadd.f32 %v9400_v28, %v8517_v55  ;;  %v9406_v10 = vsel %vm7919_vm5, 1.0, %v17483_v50  ;;  %vm7922_vm8 = vcmp.ge.f32.partialorder %v7700_v32, 1.0  ;;  %v7710_v61 = vadd.f32 %v15891_v5, %v15374_v43 }
 0x94e   : > { %v8416_v13 = vadd.f32 %v9401_v45, %v8415_v36  ;;  %v9407_v56 = vsel %vm7920_vm7, 1.0, %v17483_v50  ;;  %vm7923_vm9 = vcmp.ge.f32.partialorder %v7702_v9, 1.0  ;;  %v7712_v1 = vadd.f32 %v15896_v31, %v15377_v22 }
 0x94f   : > { %v8519_v34 = vadd.f32 %v9402_v11, %v8518_v33  ;;  %v9408_v17 = vsel %vm7921_vm1, 1.0, %v17483_v50  ;;  %vm7924_vm15 = vcmp.ge.f32.partialorder %v7706_v16, 1.0  ;;  %v7716_v58 = vadd.f32 %v15946_v26, %v15374_v43 }
 0x950   : > { %v8417_v48 = vadd.f32 %v9403_v60, %v8416_v13  ;;  %v9409_v15 = vsel %vm7922_vm8, 1.0, %v17483_v50  ;;  %vm7925_vm10 = vcmp.ge.f32.partialorder %v7708_v21, 1.0  ;;  %v7718_v5 = vadd.f32 %v7717_v54, %v15377_v22 }
 0x951   : > { %v8520_v46 = vadd.f32 %v9404_v24, %v8519_v34  ;;  %v9410_v18 = vsel %vm7923_vm9, 1.0, %v17483_v50  ;;  %vm7926_vm11 = vcmp.ge.f32.partialorder %v7710_v61, 1.0  ;;  %v7720_v3 = vadd.f32 %v7719_v20, %v15374_v43 }
 0x952   : > { %v8418_v57 = vadd.f32 %v9405_v30, %v8417_v48  ;;  %v9411_v19 = vsel %vm7924_vm15, 1.0, %v17483_v50  ;;  %vm7927_vm13 = vcmp.ge.f32.partialorder %v7712_v1, 1.0  ;;  %v7722_v35 = vadd.f32 %v7721_v4, %v15377_v22 }
 0x953   : > { %v8521_v29 = vadd.f32 %v9406_v10, %v8520_v46  ;;  %v9412_v23 = vsel %vm7925_vm10, 1.0, %v17483_v50  ;;  %vm7928_vm2 = vcmp.ge.f32.partialorder %v7716_v58, 1.0  ;;  %v9413_v42 = vsel %vm7926_vm11, 1.0, %v17483_v50 }
 0x954   : > { %v8419_v44 = vadd.f32 %v9407_v56, %v8418_v57  ;;  %vm7929_vm14 = vcmp.ge.f32.partialorder %v7718_v5, 1.0  ;;  %v9414_v27 = vsel %vm7927_vm13, 1.0, %v17483_v50  ;;  %vm7930_vm0 = vcmp.ge.f32.partialorder %v7720_v3, 1.0 }
 0x955   : > { %v8522_v49 = vadd.f32 %v9408_v17, %v8521_v29  ;;  %v9415_v47 = vsel %vm7928_vm2, 1.0, %v17483_v50  ;;  %vm7931_vm3 = vcmp.ge.f32.partialorder %v7722_v35, 1.0  ;;  %v9416_v52 = vsel %vm7929_vm14, 1.0, %v17483_v50  ;;  %v17745_v35 = vld [vmem:[#allocation530_spill] sm:$0xff] }
 0x956   : > { %v8420_v12 = vadd.f32 %v9409_v15, %v8419_v44  ;;  %v9417_v37 = vsel %vm7930_vm0, 1.0, %v17483_v50  ;;  %v9418_v41 = vsel %vm7931_vm3, 1.0, %v17483_v50  ;;  %v9990_v17 = vmov 1966171168  }
 0x957   : > { %v8523_v31 = vadd.f32 %v9410_v18, %v8522_v49  ;;  %v8542_v58 = vunpack.c.l.s4 %v9990_v17 }
 0x958   : > { %v8421_v51 = vadd.f32 %v9411_v19, %v8420_v12  ;;  %v7725_v7 = vpop.f32.mrb[176].mxu1 }
 0x959   : > { %v8524_v26 = vadd.f32 %v9412_v23, %v8523_v31  ;;  %v7726_v8 = vadd.f32 %v7725_v7, %v15374_v43  ;;  %v7727_v14 = vpop.f32.mrb[177].mxu1  ;;  %v8543_v12 = vunpack.c.0.s8 %v8542_v58  ;;  %v17746_v7 = vlaneseq }
 0x95a   : > { %v8422_v54 = vadd.f32 %v9413_v42, %v8421_v51  ;;  %v7728_v0 = vadd.f32 %v7727_v14, %v15377_v22  ;;  %v7729_v40 = vpop.f32.mrb[178].mxu1 }
 0x95b   : > { %v8525_v20 = vadd.f32 %v9414_v27, %v8524_v26  ;;  %v7730_v63 = vadd.f32 %v7729_v40, %v15374_v43  ;;  %v7731_v62 = vpop.f32.mrb[179].mxu1  ;;  %vm7932_vm4 = vcmp.ge.f32.partialorder %v7726_v8, 1.0  ;;  %v8546_v51 = vsub.s32 %v8543_v12, %v17745_v35 }
 0x95c   : > { %v8423_v4 = vadd.f32 %v9415_v47, %v8422_v54  ;;  %v7732_v53 = vadd.f32 %v7731_v62, %v15377_v22  ;;  %vm7933_vm6 = vcmp.ge.f32.partialorder %v7728_v0, 1.0  ;;  %v9419_v25 = vsel %vm7932_vm4, 1.0, %v17483_v50 }
 0x95d   : > { %v8526_v6 = vadd.f32 %v9416_v52, %v8525_v20  ;;  %vm7934_vm12 = vcmp.ge.f32.partialorder %v7730_v63, 1.0  ;;  %v9420_v36 = vsel %vm7933_vm6, 1.0, %v17483_v50  ;;  %vm8558_vm15 = vcmp.lt.s32.totalorder %v17746_v7, 256 }
 0x95e   : > { %v8424_v59 = vadd.f32 %v9417_v37, %v8423_v4  ;;  %vm7935_vm5 = vcmp.ge.f32.partialorder %v7732_v53, 1.0  ;;  %v9421_v2 = vsel %vm7934_vm12, 1.0, %v17483_v50 }
 0x95f   : > { %v8527_v55 = vadd.f32 %v9418_v41, %v8526_v6  ;;  %v9422_v45 = vsel %vm7935_vm5, 1.0, %v17483_v50 }
 0x960   : > { %v8425_v38 = vadd.f32 %v9419_v25, %v8424_v59 }
 0x961   : > { %v8528_v28 = vadd.f32 %v9420_v36, %v8527_v55 }
 0x962   : > { %v8426_v33 = vadd.f32 %v9421_v2, %v8425_v38 }
 0x963   : > { %v8529_v39 = vadd.f32 %v9422_v45, %v8528_v28 }
 0x96b   : > { %v7735_v13 = vpop.f32.mrb[180].mxu1 }
 0x96c   : > { %v7736_v11 = vadd.f32 %v7735_v13, %v15374_v43  ;;  %v7737_v32 = vpop.f32.mrb[181].mxu1 }
 0x96d   : > { %v7738_v34 = vadd.f32 %v7737_v32, %v15377_v22  ;;  %v7739_v60 = vpop.f32.mrb[182].mxu1 }
 0x96e   : > { %vm7936_vm7 = vcmp.ge.f32.partialorder %v7736_v11, 1.0  ;;  %v7740_v9 = vadd.f32 %v7739_v60, %v15374_v43  ;;  %v7741_v48 = vpop.f32.mrb[183].mxu1 }
 0x96f   : > { %v9423_v24 = vsel %vm7936_vm7, 1.0, %v17483_v50  ;;  %vm7937_vm1 = vcmp.ge.f32.partialorder %v7738_v34, 1.0  ;;  %v7742_v16 = vadd.f32 %v7741_v48, %v15377_v22 }
 0x970   : > { %v8427_v46 = vadd.f32 %v9423_v24, %v8426_v33  ;;  %v9424_v30 = vsel %vm7937_vm1, 1.0, %v17483_v50  ;;  %vm7938_vm8 = vcmp.ge.f32.partialorder %v7740_v9, 1.0 }
 0x971   : > { %v8530_v21 = vadd.f32 %v9424_v30, %v8529_v39  ;;  %v9425_v57 = vsel %vm7938_vm8, 1.0, %v17483_v50  ;;  %vm7939_vm9 = vcmp.ge.f32.partialorder %v7742_v16, 1.0 }
 0x972   : > { %v8428_v10 = vadd.f32 %v9425_v57, %v8427_v46  ;;  %v9426_v61 = vsel %vm7939_vm9, 1.0, %v17483_v50 }
 0x973   : > { %v8531_v29 = vadd.f32 %v9426_v61, %v8530_v21 }
 0x974   : > { %v8429_v56 = vrot.slane %v8428_v10, 4 }
 0x975   : > { %v8532_v43 = vrot.slane %v8531_v29, 4 }
 0x976   : > { %v8430_v1 = vadd.f32 %v8429_v56, %v8428_v10 }
 0x977   : > { %v8533_v44 = vadd.f32 %v8532_v43, %v8531_v29 }
 0x978   : > { %v8431_v22 = vrot.slane %v8430_v1, 2 }
 0x979   : > { %v8534_v49 = vrot.slane %v8533_v44, 2 }
 0x97a   : > { %v8432_v15 = vadd.f32 %v8431_v22, %v8430_v1 }
 0x97b   : > { %v8535_v5 = vadd.f32 %v8534_v49, %v8533_v44 }
 0x97c   : > { %v8433_v18 = vrot.slane %v8432_v15, 1 }
 0x97d   : > { %v8536_v3 = vrot.slane %v8535_v5, 1 }
 0x97e   : > { %v8434_v31 = vadd.f32 %v8433_v18, %v8432_v15 }
 0x97f   : > { %v8537_v19 = vadd.f32 %v8536_v3, %v8535_v5 }
 0x981   : > { %v8540_v50 = vcombine.low %v8434_v31, %v8537_v19 }
 0x983   : > { %v8547_v23 = vrot.slane %v8540_v50, %v8546_v51 }
 0x985   : > { %v8554_v26 = vrot.slane %v8547_v23, %v8546_v51 }
 0x987   : > { %8560 = vst.msk [vmem:[%s314_s19] sm:$0x3] %vm8558_vm15, %v8554_v26 }
 0x988 PF: > { %s17_s26 = sadd.s32 1, %s9978_s26   ;;  %s17747_s24 = smov %s9974_s25 }
 0x989   : > { %p14_p5 = scmp.ge.s32.totalorder %s17_s26, 4   ;;  %s17748_s25 = smov %s17750_s27 }
 0x98b   :  { %16 = sbr.rel (!%p14_p5) target bundleno = 2 (0x2), region = 78 }

</bundles_post_ra>
